<compile_context>
chip_gen: v5e
topology: v5e:2x2
jax: 0.10.0
libtpu: 0.0.40
codegen_flags: <defaults>
</compile_context>

<pallas_src>
import functools

import jax
import jax.numpy as jnp
from jax import lax
from jax.experimental import pallas as pl
from jax.experimental.pallas import tpu as pltpu


# ------------------------------ fused kernel ------------------------------- #
def _lenet_kernel(x_ref, w1_ref, b1_ref, sel1_ref, w2_ref, b2_ref, sel2_ref,
                  fc1w_ref, fc1b_ref, fc2w_ref, fc2b_ref, fc3w_ref, fc3b_ref,
                  out_ref,
                  y1s, q1s, y2s, q2s, flat_s, *, batch):
    f32 = jnp.float32
    for b in range(batch):
        # ---- conv1 (1->6, 5x5, pad 2): 25 shifted taps, accumulated on the VPU.
        # Input is the zero-padded 32x32 image flattened to 1152 lanes; output is
        # lane-dense flat (28 rows x 32 stride) = 896 lanes, 6 channels on sublanes.
        acc1 = jnp.zeros((6, 896), f32)
        for k in range(25):
            ky, kx = k // 5, k % 5
            tap = x_ref[pl.ds(b, 1), pl.ds(ky * 32 + kx, 896)]          # (1, 896)
            acc1 = acc1 + w1_ref[:, pl.ds(k, 1)] * tap                  # (6,1)*(1,896)
        y1s[...] = jnp.maximum(acc1 + b1_ref[...], 0.0)                 # bias + ReLU

        # ---- maxpool1 (2x2/2), fused: max of the 4 window corners (shifted
        # views of the flat map) + exact 0/1 selection matmul -> flat 14x14
        # (zero-padded to 256 lanes so conv2's shifted reads stay in-bounds).
        m1 = jnp.maximum(
            jnp.maximum(y1s[:, pl.ds(0, 863)], y1s[:, pl.ds(1, 863)]),
            jnp.maximum(y1s[:, pl.ds(32, 863)], y1s[:, pl.ds(33, 863)]))
        q1s[...] = jnp.dot(m1, sel1_ref[...], preferred_element_type=f32)   # (6, 256)

        # ---- conv2 (6->16, 5x5, valid): 25 accumulated small MXU dots, each
        # contracting all 6 input channels of one (ky,kx) tap. Output flat
        # (10 rows x 14 stride) = 140 lanes, 16 channels on sublanes.
        acc2 = jnp.zeros((16, 140), f32)
        for k in range(25):
            ky, kx = k // 5, k % 5
            acc2 = acc2 + jnp.dot(w2_ref[:, pl.ds(k * 6, 6)],
                                  q1s[:, pl.ds(ky * 14 + kx, 140)],
                                  preferred_element_type=f32)
        y2s[...] = jnp.maximum(acc2 + b2_ref[...], 0.0)

        # ---- maxpool2 (2x2/2), fused: corner max + selection matmul -> flat 5x5.
        m2 = jnp.maximum(
            jnp.maximum(y2s[:, pl.ds(0, 121)], y2s[:, pl.ds(1, 121)]),
            jnp.maximum(y2s[:, pl.ds(14, 121)], y2s[:, pl.ds(15, 121)]))
        q2s[...] = jnp.dot(m2, sel2_ref[...], preferred_element_type=f32)   # (16, 25)

        # ---- flatten in torch (C,H,W) order into this batch row.
        for c in range(16):
            flat_s[pl.ds(b, 1), pl.ds(c * 25, 25)] = q2s[pl.ds(c, 1), :]

    # ---- FC stack (fc1 -> fc2 -> fc3), all operands VMEM resident.
    h1 = jnp.maximum(
        jnp.dot(flat_s[...], fc1w_ref[...], preferred_element_type=f32) + fc1b_ref[...], 0.0)
    h2 = jnp.maximum(
        jnp.dot(h1, fc2w_ref[...], preferred_element_type=f32) + fc2b_ref[...], 0.0)
    out_ref[...] = jnp.dot(h2, fc3w_ref[...], preferred_element_type=f32) + fc3b_ref[...]


def _pool_select(num_rows, row_stride, out_hw, num_cols):
    """0/1 matrix S with (m @ S)[:, p] = m[:, 2*(p//out_hw)*row_stride + 2*(p%out_hw)]
    for p < out_hw*out_hw, and zero columns beyond (used as zero padding)."""
    j = jnp.arange(num_cols)
    target = 2 * (j // out_hw) * row_stride + 2 * (j % out_hw)
    valid = j < out_hw * out_hw
    i = jnp.arange(num_rows)[:, None]
    return jnp.where(valid[None, :] & (i == target[None, :]), 1.0, 0.0).astype(jnp.float32)


# ------------------------------ model wrapper ------------------------------ #
def init_params(key):
    ks = jax.random.split(key, 10)
    s = 0.1
    return {
        "w1": jax.random.normal(ks[0], (6, 1, 5, 5), jnp.float32) * s,
        "b1": jax.random.normal(ks[1], (6,), jnp.float32) * s,
        "w2": jax.random.normal(ks[2], (16, 6, 5, 5), jnp.float32) * s,
        "b2": jax.random.normal(ks[3], (16,), jnp.float32) * s,
        "fc1_w": jax.random.normal(ks[4], (120, 400), jnp.float32) * s,
        "fc1_b": jax.random.normal(ks[5], (120,), jnp.float32) * s,
        "fc2_w": jax.random.normal(ks[6], (84, 120), jnp.float32) * s,
        "fc2_b": jax.random.normal(ks[7], (84,), jnp.float32) * s,
        "fc3_w": jax.random.normal(ks[8], (10, 84), jnp.float32) * s,
        "fc3_b": jax.random.normal(ks[9], (10,), jnp.float32) * s,
    }


def classifier_forward(x, p):
    """Pallas implementation of Classifier.forward. x:(B,1,28,28) -> (B,1,10)."""
    B = x.shape[0]
    x = x.reshape(B, 1, 28, 28).astype(jnp.float32)

    # Tiny XLA prologue (constant-folds under jit): pad + flatten the input and
    # lay the weights out in kernel-friendly order.
    xpad = jnp.pad(x[:, 0], ((0, 0), (2, 2), (2, 2)))                    # (B, 32, 32)
    x_flat = jnp.pad(xpad.reshape(B, 32 * 32), ((0, 0), (0, 128)))       # (B, 1152)

    w1m = p["w1"].reshape(6, 25).astype(jnp.float32)                     # (co, ky*5+kx)
    b1c = p["b1"].reshape(6, 1).astype(jnp.float32)
    w2m = p["w2"].transpose(0, 2, 3, 1).reshape(16, 150).astype(jnp.float32)  # (co, (ky*5+kx)*6+ci)
    b2c = p["b2"].reshape(16, 1).astype(jnp.float32)
    fc1w = p["fc1_w"].T.astype(jnp.float32)                              # (400, 120)
    fc1b = p["fc1_b"].reshape(1, 120).astype(jnp.float32)
    fc2w = p["fc2_w"].T.astype(jnp.float32)                              # (120, 84)
    fc2b = p["fc2_b"].reshape(1, 84).astype(jnp.float32)
    fc3w = p["fc3_w"].T.astype(jnp.float32)                              # (84, 10)
    fc3b = p["fc3_b"].reshape(1, 10).astype(jnp.float32)

    sel1 = _pool_select(863, 32, 14, 256)   # pool1: flat 28x(stride 32) -> flat 14x14 (pad 256)
    sel2 = _pool_select(121, 14, 5, 25)     # pool2: flat 10x(stride 14) -> flat 5x5

    operands = [x_flat, w1m, b1c, sel1, w2m, b2c, sel2,
                fc1w, fc1b, fc2w, fc2b, fc3w, fc3b]

    out = pl.pallas_call(
        functools.partial(_lenet_kernel, batch=B),
        grid=(1,),
        in_specs=[pl.BlockSpec(op.shape, lambda i: (0, 0)) for op in operands],
        out_specs=pl.BlockSpec((B, 10), lambda i: (0, 0)),
        out_shape=jax.ShapeDtypeStruct((B, 10), jnp.float32),
        scratch_shapes=[
            pltpu.VMEM((6, 896), jnp.float32),    # conv1+ReLU, flat 28 rows x 32 stride
            pltpu.VMEM((6, 256), jnp.float32),    # pool1 out, flat 14x14 (zero padded)
            pltpu.VMEM((16, 140), jnp.float32),   # conv2+ReLU, flat 10 rows x 14 stride
            pltpu.VMEM((16, 25), jnp.float32),    # pool2 out, flat 5x5
            pltpu.VMEM((B, 400), jnp.float32),    # flattened features (torch C,H,W order)
        ],
        compiler_params=pltpu.CompilerParams(dimension_semantics=("arbitrary",)),
    )(*operands)

    # PyTorch forward returns (batchsize, 1, 10); softmax is defined but never applied.
    return out.reshape(B, 1, 10)


# ------------------------------ pure-JAX reference ------------------------- #
def reference_forward(x, p):
    B = x.shape[0]
    x = x.reshape(B, 1, 28, 28).astype(jnp.float32)
    dn = ("NCHW", "OIHW", "NCHW")
    y = lax.conv_general_dilated(x, p["w1"], (1, 1), ((2, 2), (2, 2)), dimension_numbers=dn)
    y = jax.nn.relu(y + p["b1"][None, :, None, None])
    y = lax.reduce_window(y, -jnp.inf, lax.max, (1, 1, 2, 2), (1, 1, 2, 2), "VALID")
    y = lax.conv_general_dilated(y, p["w2"], (1, 1), ((0, 0), (0, 0)), dimension_numbers=dn)
    y = jax.nn.relu(y + p["b2"][None, :, None, None])
    y = lax.reduce_window(y, -jnp.inf, lax.max, (1, 1, 2, 2), (1, 1, 2, 2), "VALID")
    y = y.reshape(B, 400)
    y = jax.nn.relu(y @ p["fc1_w"].T + p["fc1_b"])
    y = jax.nn.relu(y @ p["fc2_w"].T + p["fc2_b"])
    y = y @ p["fc3_w"].T + p["fc3_b"]
    return y.reshape(B, 1, 10)


if __name__ == "__main__":
    key = jax.random.PRNGKey(0)
    k_x, k_p = jax.random.split(key)

    batchsize = 2
    x = jax.random.normal(k_x, (batchsize, 1, 28, 28), jnp.float32)
    params = init_params(k_p)

    fwd = jax.jit(classifier_forward)
    out = jax.block_until_ready(fwd(x, params))
    assert out.shape == (batchsize, 1, 10), out.shape

    ref = jax.block_until_ready(reference_forward(x, params))
    assert jnp.allclose(out, ref, atol=1e-4, rtol=1e-4), float(jnp.max(jnp.abs(out - ref)))

    print("KERNEL_OK")
</pallas_src>

<mosaic_0001>
module attributes {stable_mosaic.version = 11 : i64} {
  func.func @_lenet_kernel(%arg0: i32, %arg1: memref<2x1152xf32, #tpu.memory_space<vmem>>, %arg2: memref<6x25xf32, #tpu.memory_space<vmem>>, %arg3: memref<6x1xf32, #tpu.memory_space<vmem>>, %arg4: memref<863x256xf32, #tpu.memory_space<vmem>>, %arg5: memref<16x150xf32, #tpu.memory_space<vmem>>, %arg6: memref<16x1xf32, #tpu.memory_space<vmem>>, %arg7: memref<121x25xf32, #tpu.memory_space<vmem>>, %arg8: memref<400x120xf32, #tpu.memory_space<vmem>>, %arg9: memref<1x120xf32, #tpu.memory_space<vmem>>, %arg10: memref<120x84xf32, #tpu.memory_space<vmem>>, %arg11: memref<1x84xf32, #tpu.memory_space<vmem>>, %arg12: memref<84x10xf32, #tpu.memory_space<vmem>>, %arg13: memref<1x10xf32, #tpu.memory_space<vmem>>, %arg14: memref<2x10xf32, #tpu.memory_space<vmem>>, %arg15: memref<6x896xf32, #tpu.memory_space<vmem>>, %arg16: memref<6x256xf32, #tpu.memory_space<vmem>>, %arg17: memref<16x140xf32, #tpu.memory_space<vmem>>, %arg18: memref<16x25xf32, #tpu.memory_space<vmem>>, %arg19: memref<2x400xf32, #tpu.memory_space<vmem>>) attributes {dimension_semantics = [#tpu.dimension_semantics<arbitrary>], iteration_bounds = array<i64: 1>, scalar_prefetch = 0 : i64, scratch_operands = 5 : i64, tpu.core_type = #tpu.core_type<tc>, window_params = [{pipeline_mode = #tpu.pipeline_mode<synchronous>, transform_indices = @transform_0, window_bounds = array<i64: 2, 1152>}, {pipeline_mode = #tpu.pipeline_mode<synchronous>, transform_indices = @transform_1, window_bounds = array<i64: 6, 25>}, {pipeline_mode = #tpu.pipeline_mode<synchronous>, transform_indices = @transform_2, window_bounds = array<i64: 6, 1>}, {pipeline_mode = #tpu.pipeline_mode<synchronous>, transform_indices = @transform_3, window_bounds = array<i64: 863, 256>}, {pipeline_mode = #tpu.pipeline_mode<synchronous>, transform_indices = @transform_4, window_bounds = array<i64: 16, 150>}, {pipeline_mode = #tpu.pipeline_mode<synchronous>, transform_indices = @transform_5, window_bounds = array<i64: 16, 1>}, {pipeline_mode = #tpu.pipeline_mode<synchronous>, transform_indices = @transform_6, window_bounds = array<i64: 121, 25>}, {pipeline_mode = #tpu.pipeline_mode<synchronous>, transform_indices = @transform_7, window_bounds = array<i64: 400, 120>}, {pipeline_mode = #tpu.pipeline_mode<synchronous>, transform_indices = @transform_8, window_bounds = array<i64: 1, 120>}, {pipeline_mode = #tpu.pipeline_mode<synchronous>, transform_indices = @transform_9, window_bounds = array<i64: 120, 84>}, {pipeline_mode = #tpu.pipeline_mode<synchronous>, transform_indices = @transform_10, window_bounds = array<i64: 1, 84>}, {pipeline_mode = #tpu.pipeline_mode<synchronous>, transform_indices = @transform_11, window_bounds = array<i64: 84, 10>}, {pipeline_mode = #tpu.pipeline_mode<synchronous>, transform_indices = @transform_12, window_bounds = array<i64: 1, 10>}, {pipeline_mode = #tpu.pipeline_mode<synchronous>, transform_indices = @transform_13, window_bounds = array<i64: 2, 10>}]} {
    %cst = arith.constant 0.000000e+00 : f32
    %0 = vector.broadcast %cst : f32 to vector<6x896xf32>
    %c0 = arith.constant 0 : index
    %c0_0 = arith.constant 0 : index
    %1 = vector.load %arg1[%c0, %c0_0] : memref<2x1152xf32, #tpu.memory_space<vmem>>, vector<1x896xf32>
    %c0_1 = arith.constant 0 : index
    %c0_2 = arith.constant 0 : index
    %2 = vector.load %arg2[%c0_1, %c0_2] : memref<6x25xf32, #tpu.memory_space<vmem>>, vector<6x1xf32>
    %3 = vector.broadcast %2 : vector<6x1xf32> to vector<6x896xf32>
    %4 = vector.broadcast %1 : vector<1x896xf32> to vector<6x896xf32>
    %5 = arith.mulf %3, %4 : vector<6x896xf32>
    %6 = arith.addf %0, %5 : vector<6x896xf32>
    %c0_3 = arith.constant 0 : index
    %c1 = arith.constant 1 : index
    %7 = vector.load %arg1[%c0_3, %c1] : memref<2x1152xf32, #tpu.memory_space<vmem>>, vector<1x896xf32>
    %c0_4 = arith.constant 0 : index
    %c1_5 = arith.constant 1 : index
    %8 = vector.load %arg2[%c0_4, %c1_5] : memref<6x25xf32, #tpu.memory_space<vmem>>, vector<6x1xf32>
    %9 = vector.broadcast %8 : vector<6x1xf32> to vector<6x896xf32>
    %10 = vector.broadcast %7 : vector<1x896xf32> to vector<6x896xf32>
    %11 = arith.mulf %9, %10 : vector<6x896xf32>
    %12 = arith.addf %6, %11 : vector<6x896xf32>
    %c0_6 = arith.constant 0 : index
    %c2 = arith.constant 2 : index
    %13 = vector.load %arg1[%c0_6, %c2] : memref<2x1152xf32, #tpu.memory_space<vmem>>, vector<1x896xf32>
    %c0_7 = arith.constant 0 : index
    %c2_8 = arith.constant 2 : index
    %14 = vector.load %arg2[%c0_7, %c2_8] : memref<6x25xf32, #tpu.memory_space<vmem>>, vector<6x1xf32>
    %15 = vector.broadcast %14 : vector<6x1xf32> to vector<6x896xf32>
    %16 = vector.broadcast %13 : vector<1x896xf32> to vector<6x896xf32>
    %17 = arith.mulf %15, %16 : vector<6x896xf32>
    %18 = arith.addf %12, %17 : vector<6x896xf32>
    %c0_9 = arith.constant 0 : index
    %c3 = arith.constant 3 : index
    %19 = vector.load %arg1[%c0_9, %c3] : memref<2x1152xf32, #tpu.memory_space<vmem>>, vector<1x896xf32>
    %c0_10 = arith.constant 0 : index
    %c3_11 = arith.constant 3 : index
    %20 = vector.load %arg2[%c0_10, %c3_11] : memref<6x25xf32, #tpu.memory_space<vmem>>, vector<6x1xf32>
    %21 = vector.broadcast %20 : vector<6x1xf32> to vector<6x896xf32>
    %22 = vector.broadcast %19 : vector<1x896xf32> to vector<6x896xf32>
    %23 = arith.mulf %21, %22 : vector<6x896xf32>
    %24 = arith.addf %18, %23 : vector<6x896xf32>
    %c0_12 = arith.constant 0 : index
    %c4 = arith.constant 4 : index
    %25 = vector.load %arg1[%c0_12, %c4] : memref<2x1152xf32, #tpu.memory_space<vmem>>, vector<1x896xf32>
    %c0_13 = arith.constant 0 : index
    %c4_14 = arith.constant 4 : index
    %26 = vector.load %arg2[%c0_13, %c4_14] : memref<6x25xf32, #tpu.memory_space<vmem>>, vector<6x1xf32>
    %27 = vector.broadcast %26 : vector<6x1xf32> to vector<6x896xf32>
    %28 = vector.broadcast %25 : vector<1x896xf32> to vector<6x896xf32>
    %29 = arith.mulf %27, %28 : vector<6x896xf32>
    %30 = arith.addf %24, %29 : vector<6x896xf32>
    %c0_15 = arith.constant 0 : index
    %c32 = arith.constant 32 : index
    %31 = vector.load %arg1[%c0_15, %c32] : memref<2x1152xf32, #tpu.memory_space<vmem>>, vector<1x896xf32>
    %c0_16 = arith.constant 0 : index
    %c5 = arith.constant 5 : index
    %32 = vector.load %arg2[%c0_16, %c5] : memref<6x25xf32, #tpu.memory_space<vmem>>, vector<6x1xf32>
    %33 = vector.broadcast %32 : vector<6x1xf32> to vector<6x896xf32>
    %34 = vector.broadcast %31 : vector<1x896xf32> to vector<6x896xf32>
    %35 = arith.mulf %33, %34 : vector<6x896xf32>
    %36 = arith.addf %30, %35 : vector<6x896xf32>
    %c0_17 = arith.constant 0 : index
    %c33 = arith.constant 33 : index
    %37 = vector.load %arg1[%c0_17, %c33] : memref<2x1152xf32, #tpu.memory_space<vmem>>, vector<1x896xf32>
    %c0_18 = arith.constant 0 : index
    %c6 = arith.constant 6 : index
    %38 = vector.load %arg2[%c0_18, %c6] : memref<6x25xf32, #tpu.memory_space<vmem>>, vector<6x1xf32>
    %39 = vector.broadcast %38 : vector<6x1xf32> to vector<6x896xf32>
    %40 = vector.broadcast %37 : vector<1x896xf32> to vector<6x896xf32>
    %41 = arith.mulf %39, %40 : vector<6x896xf32>
    %42 = arith.addf %36, %41 : vector<6x896xf32>
    %c0_19 = arith.constant 0 : index
    %c34 = arith.constant 34 : index
    %43 = vector.load %arg1[%c0_19, %c34] : memref<2x1152xf32, #tpu.memory_space<vmem>>, vector<1x896xf32>
    %c0_20 = arith.constant 0 : index
    %c7 = arith.constant 7 : index
    %44 = vector.load %arg2[%c0_20, %c7] : memref<6x25xf32, #tpu.memory_space<vmem>>, vector<6x1xf32>
    %45 = vector.broadcast %44 : vector<6x1xf32> to vector<6x896xf32>
    %46 = vector.broadcast %43 : vector<1x896xf32> to vector<6x896xf32>
    %47 = arith.mulf %45, %46 : vector<6x896xf32>
    %48 = arith.addf %42, %47 : vector<6x896xf32>
    %c0_21 = arith.constant 0 : index
    %c35 = arith.constant 35 : index
    %49 = vector.load %arg1[%c0_21, %c35] : memref<2x1152xf32, #tpu.memory_space<vmem>>, vector<1x896xf32>
    %c0_22 = arith.constant 0 : index
    %c8 = arith.constant 8 : index
    %50 = vector.load %arg2[%c0_22, %c8] : memref<6x25xf32, #tpu.memory_space<vmem>>, vector<6x1xf32>
    %51 = vector.broadcast %50 : vector<6x1xf32> to vector<6x896xf32>
    %52 = vector.broadcast %49 : vector<1x896xf32> to vector<6x896xf32>
    %53 = arith.mulf %51, %52 : vector<6x896xf32>
    %54 = arith.addf %48, %53 : vector<6x896xf32>
    %c0_23 = arith.constant 0 : index
    %c36 = arith.constant 36 : index
    %55 = vector.load %arg1[%c0_23, %c36] : memref<2x1152xf32, #tpu.memory_space<vmem>>, vector<1x896xf32>
    %c0_24 = arith.constant 0 : index
    %c9 = arith.constant 9 : index
    %56 = vector.load %arg2[%c0_24, %c9] : memref<6x25xf32, #tpu.memory_space<vmem>>, vector<6x1xf32>
    %57 = vector.broadcast %56 : vector<6x1xf32> to vector<6x896xf32>
    %58 = vector.broadcast %55 : vector<1x896xf32> to vector<6x896xf32>
    %59 = arith.mulf %57, %58 : vector<6x896xf32>
    %60 = arith.addf %54, %59 : vector<6x896xf32>
    %c0_25 = arith.constant 0 : index
    %c64 = arith.constant 64 : index
    %61 = vector.load %arg1[%c0_25, %c64] : memref<2x1152xf32, #tpu.memory_space<vmem>>, vector<1x896xf32>
    %c0_26 = arith.constant 0 : index
    %c10 = arith.constant 10 : index
    %62 = vector.load %arg2[%c0_26, %c10] : memref<6x25xf32, #tpu.memory_space<vmem>>, vector<6x1xf32>
    %63 = vector.broadcast %62 : vector<6x1xf32> to vector<6x896xf32>
    %64 = vector.broadcast %61 : vector<1x896xf32> to vector<6x896xf32>
    %65 = arith.mulf %63, %64 : vector<6x896xf32>
    %66 = arith.addf %60, %65 : vector<6x896xf32>
    %c0_27 = arith.constant 0 : index
    %c65 = arith.constant 65 : index
    %67 = vector.load %arg1[%c0_27, %c65] : memref<2x1152xf32, #tpu.memory_space<vmem>>, vector<1x896xf32>
    %c0_28 = arith.constant 0 : index
    %c11 = arith.constant 11 : index
    %68 = vector.load %arg2[%c0_28, %c11] : memref<6x25xf32, #tpu.memory_space<vmem>>, vector<6x1xf32>
    %69 = vector.broadcast %68 : vector<6x1xf32> to vector<6x896xf32>
    %70 = vector.broadcast %67 : vector<1x896xf32> to vector<6x896xf32>
    %71 = arith.mulf %69, %70 : vector<6x896xf32>
    %72 = arith.addf %66, %71 : vector<6x896xf32>
    %c0_29 = arith.constant 0 : index
    %c66 = arith.constant 66 : index
    %73 = vector.load %arg1[%c0_29, %c66] : memref<2x1152xf32, #tpu.memory_space<vmem>>, vector<1x896xf32>
    %c0_30 = arith.constant 0 : index
    %c12 = arith.constant 12 : index
    %74 = vector.load %arg2[%c0_30, %c12] : memref<6x25xf32, #tpu.memory_space<vmem>>, vector<6x1xf32>
    %75 = vector.broadcast %74 : vector<6x1xf32> to vector<6x896xf32>
    %76 = vector.broadcast %73 : vector<1x896xf32> to vector<6x896xf32>
    %77 = arith.mulf %75, %76 : vector<6x896xf32>
    %78 = arith.addf %72, %77 : vector<6x896xf32>
    %c0_31 = arith.constant 0 : index
    %c67 = arith.constant 67 : index
    %79 = vector.load %arg1[%c0_31, %c67] : memref<2x1152xf32, #tpu.memory_space<vmem>>, vector<1x896xf32>
    %c0_32 = arith.constant 0 : index
    %c13 = arith.constant 13 : index
    %80 = vector.load %arg2[%c0_32, %c13] : memref<6x25xf32, #tpu.memory_space<vmem>>, vector<6x1xf32>
    %81 = vector.broadcast %80 : vector<6x1xf32> to vector<6x896xf32>
    %82 = vector.broadcast %79 : vector<1x896xf32> to vector<6x896xf32>
    %83 = arith.mulf %81, %82 : vector<6x896xf32>
    %84 = arith.addf %78, %83 : vector<6x896xf32>
    %c0_33 = arith.constant 0 : index
    %c68 = arith.constant 68 : index
    %85 = vector.load %arg1[%c0_33, %c68] : memref<2x1152xf32, #tpu.memory_space<vmem>>, vector<1x896xf32>
    %c0_34 = arith.constant 0 : index
    %c14 = arith.constant 14 : index
    %86 = vector.load %arg2[%c0_34, %c14] : memref<6x25xf32, #tpu.memory_space<vmem>>, vector<6x1xf32>
    %87 = vector.broadcast %86 : vector<6x1xf32> to vector<6x896xf32>
    %88 = vector.broadcast %85 : vector<1x896xf32> to vector<6x896xf32>
    %89 = arith.mulf %87, %88 : vector<6x896xf32>
    %90 = arith.addf %84, %89 : vector<6x896xf32>
    %c0_35 = arith.constant 0 : index
    %c96 = arith.constant 96 : index
    %91 = vector.load %arg1[%c0_35, %c96] : memref<2x1152xf32, #tpu.memory_space<vmem>>, vector<1x896xf32>
    %c0_36 = arith.constant 0 : index
    %c15 = arith.constant 15 : index
    %92 = vector.load %arg2[%c0_36, %c15] : memref<6x25xf32, #tpu.memory_space<vmem>>, vector<6x1xf32>
    %93 = vector.broadcast %92 : vector<6x1xf32> to vector<6x896xf32>
    %94 = vector.broadcast %91 : vector<1x896xf32> to vector<6x896xf32>
    %95 = arith.mulf %93, %94 : vector<6x896xf32>
    %96 = arith.addf %90, %95 : vector<6x896xf32>
    %c0_37 = arith.constant 0 : index
    %c97 = arith.constant 97 : index
    %97 = vector.load %arg1[%c0_37, %c97] : memref<2x1152xf32, #tpu.memory_space<vmem>>, vector<1x896xf32>
    %c0_38 = arith.constant 0 : index
    %c16 = arith.constant 16 : index
    %98 = vector.load %arg2[%c0_38, %c16] : memref<6x25xf32, #tpu.memory_space<vmem>>, vector<6x1xf32>
    %99 = vector.broadcast %98 : vector<6x1xf32> to vector<6x896xf32>
    %100 = vector.broadcast %97 : vector<1x896xf32> to vector<6x896xf32>
    %101 = arith.mulf %99, %100 : vector<6x896xf32>
    %102 = arith.addf %96, %101 : vector<6x896xf32>
    %c0_39 = arith.constant 0 : index
    %c98 = arith.constant 98 : index
    %103 = vector.load %arg1[%c0_39, %c98] : memref<2x1152xf32, #tpu.memory_space<vmem>>, vector<1x896xf32>
    %c0_40 = arith.constant 0 : index
    %c17 = arith.constant 17 : index
    %104 = vector.load %arg2[%c0_40, %c17] : memref<6x25xf32, #tpu.memory_space<vmem>>, vector<6x1xf32>
    %105 = vector.broadcast %104 : vector<6x1xf32> to vector<6x896xf32>
    %106 = vector.broadcast %103 : vector<1x896xf32> to vector<6x896xf32>
    %107 = arith.mulf %105, %106 : vector<6x896xf32>
    %108 = arith.addf %102, %107 : vector<6x896xf32>
    %c0_41 = arith.constant 0 : index
    %c99 = arith.constant 99 : index
    %109 = vector.load %arg1[%c0_41, %c99] : memref<2x1152xf32, #tpu.memory_space<vmem>>, vector<1x896xf32>
    %c0_42 = arith.constant 0 : index
    %c18 = arith.constant 18 : index
    %110 = vector.load %arg2[%c0_42, %c18] : memref<6x25xf32, #tpu.memory_space<vmem>>, vector<6x1xf32>
    %111 = vector.broadcast %110 : vector<6x1xf32> to vector<6x896xf32>
    %112 = vector.broadcast %109 : vector<1x896xf32> to vector<6x896xf32>
    %113 = arith.mulf %111, %112 : vector<6x896xf32>
    %114 = arith.addf %108, %113 : vector<6x896xf32>
    %c0_43 = arith.constant 0 : index
    %c100 = arith.constant 100 : index
    %115 = vector.load %arg1[%c0_43, %c100] : memref<2x1152xf32, #tpu.memory_space<vmem>>, vector<1x896xf32>
    %c0_44 = arith.constant 0 : index
    %c19 = arith.constant 19 : index
    %116 = vector.load %arg2[%c0_44, %c19] : memref<6x25xf32, #tpu.memory_space<vmem>>, vector<6x1xf32>
    %117 = vector.broadcast %116 : vector<6x1xf32> to vector<6x896xf32>
    %118 = vector.broadcast %115 : vector<1x896xf32> to vector<6x896xf32>
    %119 = arith.mulf %117, %118 : vector<6x896xf32>
    %120 = arith.addf %114, %119 : vector<6x896xf32>
    %c0_45 = arith.constant 0 : index
    %c128 = arith.constant 128 : index
    %121 = vector.load %arg1[%c0_45, %c128] : memref<2x1152xf32, #tpu.memory_space<vmem>>, vector<1x896xf32>
    %c0_46 = arith.constant 0 : index
    %c20 = arith.constant 20 : index
    %122 = vector.load %arg2[%c0_46, %c20] : memref<6x25xf32, #tpu.memory_space<vmem>>, vector<6x1xf32>
    %123 = vector.broadcast %122 : vector<6x1xf32> to vector<6x896xf32>
    %124 = vector.broadcast %121 : vector<1x896xf32> to vector<6x896xf32>
    %125 = arith.mulf %123, %124 : vector<6x896xf32>
    %126 = arith.addf %120, %125 : vector<6x896xf32>
    %c0_47 = arith.constant 0 : index
    %c129 = arith.constant 129 : index
    %127 = vector.load %arg1[%c0_47, %c129] : memref<2x1152xf32, #tpu.memory_space<vmem>>, vector<1x896xf32>
    %c0_48 = arith.constant 0 : index
    %c21 = arith.constant 21 : index
    %128 = vector.load %arg2[%c0_48, %c21] : memref<6x25xf32, #tpu.memory_space<vmem>>, vector<6x1xf32>
    %129 = vector.broadcast %128 : vector<6x1xf32> to vector<6x896xf32>
    %130 = vector.broadcast %127 : vector<1x896xf32> to vector<6x896xf32>
    %131 = arith.mulf %129, %130 : vector<6x896xf32>
    %132 = arith.addf %126, %131 : vector<6x896xf32>
    %c0_49 = arith.constant 0 : index
    %c130 = arith.constant 130 : index
    %133 = vector.load %arg1[%c0_49, %c130] : memref<2x1152xf32, #tpu.memory_space<vmem>>, vector<1x896xf32>
    %c0_50 = arith.constant 0 : index
    %c22 = arith.constant 22 : index
    %134 = vector.load %arg2[%c0_50, %c22] : memref<6x25xf32, #tpu.memory_space<vmem>>, vector<6x1xf32>
    %135 = vector.broadcast %134 : vector<6x1xf32> to vector<6x896xf32>
    %136 = vector.broadcast %133 : vector<1x896xf32> to vector<6x896xf32>
    %137 = arith.mulf %135, %136 : vector<6x896xf32>
    %138 = arith.addf %132, %137 : vector<6x896xf32>
    %c0_51 = arith.constant 0 : index
    %c131 = arith.constant 131 : index
    %139 = vector.load %arg1[%c0_51, %c131] : memref<2x1152xf32, #tpu.memory_space<vmem>>, vector<1x896xf32>
    %c0_52 = arith.constant 0 : index
    %c23 = arith.constant 23 : index
    %140 = vector.load %arg2[%c0_52, %c23] : memref<6x25xf32, #tpu.memory_space<vmem>>, vector<6x1xf32>
    %141 = vector.broadcast %140 : vector<6x1xf32> to vector<6x896xf32>
    %142 = vector.broadcast %139 : vector<1x896xf32> to vector<6x896xf32>
    %143 = arith.mulf %141, %142 : vector<6x896xf32>
    %144 = arith.addf %138, %143 : vector<6x896xf32>
    %c0_53 = arith.constant 0 : index
    %c132 = arith.constant 132 : index
    %145 = vector.load %arg1[%c0_53, %c132] : memref<2x1152xf32, #tpu.memory_space<vmem>>, vector<1x896xf32>
    %c0_54 = arith.constant 0 : index
    %c24 = arith.constant 24 : index
    %146 = vector.load %arg2[%c0_54, %c24] : memref<6x25xf32, #tpu.memory_space<vmem>>, vector<6x1xf32>
    %147 = vector.broadcast %146 : vector<6x1xf32> to vector<6x896xf32>
    %148 = vector.broadcast %145 : vector<1x896xf32> to vector<6x896xf32>
    %149 = arith.mulf %147, %148 : vector<6x896xf32>
    %150 = arith.addf %144, %149 : vector<6x896xf32>
    %c0_55 = arith.constant 0 : index
    %c0_56 = arith.constant 0 : index
    %151 = vector.load %arg3[%c0_55, %c0_56] : memref<6x1xf32, #tpu.memory_space<vmem>>, vector<6x1xf32>
    %152 = vector.broadcast %151 : vector<6x1xf32> to vector<6x896xf32>
    %153 = arith.addf %150, %152 : vector<6x896xf32>
    %cst_57 = arith.constant 0.000000e+00 : f32
    %154 = vector.broadcast %cst_57 : f32 to vector<6x896xf32>
    %155 = arith.maximumf %153, %154 : vector<6x896xf32>
    %c0_58 = arith.constant 0 : index
    %c0_59 = arith.constant 0 : index
    %156 = vector.load %arg15[%c0_58, %c0_59] : memref<6x896xf32, #tpu.memory_space<vmem>>, vector<6x896xf32>
    tpu.vector_store %arg15[%c0_58, %c0_59], %155 {strides = array<i32>} : memref<6x896xf32, #tpu.memory_space<vmem>>, vector<6x896xf32>,
    %c0_60 = arith.constant 0 : index
    %c0_61 = arith.constant 0 : index
    %157 = vector.load %arg15[%c0_60, %c0_61] : memref<6x896xf32, #tpu.memory_space<vmem>>, vector<6x863xf32>
    %c0_62 = arith.constant 0 : index
    %c1_63 = arith.constant 1 : index
    %158 = vector.load %arg15[%c0_62, %c1_63] : memref<6x896xf32, #tpu.memory_space<vmem>>, vector<6x863xf32>
    %159 = arith.maximumf %157, %158 : vector<6x863xf32>
    %c0_64 = arith.constant 0 : index
    %c32_65 = arith.constant 32 : index
    %160 = vector.load %arg15[%c0_64, %c32_65] : memref<6x896xf32, #tpu.memory_space<vmem>>, vector<6x863xf32>
    %c0_66 = arith.constant 0 : index
    %c33_67 = arith.constant 33 : index
    %161 = vector.load %arg15[%c0_66, %c33_67] : memref<6x896xf32, #tpu.memory_space<vmem>>, vector<6x863xf32>
    %162 = arith.maximumf %160, %161 : vector<6x863xf32>
    %163 = arith.maximumf %159, %162 : vector<6x863xf32>
    %c0_68 = arith.constant 0 : index
    %c0_69 = arith.constant 0 : index
    %164 = vector.load %arg4[%c0_68, %c0_69] : memref<863x256xf32, #tpu.memory_space<vmem>>, vector<863x256xf32>
    %cst_70 = arith.constant dense<0.000000e+00> : vector<6x256xf32>
    %165 = tpu.matmul %163, %164, %cst_70 {dimension_numbers = #tpu.dot_dimension_numbers<[1], [0], [0], [1], [0, 0, 1, 1], [], []>} : vector<6x863xf32>, vector<863x256xf32>, vector<6x256xf32> -> vector<6x256xf32>
    %c0_71 = arith.constant 0 : index
    %c0_72 = arith.constant 0 : index
    %166 = vector.load %arg16[%c0_71, %c0_72] : memref<6x256xf32, #tpu.memory_space<vmem>>, vector<6x256xf32>
    tpu.vector_store %arg16[%c0_71, %c0_72], %165 {strides = array<i32>} : memref<6x256xf32, #tpu.memory_space<vmem>>, vector<6x256xf32>,
    %cst_73 = arith.constant 0.000000e+00 : f32
    %167 = vector.broadcast %cst_73 : f32 to vector<16x140xf32>
    %c0_74 = arith.constant 0 : index
    %c0_75 = arith.constant 0 : index
    %168 = vector.load %arg5[%c0_74, %c0_75] : memref<16x150xf32, #tpu.memory_space<vmem>>, vector<16x6xf32>
    %c0_76 = arith.constant 0 : index
    %c0_77 = arith.constant 0 : index
    %169 = vector.load %arg16[%c0_76, %c0_77] : memref<6x256xf32, #tpu.memory_space<vmem>>, vector<6x140xf32>
    %cst_78 = arith.constant dense<0.000000e+00> : vector<16x140xf32>
    %170 = tpu.matmul %168, %169, %cst_78 {dimension_numbers = #tpu.dot_dimension_numbers<[1], [0], [0], [1], [0, 0, 1, 1], [], []>} : vector<16x6xf32>, vector<6x140xf32>, vector<16x140xf32> -> vector<16x140xf32>
    %171 = arith.addf %167, %170 : vector<16x140xf32>
    %c0_79 = arith.constant 0 : index
    %c6_80 = arith.constant 6 : index
    %172 = vector.load %arg5[%c0_79, %c6_80] : memref<16x150xf32, #tpu.memory_space<vmem>>, vector<16x6xf32>
    %c0_81 = arith.constant 0 : index
    %c1_82 = arith.constant 1 : index
    %173 = vector.load %arg16[%c0_81, %c1_82] : memref<6x256xf32, #tpu.memory_space<vmem>>, vector<6x140xf32>
    %cst_83 = arith.constant dense<0.000000e+00> : vector<16x140xf32>
    %174 = tpu.matmul %172, %173, %cst_83 {dimension_numbers = #tpu.dot_dimension_numbers<[1], [0], [0], [1], [0, 0, 1, 1], [], []>} : vector<16x6xf32>, vector<6x140xf32>, vector<16x140xf32> -> vector<16x140xf32>
    %175 = arith.addf %171, %174 : vector<16x140xf32>
    %c0_84 = arith.constant 0 : index
    %c12_85 = arith.constant 12 : index
    %176 = vector.load %arg5[%c0_84, %c12_85] : memref<16x150xf32, #tpu.memory_space<vmem>>, vector<16x6xf32>
    %c0_86 = arith.constant 0 : index
    %c2_87 = arith.constant 2 : index
    %177 = vector.load %arg16[%c0_86, %c2_87] : memref<6x256xf32, #tpu.memory_space<vmem>>, vector<6x140xf32>
    %cst_88 = arith.constant dense<0.000000e+00> : vector<16x140xf32>
    %178 = tpu.matmul %176, %177, %cst_88 {dimension_numbers = #tpu.dot_dimension_numbers<[1], [0], [0], [1], [0, 0, 1, 1], [], []>} : vector<16x6xf32>, vector<6x140xf32>, vector<16x140xf32> -> vector<16x140xf32>
    %179 = arith.addf %175, %178 : vector<16x140xf32>
    %c0_89 = arith.constant 0 : index
    %c18_90 = arith.constant 18 : index
    %180 = vector.load %arg5[%c0_89, %c18_90] : memref<16x150xf32, #tpu.memory_space<vmem>>, vector<16x6xf32>
    %c0_91 = arith.constant 0 : index
    %c3_92 = arith.constant 3 : index
    %181 = vector.load %arg16[%c0_91, %c3_92] : memref<6x256xf32, #tpu.memory_space<vmem>>, vector<6x140xf32>
    %cst_93 = arith.constant dense<0.000000e+00> : vector<16x140xf32>
    %182 = tpu.matmul %180, %181, %cst_93 {dimension_numbers = #tpu.dot_dimension_numbers<[1], [0], [0], [1], [0, 0, 1, 1], [], []>} : vector<16x6xf32>, vector<6x140xf32>, vector<16x140xf32> -> vector<16x140xf32>
    %183 = arith.addf %179, %182 : vector<16x140xf32>
    %c0_94 = arith.constant 0 : index
    %c24_95 = arith.constant 24 : index
    %184 = vector.load %arg5[%c0_94, %c24_95] : memref<16x150xf32, #tpu.memory_space<vmem>>, vector<16x6xf32>
    %c0_96 = arith.constant 0 : index
    %c4_97 = arith.constant 4 : index
    %185 = vector.load %arg16[%c0_96, %c4_97] : memref<6x256xf32, #tpu.memory_space<vmem>>, vector<6x140xf32>
    %cst_98 = arith.constant dense<0.000000e+00> : vector<16x140xf32>
    %186 = tpu.matmul %184, %185, %cst_98 {dimension_numbers = #tpu.dot_dimension_numbers<[1], [0], [0], [1], [0, 0, 1, 1], [], []>} : vector<16x6xf32>, vector<6x140xf32>, vector<16x140xf32> -> vector<16x140xf32>
    %187 = arith.addf %183, %186 : vector<16x140xf32>
    %c0_99 = arith.constant 0 : index
    %c30 = arith.constant 30 : index
    %188 = vector.load %arg5[%c0_99, %c30] : memref<16x150xf32, #tpu.memory_space<vmem>>, vector<16x6xf32>
    %c0_100 = arith.constant 0 : index
    %c14_101 = arith.constant 14 : index
    %189 = vector.load %arg16[%c0_100, %c14_101] : memref<6x256xf32, #tpu.memory_space<vmem>>, vector<6x140xf32>
    %cst_102 = arith.constant dense<0.000000e+00> : vector<16x140xf32>
    %190 = tpu.matmul %188, %189, %cst_102 {dimension_numbers = #tpu.dot_dimension_numbers<[1], [0], [0], [1], [0, 0, 1, 1], [], []>} : vector<16x6xf32>, vector<6x140xf32>, vector<16x140xf32> -> vector<16x140xf32>
    %191 = arith.addf %187, %190 : vector<16x140xf32>
    %c0_103 = arith.constant 0 : index
    %c36_104 = arith.constant 36 : index
    %192 = vector.load %arg5[%c0_103, %c36_104] : memref<16x150xf32, #tpu.memory_space<vmem>>, vector<16x6xf32>
    %c0_105 = arith.constant 0 : index
    %c15_106 = arith.constant 15 : index
    %193 = vector.load %arg16[%c0_105, %c15_106] : memref<6x256xf32, #tpu.memory_space<vmem>>, vector<6x140xf32>
    %cst_107 = arith.constant dense<0.000000e+00> : vector<16x140xf32>
    %194 = tpu.matmul %192, %193, %cst_107 {dimension_numbers = #tpu.dot_dimension_numbers<[1], [0], [0], [1], [0, 0, 1, 1], [], []>} : vector<16x6xf32>, vector<6x140xf32>, vector<16x140xf32> -> vector<16x140xf32>
    %195 = arith.addf %191, %194 : vector<16x140xf32>
    %c0_108 = arith.constant 0 : index
    %c42 = arith.constant 42 : index
    %196 = vector.load %arg5[%c0_108, %c42] : memref<16x150xf32, #tpu.memory_space<vmem>>, vector<16x6xf32>
    %c0_109 = arith.constant 0 : index
    %c16_110 = arith.constant 16 : index
    %197 = vector.load %arg16[%c0_109, %c16_110] : memref<6x256xf32, #tpu.memory_space<vmem>>, vector<6x140xf32>
    %cst_111 = arith.constant dense<0.000000e+00> : vector<16x140xf32>
    %198 = tpu.matmul %196, %197, %cst_111 {dimension_numbers = #tpu.dot_dimension_numbers<[1], [0], [0], [1], [0, 0, 1, 1], [], []>} : vector<16x6xf32>, vector<6x140xf32>, vector<16x140xf32> -> vector<16x140xf32>
    %199 = arith.addf %195, %198 : vector<16x140xf32>
    %c0_112 = arith.constant 0 : index
    %c48 = arith.constant 48 : index
    %200 = vector.load %arg5[%c0_112, %c48] : memref<16x150xf32, #tpu.memory_space<vmem>>, vector<16x6xf32>
    %c0_113 = arith.constant 0 : index
    %c17_114 = arith.constant 17 : index
    %201 = vector.load %arg16[%c0_113, %c17_114] : memref<6x256xf32, #tpu.memory_space<vmem>>, vector<6x140xf32>
    %cst_115 = arith.constant dense<0.000000e+00> : vector<16x140xf32>
    %202 = tpu.matmul %200, %201, %cst_115 {dimension_numbers = #tpu.dot_dimension_numbers<[1], [0], [0], [1], [0, 0, 1, 1], [], []>} : vector<16x6xf32>, vector<6x140xf32>, vector<16x140xf32> -> vector<16x140xf32>
    %203 = arith.addf %199, %202 : vector<16x140xf32>
    %c0_116 = arith.constant 0 : index
    %c54 = arith.constant 54 : index
    %204 = vector.load %arg5[%c0_116, %c54] : memref<16x150xf32, #tpu.memory_space<vmem>>, vector<16x6xf32>
    %c0_117 = arith.constant 0 : index
    %c18_118 = arith.constant 18 : index
    %205 = vector.load %arg16[%c0_117, %c18_118] : memref<6x256xf32, #tpu.memory_space<vmem>>, vector<6x140xf32>
    %cst_119 = arith.constant dense<0.000000e+00> : vector<16x140xf32>
    %206 = tpu.matmul %204, %205, %cst_119 {dimension_numbers = #tpu.dot_dimension_numbers<[1], [0], [0], [1], [0, 0, 1, 1], [], []>} : vector<16x6xf32>, vector<6x140xf32>, vector<16x140xf32> -> vector<16x140xf32>
    %207 = arith.addf %203, %206 : vector<16x140xf32>
    %c0_120 = arith.constant 0 : index
    %c60 = arith.constant 60 : index
    %208 = vector.load %arg5[%c0_120, %c60] : memref<16x150xf32, #tpu.memory_space<vmem>>, vector<16x6xf32>
    %c0_121 = arith.constant 0 : index
    %c28 = arith.constant 28 : index
    %209 = vector.load %arg16[%c0_121, %c28] : memref<6x256xf32, #tpu.memory_space<vmem>>, vector<6x140xf32>
    %cst_122 = arith.constant dense<0.000000e+00> : vector<16x140xf32>
    %210 = tpu.matmul %208, %209, %cst_122 {dimension_numbers = #tpu.dot_dimension_numbers<[1], [0], [0], [1], [0, 0, 1, 1], [], []>} : vector<16x6xf32>, vector<6x140xf32>, vector<16x140xf32> -> vector<16x140xf32>
    %211 = arith.addf %207, %210 : vector<16x140xf32>
    %c0_123 = arith.constant 0 : index
    %c66_124 = arith.constant 66 : index
    %212 = vector.load %arg5[%c0_123, %c66_124] : memref<16x150xf32, #tpu.memory_space<vmem>>, vector<16x6xf32>
    %c0_125 = arith.constant 0 : index
    %c29 = arith.constant 29 : index
    %213 = vector.load %arg16[%c0_125, %c29] : memref<6x256xf32, #tpu.memory_space<vmem>>, vector<6x140xf32>
    %cst_126 = arith.constant dense<0.000000e+00> : vector<16x140xf32>
    %214 = tpu.matmul %212, %213, %cst_126 {dimension_numbers = #tpu.dot_dimension_numbers<[1], [0], [0], [1], [0, 0, 1, 1], [], []>} : vector<16x6xf32>, vector<6x140xf32>, vector<16x140xf32> -> vector<16x140xf32>
    %215 = arith.addf %211, %214 : vector<16x140xf32>
    %c0_127 = arith.constant 0 : index
    %c72 = arith.constant 72 : index
    %216 = vector.load %arg5[%c0_127, %c72] : memref<16x150xf32, #tpu.memory_space<vmem>>, vector<16x6xf32>
    %c0_128 = arith.constant 0 : index
    %c30_129 = arith.constant 30 : index
    %217 = vector.load %arg16[%c0_128, %c30_129] : memref<6x256xf32, #tpu.memory_space<vmem>>, vector<6x140xf32>
    %cst_130 = arith.constant dense<0.000000e+00> : vector<16x140xf32>
    %218 = tpu.matmul %216, %217, %cst_130 {dimension_numbers = #tpu.dot_dimension_numbers<[1], [0], [0], [1], [0, 0, 1, 1], [], []>} : vector<16x6xf32>, vector<6x140xf32>, vector<16x140xf32> -> vector<16x140xf32>
    %219 = arith.addf %215, %218 : vector<16x140xf32>
    %c0_131 = arith.constant 0 : index
    %c78 = arith.constant 78 : index
    %220 = vector.load %arg5[%c0_131, %c78] : memref<16x150xf32, #tpu.memory_space<vmem>>, vector<16x6xf32>
    %c0_132 = arith.constant 0 : index
    %c31 = arith.constant 31 : index
    %221 = vector.load %arg16[%c0_132, %c31] : memref<6x256xf32, #tpu.memory_space<vmem>>, vector<6x140xf32>
    %cst_133 = arith.constant dense<0.000000e+00> : vector<16x140xf32>
    %222 = tpu.matmul %220, %221, %cst_133 {dimension_numbers = #tpu.dot_dimension_numbers<[1], [0], [0], [1], [0, 0, 1, 1], [], []>} : vector<16x6xf32>, vector<6x140xf32>, vector<16x140xf32> -> vector<16x140xf32>
    %223 = arith.addf %219, %222 : vector<16x140xf32>
    %c0_134 = arith.constant 0 : index
    %c84 = arith.constant 84 : index
    %224 = vector.load %arg5[%c0_134, %c84] : memref<16x150xf32, #tpu.memory_space<vmem>>, vector<16x6xf32>
    %c0_135 = arith.constant 0 : index
    %c32_136 = arith.constant 32 : index
    %225 = vector.load %arg16[%c0_135, %c32_136] : memref<6x256xf32, #tpu.memory_space<vmem>>, vector<6x140xf32>
    %cst_137 = arith.constant dense<0.000000e+00> : vector<16x140xf32>
    %226 = tpu.matmul %224, %225, %cst_137 {dimension_numbers = #tpu.dot_dimension_numbers<[1], [0], [0], [1], [0, 0, 1, 1], [], []>} : vector<16x6xf32>, vector<6x140xf32>, vector<16x140xf32> -> vector<16x140xf32>
    %227 = arith.addf %223, %226 : vector<16x140xf32>
    %c0_138 = arith.constant 0 : index
    %c90 = arith.constant 90 : index
    %228 = vector.load %arg5[%c0_138, %c90] : memref<16x150xf32, #tpu.memory_space<vmem>>, vector<16x6xf32>
    %c0_139 = arith.constant 0 : index
    %c42_140 = arith.constant 42 : index
    %229 = vector.load %arg16[%c0_139, %c42_140] : memref<6x256xf32, #tpu.memory_space<vmem>>, vector<6x140xf32>
    %cst_141 = arith.constant dense<0.000000e+00> : vector<16x140xf32>
    %230 = tpu.matmul %228, %229, %cst_141 {dimension_numbers = #tpu.dot_dimension_numbers<[1], [0], [0], [1], [0, 0, 1, 1], [], []>} : vector<16x6xf32>, vector<6x140xf32>, vector<16x140xf32> -> vector<16x140xf32>
    %231 = arith.addf %227, %230 : vector<16x140xf32>
    %c0_142 = arith.constant 0 : index
    %c96_143 = arith.constant 96 : index
    %232 = vector.load %arg5[%c0_142, %c96_143] : memref<16x150xf32, #tpu.memory_space<vmem>>, vector<16x6xf32>
    %c0_144 = arith.constant 0 : index
    %c43 = arith.constant 43 : index
    %233 = vector.load %arg16[%c0_144, %c43] : memref<6x256xf32, #tpu.memory_space<vmem>>, vector<6x140xf32>
    %cst_145 = arith.constant dense<0.000000e+00> : vector<16x140xf32>
    %234 = tpu.matmul %232, %233, %cst_145 {dimension_numbers = #tpu.dot_dimension_numbers<[1], [0], [0], [1], [0, 0, 1, 1], [], []>} : vector<16x6xf32>, vector<6x140xf32>, vector<16x140xf32> -> vector<16x140xf32>
    %235 = arith.addf %231, %234 : vector<16x140xf32>
    %c0_146 = arith.constant 0 : index
    %c102 = arith.constant 102 : index
    %236 = vector.load %arg5[%c0_146, %c102] : memref<16x150xf32, #tpu.memory_space<vmem>>, vector<16x6xf32>
    %c0_147 = arith.constant 0 : index
    %c44 = arith.constant 44 : index
    %237 = vector.load %arg16[%c0_147, %c44] : memref<6x256xf32, #tpu.memory_space<vmem>>, vector<6x140xf32>
    %cst_148 = arith.constant dense<0.000000e+00> : vector<16x140xf32>
    %238 = tpu.matmul %236, %237, %cst_148 {dimension_numbers = #tpu.dot_dimension_numbers<[1], [0], [0], [1], [0, 0, 1, 1], [], []>} : vector<16x6xf32>, vector<6x140xf32>, vector<16x140xf32> -> vector<16x140xf32>
    %239 = arith.addf %235, %238 : vector<16x140xf32>
    %c0_149 = arith.constant 0 : index
    %c108 = arith.constant 108 : index
    %240 = vector.load %arg5[%c0_149, %c108] : memref<16x150xf32, #tpu.memory_space<vmem>>, vector<16x6xf32>
    %c0_150 = arith.constant 0 : index
    %c45 = arith.constant 45 : index
    %241 = vector.load %arg16[%c0_150, %c45] : memref<6x256xf32, #tpu.memory_space<vmem>>, vector<6x140xf32>
    %cst_151 = arith.constant dense<0.000000e+00> : vector<16x140xf32>
    %242 = tpu.matmul %240, %241, %cst_151 {dimension_numbers = #tpu.dot_dimension_numbers<[1], [0], [0], [1], [0, 0, 1, 1], [], []>} : vector<16x6xf32>, vector<6x140xf32>, vector<16x140xf32> -> vector<16x140xf32>
    %243 = arith.addf %239, %242 : vector<16x140xf32>
    %c0_152 = arith.constant 0 : index
    %c114 = arith.constant 114 : index
    %244 = vector.load %arg5[%c0_152, %c114] : memref<16x150xf32, #tpu.memory_space<vmem>>, vector<16x6xf32>
    %c0_153 = arith.constant 0 : index
    %c46 = arith.constant 46 : index
    %245 = vector.load %arg16[%c0_153, %c46] : memref<6x256xf32, #tpu.memory_space<vmem>>, vector<6x140xf32>
    %cst_154 = arith.constant dense<0.000000e+00> : vector<16x140xf32>
    %246 = tpu.matmul %244, %245, %cst_154 {dimension_numbers = #tpu.dot_dimension_numbers<[1], [0], [0], [1], [0, 0, 1, 1], [], []>} : vector<16x6xf32>, vector<6x140xf32>, vector<16x140xf32> -> vector<16x140xf32>
    %247 = arith.addf %243, %246 : vector<16x140xf32>
    %c0_155 = arith.constant 0 : index
    %c120 = arith.constant 120 : index
    %248 = vector.load %arg5[%c0_155, %c120] : memref<16x150xf32, #tpu.memory_space<vmem>>, vector<16x6xf32>
    %c0_156 = arith.constant 0 : index
    %c56 = arith.constant 56 : index
    %249 = vector.load %arg16[%c0_156, %c56] : memref<6x256xf32, #tpu.memory_space<vmem>>, vector<6x140xf32>
    %cst_157 = arith.constant dense<0.000000e+00> : vector<16x140xf32>
    %250 = tpu.matmul %248, %249, %cst_157 {dimension_numbers = #tpu.dot_dimension_numbers<[1], [0], [0], [1], [0, 0, 1, 1], [], []>} : vector<16x6xf32>, vector<6x140xf32>, vector<16x140xf32> -> vector<16x140xf32>
    %251 = arith.addf %247, %250 : vector<16x140xf32>
    %c0_158 = arith.constant 0 : index
    %c126 = arith.constant 126 : index
    %252 = vector.load %arg5[%c0_158, %c126] : memref<16x150xf32, #tpu.memory_space<vmem>>, vector<16x6xf32>
    %c0_159 = arith.constant 0 : index
    %c57 = arith.constant 57 : index
    %253 = vector.load %arg16[%c0_159, %c57] : memref<6x256xf32, #tpu.memory_space<vmem>>, vector<6x140xf32>
    %cst_160 = arith.constant dense<0.000000e+00> : vector<16x140xf32>
    %254 = tpu.matmul %252, %253, %cst_160 {dimension_numbers = #tpu.dot_dimension_numbers<[1], [0], [0], [1], [0, 0, 1, 1], [], []>} : vector<16x6xf32>, vector<6x140xf32>, vector<16x140xf32> -> vector<16x140xf32>
    %255 = arith.addf %251, %254 : vector<16x140xf32>
    %c0_161 = arith.constant 0 : index
    %c132_162 = arith.constant 132 : index
    %256 = vector.load %arg5[%c0_161, %c132_162] : memref<16x150xf32, #tpu.memory_space<vmem>>, vector<16x6xf32>
    %c0_163 = arith.constant 0 : index
    %c58 = arith.constant 58 : index
    %257 = vector.load %arg16[%c0_163, %c58] : memref<6x256xf32, #tpu.memory_space<vmem>>, vector<6x140xf32>
    %cst_164 = arith.constant dense<0.000000e+00> : vector<16x140xf32>
    %258 = tpu.matmul %256, %257, %cst_164 {dimension_numbers = #tpu.dot_dimension_numbers<[1], [0], [0], [1], [0, 0, 1, 1], [], []>} : vector<16x6xf32>, vector<6x140xf32>, vector<16x140xf32> -> vector<16x140xf32>
    %259 = arith.addf %255, %258 : vector<16x140xf32>
    %c0_165 = arith.constant 0 : index
    %c138 = arith.constant 138 : index
    %260 = vector.load %arg5[%c0_165, %c138] : memref<16x150xf32, #tpu.memory_space<vmem>>, vector<16x6xf32>
    %c0_166 = arith.constant 0 : index
    %c59 = arith.constant 59 : index
    %261 = vector.load %arg16[%c0_166, %c59] : memref<6x256xf32, #tpu.memory_space<vmem>>, vector<6x140xf32>
    %cst_167 = arith.constant dense<0.000000e+00> : vector<16x140xf32>
    %262 = tpu.matmul %260, %261, %cst_167 {dimension_numbers = #tpu.dot_dimension_numbers<[1], [0], [0], [1], [0, 0, 1, 1], [], []>} : vector<16x6xf32>, vector<6x140xf32>, vector<16x140xf32> -> vector<16x140xf32>
    %263 = arith.addf %259, %262 : vector<16x140xf32>
    %c0_168 = arith.constant 0 : index
    %c144 = arith.constant 144 : index
    %264 = vector.load %arg5[%c0_168, %c144] : memref<16x150xf32, #tpu.memory_space<vmem>>, vector<16x6xf32>
    %c0_169 = arith.constant 0 : index
    %c60_170 = arith.constant 60 : index
    %265 = vector.load %arg16[%c0_169, %c60_170] : memref<6x256xf32, #tpu.memory_space<vmem>>, vector<6x140xf32>
    %cst_171 = arith.constant dense<0.000000e+00> : vector<16x140xf32>
    %266 = tpu.matmul %264, %265, %cst_171 {dimension_numbers = #tpu.dot_dimension_numbers<[1], [0], [0], [1], [0, 0, 1, 1], [], []>} : vector<16x6xf32>, vector<6x140xf32>, vector<16x140xf32> -> vector<16x140xf32>
    %267 = arith.addf %263, %266 : vector<16x140xf32>
    %c0_172 = arith.constant 0 : index
    %c0_173 = arith.constant 0 : index
    %268 = vector.load %arg6[%c0_172, %c0_173] : memref<16x1xf32, #tpu.memory_space<vmem>>, vector<16x1xf32>
    %269 = vector.broadcast %268 : vector<16x1xf32> to vector<16x140xf32>
    %270 = arith.addf %267, %269 : vector<16x140xf32>
    %cst_174 = arith.constant 0.000000e+00 : f32
    %271 = vector.broadcast %cst_174 : f32 to vector<16x140xf32>
    %272 = arith.maximumf %270, %271 : vector<16x140xf32>
    %c0_175 = arith.constant 0 : index
    %c0_176 = arith.constant 0 : index
    %273 = vector.load %arg17[%c0_175, %c0_176] : memref<16x140xf32, #tpu.memory_space<vmem>>, vector<16x140xf32>
    tpu.vector_store %arg17[%c0_175, %c0_176], %272 {strides = array<i32>} : memref<16x140xf32, #tpu.memory_space<vmem>>, vector<16x140xf32>,
    %c0_177 = arith.constant 0 : index
    %c0_178 = arith.constant 0 : index
    %274 = vector.load %arg17[%c0_177, %c0_178] : memref<16x140xf32, #tpu.memory_space<vmem>>, vector<16x121xf32>
    %c0_179 = arith.constant 0 : index
    %c1_180 = arith.constant 1 : index
    %275 = vector.load %arg17[%c0_179, %c1_180] : memref<16x140xf32, #tpu.memory_space<vmem>>, vector<16x121xf32>
    %276 = arith.maximumf %274, %275 : vector<16x121xf32>
    %c0_181 = arith.constant 0 : index
    %c14_182 = arith.constant 14 : index
    %277 = vector.load %arg17[%c0_181, %c14_182] : memref<16x140xf32, #tpu.memory_space<vmem>>, vector<16x121xf32>
    %c0_183 = arith.constant 0 : index
    %c15_184 = arith.constant 15 : index
    %278 = vector.load %arg17[%c0_183, %c15_184] : memref<16x140xf32, #tpu.memory_space<vmem>>, vector<16x121xf32>
    %279 = arith.maximumf %277, %278 : vector<16x121xf32>
    %280 = arith.maximumf %276, %279 : vector<16x121xf32>
    %c0_185 = arith.constant 0 : index
    %c0_186 = arith.constant 0 : index
    %281 = vector.load %arg7[%c0_185, %c0_186] : memref<121x25xf32, #tpu.memory_space<vmem>>, vector<121x25xf32>
    %cst_187 = arith.constant dense<0.000000e+00> : vector<16x25xf32>
    %282 = tpu.matmul %280, %281, %cst_187 {dimension_numbers = #tpu.dot_dimension_numbers<[1], [0], [0], [1], [0, 0, 1, 1], [], []>} : vector<16x121xf32>, vector<121x25xf32>, vector<16x25xf32> -> vector<16x25xf32>
    %c0_188 = arith.constant 0 : index
    %c0_189 = arith.constant 0 : index
    %283 = vector.load %arg18[%c0_188, %c0_189] : memref<16x25xf32, #tpu.memory_space<vmem>>, vector<16x25xf32>
    tpu.vector_store %arg18[%c0_188, %c0_189], %282 {strides = array<i32>} : memref<16x25xf32, #tpu.memory_space<vmem>>, vector<16x25xf32>,
    %c0_190 = arith.constant 0 : index
    %c0_191 = arith.constant 0 : index
    %284 = vector.load %arg18[%c0_190, %c0_191] : memref<16x25xf32, #tpu.memory_space<vmem>>, vector<1x25xf32>
    %c0_192 = arith.constant 0 : index
    %c0_193 = arith.constant 0 : index
    %285 = vector.load %arg19[%c0_192, %c0_193] : memref<2x400xf32, #tpu.memory_space<vmem>>, vector<1x25xf32>
    tpu.vector_store %arg19[%c0_192, %c0_193], %284 {strides = array<i32>} : memref<2x400xf32, #tpu.memory_space<vmem>>, vector<1x25xf32>,
    %c1_194 = arith.constant 1 : index
    %c0_195 = arith.constant 0 : index
    %286 = vector.load %arg18[%c1_194, %c0_195] : memref<16x25xf32, #tpu.memory_space<vmem>>, vector<1x25xf32>
    %c0_196 = arith.constant 0 : index
    %c25 = arith.constant 25 : index
    %287 = vector.load %arg19[%c0_196, %c25] : memref<2x400xf32, #tpu.memory_space<vmem>>, vector<1x25xf32>
    tpu.vector_store %arg19[%c0_196, %c25], %286 {strides = array<i32>} : memref<2x400xf32, #tpu.memory_space<vmem>>, vector<1x25xf32>,
    %c2_197 = arith.constant 2 : index
    %c0_198 = arith.constant 0 : index
    %288 = vector.load %arg18[%c2_197, %c0_198] : memref<16x25xf32, #tpu.memory_space<vmem>>, vector<1x25xf32>
    %c0_199 = arith.constant 0 : index
    %c50 = arith.constant 50 : index
    %289 = vector.load %arg19[%c0_199, %c50] : memref<2x400xf32, #tpu.memory_space<vmem>>, vector<1x25xf32>
    tpu.vector_store %arg19[%c0_199, %c50], %288 {strides = array<i32>} : memref<2x400xf32, #tpu.memory_space<vmem>>, vector<1x25xf32>,
    %c3_200 = arith.constant 3 : index
    %c0_201 = arith.constant 0 : index
    %290 = vector.load %arg18[%c3_200, %c0_201] : memref<16x25xf32, #tpu.memory_space<vmem>>, vector<1x25xf32>
    %c0_202 = arith.constant 0 : index
    %c75 = arith.constant 75 : index
    %291 = vector.load %arg19[%c0_202, %c75] : memref<2x400xf32, #tpu.memory_space<vmem>>, vector<1x25xf32>
    tpu.vector_store %arg19[%c0_202, %c75], %290 {strides = array<i32>} : memref<2x400xf32, #tpu.memory_space<vmem>>, vector<1x25xf32>,
    %c4_203 = arith.constant 4 : index
    %c0_204 = arith.constant 0 : index
    %292 = vector.load %arg18[%c4_203, %c0_204] : memref<16x25xf32, #tpu.memory_space<vmem>>, vector<1x25xf32>
    %c0_205 = arith.constant 0 : index
    %c100_206 = arith.constant 100 : index
    %293 = vector.load %arg19[%c0_205, %c100_206] : memref<2x400xf32, #tpu.memory_space<vmem>>, vector<1x25xf32>
    tpu.vector_store %arg19[%c0_205, %c100_206], %292 {strides = array<i32>} : memref<2x400xf32, #tpu.memory_space<vmem>>, vector<1x25xf32>,
    %c5_207 = arith.constant 5 : index
    %c0_208 = arith.constant 0 : index
    %294 = vector.load %arg18[%c5_207, %c0_208] : memref<16x25xf32, #tpu.memory_space<vmem>>, vector<1x25xf32>
    %c0_209 = arith.constant 0 : index
    %c125 = arith.constant 125 : index
    %295 = vector.load %arg19[%c0_209, %c125] : memref<2x400xf32, #tpu.memory_space<vmem>>, vector<1x25xf32>
    tpu.vector_store %arg19[%c0_209, %c125], %294 {strides = array<i32>} : memref<2x400xf32, #tpu.memory_space<vmem>>, vector<1x25xf32>,
    %c6_210 = arith.constant 6 : index
    %c0_211 = arith.constant 0 : index
    %296 = vector.load %arg18[%c6_210, %c0_211] : memref<16x25xf32, #tpu.memory_space<vmem>>, vector<1x25xf32>
    %c0_212 = arith.constant 0 : index
    %c150 = arith.constant 150 : index
    %297 = vector.load %arg19[%c0_212, %c150] : memref<2x400xf32, #tpu.memory_space<vmem>>, vector<1x25xf32>
    tpu.vector_store %arg19[%c0_212, %c150], %296 {strides = array<i32>} : memref<2x400xf32, #tpu.memory_space<vmem>>, vector<1x25xf32>,
    %c7_213 = arith.constant 7 : index
    %c0_214 = arith.constant 0 : index
    %298 = vector.load %arg18[%c7_213, %c0_214] : memref<16x25xf32, #tpu.memory_space<vmem>>, vector<1x25xf32>
    %c0_215 = arith.constant 0 : index
    %c175 = arith.constant 175 : index
    %299 = vector.load %arg19[%c0_215, %c175] : memref<2x400xf32, #tpu.memory_space<vmem>>, vector<1x25xf32>
    tpu.vector_store %arg19[%c0_215, %c175], %298 {strides = array<i32>} : memref<2x400xf32, #tpu.memory_space<vmem>>, vector<1x25xf32>,
    %c8_216 = arith.constant 8 : index
    %c0_217 = arith.constant 0 : index
    %300 = vector.load %arg18[%c8_216, %c0_217] : memref<16x25xf32, #tpu.memory_space<vmem>>, vector<1x25xf32>
    %c0_218 = arith.constant 0 : index
    %c200 = arith.constant 200 : index
    %301 = vector.load %arg19[%c0_218, %c200] : memref<2x400xf32, #tpu.memory_space<vmem>>, vector<1x25xf32>
    tpu.vector_store %arg19[%c0_218, %c200], %300 {strides = array<i32>} : memref<2x400xf32, #tpu.memory_space<vmem>>, vector<1x25xf32>,
    %c9_219 = arith.constant 9 : index
    %c0_220 = arith.constant 0 : index
    %302 = vector.load %arg18[%c9_219, %c0_220] : memref<16x25xf32, #tpu.memory_space<vmem>>, vector<1x25xf32>
    %c0_221 = arith.constant 0 : index
    %c225 = arith.constant 225 : index
    %303 = vector.load %arg19[%c0_221, %c225] : memref<2x400xf32, #tpu.memory_space<vmem>>, vector<1x25xf32>
    tpu.vector_store %arg19[%c0_221, %c225], %302 {strides = array<i32>} : memref<2x400xf32, #tpu.memory_space<vmem>>, vector<1x25xf32>,
    %c10_222 = arith.constant 10 : index
    %c0_223 = arith.constant 0 : index
    %304 = vector.load %arg18[%c10_222, %c0_223] : memref<16x25xf32, #tpu.memory_space<vmem>>, vector<1x25xf32>
    %c0_224 = arith.constant 0 : index
    %c250 = arith.constant 250 : index
    %305 = vector.load %arg19[%c0_224, %c250] : memref<2x400xf32, #tpu.memory_space<vmem>>, vector<1x25xf32>
    tpu.vector_store %arg19[%c0_224, %c250], %304 {strides = array<i32>} : memref<2x400xf32, #tpu.memory_space<vmem>>, vector<1x25xf32>,
    %c11_225 = arith.constant 11 : index
    %c0_226 = arith.constant 0 : index
    %306 = vector.load %arg18[%c11_225, %c0_226] : memref<16x25xf32, #tpu.memory_space<vmem>>, vector<1x25xf32>
    %c0_227 = arith.constant 0 : index
    %c275 = arith.constant 275 : index
    %307 = vector.load %arg19[%c0_227, %c275] : memref<2x400xf32, #tpu.memory_space<vmem>>, vector<1x25xf32>
    tpu.vector_store %arg19[%c0_227, %c275], %306 {strides = array<i32>} : memref<2x400xf32, #tpu.memory_space<vmem>>, vector<1x25xf32>,
    %c12_228 = arith.constant 12 : index
    %c0_229 = arith.constant 0 : index
    %308 = vector.load %arg18[%c12_228, %c0_229] : memref<16x25xf32, #tpu.memory_space<vmem>>, vector<1x25xf32>
    %c0_230 = arith.constant 0 : index
    %c300 = arith.constant 300 : index
    %309 = vector.load %arg19[%c0_230, %c300] : memref<2x400xf32, #tpu.memory_space<vmem>>, vector<1x25xf32>
    tpu.vector_store %arg19[%c0_230, %c300], %308 {strides = array<i32>} : memref<2x400xf32, #tpu.memory_space<vmem>>, vector<1x25xf32>,
    %c13_231 = arith.constant 13 : index
    %c0_232 = arith.constant 0 : index
    %310 = vector.load %arg18[%c13_231, %c0_232] : memref<16x25xf32, #tpu.memory_space<vmem>>, vector<1x25xf32>
    %c0_233 = arith.constant 0 : index
    %c325 = arith.constant 325 : index
    %311 = vector.load %arg19[%c0_233, %c325] : memref<2x400xf32, #tpu.memory_space<vmem>>, vector<1x25xf32>
    tpu.vector_store %arg19[%c0_233, %c325], %310 {strides = array<i32>} : memref<2x400xf32, #tpu.memory_space<vmem>>, vector<1x25xf32>,
    %c14_234 = arith.constant 14 : index
    %c0_235 = arith.constant 0 : index
    %312 = vector.load %arg18[%c14_234, %c0_235] : memref<16x25xf32, #tpu.memory_space<vmem>>, vector<1x25xf32>
    %c0_236 = arith.constant 0 : index
    %c350 = arith.constant 350 : index
    %313 = vector.load %arg19[%c0_236, %c350] : memref<2x400xf32, #tpu.memory_space<vmem>>, vector<1x25xf32>
    tpu.vector_store %arg19[%c0_236, %c350], %312 {strides = array<i32>} : memref<2x400xf32, #tpu.memory_space<vmem>>, vector<1x25xf32>,
    %c15_237 = arith.constant 15 : index
    %c0_238 = arith.constant 0 : index
    %314 = vector.load %arg18[%c15_237, %c0_238] : memref<16x25xf32, #tpu.memory_space<vmem>>, vector<1x25xf32>
    %c0_239 = arith.constant 0 : index
    %c375 = arith.constant 375 : index
    %315 = vector.load %arg19[%c0_239, %c375] : memref<2x400xf32, #tpu.memory_space<vmem>>, vector<1x25xf32>
    tpu.vector_store %arg19[%c0_239, %c375], %314 {strides = array<i32>} : memref<2x400xf32, #tpu.memory_space<vmem>>, vector<1x25xf32>,
    %cst_240 = arith.constant 0.000000e+00 : f32
    %316 = vector.broadcast %cst_240 : f32 to vector<6x896xf32>
    %c1_241 = arith.constant 1 : index
    %c0_242 = arith.constant 0 : index
    %317 = vector.load %arg1[%c1_241, %c0_242] : memref<2x1152xf32, #tpu.memory_space<vmem>>, vector<1x896xf32>
    %c0_243 = arith.constant 0 : index
    %c0_244 = arith.constant 0 : index
    %318 = vector.load %arg2[%c0_243, %c0_244] : memref<6x25xf32, #tpu.memory_space<vmem>>, vector<6x1xf32>
    %319 = vector.broadcast %318 : vector<6x1xf32> to vector<6x896xf32>
    %320 = vector.broadcast %317 : vector<1x896xf32> to vector<6x896xf32>
    %321 = arith.mulf %319, %320 : vector<6x896xf32>
    %322 = arith.addf %316, %321 : vector<6x896xf32>
    %c1_245 = arith.constant 1 : index
    %c1_246 = arith.constant 1 : index
    %323 = vector.load %arg1[%c1_245, %c1_246] : memref<2x1152xf32, #tpu.memory_space<vmem>>, vector<1x896xf32>
    %c0_247 = arith.constant 0 : index
    %c1_248 = arith.constant 1 : index
    %324 = vector.load %arg2[%c0_247, %c1_248] : memref<6x25xf32, #tpu.memory_space<vmem>>, vector<6x1xf32>
    %325 = vector.broadcast %324 : vector<6x1xf32> to vector<6x896xf32>
    %326 = vector.broadcast %323 : vector<1x896xf32> to vector<6x896xf32>
    %327 = arith.mulf %325, %326 : vector<6x896xf32>
    %328 = arith.addf %322, %327 : vector<6x896xf32>
    %c1_249 = arith.constant 1 : index
    %c2_250 = arith.constant 2 : index
    %329 = vector.load %arg1[%c1_249, %c2_250] : memref<2x1152xf32, #tpu.memory_space<vmem>>, vector<1x896xf32>
    %c0_251 = arith.constant 0 : index
    %c2_252 = arith.constant 2 : index
    %330 = vector.load %arg2[%c0_251, %c2_252] : memref<6x25xf32, #tpu.memory_space<vmem>>, vector<6x1xf32>
    %331 = vector.broadcast %330 : vector<6x1xf32> to vector<6x896xf32>
    %332 = vector.broadcast %329 : vector<1x896xf32> to vector<6x896xf32>
    %333 = arith.mulf %331, %332 : vector<6x896xf32>
    %334 = arith.addf %328, %333 : vector<6x896xf32>
    %c1_253 = arith.constant 1 : index
    %c3_254 = arith.constant 3 : index
    %335 = vector.load %arg1[%c1_253, %c3_254] : memref<2x1152xf32, #tpu.memory_space<vmem>>, vector<1x896xf32>
    %c0_255 = arith.constant 0 : index
    %c3_256 = arith.constant 3 : index
    %336 = vector.load %arg2[%c0_255, %c3_256] : memref<6x25xf32, #tpu.memory_space<vmem>>, vector<6x1xf32>
    %337 = vector.broadcast %336 : vector<6x1xf32> to vector<6x896xf32>
    %338 = vector.broadcast %335 : vector<1x896xf32> to vector<6x896xf32>
    %339 = arith.mulf %337, %338 : vector<6x896xf32>
    %340 = arith.addf %334, %339 : vector<6x896xf32>
    %c1_257 = arith.constant 1 : index
    %c4_258 = arith.constant 4 : index
    %341 = vector.load %arg1[%c1_257, %c4_258] : memref<2x1152xf32, #tpu.memory_space<vmem>>, vector<1x896xf32>
    %c0_259 = arith.constant 0 : index
    %c4_260 = arith.constant 4 : index
    %342 = vector.load %arg2[%c0_259, %c4_260] : memref<6x25xf32, #tpu.memory_space<vmem>>, vector<6x1xf32>
    %343 = vector.broadcast %342 : vector<6x1xf32> to vector<6x896xf32>
    %344 = vector.broadcast %341 : vector<1x896xf32> to vector<6x896xf32>
    %345 = arith.mulf %343, %344 : vector<6x896xf32>
    %346 = arith.addf %340, %345 : vector<6x896xf32>
    %c1_261 = arith.constant 1 : index
    %c32_262 = arith.constant 32 : index
    %347 = vector.load %arg1[%c1_261, %c32_262] : memref<2x1152xf32, #tpu.memory_space<vmem>>, vector<1x896xf32>
    %c0_263 = arith.constant 0 : index
    %c5_264 = arith.constant 5 : index
    %348 = vector.load %arg2[%c0_263, %c5_264] : memref<6x25xf32, #tpu.memory_space<vmem>>, vector<6x1xf32>
    %349 = vector.broadcast %348 : vector<6x1xf32> to vector<6x896xf32>
    %350 = vector.broadcast %347 : vector<1x896xf32> to vector<6x896xf32>
    %351 = arith.mulf %349, %350 : vector<6x896xf32>
    %352 = arith.addf %346, %351 : vector<6x896xf32>
    %c1_265 = arith.constant 1 : index
    %c33_266 = arith.constant 33 : index
    %353 = vector.load %arg1[%c1_265, %c33_266] : memref<2x1152xf32, #tpu.memory_space<vmem>>, vector<1x896xf32>
    %c0_267 = arith.constant 0 : index
    %c6_268 = arith.constant 6 : index
    %354 = vector.load %arg2[%c0_267, %c6_268] : memref<6x25xf32, #tpu.memory_space<vmem>>, vector<6x1xf32>
    %355 = vector.broadcast %354 : vector<6x1xf32> to vector<6x896xf32>
    %356 = vector.broadcast %353 : vector<1x896xf32> to vector<6x896xf32>
    %357 = arith.mulf %355, %356 : vector<6x896xf32>
    %358 = arith.addf %352, %357 : vector<6x896xf32>
    %c1_269 = arith.constant 1 : index
    %c34_270 = arith.constant 34 : index
    %359 = vector.load %arg1[%c1_269, %c34_270] : memref<2x1152xf32, #tpu.memory_space<vmem>>, vector<1x896xf32>
    %c0_271 = arith.constant 0 : index
    %c7_272 = arith.constant 7 : index
    %360 = vector.load %arg2[%c0_271, %c7_272] : memref<6x25xf32, #tpu.memory_space<vmem>>, vector<6x1xf32>
    %361 = vector.broadcast %360 : vector<6x1xf32> to vector<6x896xf32>
    %362 = vector.broadcast %359 : vector<1x896xf32> to vector<6x896xf32>
    %363 = arith.mulf %361, %362 : vector<6x896xf32>
    %364 = arith.addf %358, %363 : vector<6x896xf32>
    %c1_273 = arith.constant 1 : index
    %c35_274 = arith.constant 35 : index
    %365 = vector.load %arg1[%c1_273, %c35_274] : memref<2x1152xf32, #tpu.memory_space<vmem>>, vector<1x896xf32>
    %c0_275 = arith.constant 0 : index
    %c8_276 = arith.constant 8 : index
    %366 = vector.load %arg2[%c0_275, %c8_276] : memref<6x25xf32, #tpu.memory_space<vmem>>, vector<6x1xf32>
    %367 = vector.broadcast %366 : vector<6x1xf32> to vector<6x896xf32>
    %368 = vector.broadcast %365 : vector<1x896xf32> to vector<6x896xf32>
    %369 = arith.mulf %367, %368 : vector<6x896xf32>
    %370 = arith.addf %364, %369 : vector<6x896xf32>
    %c1_277 = arith.constant 1 : index
    %c36_278 = arith.constant 36 : index
    %371 = vector.load %arg1[%c1_277, %c36_278] : memref<2x1152xf32, #tpu.memory_space<vmem>>, vector<1x896xf32>
    %c0_279 = arith.constant 0 : index
    %c9_280 = arith.constant 9 : index
    %372 = vector.load %arg2[%c0_279, %c9_280] : memref<6x25xf32, #tpu.memory_space<vmem>>, vector<6x1xf32>
    %373 = vector.broadcast %372 : vector<6x1xf32> to vector<6x896xf32>
    %374 = vector.broadcast %371 : vector<1x896xf32> to vector<6x896xf32>
    %375 = arith.mulf %373, %374 : vector<6x896xf32>
    %376 = arith.addf %370, %375 : vector<6x896xf32>
    %c1_281 = arith.constant 1 : index
    %c64_282 = arith.constant 64 : index
    %377 = vector.load %arg1[%c1_281, %c64_282] : memref<2x1152xf32, #tpu.memory_space<vmem>>, vector<1x896xf32>
    %c0_283 = arith.constant 0 : index
    %c10_284 = arith.constant 10 : index
    %378 = vector.load %arg2[%c0_283, %c10_284] : memref<6x25xf32, #tpu.memory_space<vmem>>, vector<6x1xf32>
    %379 = vector.broadcast %378 : vector<6x1xf32> to vector<6x896xf32>
    %380 = vector.broadcast %377 : vector<1x896xf32> to vector<6x896xf32>
    %381 = arith.mulf %379, %380 : vector<6x896xf32>
    %382 = arith.addf %376, %381 : vector<6x896xf32>
    %c1_285 = arith.constant 1 : index
    %c65_286 = arith.constant 65 : index
    %383 = vector.load %arg1[%c1_285, %c65_286] : memref<2x1152xf32, #tpu.memory_space<vmem>>, vector<1x896xf32>
    %c0_287 = arith.constant 0 : index
    %c11_288 = arith.constant 11 : index
    %384 = vector.load %arg2[%c0_287, %c11_288] : memref<6x25xf32, #tpu.memory_space<vmem>>, vector<6x1xf32>
    %385 = vector.broadcast %384 : vector<6x1xf32> to vector<6x896xf32>
    %386 = vector.broadcast %383 : vector<1x896xf32> to vector<6x896xf32>
    %387 = arith.mulf %385, %386 : vector<6x896xf32>
    %388 = arith.addf %382, %387 : vector<6x896xf32>
    %c1_289 = arith.constant 1 : index
    %c66_290 = arith.constant 66 : index
    %389 = vector.load %arg1[%c1_289, %c66_290] : memref<2x1152xf32, #tpu.memory_space<vmem>>, vector<1x896xf32>
    %c0_291 = arith.constant 0 : index
    %c12_292 = arith.constant 12 : index
    %390 = vector.load %arg2[%c0_291, %c12_292] : memref<6x25xf32, #tpu.memory_space<vmem>>, vector<6x1xf32>
    %391 = vector.broadcast %390 : vector<6x1xf32> to vector<6x896xf32>
    %392 = vector.broadcast %389 : vector<1x896xf32> to vector<6x896xf32>
    %393 = arith.mulf %391, %392 : vector<6x896xf32>
    %394 = arith.addf %388, %393 : vector<6x896xf32>
    %c1_293 = arith.constant 1 : index
    %c67_294 = arith.constant 67 : index
    %395 = vector.load %arg1[%c1_293, %c67_294] : memref<2x1152xf32, #tpu.memory_space<vmem>>, vector<1x896xf32>
    %c0_295 = arith.constant 0 : index
    %c13_296 = arith.constant 13 : index
    %396 = vector.load %arg2[%c0_295, %c13_296] : memref<6x25xf32, #tpu.memory_space<vmem>>, vector<6x1xf32>
    %397 = vector.broadcast %396 : vector<6x1xf32> to vector<6x896xf32>
    %398 = vector.broadcast %395 : vector<1x896xf32> to vector<6x896xf32>
    %399 = arith.mulf %397, %398 : vector<6x896xf32>
    %400 = arith.addf %394, %399 : vector<6x896xf32>
    %c1_297 = arith.constant 1 : index
    %c68_298 = arith.constant 68 : index
    %401 = vector.load %arg1[%c1_297, %c68_298] : memref<2x1152xf32, #tpu.memory_space<vmem>>, vector<1x896xf32>
    %c0_299 = arith.constant 0 : index
    %c14_300 = arith.constant 14 : index
    %402 = vector.load %arg2[%c0_299, %c14_300] : memref<6x25xf32, #tpu.memory_space<vmem>>, vector<6x1xf32>
    %403 = vector.broadcast %402 : vector<6x1xf32> to vector<6x896xf32>
    %404 = vector.broadcast %401 : vector<1x896xf32> to vector<6x896xf32>
    %405 = arith.mulf %403, %404 : vector<6x896xf32>
    %406 = arith.addf %400, %405 : vector<6x896xf32>
    %c1_301 = arith.constant 1 : index
    %c96_302 = arith.constant 96 : index
    %407 = vector.load %arg1[%c1_301, %c96_302] : memref<2x1152xf32, #tpu.memory_space<vmem>>, vector<1x896xf32>
    %c0_303 = arith.constant 0 : index
    %c15_304 = arith.constant 15 : index
    %408 = vector.load %arg2[%c0_303, %c15_304] : memref<6x25xf32, #tpu.memory_space<vmem>>, vector<6x1xf32>
    %409 = vector.broadcast %408 : vector<6x1xf32> to vector<6x896xf32>
    %410 = vector.broadcast %407 : vector<1x896xf32> to vector<6x896xf32>
    %411 = arith.mulf %409, %410 : vector<6x896xf32>
    %412 = arith.addf %406, %411 : vector<6x896xf32>
    %c1_305 = arith.constant 1 : index
    %c97_306 = arith.constant 97 : index
    %413 = vector.load %arg1[%c1_305, %c97_306] : memref<2x1152xf32, #tpu.memory_space<vmem>>, vector<1x896xf32>
    %c0_307 = arith.constant 0 : index
    %c16_308 = arith.constant 16 : index
    %414 = vector.load %arg2[%c0_307, %c16_308] : memref<6x25xf32, #tpu.memory_space<vmem>>, vector<6x1xf32>
    %415 = vector.broadcast %414 : vector<6x1xf32> to vector<6x896xf32>
    %416 = vector.broadcast %413 : vector<1x896xf32> to vector<6x896xf32>
    %417 = arith.mulf %415, %416 : vector<6x896xf32>
    %418 = arith.addf %412, %417 : vector<6x896xf32>
    %c1_309 = arith.constant 1 : index
    %c98_310 = arith.constant 98 : index
    %419 = vector.load %arg1[%c1_309, %c98_310] : memref<2x1152xf32, #tpu.memory_space<vmem>>, vector<1x896xf32>
    %c0_311 = arith.constant 0 : index
    %c17_312 = arith.constant 17 : index
    %420 = vector.load %arg2[%c0_311, %c17_312] : memref<6x25xf32, #tpu.memory_space<vmem>>, vector<6x1xf32>
    %421 = vector.broadcast %420 : vector<6x1xf32> to vector<6x896xf32>
    %422 = vector.broadcast %419 : vector<1x896xf32> to vector<6x896xf32>
    %423 = arith.mulf %421, %422 : vector<6x896xf32>
    %424 = arith.addf %418, %423 : vector<6x896xf32>
    %c1_313 = arith.constant 1 : index
    %c99_314 = arith.constant 99 : index
    %425 = vector.load %arg1[%c1_313, %c99_314] : memref<2x1152xf32, #tpu.memory_space<vmem>>, vector<1x896xf32>
    %c0_315 = arith.constant 0 : index
    %c18_316 = arith.constant 18 : index
    %426 = vector.load %arg2[%c0_315, %c18_316] : memref<6x25xf32, #tpu.memory_space<vmem>>, vector<6x1xf32>
    %427 = vector.broadcast %426 : vector<6x1xf32> to vector<6x896xf32>
    %428 = vector.broadcast %425 : vector<1x896xf32> to vector<6x896xf32>
    %429 = arith.mulf %427, %428 : vector<6x896xf32>
    %430 = arith.addf %424, %429 : vector<6x896xf32>
    %c1_317 = arith.constant 1 : index
    %c100_318 = arith.constant 100 : index
    %431 = vector.load %arg1[%c1_317, %c100_318] : memref<2x1152xf32, #tpu.memory_space<vmem>>, vector<1x896xf32>
    %c0_319 = arith.constant 0 : index
    %c19_320 = arith.constant 19 : index
    %432 = vector.load %arg2[%c0_319, %c19_320] : memref<6x25xf32, #tpu.memory_space<vmem>>, vector<6x1xf32>
    %433 = vector.broadcast %432 : vector<6x1xf32> to vector<6x896xf32>
    %434 = vector.broadcast %431 : vector<1x896xf32> to vector<6x896xf32>
    %435 = arith.mulf %433, %434 : vector<6x896xf32>
    %436 = arith.addf %430, %435 : vector<6x896xf32>
    %c1_321 = arith.constant 1 : index
    %c128_322 = arith.constant 128 : index
    %437 = vector.load %arg1[%c1_321, %c128_322] : memref<2x1152xf32, #tpu.memory_space<vmem>>, vector<1x896xf32>
    %c0_323 = arith.constant 0 : index
    %c20_324 = arith.constant 20 : index
    %438 = vector.load %arg2[%c0_323, %c20_324] : memref<6x25xf32, #tpu.memory_space<vmem>>, vector<6x1xf32>
    %439 = vector.broadcast %438 : vector<6x1xf32> to vector<6x896xf32>
    %440 = vector.broadcast %437 : vector<1x896xf32> to vector<6x896xf32>
    %441 = arith.mulf %439, %440 : vector<6x896xf32>
    %442 = arith.addf %436, %441 : vector<6x896xf32>
    %c1_325 = arith.constant 1 : index
    %c129_326 = arith.constant 129 : index
    %443 = vector.load %arg1[%c1_325, %c129_326] : memref<2x1152xf32, #tpu.memory_space<vmem>>, vector<1x896xf32>
    %c0_327 = arith.constant 0 : index
    %c21_328 = arith.constant 21 : index
    %444 = vector.load %arg2[%c0_327, %c21_328] : memref<6x25xf32, #tpu.memory_space<vmem>>, vector<6x1xf32>
    %445 = vector.broadcast %444 : vector<6x1xf32> to vector<6x896xf32>
    %446 = vector.broadcast %443 : vector<1x896xf32> to vector<6x896xf32>
    %447 = arith.mulf %445, %446 : vector<6x896xf32>
    %448 = arith.addf %442, %447 : vector<6x896xf32>
    %c1_329 = arith.constant 1 : index
    %c130_330 = arith.constant 130 : index
    %449 = vector.load %arg1[%c1_329, %c130_330] : memref<2x1152xf32, #tpu.memory_space<vmem>>, vector<1x896xf32>
    %c0_331 = arith.constant 0 : index
    %c22_332 = arith.constant 22 : index
    %450 = vector.load %arg2[%c0_331, %c22_332] : memref<6x25xf32, #tpu.memory_space<vmem>>, vector<6x1xf32>
    %451 = vector.broadcast %450 : vector<6x1xf32> to vector<6x896xf32>
    %452 = vector.broadcast %449 : vector<1x896xf32> to vector<6x896xf32>
    %453 = arith.mulf %451, %452 : vector<6x896xf32>
    %454 = arith.addf %448, %453 : vector<6x896xf32>
    %c1_333 = arith.constant 1 : index
    %c131_334 = arith.constant 131 : index
    %455 = vector.load %arg1[%c1_333, %c131_334] : memref<2x1152xf32, #tpu.memory_space<vmem>>, vector<1x896xf32>
    %c0_335 = arith.constant 0 : index
    %c23_336 = arith.constant 23 : index
    %456 = vector.load %arg2[%c0_335, %c23_336] : memref<6x25xf32, #tpu.memory_space<vmem>>, vector<6x1xf32>
    %457 = vector.broadcast %456 : vector<6x1xf32> to vector<6x896xf32>
    %458 = vector.broadcast %455 : vector<1x896xf32> to vector<6x896xf32>
    %459 = arith.mulf %457, %458 : vector<6x896xf32>
    %460 = arith.addf %454, %459 : vector<6x896xf32>
    %c1_337 = arith.constant 1 : index
    %c132_338 = arith.constant 132 : index
    %461 = vector.load %arg1[%c1_337, %c132_338] : memref<2x1152xf32, #tpu.memory_space<vmem>>, vector<1x896xf32>
    %c0_339 = arith.constant 0 : index
    %c24_340 = arith.constant 24 : index
    %462 = vector.load %arg2[%c0_339, %c24_340] : memref<6x25xf32, #tpu.memory_space<vmem>>, vector<6x1xf32>
    %463 = vector.broadcast %462 : vector<6x1xf32> to vector<6x896xf32>
    %464 = vector.broadcast %461 : vector<1x896xf32> to vector<6x896xf32>
    %465 = arith.mulf %463, %464 : vector<6x896xf32>
    %466 = arith.addf %460, %465 : vector<6x896xf32>
    %c0_341 = arith.constant 0 : index
    %c0_342 = arith.constant 0 : index
    %467 = vector.load %arg3[%c0_341, %c0_342] : memref<6x1xf32, #tpu.memory_space<vmem>>, vector<6x1xf32>
    %468 = vector.broadcast %467 : vector<6x1xf32> to vector<6x896xf32>
    %469 = arith.addf %466, %468 : vector<6x896xf32>
    %cst_343 = arith.constant 0.000000e+00 : f32
    %470 = vector.broadcast %cst_343 : f32 to vector<6x896xf32>
    %471 = arith.maximumf %469, %470 : vector<6x896xf32>
    %c0_344 = arith.constant 0 : index
    %c0_345 = arith.constant 0 : index
    %472 = vector.load %arg15[%c0_344, %c0_345] : memref<6x896xf32, #tpu.memory_space<vmem>>, vector<6x896xf32>
    tpu.vector_store %arg15[%c0_344, %c0_345], %471 {strides = array<i32>} : memref<6x896xf32, #tpu.memory_space<vmem>>, vector<6x896xf32>,
    %c0_346 = arith.constant 0 : index
    %c0_347 = arith.constant 0 : index
    %473 = vector.load %arg15[%c0_346, %c0_347] : memref<6x896xf32, #tpu.memory_space<vmem>>, vector<6x863xf32>
    %c0_348 = arith.constant 0 : index
    %c1_349 = arith.constant 1 : index
    %474 = vector.load %arg15[%c0_348, %c1_349] : memref<6x896xf32, #tpu.memory_space<vmem>>, vector<6x863xf32>
    %475 = arith.maximumf %473, %474 : vector<6x863xf32>
    %c0_350 = arith.constant 0 : index
    %c32_351 = arith.constant 32 : index
    %476 = vector.load %arg15[%c0_350, %c32_351] : memref<6x896xf32, #tpu.memory_space<vmem>>, vector<6x863xf32>
    %c0_352 = arith.constant 0 : index
    %c33_353 = arith.constant 33 : index
    %477 = vector.load %arg15[%c0_352, %c33_353] : memref<6x896xf32, #tpu.memory_space<vmem>>, vector<6x863xf32>
    %478 = arith.maximumf %476, %477 : vector<6x863xf32>
    %479 = arith.maximumf %475, %478 : vector<6x863xf32>
    %c0_354 = arith.constant 0 : index
    %c0_355 = arith.constant 0 : index
    %480 = vector.load %arg4[%c0_354, %c0_355] : memref<863x256xf32, #tpu.memory_space<vmem>>, vector<863x256xf32>
    %cst_356 = arith.constant dense<0.000000e+00> : vector<6x256xf32>
    %481 = tpu.matmul %479, %480, %cst_356 {dimension_numbers = #tpu.dot_dimension_numbers<[1], [0], [0], [1], [0, 0, 1, 1], [], []>} : vector<6x863xf32>, vector<863x256xf32>, vector<6x256xf32> -> vector<6x256xf32>
    %c0_357 = arith.constant 0 : index
    %c0_358 = arith.constant 0 : index
    %482 = vector.load %arg16[%c0_357, %c0_358] : memref<6x256xf32, #tpu.memory_space<vmem>>, vector<6x256xf32>
    tpu.vector_store %arg16[%c0_357, %c0_358], %481 {strides = array<i32>} : memref<6x256xf32, #tpu.memory_space<vmem>>, vector<6x256xf32>,
    %cst_359 = arith.constant 0.000000e+00 : f32
    %483 = vector.broadcast %cst_359 : f32 to vector<16x140xf32>
    %c0_360 = arith.constant 0 : index
    %c0_361 = arith.constant 0 : index
    %484 = vector.load %arg5[%c0_360, %c0_361] : memref<16x150xf32, #tpu.memory_space<vmem>>, vector<16x6xf32>
    %c0_362 = arith.constant 0 : index
    %c0_363 = arith.constant 0 : index
    %485 = vector.load %arg16[%c0_362, %c0_363] : memref<6x256xf32, #tpu.memory_space<vmem>>, vector<6x140xf32>
    %cst_364 = arith.constant dense<0.000000e+00> : vector<16x140xf32>
    %486 = tpu.matmul %484, %485, %cst_364 {dimension_numbers = #tpu.dot_dimension_numbers<[1], [0], [0], [1], [0, 0, 1, 1], [], []>} : vector<16x6xf32>, vector<6x140xf32>, vector<16x140xf32> -> vector<16x140xf32>
    %487 = arith.addf %483, %486 : vector<16x140xf32>
    %c0_365 = arith.constant 0 : index
    %c6_366 = arith.constant 6 : index
    %488 = vector.load %arg5[%c0_365, %c6_366] : memref<16x150xf32, #tpu.memory_space<vmem>>, vector<16x6xf32>
    %c0_367 = arith.constant 0 : index
    %c1_368 = arith.constant 1 : index
    %489 = vector.load %arg16[%c0_367, %c1_368] : memref<6x256xf32, #tpu.memory_space<vmem>>, vector<6x140xf32>
    %cst_369 = arith.constant dense<0.000000e+00> : vector<16x140xf32>
    %490 = tpu.matmul %488, %489, %cst_369 {dimension_numbers = #tpu.dot_dimension_numbers<[1], [0], [0], [1], [0, 0, 1, 1], [], []>} : vector<16x6xf32>, vector<6x140xf32>, vector<16x140xf32> -> vector<16x140xf32>
    %491 = arith.addf %487, %490 : vector<16x140xf32>
    %c0_370 = arith.constant 0 : index
    %c12_371 = arith.constant 12 : index
    %492 = vector.load %arg5[%c0_370, %c12_371] : memref<16x150xf32, #tpu.memory_space<vmem>>, vector<16x6xf32>
    %c0_372 = arith.constant 0 : index
    %c2_373 = arith.constant 2 : index
    %493 = vector.load %arg16[%c0_372, %c2_373] : memref<6x256xf32, #tpu.memory_space<vmem>>, vector<6x140xf32>
    %cst_374 = arith.constant dense<0.000000e+00> : vector<16x140xf32>
    %494 = tpu.matmul %492, %493, %cst_374 {dimension_numbers = #tpu.dot_dimension_numbers<[1], [0], [0], [1], [0, 0, 1, 1], [], []>} : vector<16x6xf32>, vector<6x140xf32>, vector<16x140xf32> -> vector<16x140xf32>
    %495 = arith.addf %491, %494 : vector<16x140xf32>
    %c0_375 = arith.constant 0 : index
    %c18_376 = arith.constant 18 : index
    %496 = vector.load %arg5[%c0_375, %c18_376] : memref<16x150xf32, #tpu.memory_space<vmem>>, vector<16x6xf32>
    %c0_377 = arith.constant 0 : index
    %c3_378 = arith.constant 3 : index
    %497 = vector.load %arg16[%c0_377, %c3_378] : memref<6x256xf32, #tpu.memory_space<vmem>>, vector<6x140xf32>
    %cst_379 = arith.constant dense<0.000000e+00> : vector<16x140xf32>
    %498 = tpu.matmul %496, %497, %cst_379 {dimension_numbers = #tpu.dot_dimension_numbers<[1], [0], [0], [1], [0, 0, 1, 1], [], []>} : vector<16x6xf32>, vector<6x140xf32>, vector<16x140xf32> -> vector<16x140xf32>
    %499 = arith.addf %495, %498 : vector<16x140xf32>
    %c0_380 = arith.constant 0 : index
    %c24_381 = arith.constant 24 : index
    %500 = vector.load %arg5[%c0_380, %c24_381] : memref<16x150xf32, #tpu.memory_space<vmem>>, vector<16x6xf32>
    %c0_382 = arith.constant 0 : index
    %c4_383 = arith.constant 4 : index
    %501 = vector.load %arg16[%c0_382, %c4_383] : memref<6x256xf32, #tpu.memory_space<vmem>>, vector<6x140xf32>
    %cst_384 = arith.constant dense<0.000000e+00> : vector<16x140xf32>
    %502 = tpu.matmul %500, %501, %cst_384 {dimension_numbers = #tpu.dot_dimension_numbers<[1], [0], [0], [1], [0, 0, 1, 1], [], []>} : vector<16x6xf32>, vector<6x140xf32>, vector<16x140xf32> -> vector<16x140xf32>
    %503 = arith.addf %499, %502 : vector<16x140xf32>
    %c0_385 = arith.constant 0 : index
    %c30_386 = arith.constant 30 : index
    %504 = vector.load %arg5[%c0_385, %c30_386] : memref<16x150xf32, #tpu.memory_space<vmem>>, vector<16x6xf32>
    %c0_387 = arith.constant 0 : index
    %c14_388 = arith.constant 14 : index
    %505 = vector.load %arg16[%c0_387, %c14_388] : memref<6x256xf32, #tpu.memory_space<vmem>>, vector<6x140xf32>
    %cst_389 = arith.constant dense<0.000000e+00> : vector<16x140xf32>
    %506 = tpu.matmul %504, %505, %cst_389 {dimension_numbers = #tpu.dot_dimension_numbers<[1], [0], [0], [1], [0, 0, 1, 1], [], []>} : vector<16x6xf32>, vector<6x140xf32>, vector<16x140xf32> -> vector<16x140xf32>
    %507 = arith.addf %503, %506 : vector<16x140xf32>
    %c0_390 = arith.constant 0 : index
    %c36_391 = arith.constant 36 : index
    %508 = vector.load %arg5[%c0_390, %c36_391] : memref<16x150xf32, #tpu.memory_space<vmem>>, vector<16x6xf32>
    %c0_392 = arith.constant 0 : index
    %c15_393 = arith.constant 15 : index
    %509 = vector.load %arg16[%c0_392, %c15_393] : memref<6x256xf32, #tpu.memory_space<vmem>>, vector<6x140xf32>
    %cst_394 = arith.constant dense<0.000000e+00> : vector<16x140xf32>
    %510 = tpu.matmul %508, %509, %cst_394 {dimension_numbers = #tpu.dot_dimension_numbers<[1], [0], [0], [1], [0, 0, 1, 1], [], []>} : vector<16x6xf32>, vector<6x140xf32>, vector<16x140xf32> -> vector<16x140xf32>
    %511 = arith.addf %507, %510 : vector<16x140xf32>
    %c0_395 = arith.constant 0 : index
    %c42_396 = arith.constant 42 : index
    %512 = vector.load %arg5[%c0_395, %c42_396] : memref<16x150xf32, #tpu.memory_space<vmem>>, vector<16x6xf32>
    %c0_397 = arith.constant 0 : index
    %c16_398 = arith.constant 16 : index
    %513 = vector.load %arg16[%c0_397, %c16_398] : memref<6x256xf32, #tpu.memory_space<vmem>>, vector<6x140xf32>
    %cst_399 = arith.constant dense<0.000000e+00> : vector<16x140xf32>
    %514 = tpu.matmul %512, %513, %cst_399 {dimension_numbers = #tpu.dot_dimension_numbers<[1], [0], [0], [1], [0, 0, 1, 1], [], []>} : vector<16x6xf32>, vector<6x140xf32>, vector<16x140xf32> -> vector<16x140xf32>
    %515 = arith.addf %511, %514 : vector<16x140xf32>
    %c0_400 = arith.constant 0 : index
    %c48_401 = arith.constant 48 : index
    %516 = vector.load %arg5[%c0_400, %c48_401] : memref<16x150xf32, #tpu.memory_space<vmem>>, vector<16x6xf32>
    %c0_402 = arith.constant 0 : index
    %c17_403 = arith.constant 17 : index
    %517 = vector.load %arg16[%c0_402, %c17_403] : memref<6x256xf32, #tpu.memory_space<vmem>>, vector<6x140xf32>
    %cst_404 = arith.constant dense<0.000000e+00> : vector<16x140xf32>
    %518 = tpu.matmul %516, %517, %cst_404 {dimension_numbers = #tpu.dot_dimension_numbers<[1], [0], [0], [1], [0, 0, 1, 1], [], []>} : vector<16x6xf32>, vector<6x140xf32>, vector<16x140xf32> -> vector<16x140xf32>
    %519 = arith.addf %515, %518 : vector<16x140xf32>
    %c0_405 = arith.constant 0 : index
    %c54_406 = arith.constant 54 : index
    %520 = vector.load %arg5[%c0_405, %c54_406] : memref<16x150xf32, #tpu.memory_space<vmem>>, vector<16x6xf32>
    %c0_407 = arith.constant 0 : index
    %c18_408 = arith.constant 18 : index
    %521 = vector.load %arg16[%c0_407, %c18_408] : memref<6x256xf32, #tpu.memory_space<vmem>>, vector<6x140xf32>
    %cst_409 = arith.constant dense<0.000000e+00> : vector<16x140xf32>
    %522 = tpu.matmul %520, %521, %cst_409 {dimension_numbers = #tpu.dot_dimension_numbers<[1], [0], [0], [1], [0, 0, 1, 1], [], []>} : vector<16x6xf32>, vector<6x140xf32>, vector<16x140xf32> -> vector<16x140xf32>
    %523 = arith.addf %519, %522 : vector<16x140xf32>
    %c0_410 = arith.constant 0 : index
    %c60_411 = arith.constant 60 : index
    %524 = vector.load %arg5[%c0_410, %c60_411] : memref<16x150xf32, #tpu.memory_space<vmem>>, vector<16x6xf32>
    %c0_412 = arith.constant 0 : index
    %c28_413 = arith.constant 28 : index
    %525 = vector.load %arg16[%c0_412, %c28_413] : memref<6x256xf32, #tpu.memory_space<vmem>>, vector<6x140xf32>
    %cst_414 = arith.constant dense<0.000000e+00> : vector<16x140xf32>
    %526 = tpu.matmul %524, %525, %cst_414 {dimension_numbers = #tpu.dot_dimension_numbers<[1], [0], [0], [1], [0, 0, 1, 1], [], []>} : vector<16x6xf32>, vector<6x140xf32>, vector<16x140xf32> -> vector<16x140xf32>
    %527 = arith.addf %523, %526 : vector<16x140xf32>
    %c0_415 = arith.constant 0 : index
    %c66_416 = arith.constant 66 : index
    %528 = vector.load %arg5[%c0_415, %c66_416] : memref<16x150xf32, #tpu.memory_space<vmem>>, vector<16x6xf32>
    %c0_417 = arith.constant 0 : index
    %c29_418 = arith.constant 29 : index
    %529 = vector.load %arg16[%c0_417, %c29_418] : memref<6x256xf32, #tpu.memory_space<vmem>>, vector<6x140xf32>
    %cst_419 = arith.constant dense<0.000000e+00> : vector<16x140xf32>
    %530 = tpu.matmul %528, %529, %cst_419 {dimension_numbers = #tpu.dot_dimension_numbers<[1], [0], [0], [1], [0, 0, 1, 1], [], []>} : vector<16x6xf32>, vector<6x140xf32>, vector<16x140xf32> -> vector<16x140xf32>
    %531 = arith.addf %527, %530 : vector<16x140xf32>
    %c0_420 = arith.constant 0 : index
    %c72_421 = arith.constant 72 : index
    %532 = vector.load %arg5[%c0_420, %c72_421] : memref<16x150xf32, #tpu.memory_space<vmem>>, vector<16x6xf32>
    %c0_422 = arith.constant 0 : index
    %c30_423 = arith.constant 30 : index
    %533 = vector.load %arg16[%c0_422, %c30_423] : memref<6x256xf32, #tpu.memory_space<vmem>>, vector<6x140xf32>
    %cst_424 = arith.constant dense<0.000000e+00> : vector<16x140xf32>
    %534 = tpu.matmul %532, %533, %cst_424 {dimension_numbers = #tpu.dot_dimension_numbers<[1], [0], [0], [1], [0, 0, 1, 1], [], []>} : vector<16x6xf32>, vector<6x140xf32>, vector<16x140xf32> -> vector<16x140xf32>
    %535 = arith.addf %531, %534 : vector<16x140xf32>
    %c0_425 = arith.constant 0 : index
    %c78_426 = arith.constant 78 : index
    %536 = vector.load %arg5[%c0_425, %c78_426] : memref<16x150xf32, #tpu.memory_space<vmem>>, vector<16x6xf32>
    %c0_427 = arith.constant 0 : index
    %c31_428 = arith.constant 31 : index
    %537 = vector.load %arg16[%c0_427, %c31_428] : memref<6x256xf32, #tpu.memory_space<vmem>>, vector<6x140xf32>
    %cst_429 = arith.constant dense<0.000000e+00> : vector<16x140xf32>
    %538 = tpu.matmul %536, %537, %cst_429 {dimension_numbers = #tpu.dot_dimension_numbers<[1], [0], [0], [1], [0, 0, 1, 1], [], []>} : vector<16x6xf32>, vector<6x140xf32>, vector<16x140xf32> -> vector<16x140xf32>
    %539 = arith.addf %535, %538 : vector<16x140xf32>
    %c0_430 = arith.constant 0 : index
    %c84_431 = arith.constant 84 : index
    %540 = vector.load %arg5[%c0_430, %c84_431] : memref<16x150xf32, #tpu.memory_space<vmem>>, vector<16x6xf32>
    %c0_432 = arith.constant 0 : index
    %c32_433 = arith.constant 32 : index
    %541 = vector.load %arg16[%c0_432, %c32_433] : memref<6x256xf32, #tpu.memory_space<vmem>>, vector<6x140xf32>
    %cst_434 = arith.constant dense<0.000000e+00> : vector<16x140xf32>
    %542 = tpu.matmul %540, %541, %cst_434 {dimension_numbers = #tpu.dot_dimension_numbers<[1], [0], [0], [1], [0, 0, 1, 1], [], []>} : vector<16x6xf32>, vector<6x140xf32>, vector<16x140xf32> -> vector<16x140xf32>
    %543 = arith.addf %539, %542 : vector<16x140xf32>
    %c0_435 = arith.constant 0 : index
    %c90_436 = arith.constant 90 : index
    %544 = vector.load %arg5[%c0_435, %c90_436] : memref<16x150xf32, #tpu.memory_space<vmem>>, vector<16x6xf32>
    %c0_437 = arith.constant 0 : index
    %c42_438 = arith.constant 42 : index
    %545 = vector.load %arg16[%c0_437, %c42_438] : memref<6x256xf32, #tpu.memory_space<vmem>>, vector<6x140xf32>
    %cst_439 = arith.constant dense<0.000000e+00> : vector<16x140xf32>
    %546 = tpu.matmul %544, %545, %cst_439 {dimension_numbers = #tpu.dot_dimension_numbers<[1], [0], [0], [1], [0, 0, 1, 1], [], []>} : vector<16x6xf32>, vector<6x140xf32>, vector<16x140xf32> -> vector<16x140xf32>
    %547 = arith.addf %543, %546 : vector<16x140xf32>
    %c0_440 = arith.constant 0 : index
    %c96_441 = arith.constant 96 : index
    %548 = vector.load %arg5[%c0_440, %c96_441] : memref<16x150xf32, #tpu.memory_space<vmem>>, vector<16x6xf32>
    %c0_442 = arith.constant 0 : index
    %c43_443 = arith.constant 43 : index
    %549 = vector.load %arg16[%c0_442, %c43_443] : memref<6x256xf32, #tpu.memory_space<vmem>>, vector<6x140xf32>
    %cst_444 = arith.constant dense<0.000000e+00> : vector<16x140xf32>
    %550 = tpu.matmul %548, %549, %cst_444 {dimension_numbers = #tpu.dot_dimension_numbers<[1], [0], [0], [1], [0, 0, 1, 1], [], []>} : vector<16x6xf32>, vector<6x140xf32>, vector<16x140xf32> -> vector<16x140xf32>
    %551 = arith.addf %547, %550 : vector<16x140xf32>
    %c0_445 = arith.constant 0 : index
    %c102_446 = arith.constant 102 : index
    %552 = vector.load %arg5[%c0_445, %c102_446] : memref<16x150xf32, #tpu.memory_space<vmem>>, vector<16x6xf32>
    %c0_447 = arith.constant 0 : index
    %c44_448 = arith.constant 44 : index
    %553 = vector.load %arg16[%c0_447, %c44_448] : memref<6x256xf32, #tpu.memory_space<vmem>>, vector<6x140xf32>
    %cst_449 = arith.constant dense<0.000000e+00> : vector<16x140xf32>
    %554 = tpu.matmul %552, %553, %cst_449 {dimension_numbers = #tpu.dot_dimension_numbers<[1], [0], [0], [1], [0, 0, 1, 1], [], []>} : vector<16x6xf32>, vector<6x140xf32>, vector<16x140xf32> -> vector<16x140xf32>
    %555 = arith.addf %551, %554 : vector<16x140xf32>
    %c0_450 = arith.constant 0 : index
    %c108_451 = arith.constant 108 : index
    %556 = vector.load %arg5[%c0_450, %c108_451] : memref<16x150xf32, #tpu.memory_space<vmem>>, vector<16x6xf32>
    %c0_452 = arith.constant 0 : index
    %c45_453 = arith.constant 45 : index
    %557 = vector.load %arg16[%c0_452, %c45_453] : memref<6x256xf32, #tpu.memory_space<vmem>>, vector<6x140xf32>
    %cst_454 = arith.constant dense<0.000000e+00> : vector<16x140xf32>
    %558 = tpu.matmul %556, %557, %cst_454 {dimension_numbers = #tpu.dot_dimension_numbers<[1], [0], [0], [1], [0, 0, 1, 1], [], []>} : vector<16x6xf32>, vector<6x140xf32>, vector<16x140xf32> -> vector<16x140xf32>
    %559 = arith.addf %555, %558 : vector<16x140xf32>
    %c0_455 = arith.constant 0 : index
    %c114_456 = arith.constant 114 : index
    %560 = vector.load %arg5[%c0_455, %c114_456] : memref<16x150xf32, #tpu.memory_space<vmem>>, vector<16x6xf32>
    %c0_457 = arith.constant 0 : index
    %c46_458 = arith.constant 46 : index
    %561 = vector.load %arg16[%c0_457, %c46_458] : memref<6x256xf32, #tpu.memory_space<vmem>>, vector<6x140xf32>
    %cst_459 = arith.constant dense<0.000000e+00> : vector<16x140xf32>
    %562 = tpu.matmul %560, %561, %cst_459 {dimension_numbers = #tpu.dot_dimension_numbers<[1], [0], [0], [1], [0, 0, 1, 1], [], []>} : vector<16x6xf32>, vector<6x140xf32>, vector<16x140xf32> -> vector<16x140xf32>
    %563 = arith.addf %559, %562 : vector<16x140xf32>
    %c0_460 = arith.constant 0 : index
    %c120_461 = arith.constant 120 : index
    %564 = vector.load %arg5[%c0_460, %c120_461] : memref<16x150xf32, #tpu.memory_space<vmem>>, vector<16x6xf32>
    %c0_462 = arith.constant 0 : index
    %c56_463 = arith.constant 56 : index
    %565 = vector.load %arg16[%c0_462, %c56_463] : memref<6x256xf32, #tpu.memory_space<vmem>>, vector<6x140xf32>
    %cst_464 = arith.constant dense<0.000000e+00> : vector<16x140xf32>
    %566 = tpu.matmul %564, %565, %cst_464 {dimension_numbers = #tpu.dot_dimension_numbers<[1], [0], [0], [1], [0, 0, 1, 1], [], []>} : vector<16x6xf32>, vector<6x140xf32>, vector<16x140xf32> -> vector<16x140xf32>
    %567 = arith.addf %563, %566 : vector<16x140xf32>
    %c0_465 = arith.constant 0 : index
    %c126_466 = arith.constant 126 : index
    %568 = vector.load %arg5[%c0_465, %c126_466] : memref<16x150xf32, #tpu.memory_space<vmem>>, vector<16x6xf32>
    %c0_467 = arith.constant 0 : index
    %c57_468 = arith.constant 57 : index
    %569 = vector.load %arg16[%c0_467, %c57_468] : memref<6x256xf32, #tpu.memory_space<vmem>>, vector<6x140xf32>
    %cst_469 = arith.constant dense<0.000000e+00> : vector<16x140xf32>
    %570 = tpu.matmul %568, %569, %cst_469 {dimension_numbers = #tpu.dot_dimension_numbers<[1], [0], [0], [1], [0, 0, 1, 1], [], []>} : vector<16x6xf32>, vector<6x140xf32>, vector<16x140xf32> -> vector<16x140xf32>
    %571 = arith.addf %567, %570 : vector<16x140xf32>
    %c0_470 = arith.constant 0 : index
    %c132_471 = arith.constant 132 : index
    %572 = vector.load %arg5[%c0_470, %c132_471] : memref<16x150xf32, #tpu.memory_space<vmem>>, vector<16x6xf32>
    %c0_472 = arith.constant 0 : index
    %c58_473 = arith.constant 58 : index
    %573 = vector.load %arg16[%c0_472, %c58_473] : memref<6x256xf32, #tpu.memory_space<vmem>>, vector<6x140xf32>
    %cst_474 = arith.constant dense<0.000000e+00> : vector<16x140xf32>
    %574 = tpu.matmul %572, %573, %cst_474 {dimension_numbers = #tpu.dot_dimension_numbers<[1], [0], [0], [1], [0, 0, 1, 1], [], []>} : vector<16x6xf32>, vector<6x140xf32>, vector<16x140xf32> -> vector<16x140xf32>
    %575 = arith.addf %571, %574 : vector<16x140xf32>
    %c0_475 = arith.constant 0 : index
    %c138_476 = arith.constant 138 : index
    %576 = vector.load %arg5[%c0_475, %c138_476] : memref<16x150xf32, #tpu.memory_space<vmem>>, vector<16x6xf32>
    %c0_477 = arith.constant 0 : index
    %c59_478 = arith.constant 59 : index
    %577 = vector.load %arg16[%c0_477, %c59_478] : memref<6x256xf32, #tpu.memory_space<vmem>>, vector<6x140xf32>
    %cst_479 = arith.constant dense<0.000000e+00> : vector<16x140xf32>
    %578 = tpu.matmul %576, %577, %cst_479 {dimension_numbers = #tpu.dot_dimension_numbers<[1], [0], [0], [1], [0, 0, 1, 1], [], []>} : vector<16x6xf32>, vector<6x140xf32>, vector<16x140xf32> -> vector<16x140xf32>
    %579 = arith.addf %575, %578 : vector<16x140xf32>
    %c0_480 = arith.constant 0 : index
    %c144_481 = arith.constant 144 : index
    %580 = vector.load %arg5[%c0_480, %c144_481] : memref<16x150xf32, #tpu.memory_space<vmem>>, vector<16x6xf32>
    %c0_482 = arith.constant 0 : index
    %c60_483 = arith.constant 60 : index
    %581 = vector.load %arg16[%c0_482, %c60_483] : memref<6x256xf32, #tpu.memory_space<vmem>>, vector<6x140xf32>
    %cst_484 = arith.constant dense<0.000000e+00> : vector<16x140xf32>
    %582 = tpu.matmul %580, %581, %cst_484 {dimension_numbers = #tpu.dot_dimension_numbers<[1], [0], [0], [1], [0, 0, 1, 1], [], []>} : vector<16x6xf32>, vector<6x140xf32>, vector<16x140xf32> -> vector<16x140xf32>
    %583 = arith.addf %579, %582 : vector<16x140xf32>
    %c0_485 = arith.constant 0 : index
    %c0_486 = arith.constant 0 : index
    %584 = vector.load %arg6[%c0_485, %c0_486] : memref<16x1xf32, #tpu.memory_space<vmem>>, vector<16x1xf32>
    %585 = vector.broadcast %584 : vector<16x1xf32> to vector<16x140xf32>
    %586 = arith.addf %583, %585 : vector<16x140xf32>
    %cst_487 = arith.constant 0.000000e+00 : f32
    %587 = vector.broadcast %cst_487 : f32 to vector<16x140xf32>
    %588 = arith.maximumf %586, %587 : vector<16x140xf32>
    %c0_488 = arith.constant 0 : index
    %c0_489 = arith.constant 0 : index
    %589 = vector.load %arg17[%c0_488, %c0_489] : memref<16x140xf32, #tpu.memory_space<vmem>>, vector<16x140xf32>
    tpu.vector_store %arg17[%c0_488, %c0_489], %588 {strides = array<i32>} : memref<16x140xf32, #tpu.memory_space<vmem>>, vector<16x140xf32>,
    %c0_490 = arith.constant 0 : index
    %c0_491 = arith.constant 0 : index
    %590 = vector.load %arg17[%c0_490, %c0_491] : memref<16x140xf32, #tpu.memory_space<vmem>>, vector<16x121xf32>
    %c0_492 = arith.constant 0 : index
    %c1_493 = arith.constant 1 : index
    %591 = vector.load %arg17[%c0_492, %c1_493] : memref<16x140xf32, #tpu.memory_space<vmem>>, vector<16x121xf32>
    %592 = arith.maximumf %590, %591 : vector<16x121xf32>
    %c0_494 = arith.constant 0 : index
    %c14_495 = arith.constant 14 : index
    %593 = vector.load %arg17[%c0_494, %c14_495] : memref<16x140xf32, #tpu.memory_space<vmem>>, vector<16x121xf32>
    %c0_496 = arith.constant 0 : index
    %c15_497 = arith.constant 15 : index
    %594 = vector.load %arg17[%c0_496, %c15_497] : memref<16x140xf32, #tpu.memory_space<vmem>>, vector<16x121xf32>
    %595 = arith.maximumf %593, %594 : vector<16x121xf32>
    %596 = arith.maximumf %592, %595 : vector<16x121xf32>
    %c0_498 = arith.constant 0 : index
    %c0_499 = arith.constant 0 : index
    %597 = vector.load %arg7[%c0_498, %c0_499] : memref<121x25xf32, #tpu.memory_space<vmem>>, vector<121x25xf32>
    %cst_500 = arith.constant dense<0.000000e+00> : vector<16x25xf32>
    %598 = tpu.matmul %596, %597, %cst_500 {dimension_numbers = #tpu.dot_dimension_numbers<[1], [0], [0], [1], [0, 0, 1, 1], [], []>} : vector<16x121xf32>, vector<121x25xf32>, vector<16x25xf32> -> vector<16x25xf32>
    %c0_501 = arith.constant 0 : index
    %c0_502 = arith.constant 0 : index
    %599 = vector.load %arg18[%c0_501, %c0_502] : memref<16x25xf32, #tpu.memory_space<vmem>>, vector<16x25xf32>
    tpu.vector_store %arg18[%c0_501, %c0_502], %598 {strides = array<i32>} : memref<16x25xf32, #tpu.memory_space<vmem>>, vector<16x25xf32>,
    %c0_503 = arith.constant 0 : index
    %c0_504 = arith.constant 0 : index
    %600 = vector.load %arg18[%c0_503, %c0_504] : memref<16x25xf32, #tpu.memory_space<vmem>>, vector<1x25xf32>
    %c1_505 = arith.constant 1 : index
    %c0_506 = arith.constant 0 : index
    %601 = vector.load %arg19[%c1_505, %c0_506] : memref<2x400xf32, #tpu.memory_space<vmem>>, vector<1x25xf32>
    tpu.vector_store %arg19[%c1_505, %c0_506], %600 {strides = array<i32>} : memref<2x400xf32, #tpu.memory_space<vmem>>, vector<1x25xf32>,
    %c1_507 = arith.constant 1 : index
    %c0_508 = arith.constant 0 : index
    %602 = vector.load %arg18[%c1_507, %c0_508] : memref<16x25xf32, #tpu.memory_space<vmem>>, vector<1x25xf32>
    %c1_509 = arith.constant 1 : index
    %c25_510 = arith.constant 25 : index
    %603 = vector.load %arg19[%c1_509, %c25_510] : memref<2x400xf32, #tpu.memory_space<vmem>>, vector<1x25xf32>
    tpu.vector_store %arg19[%c1_509, %c25_510], %602 {strides = array<i32>} : memref<2x400xf32, #tpu.memory_space<vmem>>, vector<1x25xf32>,
    %c2_511 = arith.constant 2 : index
    %c0_512 = arith.constant 0 : index
    %604 = vector.load %arg18[%c2_511, %c0_512] : memref<16x25xf32, #tpu.memory_space<vmem>>, vector<1x25xf32>
    %c1_513 = arith.constant 1 : index
    %c50_514 = arith.constant 50 : index
    %605 = vector.load %arg19[%c1_513, %c50_514] : memref<2x400xf32, #tpu.memory_space<vmem>>, vector<1x25xf32>
    tpu.vector_store %arg19[%c1_513, %c50_514], %604 {strides = array<i32>} : memref<2x400xf32, #tpu.memory_space<vmem>>, vector<1x25xf32>,
    %c3_515 = arith.constant 3 : index
    %c0_516 = arith.constant 0 : index
    %606 = vector.load %arg18[%c3_515, %c0_516] : memref<16x25xf32, #tpu.memory_space<vmem>>, vector<1x25xf32>
    %c1_517 = arith.constant 1 : index
    %c75_518 = arith.constant 75 : index
    %607 = vector.load %arg19[%c1_517, %c75_518] : memref<2x400xf32, #tpu.memory_space<vmem>>, vector<1x25xf32>
    tpu.vector_store %arg19[%c1_517, %c75_518], %606 {strides = array<i32>} : memref<2x400xf32, #tpu.memory_space<vmem>>, vector<1x25xf32>,
    %c4_519 = arith.constant 4 : index
    %c0_520 = arith.constant 0 : index
    %608 = vector.load %arg18[%c4_519, %c0_520] : memref<16x25xf32, #tpu.memory_space<vmem>>, vector<1x25xf32>
    %c1_521 = arith.constant 1 : index
    %c100_522 = arith.constant 100 : index
    %609 = vector.load %arg19[%c1_521, %c100_522] : memref<2x400xf32, #tpu.memory_space<vmem>>, vector<1x25xf32>
    tpu.vector_store %arg19[%c1_521, %c100_522], %608 {strides = array<i32>} : memref<2x400xf32, #tpu.memory_space<vmem>>, vector<1x25xf32>,
    %c5_523 = arith.constant 5 : index
    %c0_524 = arith.constant 0 : index
    %610 = vector.load %arg18[%c5_523, %c0_524] : memref<16x25xf32, #tpu.memory_space<vmem>>, vector<1x25xf32>
    %c1_525 = arith.constant 1 : index
    %c125_526 = arith.constant 125 : index
    %611 = vector.load %arg19[%c1_525, %c125_526] : memref<2x400xf32, #tpu.memory_space<vmem>>, vector<1x25xf32>
    tpu.vector_store %arg19[%c1_525, %c125_526], %610 {strides = array<i32>} : memref<2x400xf32, #tpu.memory_space<vmem>>, vector<1x25xf32>,
    %c6_527 = arith.constant 6 : index
    %c0_528 = arith.constant 0 : index
    %612 = vector.load %arg18[%c6_527, %c0_528] : memref<16x25xf32, #tpu.memory_space<vmem>>, vector<1x25xf32>
    %c1_529 = arith.constant 1 : index
    %c150_530 = arith.constant 150 : index
    %613 = vector.load %arg19[%c1_529, %c150_530] : memref<2x400xf32, #tpu.memory_space<vmem>>, vector<1x25xf32>
    tpu.vector_store %arg19[%c1_529, %c150_530], %612 {strides = array<i32>} : memref<2x400xf32, #tpu.memory_space<vmem>>, vector<1x25xf32>,
    %c7_531 = arith.constant 7 : index
    %c0_532 = arith.constant 0 : index
    %614 = vector.load %arg18[%c7_531, %c0_532] : memref<16x25xf32, #tpu.memory_space<vmem>>, vector<1x25xf32>
    %c1_533 = arith.constant 1 : index
    %c175_534 = arith.constant 175 : index
    %615 = vector.load %arg19[%c1_533, %c175_534] : memref<2x400xf32, #tpu.memory_space<vmem>>, vector<1x25xf32>
    tpu.vector_store %arg19[%c1_533, %c175_534], %614 {strides = array<i32>} : memref<2x400xf32, #tpu.memory_space<vmem>>, vector<1x25xf32>,
    %c8_535 = arith.constant 8 : index
    %c0_536 = arith.constant 0 : index
    %616 = vector.load %arg18[%c8_535, %c0_536] : memref<16x25xf32, #tpu.memory_space<vmem>>, vector<1x25xf32>
    %c1_537 = arith.constant 1 : index
    %c200_538 = arith.constant 200 : index
    %617 = vector.load %arg19[%c1_537, %c200_538] : memref<2x400xf32, #tpu.memory_space<vmem>>, vector<1x25xf32>
    tpu.vector_store %arg19[%c1_537, %c200_538], %616 {strides = array<i32>} : memref<2x400xf32, #tpu.memory_space<vmem>>, vector<1x25xf32>,
    %c9_539 = arith.constant 9 : index
    %c0_540 = arith.constant 0 : index
    %618 = vector.load %arg18[%c9_539, %c0_540] : memref<16x25xf32, #tpu.memory_space<vmem>>, vector<1x25xf32>
    %c1_541 = arith.constant 1 : index
    %c225_542 = arith.constant 225 : index
    %619 = vector.load %arg19[%c1_541, %c225_542] : memref<2x400xf32, #tpu.memory_space<vmem>>, vector<1x25xf32>
    tpu.vector_store %arg19[%c1_541, %c225_542], %618 {strides = array<i32>} : memref<2x400xf32, #tpu.memory_space<vmem>>, vector<1x25xf32>,
    %c10_543 = arith.constant 10 : index
    %c0_544 = arith.constant 0 : index
    %620 = vector.load %arg18[%c10_543, %c0_544] : memref<16x25xf32, #tpu.memory_space<vmem>>, vector<1x25xf32>
    %c1_545 = arith.constant 1 : index
    %c250_546 = arith.constant 250 : index
    %621 = vector.load %arg19[%c1_545, %c250_546] : memref<2x400xf32, #tpu.memory_space<vmem>>, vector<1x25xf32>
    tpu.vector_store %arg19[%c1_545, %c250_546], %620 {strides = array<i32>} : memref<2x400xf32, #tpu.memory_space<vmem>>, vector<1x25xf32>,
    %c11_547 = arith.constant 11 : index
    %c0_548 = arith.constant 0 : index
    %622 = vector.load %arg18[%c11_547, %c0_548] : memref<16x25xf32, #tpu.memory_space<vmem>>, vector<1x25xf32>
    %c1_549 = arith.constant 1 : index
    %c275_550 = arith.constant 275 : index
    %623 = vector.load %arg19[%c1_549, %c275_550] : memref<2x400xf32, #tpu.memory_space<vmem>>, vector<1x25xf32>
    tpu.vector_store %arg19[%c1_549, %c275_550], %622 {strides = array<i32>} : memref<2x400xf32, #tpu.memory_space<vmem>>, vector<1x25xf32>,
    %c12_551 = arith.constant 12 : index
    %c0_552 = arith.constant 0 : index
    %624 = vector.load %arg18[%c12_551, %c0_552] : memref<16x25xf32, #tpu.memory_space<vmem>>, vector<1x25xf32>
    %c1_553 = arith.constant 1 : index
    %c300_554 = arith.constant 300 : index
    %625 = vector.load %arg19[%c1_553, %c300_554] : memref<2x400xf32, #tpu.memory_space<vmem>>, vector<1x25xf32>
    tpu.vector_store %arg19[%c1_553, %c300_554], %624 {strides = array<i32>} : memref<2x400xf32, #tpu.memory_space<vmem>>, vector<1x25xf32>,
    %c13_555 = arith.constant 13 : index
    %c0_556 = arith.constant 0 : index
    %626 = vector.load %arg18[%c13_555, %c0_556] : memref<16x25xf32, #tpu.memory_space<vmem>>, vector<1x25xf32>
    %c1_557 = arith.constant 1 : index
    %c325_558 = arith.constant 325 : index
    %627 = vector.load %arg19[%c1_557, %c325_558] : memref<2x400xf32, #tpu.memory_space<vmem>>, vector<1x25xf32>
    tpu.vector_store %arg19[%c1_557, %c325_558], %626 {strides = array<i32>} : memref<2x400xf32, #tpu.memory_space<vmem>>, vector<1x25xf32>,
    %c14_559 = arith.constant 14 : index
    %c0_560 = arith.constant 0 : index
    %628 = vector.load %arg18[%c14_559, %c0_560] : memref<16x25xf32, #tpu.memory_space<vmem>>, vector<1x25xf32>
    %c1_561 = arith.constant 1 : index
    %c350_562 = arith.constant 350 : index
    %629 = vector.load %arg19[%c1_561, %c350_562] : memref<2x400xf32, #tpu.memory_space<vmem>>, vector<1x25xf32>
    tpu.vector_store %arg19[%c1_561, %c350_562], %628 {strides = array<i32>} : memref<2x400xf32, #tpu.memory_space<vmem>>, vector<1x25xf32>,
    %c15_563 = arith.constant 15 : index
    %c0_564 = arith.constant 0 : index
    %630 = vector.load %arg18[%c15_563, %c0_564] : memref<16x25xf32, #tpu.memory_space<vmem>>, vector<1x25xf32>
    %c1_565 = arith.constant 1 : index
    %c375_566 = arith.constant 375 : index
    %631 = vector.load %arg19[%c1_565, %c375_566] : memref<2x400xf32, #tpu.memory_space<vmem>>, vector<1x25xf32>
    tpu.vector_store %arg19[%c1_565, %c375_566], %630 {strides = array<i32>} : memref<2x400xf32, #tpu.memory_space<vmem>>, vector<1x25xf32>,
    %c0_567 = arith.constant 0 : index
    %c0_568 = arith.constant 0 : index
    %632 = vector.load %arg19[%c0_567, %c0_568] : memref<2x400xf32, #tpu.memory_space<vmem>>, vector<2x400xf32>
    %c0_569 = arith.constant 0 : index
    %c0_570 = arith.constant 0 : index
    %633 = vector.load %arg8[%c0_569, %c0_570] : memref<400x120xf32, #tpu.memory_space<vmem>>, vector<400x120xf32>
    %cst_571 = arith.constant dense<0.000000e+00> : vector<2x120xf32>
    %634 = tpu.matmul %632, %633, %cst_571 {dimension_numbers = #tpu.dot_dimension_numbers<[1], [0], [0], [1], [0, 0, 1, 1], [], []>} : vector<2x400xf32>, vector<400x120xf32>, vector<2x120xf32> -> vector<2x120xf32>
    %c0_572 = arith.constant 0 : index
    %c0_573 = arith.constant 0 : index
    %635 = vector.load %arg9[%c0_572, %c0_573] : memref<1x120xf32, #tpu.memory_space<vmem>>, vector<1x120xf32>
    %636 = vector.broadcast %635 : vector<1x120xf32> to vector<2x120xf32>
    %637 = arith.addf %634, %636 : vector<2x120xf32>
    %cst_574 = arith.constant 0.000000e+00 : f32
    %638 = vector.broadcast %cst_574 : f32 to vector<2x120xf32>
    %639 = arith.maximumf %637, %638 : vector<2x120xf32>
    %c0_575 = arith.constant 0 : index
    %c0_576 = arith.constant 0 : index
    %640 = vector.load %arg10[%c0_575, %c0_576] : memref<120x84xf32, #tpu.memory_space<vmem>>, vector<120x84xf32>
    %cst_577 = arith.constant dense<0.000000e+00> : vector<2x84xf32>
    %641 = tpu.matmul %639, %640, %cst_577 {dimension_numbers = #tpu.dot_dimension_numbers<[1], [0], [0], [1], [0, 0, 1, 1], [], []>} : vector<2x120xf32>, vector<120x84xf32>, vector<2x84xf32> -> vector<2x84xf32>
    %c0_578 = arith.constant 0 : index
    %c0_579 = arith.constant 0 : index
    %642 = vector.load %arg11[%c0_578, %c0_579] : memref<1x84xf32, #tpu.memory_space<vmem>>, vector<1x84xf32>
    %643 = vector.broadcast %642 : vector<1x84xf32> to vector<2x84xf32>
    %644 = arith.addf %641, %643 : vector<2x84xf32>
    %cst_580 = arith.constant 0.000000e+00 : f32
    %645 = vector.broadcast %cst_580 : f32 to vector<2x84xf32>
    %646 = arith.maximumf %644, %645 : vector<2x84xf32>
    %c0_581 = arith.constant 0 : index
    %c0_582 = arith.constant 0 : index
    %647 = vector.load %arg12[%c0_581, %c0_582] : memref<84x10xf32, #tpu.memory_space<vmem>>, vector<84x10xf32>
    %cst_583 = arith.constant dense<0.000000e+00> : vector<2x10xf32>
    %648 = tpu.matmul %646, %647, %cst_583 {dimension_numbers = #tpu.dot_dimension_numbers<[1], [0], [0], [1], [0, 0, 1, 1], [], []>} : vector<2x84xf32>, vector<84x10xf32>, vector<2x10xf32> -> vector<2x10xf32>
    %c0_584 = arith.constant 0 : index
    %c0_585 = arith.constant 0 : index
    %649 = vector.load %arg13[%c0_584, %c0_585] : memref<1x10xf32, #tpu.memory_space<vmem>>, vector<1x10xf32>
    %650 = vector.broadcast %649 : vector<1x10xf32> to vector<2x10xf32>
    %651 = arith.addf %648, %650 : vector<2x10xf32>
    %c0_586 = arith.constant 0 : index
    %c0_587 = arith.constant 0 : index
    %652 = vector.load %arg14[%c0_586, %c0_587] : memref<2x10xf32, #tpu.memory_space<vmem>>, vector<2x10xf32>
    tpu.vector_store %arg14[%c0_586, %c0_587], %651 {strides = array<i32>} : memref<2x10xf32, #tpu.memory_space<vmem>>, vector<2x10xf32>,
    return
  }
  func.func @transform_0(%arg0: i32) -> (i32, i32) {
    %c0_i32 = arith.constant 0 : i32
    %c0_i32_0 = arith.constant 0 : i32
    %c0_i32_1 = arith.constant 0 : i32
    return %c0_i32, %c0_i32_0 : i32, i32
  }
  func.func @transform_1(%arg0: i32) -> (i32, i32) {
    %c0_i32 = arith.constant 0 : i32
    %c0_i32_0 = arith.constant 0 : i32
    %c0_i32_1 = arith.constant 0 : i32
    return %c0_i32, %c0_i32_0 : i32, i32
  }
  func.func @transform_2(%arg0: i32) -> (i32, i32) {
    %c0_i32 = arith.constant 0 : i32
    %c0_i32_0 = arith.constant 0 : i32
    %c0_i32_1 = arith.constant 0 : i32
    return %c0_i32, %c0_i32_0 : i32, i32
  }
  func.func @transform_3(%arg0: i32) -> (i32, i32) {
    %c0_i32 = arith.constant 0 : i32
    %c0_i32_0 = arith.constant 0 : i32
    %c0_i32_1 = arith.constant 0 : i32
    return %c0_i32, %c0_i32_0 : i32, i32
  }
  func.func @transform_4(%arg0: i32) -> (i32, i32) {
    %c0_i32 = arith.constant 0 : i32
    %c0_i32_0 = arith.constant 0 : i32
    %c0_i32_1 = arith.constant 0 : i32
    return %c0_i32, %c0_i32_0 : i32, i32
  }
  func.func @transform_5(%arg0: i32) -> (i32, i32) {
    %c0_i32 = arith.constant 0 : i32
    %c0_i32_0 = arith.constant 0 : i32
    %c0_i32_1 = arith.constant 0 : i32
    return %c0_i32, %c0_i32_0 : i32, i32
  }
  func.func @transform_6(%arg0: i32) -> (i32, i32) {
    %c0_i32 = arith.constant 0 : i32
    %c0_i32_0 = arith.constant 0 : i32
    %c0_i32_1 = arith.constant 0 : i32
    return %c0_i32, %c0_i32_0 : i32, i32
  }
  func.func @transform_7(%arg0: i32) -> (i32, i32) {
    %c0_i32 = arith.constant 0 : i32
    %c0_i32_0 = arith.constant 0 : i32
    %c0_i32_1 = arith.constant 0 : i32
    return %c0_i32, %c0_i32_0 : i32, i32
  }
  func.func @transform_8(%arg0: i32) -> (i32, i32) {
    %c0_i32 = arith.constant 0 : i32
    %c0_i32_0 = arith.constant 0 : i32
    %c0_i32_1 = arith.constant 0 : i32
    return %c0_i32, %c0_i32_0 : i32, i32
  }
  func.func @transform_9(%arg0: i32) -> (i32, i32) {
    %c0_i32 = arith.constant 0 : i32
    %c0_i32_0 = arith.constant 0 : i32
    %c0_i32_1 = arith.constant 0 : i32
    return %c0_i32, %c0_i32_0 : i32, i32
  }
  func.func @transform_10(%arg0: i32) -> (i32, i32) {
    %c0_i32 = arith.constant 0 : i32
    %c0_i32_0 = arith.constant 0 : i32
    %c0_i32_1 = arith.constant 0 : i32
    return %c0_i32, %c0_i32_0 : i32, i32
  }
  func.func @transform_11(%arg0: i32) -> (i32, i32) {
    %c0_i32 = arith.constant 0 : i32
    %c0_i32_0 = arith.constant 0 : i32
    %c0_i32_1 = arith.constant 0 : i32
    return %c0_i32, %c0_i32_0 : i32, i32
  }
  func.func @transform_12(%arg0: i32) -> (i32, i32) {
    %c0_i32 = arith.constant 0 : i32
    %c0_i32_0 = arith.constant 0 : i32
    %c0_i32_1 = arith.constant 0 : i32
    return %c0_i32, %c0_i32_0 : i32, i32
  }
  func.func @transform_13(%arg0: i32) -> (i32, i32) {
    %c0_i32 = arith.constant 0 : i32
    %c0_i32_0 = arith.constant 0 : i32
    %c0_i32_1 = arith.constant 0 : i32
    return %c0_i32, %c0_i32_0 : i32, i32
  }
}

</mosaic_0001>

<bundles_post_ra>
// kernel: classifier_forward.1
= control target key start
LH: loop header
LB: loop body
LE: loop exit
PB: predicated region body
PF: predicated region fallthrough
CT: control target
= control target key end

     0   :  { %v15591_v1 = vmov 0   ;;  %v15609_v2 = vmov 2   ;;  %v15605_v3 = vmov 6   ;;  %s15573_s0 = inlined_call_operand.vmem [shape: f32[2,1152], index: 0, kind: input, shape index: {}]   ;;  %s15574_s1 = inlined_call_operand.vmem [shape: f32[6,25], index: 1, kind: input, shape index: {}]   ;;  %s15575_s2 = inlined_call_operand.vmem [shape: f32[6,1], index: 2, kind: input, shape index: {}]   ;;  %s15576_s3 = inlined_call_operand.vmem [shape: f32[863,256], index: 3, kind: input, shape index: {}]   ;;  %s15577_s4 = inlined_call_operand.vmem [shape: f32[16,150], index: 4, kind: input, shape index: {}]   ;;  %s15578_s5 = inlined_call_operand.vmem [shape: f32[16,1], index: 5, kind: input, shape index: {}]   ;;  %s15579_s6 = inlined_call_operand.vmem [shape: f32[121,25], index: 6, kind: input, shape index: {}]   ;;  %s15580_s7 = inlined_call_operand.vmem [shape: f32[400,120], index: 7, kind: input, shape index: {}]   ;;  %s15581_s8 = inlined_call_operand.vmem [shape: f32[1,120], index: 8, kind: input, shape index: {}]   ;;  %s15582_s9 = inlined_call_operand.vmem [shape: f32[120,84], index: 9, kind: input, shape index: {}]   ;;  %s15583_s10 = inlined_call_operand.vmem [shape: f32[1,84], index: 10, kind: input, shape index: {}]   ;;  %s15584_s11 = inlined_call_operand.vmem [shape: f32[84,10], index: 11, kind: input, shape index: {}]   ;;  %s15585_s12 = inlined_call_operand.vmem [shape: f32[1,10], index: 12, kind: input, shape index: {}]   ;;  %s15586_s13 = inlined_call_operand.hbm [shape: f32[2,10], index: 13, kind: output, shape index: {}]  }
   0x1   :  { %v8955_v0 = vld [vmem:[%s15574_s1] sm:$0x3f]  ;;  %8663 = vset.pattern.permute.xlu0 %v15591_v1  ;;  %8665 = vset.pattern.permute.xlu2 %v15609_v2 }
   0x2   :  { %49 = vperm.xlu0 %8663, %v8955_v0   ;;  %158 = vperm.xlu2 %8665, %v8955_v0  }
   0x3   :  { %8669 = vset.pattern.permute.xlu1 %v15605_v3 }
   0x4   :  { %18 = vsyncpa [#allocation8], 0  ;;  %390 = vperm.xlu1 %8669, %v8955_v0   ;;  %v8800_v4 = vmov 1   ;;  %v15610_v5 = vmov 3   ;;  %v15603_v6 = vmov 8   ;;  %v15607_v7 = vmov 4  }
   0x5   :  { %v15608_v8 = vmov 5   ;;  %v15599_v9 = vmov 11   ;;  %v15606_v10 = vmov 7   ;;  %v15602_v11 = vmov 9   ;;  %v81_v17 = vld [vmem:[%s15573_s0] ss:$2 sm:$0xff] }
   0x6   :  { %v15601_v12 = vmov 12   ;;  %v15600_v13 = vmov 13   ;;  %v15596_v14 = vmov 14   ;;  %v15604_v15 = vmov 10   ;;  %s8812_s29 = smov 127   ;;  %s8813_s30 = smov 126  }
   0x7   :  { %v8992_v18 = vperm.slane %v81_v17, 6  ;;  %v8994_v19 = vperm.slane %v81_v17, 2  ;;  %v8996_v20 = vperm.slane %v81_v17, 0  ;;  %v9004_v26 = vperm.slane %v81_v17, 3  ;;  %s8816_s14 = smov 125   ;;  %s8820_s15 = smov 124  }
   0x8   :  { %v9006_v27 = vperm.slane %v81_v17, 1  ;;  %v9014_v31 = vperm.slane %v81_v17, 5  ;;  %v9016_v32 = vperm.slane %v81_v17, 4  ;;  %v15595_v36 = vmov 17   ;;  %s15741_s16 = smov 96   ;;  %s15735_s17 = smov 95  }
   0x9   :  { %v15598_v37 = vmov 15   ;;  %v9026_v38 = vperm.slane %v81_v17, 7  ;;  %v15593_v46 = vmov 16   ;;  %v15588_v58 = vmov 21   ;;  %s15733_s18 = smov 94   ;;  %s15653_s19 = smov 93  }
   0xa   :  { %8664 = vset.pattern.permute.xlu0 %v8800_v4  ;;  %8666 = vset.pattern.permute.xlu2 %v15610_v5  ;;  %v15590_v59 = vmov 19   ;;  %v15589_v62 = vmov 23   ;;  %s8829_s20 = smov 92   ;;  %s15651_s21 = smov 64   ;;  %vm135_vm0 = vcmask 1039360   ;;  %vm193_vm1 = vcmask 1031168  }
   0xb   :  { %83 = vperm.xlu0 %8664, %v8955_v0   ;;  %216 = vperm.xlu2 %8666, %v8955_v0   ;;  %s15636_s22 = smov 63   ;;  %s15891_s23 = smov 62   ;;  %vm15718_vm2 = vcmask 1022976   ;;  %vm15717_vm3 = vcmask 1014784   ;;  %vm367_vm4 = vcmask 785408   ;;  %vm425_vm5 = vcmask 777216  }
   0xc   :  { %8671 = vset.pattern.permute.xlu1 %v15603_v6  ;;  %s15646_s24 = smov 61   ;;  %s15731_s25 = smov 60   ;;  %vm483_vm6 = vcmask 769024   ;;  %vm541_vm7 = vcmask 760832   ;;  %vm599_vm8 = vcmask 752640   ;;  %vm15721_vm9 = vcmask 523264  }
   0xd   :  { %506 = vperm.xlu1 %8671, %v8955_v0   ;;  %s15737_s26 = smov 32   ;;  %s15729_s27 = smov 31   ;;  %vm15722_vm10 = vcmask 515072   ;;  %vm773_vm11 = vcmask 506880   ;;  %vm831_vm12 = vcmask 498688   ;;  %vm15685_vm13 = vcmask 490496  }
   0xe   :  { %s15727_s28 = smov 30   ;;  %vm947_vm14 = vcmask 261120   ;;  %vm15693_vm15 = vcmask 252928  }
  0x13   :  { %8667 = vset.pattern.permute.xlu2 %v15607_v7  ;;  %8668 = vset.pattern.permute.xlu0 %v15608_v8 }
  0x14   :  { %274 = vperm.xlu2 %8667, %v8955_v0   ;;  %332 = vperm.xlu0 %8668, %v8955_v0  }
  0x15   :  { %8674 = vset.pattern.permute.xlu1 %v15599_v9 }
  0x16   :  { %680 = vperm.xlu1 %8674, %v8955_v0  }
  0x1c   :  { %8670 = vset.pattern.permute.xlu2 %v15606_v10  ;;  %8673 = vset.pattern.permute.xlu0 %v15604_v15 }
  0x1d   :  { %448 = vperm.xlu2 %8670, %v8955_v0   ;;  %622 = vperm.xlu0 %8673, %v8955_v0  }
  0x1e   :  { %8676 = vset.pattern.permute.xlu1 %v15600_v13 }
  0x1f   :  { %796 = vperm.xlu1 %8676, %v8955_v0  }
  0x25   :  { %8672 = vset.pattern.permute.xlu2 %v15602_v11  ;;  %8678 = vset.pattern.permute.xlu0 %v15598_v37 }
  0x26   :  { %564 = vperm.xlu2 %8672, %v8955_v0  }
  0x27   :  { %8679 = vset.pattern.permute.xlu1 %v15593_v46 }
  0x2e   :  { %8675 = vset.pattern.permute.xlu2 %v15601_v12 }
  0x2f   :  { %738 = vperm.xlu2 %8675, %v8955_v0  }
  0x37   :  { %8677 = vset.pattern.permute.xlu2 %v15596_v14 }
  0x38   :  { %854 = vperm.xlu2 %8677, %v8955_v0  }
  0x40   :  { %8680 = vset.pattern.permute.xlu2 %v15595_v36 }
  0x5c   :  { %v159_v25 = vpop.permute.xlu2 %158 }
  0x5d   :  { %v161_v28 = vmul.f32 %v159_v25, %v8996_v20  ;;  %v164_v33 = vmul.f32 %v159_v25, %v9004_v26  ;;  %v167_v39 = vmul.f32 %v159_v25, %v8992_v18  ;;  %v163_v40 = vmul.f32 %v159_v25, %v8994_v19 }
  0x5e   :  { %v166_v44 = vmul.f32 %v159_v25, %v9014_v31  ;;  %v162_v45 = vmul.f32 %v159_v25, %v9006_v27  ;;  %v165_v49 = vmul.f32 %v159_v25, %v9016_v32  ;;  %v168_v53 = vmul.f32 %v159_v25, %v9026_v38 }
  0x5f   :  { %v15597_v25 = vmov 18  }
  0x65   :  { %v217_v42 = vpop.permute.xlu2 %216 }
  0x66   :  { %v219_v43 = vmul.f32 %v217_v42, %v8996_v20  ;;  %v222_v47 = vmul.f32 %v217_v42, %v9004_v26  ;;  %v221_v48 = vmul.f32 %v217_v42, %v8994_v19  ;;  %v225_v51 = vmul.f32 %v217_v42, %v8992_v18 }
  0x67   :  { %v224_v52 = vmul.f32 %v217_v42, %v9014_v31  ;;  %v220_v55 = vmul.f32 %v217_v42, %v9006_v27  ;;  %v223_v57 = vmul.f32 %v217_v42, %v9016_v32 }
  0x6e   :  { %v9046_v50 = vpop.permute.xlu2 %274 }
  0x6f   :  { %v280_v60 = vmul.f32 %v9046_v50, %v9004_v26 }
  0x74   :  { %v8987_v16 = vpop.permute.xlu0 %49 }
  0x76   :  { %v9079_v17 = vpop.permute.xlu1 %390 }
  0x77   :  { %v9055_v54 = vpop.permute.xlu2 %448 }
  0x78   :  { %v452_v6 = vmul.f32 %v9055_v54, %v9006_v27  ;;  %v458_v8 = vmul.f32 %v9055_v54, %v9026_v38 }
  0x7d   :  { %v84_v21 = vpop.permute.xlu0 %83 }
  0x7e   :  { %v109_v22 = vmul.f32 %v8992_v18, %v84_v21  ;;  %v105_v23 = vmul.f32 %v8994_v19, %v84_v21  ;;  %v103_v24 = vmul.f32 %v8996_v20, %v84_v21  ;;  %v106_v29 = vmul.f32 %v9004_v26, %v84_v21 }
  0x7f   :  { %v104_v30 = vmul.f32 %v9006_v27, %v84_v21  ;;  %v108_v34 = vmul.f32 %v9014_v31, %v84_v21  ;;  %v107_v35 = vmul.f32 %v9016_v32, %v84_v21  ;;  %v110_v41 = vmul.f32 %v9026_v38, %v84_v21 }
  0x80   :  { %131 = vrot.lane.b32.xlu0 %v109_v22, %s8812_s29  ;;  %123 = vrot.lane.b32.xlu2 %v105_v23, %s8812_s29  ;;  %v9061_v56 = vpop.permute.xlu2 %564  ;;  %v226_v22 = vmul.f32 %v217_v42, %v9026_v38  ;;  %v279_v23 = vmul.f32 %v9046_v50, %v8994_v19  ;;  %v453_v42 = vmul.f32 %v9055_v54, %v8994_v19 }
  0x81   :  { %119 = vrot.lane.b32.xlu1 %v103_v24, %s8812_s29 }
  0x86   :  { %v9076_v63 = vpop.permute.xlu0 %332 }
  0x87   :  { %v337_v21 = vmul.f32 %v9076_v63, %v8994_v19 }
  0x88   :  { %177 = vrot.lane.b32.xlu0 %v161_v28, %s8813_s30  ;;  %125 = vrot.lane.b32.xlu2 %v106_v29, %s8812_s29  ;;  %v9093_v28 = vpop.permute.xlu1 %506  ;;  %v340_v29 = vmul.f32 %v9076_v63, %v9014_v31 }
  0x89   :  { %121 = vrot.lane.b32.xlu1 %v104_v30, %s8812_s29  ;;  %v9071_v61 = vpop.permute.xlu2 %738  ;;  %v282_v30 = vmul.f32 %v9046_v50, %v9014_v31  ;;  %v514_v36 = vmul.f32 %v9093_v28, %v9014_v31  ;;  %v509_v3 = vmul.f32 %v9093_v28, %v8996_v20 }
  0x8a   :  { %v743_v7 = vmul.f32 %v9071_v61, %v8994_v19  ;;  %v746_v5 = vmul.f32 %v9071_v61, %v9014_v31 }
  0x90   :  { %183 = vrot.lane.b32.xlu0 %v164_v33, %s8813_s30  ;;  %129 = vrot.lane.b32.xlu2 %v108_v34, %s8812_s29  ;;  %v9104_v34 = vpop.permute.xlu1 %680 }
  0x91   :  { %127 = vrot.lane.b32.xlu1 %v107_v35, %s8812_s29  ;;  %v397_v35 = vmul.f32 %v9079_v17, %v9016_v32  ;;  %v687_v11 = vmul.f32 %v9104_v34, %v9016_v32 }
  0x92   :  { %v9086_v24 = vpop.permute.xlu2 %854 }
  0x98   :  { %189 = vrot.lane.b32.xlu0 %v167_v39, %s8813_s30  ;;  %181 = vrot.lane.b32.xlu2 %v163_v40, %s8813_s30  ;;  %v339_v39 = vmul.f32 %v9076_v63, %v9016_v32  ;;  %v15594_v40 = vmov 22  }
  0x99   :  { %133 = vrot.lane.b32.xlu1 %v110_v41, %s8812_s29 }
  0xa0   :  { %235 = vrot.lane.b32.xlu0 %v219_v43, %s8816_s14  ;;  %187 = vrot.lane.b32.xlu2 %v166_v44, %s8813_s30  ;;  %v9118_v43 = vpop.permute.xlu0 %622  ;;  %v9121_v44 = vpop.permute.xlu1 %796 }
  0xa1   :  { %179 = vrot.lane.b32.xlu1 %v162_v45, %s8813_s30  ;;  %v396_v45 = vmul.f32 %v9079_v17, %v9004_v26  ;;  %v627_v37 = vmul.f32 %v9118_v43, %v8994_v19  ;;  %v630_v13 = vmul.f32 %v9118_v43, %v9014_v31 }
  0xa8   :  { %241 = vrot.lane.b32.xlu0 %v222_v47, %s8816_s14  ;;  %239 = vrot.lane.b32.xlu2 %v221_v48, %s8816_s14  ;;  %v15587_v47 = vmov 24  }
  0xa9   :  { %185 = vrot.lane.b32.xlu1 %v165_v49, %s8813_s30  ;;  %v456_v49 = vmul.f32 %v9055_v54, %v9014_v31 }
  0xb0   :  { %247 = vrot.lane.b32.xlu0 %v225_v51, %s8816_s14  ;;  %245 = vrot.lane.b32.xlu2 %v224_v52, %s8816_s14  ;;  %v281_v51 = vmul.f32 %v9046_v50, %v9016_v32  ;;  %v283_v52 = vmul.f32 %v9046_v50, %v8992_v18 }
  0xb1   :  { %191 = vrot.lane.b32.xlu1 %v168_v53, %s8813_s30 }
  0xb8   :  { %912 = vperm.xlu0 %8678, %v8955_v0   ;;  %1028 = vperm.xlu2 %8680, %v8955_v0  }
  0xb9   :  { %237 = vrot.lane.b32.xlu1 %v220_v55, %s8816_s14 }
  0xc0   :  { %8683 = vset.pattern.permute.xlu0 %v15588_v58  ;;  %8682 = vset.pattern.permute.xlu2 %v15590_v59 }
  0xc1   :  { %243 = vrot.lane.b32.xlu1 %v223_v57, %s8816_s14  ;;  %1239 = vperm.xlu0 %8683, %v8955_v0  }
  0xc2   :  { %1144 = vperm.xlu2 %8682, %v8955_v0  }
  0xc9   :  { %970 = vperm.xlu1 %8679, %v8955_v0   ;;  %299 = vrot.lane.b32.xlu0 %v280_v60, %s8820_s15  ;;  %v341_v60 = vmul.f32 %v9076_v63, %v8992_v18 }
  0xca   :  { %8685 = vset.pattern.permute.xlu2 %v15589_v62 }
  0xcb   :  { %1370 = vperm.xlu2 %8685, %v8955_v0  }
  0xd1   :  { %249 = vrot.lane.b32.xlu1 %v226_v22, %s8816_s14  ;;  %355 = vrot.lane.b32.xlu0 %v337_v21, %s15741_s16  ;;  %v338_v21 = vmul.f32 %v9076_v63, %v9004_v26  ;;  %v455_v22 = vmul.f32 %v9055_v54, %v9016_v32 }
  0xd2   :  { %8681 = vset.pattern.permute.xlu1 %v15597_v25 }
  0xd3   :  { %297 = vrot.lane.b32.xlu2 %v279_v23, %s8820_s15 }
  0xd4   :  { %8688 = vset.pattern.permute.xlu2 %v15591_v1 }
  0xd9   :  { %1086 = vperm.xlu1 %8681, %v8955_v0   ;;  %361 = vrot.lane.b32.xlu0 %v340_v29, %s15741_s16 }
  0xda   :  { %v9101_v33 = vpop.permute.xlu2 %123 }
  0xdb   :  { %303 = vrot.lane.b32.xlu2 %v282_v30, %s8820_s15 }
  0xe1   :  { %8684 = vset.pattern.permute.xlu1 %v15594_v40  ;;  %417 = vrot.lane.b32.xlu0 %v397_v35, %s15735_s17  ;;  %v278_v35 = vmul.f32 %v9046_v50, %v9006_v27 }
  0xe2   :  { %1313 = vperm.xlu1 %8684, %v8955_v0   ;;  %v9113_v41 = vpop.permute.xlu2 %125 }
  0xe3   :  { %359 = vrot.lane.b32.xlu2 %v339_v39, %s15741_s16  ;;  %v395_v39 = vmul.f32 %v9079_v17, %v8994_v19 }
  0xe9   :  { %471 = vrot.lane.b32.xlu0 %v453_v42, %s15733_s18 }
  0xea   :  { %8686 = vset.pattern.permute.xlu1 %v15587_v47  ;;  %v9126_v48 = vpop.permute.xlu2 %129 }
  0xeb   :  { %15944 = vst [vmem:[#allocation10_spill] sm:$0xff] %v9126_v48  ;;  %1427 = vperm.xlu1 %8686, %v8955_v0   ;;  %415 = vrot.lane.b32.xlu2 %v396_v45, %s15735_s17 }
  0xf1   :  { %477 = vrot.lane.b32.xlu0 %v456_v49, %s15733_s18 }
  0xf2   :  { %v9137_v53 = vpop.permute.xlu2 %181  ;;  %v9139_v55 = vpop.permute.xlu0 %131 }
  0xf3   :  { %301 = vrot.lane.b32.xlu1 %v281_v51, %s8820_s15  ;;  %v9142_v57 = vpop.permute.xlu1 %119  ;;  %305 = vrot.lane.b32.xlu2 %v283_v52, %s8820_s15  ;;  %v335_v51 = vmul.f32 %v9076_v63, %v8996_v20  ;;  %v512_v52 = vmul.f32 %v9093_v28, %v9004_v26 }
  0xf4   :  { %15945 = vst [vmem:[#allocation11_spill] sm:$0xff] %v9142_v57  ;;  %8719 = vset.pattern.permute.xlu1 %v8800_v4  ;;  %v513_v4 = vmul.f32 %v9093_v28, %v9016_v32 }
  0xf9   :  { %363 = vrot.lane.b32.xlu0 %v341_v60, %s15741_s16  ;;  %v398_v60 = vmul.f32 %v9079_v17, %v9014_v31 }
  0xfa   :  { %v9153_v23 = vpop.permute.xlu2 %187  ;;  %v9155_v29 = vpop.permute.xlu0 %177 }
  0xfb   :  { %15946 = vst [vmem:[#allocation12_spill] sm:$0xff] %v9155_v29  ;;  %v9157_v30 = vpop.permute.xlu1 %121  ;;  %475 = vrot.lane.b32.xlu2 %v455_v22, %s15733_s18  ;;  %357 = vrot.lane.b32.xlu1 %v338_v21, %s15741_s16  ;;  %v625_v29 = vmul.f32 %v9118_v43, %v8996_v20 }
 0x101   :  { %533 = vrot.lane.b32.xlu0 %v513_v4, %s15653_s19 }
 0x102   :  { %v9168_v42 = vpop.permute.xlu0 %183  ;;  %v9170_v45 = vpop.permute.xlu2 %239 }
 0x103   :  { %v9172_v49 = vpop.permute.xlu1 %127  ;;  %295 = vrot.lane.b32.xlu2 %v278_v35, %s8820_s15  ;;  %413 = vrot.lane.b32.xlu1 %v395_v39, %s15735_s17  ;;  %v569_v35 = vmul.f32 %v9061_v56, %v8994_v19  ;;  %v284_v39 = vmul.f32 %v9046_v50, %v9026_v38 }
 0x109   :  { %351 = vrot.lane.b32.xlu0 %v335_v51, %s15741_s16  ;;  %v454_v51 = vmul.f32 %v9055_v54, %v9004_v26 }
 0x10a   :  { %v9183_v21 = vpop.permute.xlu0 %189  ;;  %v9185_v22 = vpop.permute.xlu2 %245 }
 0x10b   :  { %v9187_v4 = vpop.permute.xlu1 %133  ;;  %531 = vrot.lane.b32.xlu2 %v512_v52, %s15653_s19  ;;  %419 = vrot.lane.b32.xlu1 %v398_v60, %s15735_s17  ;;  %v572_v52 = vmul.f32 %v9061_v56, %v9014_v31  ;;  %v399_v60 = vmul.f32 %v9079_v17, %v8992_v18 }
 0x10c   :  { %15947 = vst [vmem:[#allocation13_spill] sm:$0xff] %v9187_v4  ;;  %v568_v4 = vmul.f32 %v9061_v56, %v9006_v27 }
 0x111   :  { %587 = vrot.lane.b32.xlu0 %v569_v35, %s8829_s20  ;;  %v277_v35 = vmul.f32 %v9046_v50, %v8996_v20  ;;  %v511_v50 = vmul.f32 %v9093_v28, %v8994_v19 }
 0x112   :  { %v9198_v47 = vpop.permute.xlu0 %235  ;;  %v9200_v58 = vpop.permute.xlu2 %1028 }
 0x113   :  { %15948 = vst [vmem:[#allocation14_spill] sm:$0xff] %v9198_v47  ;;  %v9202_v62 = vpop.permute.xlu1 %179  ;;  %307 = vrot.lane.b32.xlu2 %v284_v39, %s8820_s15  ;;  %473 = vrot.lane.b32.xlu1 %v454_v51, %s15733_s18  ;;  %v394_v51 = vmul.f32 %v9079_v17, %v9006_v27  ;;  %v801_v47 = vmul.f32 %v9121_v44, %v8994_v19 }
 0x119   :  { %593 = vrot.lane.b32.xlu0 %v572_v52, %s8829_s20  ;;  %v571_v52 = vmul.f32 %v9061_v56, %v9016_v32 }
 0x11a   :  { %v9213_v59 = vpop.permute.xlu0 %241 }
 0x11b   :  { %15949 = vst [vmem:[#allocation15_spill] sm:$0xff] %v9213_v59  ;;  %v9215_v1 = vpop.permute.xlu1 %185  ;;  %421 = vrot.lane.b32.xlu2 %v399_v60, %s15735_s17  ;;  %293 = vrot.lane.b32.xlu1 %v277_v35, %s8820_s15  ;;  %v628_v35 = vmul.f32 %v9118_v43, %v9004_v26 }
 0x11c   :  { %v9219_v39 = vpop.permute.xlu2 %1144 }
 0x11d   :  { %v1148_v59 = vmul.f32 %v9219_v39, %v9006_v27 }
 0x121   :  { %411 = vrot.lane.b32.xlu0 %v394_v51, %s15735_s17  ;;  %v393_v51 = vmul.f32 %v9079_v17, %v8996_v20 }
 0x122   :  { %v9228_v46 = vpop.permute.xlu0 %247 }
 0x123   :  { %v9230_v40 = vpop.permute.xlu1 %191  ;;  %591 = vrot.lane.b32.xlu2 %v571_v52, %s8829_s20  ;;  %529 = vrot.lane.b32.xlu1 %v511_v50, %s15653_s19  ;;  %v400_v50 = vmul.f32 %v9079_v17, %v9026_v38  ;;  %v515_v17 = vmul.f32 %v9093_v28, %v8992_v18 }
 0x124   :  { %15950 = vst [vmem:[#allocation16_spill] sm:$0xff] %v9230_v40 }
 0x125   :  { %v9234_v60 = vpop.permute.xlu2 %1370 }
 0x129   :  { %647 = vrot.lane.b32.xlu0 %v628_v35, %s15651_s21  ;;  %v336_v35 = vmul.f32 %v9076_v63, %v9006_v27 }
 0x12a   :  { %v9243_v14 = vpop.permute.xlu0 %912 }
 0x12b   :  { %v9245_v25 = vpop.permute.xlu1 %237  ;;  %409 = vrot.lane.b32.xlu2 %v393_v51, %s15735_s17  ;;  %535 = vrot.lane.b32.xlu1 %v514_v36, %s15653_s19 }
 0x12d   :  { %v9249_v52 = vpop.permute.xlu2 %297 }
 0x12e   :  { %15951 = vst [vmem:[#allocation17_spill] sm:$0xff] %v9249_v52 }
 0x131   :  { %423 = vrot.lane.b32.xlu0 %v400_v50, %s15735_s17  ;;  %v570_v50 = vmul.f32 %v9061_v56, %v9004_v26  ;;  %s15745_s17 = smov 74  }
 0x133   :  { %v9258_v9 = vpop.permute.xlu1 %243  ;;  %353 = vrot.lane.b32.xlu1 %v336_v35, %s15741_s16  ;;  %645 = vrot.lane.b32.xlu2 %v627_v37, %s15651_s21  ;;  %v9262_v36 = vpop.permute.xlu0 %1239 }
 0x134   :  { %15952 = vst [vmem:[#allocation18_spill] sm:$0xff] %v9258_v9 }
 0x135   :  { %v9264_v51 = vpop.permute.xlu2 %303 }
 0x139   :  { %537 = vrot.lane.b32.xlu0 %v515_v17, %s15653_s19  ;;  %v342_v17 = vmul.f32 %v9076_v63, %v9026_v38  ;;  %v686_v63 = vmul.f32 %v9104_v34, %v9004_v26 }
 0x13b   :  { %v9273_v12 = vpop.permute.xlu1 %970  ;;  %589 = vrot.lane.b32.xlu1 %v570_v50, %s8829_s20  ;;  %651 = vrot.lane.b32.xlu2 %v630_v13, %s15651_s21  ;;  %v9277_v37 = vpop.permute.xlu0 %299 }
 0x13c   :  { %15953 = vst [vmem:[#allocation19_spill] sm:$0xff] %v9277_v37  ;;  %v857_v37 = vmul.f32 %v9086_v24, %v8996_v20 }
 0x13d   :  { %v9279_v35 = vpop.permute.xlu2 %359 }
 0x13e   :  { %15954 = vst [vmem:[#allocation20_spill] sm:$0xff] %v9279_v35  ;;  %v683_v35 = vmul.f32 %v9104_v34, %v8996_v20 }
 0x141   :  { %707 = vrot.lane.b32.xlu0 %v687_v11, %s15636_s22  ;;  %v457_v11 = vmul.f32 %v9055_v54, %v8992_v18 }
 0x143   :  { %v9288_v15 = vpop.permute.xlu1 %249  ;;  %365 = vrot.lane.b32.xlu1 %v342_v17, %s15741_s16  ;;  %469 = vrot.lane.b32.xlu2 %v452_v6, %s15733_s18  ;;  %v9292_v13 = vpop.permute.xlu0 %355 }
 0x144   :  { %15955 = vst [vmem:[#allocation21_spill] sm:$0xff] %v9288_v15  ;;  %v573_v15 = vmul.f32 %v9061_v56, %v8992_v18 }
 0x145   :  { %15956 = vst [vmem:[#allocation22_spill] sm:$0xff] %v9292_v13  ;;  %v9294_v50 = vpop.permute.xlu2 %415  ;;  %v975_v13 = vmul.f32 %v9273_v12, %v8994_v19 }
 0x146   :  { %15957 = vst [vmem:[#allocation23_spill] sm:$0xff] %v9294_v50 }
 0x149   :  { %525 = vrot.lane.b32.xlu0 %v509_v3, %s15653_s19  ;;  %v629_v3 = vmul.f32 %v9118_v43, %v9016_v32 }
 0x14b   :  { %v9303_v10 = vpop.permute.xlu1 %1086  ;;  %479 = vrot.lane.b32.xlu1 %v457_v11, %s15733_s18  ;;  %705 = vrot.lane.b32.xlu2 %v686_v63, %s15636_s22  ;;  %v9307_v6 = vpop.permute.xlu0 %361 }
 0x14d   :  { %v9309_v17 = vpop.permute.xlu2 %305 }
 0x151   :  { %761 = vrot.lane.b32.xlu0 %v743_v7, %s15891_s23  ;;  %v451_v7 = vmul.f32 %v9055_v54, %v8996_v20  ;;  %v745_v54 = vmul.f32 %v9071_v61, %v9016_v32 }
 0x153   :  { %649 = vrot.lane.b32.xlu1 %v629_v3, %s15651_s21  ;;  %481 = vrot.lane.b32.xlu2 %v458_v8, %s15733_s18  ;;  %v9320_v11 = vpop.permute.xlu0 %417 }
 0x154   :  { %15958 = vst [vmem:[#allocation24_spill] sm:$0xff] %v9320_v11  ;;  %v9322_v63 = vpop.permute.xlu1 %1313  ;;  %v574_v11 = vmul.f32 %v9061_v56, %v9026_v38 }
 0x155   :  { %v9324_v2 = vpop.permute.xlu2 %475 }
 0x156   :  { %15959 = vst [vmem:[#allocation25_spill] sm:$0xff] %v9324_v2  ;;  %v802_v2 = vmul.f32 %v9121_v44, %v9004_v26 }
 0x159   :  { %767 = vrot.lane.b32.xlu0 %v746_v5, %s15891_s23  ;;  %v685_v5 = vmul.f32 %v9104_v34, %v8994_v19 }
 0x15b   :  { %467 = vrot.lane.b32.xlu1 %v451_v7, %s15733_s18  ;;  %595 = vrot.lane.b32.xlu2 %v573_v15, %s8829_s20  ;;  %v9335_v8 = vpop.permute.xlu0 %471  ;;  %s15779_s18 = smov 110  }
 0x15c   :  { %15960 = vst [vmem:[#allocation26_spill] sm:$0xff] %v9335_v8 }
 0x15d   :  { %v9337_v3 = vpop.permute.xlu1 %1427  ;;  %v9339_v40 = vpop.permute.xlu2 %295 }
 0x15e   :  { %15961 = vst [vmem:[#allocation27_spill] sm:$0xff] %v9339_v40 }
 0x161   :  { %585 = vrot.lane.b32.xlu0 %v568_v4, %s8829_s20  ;;  %v688_v4 = vmul.f32 %v9104_v34, %v9014_v31 }
 0x163   :  { %703 = vrot.lane.b32.xlu1 %v685_v5, %s15636_s22  ;;  %765 = vrot.lane.b32.xlu2 %v745_v54, %s15891_s23  ;;  %v9350_v15 = vpop.permute.xlu0 %477  ;;  %v567_v5 = vmul.f32 %v9061_v56, %v8996_v20  ;;  %v689_v56 = vmul.f32 %v9104_v34, %v8992_v18 }
 0x165   :  { %v9352_v7 = vpop.permute.xlu1 %301  ;;  %v9354_v8 = vpop.permute.xlu2 %531 }
 0x166   :  { %15962 = vst [vmem:[#allocation28_spill] sm:$0xff] %v9352_v7  ;;  %v799_v7 = vmul.f32 %v9121_v44, %v8996_v20 }
 0x167   :  { %15963 = vst [vmem:[#allocation29_spill] sm:$0xff] %v9354_v8 }
 0x169   :  { %821 = vrot.lane.b32.xlu0 %v802_v2, %s15646_s24  ;;  %v510_v2 = vmul.f32 %v9093_v28, %v9006_v27 }
 0x16b   :  { %709 = vrot.lane.b32.xlu1 %v688_v4, %s15636_s22  ;;  %583 = vrot.lane.b32.xlu2 %v567_v5, %s8829_s20  ;;  %v9365_v54 = vpop.permute.xlu0 %363 }
 0x16d   :  { %v9367_v50 = vpop.permute.xlu2 %307  ;;  %v9369_v8 = vpop.permute.xlu1 %357 }
 0x16e   :  { %15964 = vst [vmem:[#allocation30_spill] sm:$0xff] %v9367_v50 }
 0x16f   :  { %15965 = vst [vmem:[#allocation31_spill] sm:$0xff] %v9369_v8  ;;  %v804_v8 = vmul.f32 %v9121_v44, %v9014_v31 }
 0x171   :  { %597 = vrot.lane.b32.xlu0 %v574_v11, %s8829_s20  ;;  %v744_v11 = vmul.f32 %v9071_v61, %v9004_v26 }
 0x173   :  { %527 = vrot.lane.b32.xlu1 %v510_v2, %s15653_s19  ;;  %819 = vrot.lane.b32.xlu2 %v801_v47, %s15646_s24  ;;  %v9380_v4 = vpop.permute.xlu0 %533 }
 0x174   :  { %15966 = vst [vmem:[#allocation32_spill] sm:$0xff] %v9380_v4 }
 0x175   :  { %v9382_v5 = vpop.permute.xlu2 %421  ;;  %v9384_v50 = vpop.permute.xlu1 %413 }
 0x176   :  { %15967 = vst [vmem:[#allocation33_spill] sm:$0xff] %v9384_v50  ;;  %v861_v50 = vmul.f32 %v9086_v24, %v9016_v32 }
 0x179   :  { %711 = vrot.lane.b32.xlu0 %v689_v56, %s15636_s22  ;;  %v516_v56 = vmul.f32 %v9093_v28, %v9026_v38  ;;  %v631_v28 = vmul.f32 %v9118_v43, %v8992_v18 }
 0x17b   :  { %763 = vrot.lane.b32.xlu1 %v744_v11, %s15891_s23  ;;  %825 = vrot.lane.b32.xlu2 %v804_v8, %s15646_s24  ;;  %v9395_v47 = vpop.permute.xlu0 %351  ;;  %v626_v11 = vmul.f32 %v9118_v43, %v9006_v27 }
 0x17c   :  { %15968 = vst [vmem:[#allocation34_spill] sm:$0xff] %v9395_v47 }
 0x17d   :  { %v9397_v2 = vpop.permute.xlu2 %591  ;;  %v9399_v4 = vpop.permute.xlu1 %419 }
 0x17e   :  { %15969 = vst [vmem:[#allocation35_spill] sm:$0xff] %v9397_v2 }
 0x17f   :  { %15970 = vst [vmem:[#allocation36_spill] sm:$0xff] %v9399_v4 }
 0x181   :  { %881 = vrot.lane.b32.xlu0 %v861_v50, %s15731_s25  ;;  %v860_v50 = vmul.f32 %v9086_v24, %v9004_v26 }
 0x183   :  { %539 = vrot.lane.b32.xlu1 %v516_v56, %s15653_s19  ;;  %643 = vrot.lane.b32.xlu2 %v626_v11, %s15651_s21  ;;  %v9410_v8 = vpop.permute.xlu0 %587  ;;  %s15749_s19 = smov 104  }
 0x184   :  { %15971 = vst [vmem:[#allocation37_spill] sm:$0xff] %v9410_v8 }
 0x185   :  { %v9412_v2 = vpop.permute.xlu2 %409  ;;  %v9414_v47 = vpop.permute.xlu1 %473 }
 0x186   :  { %15972 = vst [vmem:[#allocation38_spill] sm:$0xff] %v9412_v2  ;;  %v917_v2 = vmul.f32 %v9243_v14, %v8994_v19 }
 0x187   :  { %15973 = vst [vmem:[#allocation39_spill] sm:$0xff] %v9414_v47 }
 0x189   :  { %699 = vrot.lane.b32.xlu0 %v683_v35, %s15636_s22  ;;  %v803_v35 = vmul.f32 %v9121_v44, %v9016_v32 }
 0x18b   :  { %653 = vrot.lane.b32.xlu1 %v631_v28, %s15651_s21  ;;  %879 = vrot.lane.b32.xlu2 %v860_v50, %s15731_s25  ;;  %v9425_v56 = vpop.permute.xlu0 %593  ;;  %v632_v28 = vmul.f32 %v9118_v43, %v9026_v38  ;;  %v919_v43 = vmul.f32 %v9243_v14, %v9016_v32 }
 0x18c   :  { %15974 = vst [vmem:[#allocation40_spill] sm:$0xff] %v9425_v56 }
 0x18d   :  { %v9427_v11 = vpop.permute.xlu1 %293  ;;  %v9429_v8 = vpop.permute.xlu2 %645 }
 0x18e   :  { %15975 = vst [vmem:[#allocation41_spill] sm:$0xff] %v9427_v11  ;;  %v920_v11 = vmul.f32 %v9243_v14, %v9014_v31 }
 0x18f   :  { %15976 = vst [vmem:[#allocation42_spill] sm:$0xff] %v9429_v8 }
 0x191   :  { %935 = vrot.lane.b32.xlu0 %v917_v2, %s15737_s26  ;;  %v747_v2 = vmul.f32 %v9071_v61, %v8992_v18 }
 0x193   :  { %823 = vrot.lane.b32.xlu1 %v803_v35, %s15646_s24  ;;  %655 = vrot.lane.b32.xlu2 %v632_v28, %s15651_s21  ;;  %v9440_v50 = vpop.permute.xlu0 %411 }
 0x194   :  { %15977 = vst [vmem:[#allocation43_spill] sm:$0xff] %v9440_v50  ;;  %v742_v50 = vmul.f32 %v9071_v61, %v9006_v27 }
 0x195   :  { %v9442_v47 = vpop.permute.xlu1 %529  ;;  %v9444_v8 = vpop.permute.xlu2 %651 }
 0x196   :  { %15978 = vst [vmem:[#allocation44_spill] sm:$0xff] %v9442_v47 }
 0x197   :  { %15979 = vst [vmem:[#allocation45_spill] sm:$0xff] %v9444_v8 }
 0x199   :  { %941 = vrot.lane.b32.xlu0 %v920_v11, %s15737_s26  ;;  %v859_v11 = vmul.f32 %v9086_v24, %v8994_v19 }
 0x19b   :  { %769 = vrot.lane.b32.xlu2 %v747_v2, %s15891_s23  ;;  %641 = vrot.lane.b32.xlu1 %v625_v29, %s15651_s21  ;;  %v9455_v35 = vpop.permute.xlu0 %647  ;;  %s15753_s21 = smov 111  }
 0x19c   :  { %15980 = vst [vmem:[#allocation46_spill] sm:$0xff] %v9455_v35 }
 0x19d   :  { %v9457_v28 = vpop.permute.xlu1 %535  ;;  %v9459_v47 = vpop.permute.xlu2 %469 }
 0x19e   :  { %15981 = vst [vmem:[#allocation47_spill] sm:$0xff] %v9457_v28 }
 0x19f   :  { %15982 = vst [vmem:[#allocation48_spill] sm:$0xff] %v9459_v47  ;;  %v976_v47 = vmul.f32 %v9273_v12, %v9004_v26 }
 0x1a1   :  { %759 = vrot.lane.b32.xlu0 %v742_v50, %s15891_s23  ;;  %v862_v50 = vmul.f32 %v9086_v24, %v9014_v31 }
 0x1a3   :  { %877 = vrot.lane.b32.xlu1 %v859_v11, %s15731_s25  ;;  %939 = vrot.lane.b32.xlu2 %v919_v43, %s15737_s26  ;;  %v9470_v29 = vpop.permute.xlu0 %423  ;;  %v741_v11 = vmul.f32 %v9071_v61, %v8996_v20 }
 0x1a4   :  { %15983 = vst [vmem:[#allocation49_spill] sm:$0xff] %v9470_v29 }
 0x1a5   :  { %v9472_v2 = vpop.permute.xlu1 %353  ;;  %v9474_v35 = vpop.permute.xlu2 %705 }
 0x1a6   :  { %15984 = vst [vmem:[#allocation50_spill] sm:$0xff] %v9472_v2  ;;  %v748_v2 = vmul.f32 %v9071_v61, %v9026_v38  ;;  %v863_v61 = vmul.f32 %v9086_v24, %v8992_v18 }
 0x1a7   :  { %15985 = vst [vmem:[#allocation51_spill] sm:$0xff] %v9474_v35 }
 0x1a9   :  { %995 = vrot.lane.b32.xlu0 %v976_v47, %s15729_s27  ;;  %v684_v47 = vmul.f32 %v9104_v34, %v9006_v27 }
 0x1ab   :  { %883 = vrot.lane.b32.xlu1 %v862_v50, %s15731_s25  ;;  %757 = vrot.lane.b32.xlu2 %v741_v11, %s15891_s23  ;;  %v9485_v43 = vpop.permute.xlu0 %537 }
 0x1ad   :  { %v9487_v29 = vpop.permute.xlu1 %589  ;;  %v9489_v35 = vpop.permute.xlu2 %481 }
 0x1ae   :  { %15986 = vst [vmem:[#allocation52_spill] sm:$0xff] %v9487_v29  ;;  %v918_v29 = vmul.f32 %v9243_v14, %v9004_v26 }
 0x1af   :  { %15987 = vst [vmem:[#allocation53_spill] sm:$0xff] %v9489_v35 }
 0x1b1   :  { %771 = vrot.lane.b32.xlu0 %v748_v2, %s15891_s23  ;;  %v978_v2 = vmul.f32 %v9273_v12, %v9014_v31 }
 0x1b3   :  { %701 = vrot.lane.b32.xlu1 %v684_v47, %s15636_s22  ;;  %993 = vrot.lane.b32.xlu2 %v975_v13, %s15729_s27  ;;  %v9500_v50 = vpop.permute.xlu0 %707 }
 0x1b4   :  { %15988 = vst [vmem:[#allocation54_spill] sm:$0xff] %v9500_v50 }
 0x1b5   :  { %v9502_v11 = vpop.permute.xlu1 %365  ;;  %v9504_v35 = vpop.permute.xlu2 %595 }
 0x1b6   :  { %15989 = vst [vmem:[#allocation55_spill] sm:$0xff] %v9502_v11  ;;  %v1035_v11 = vmul.f32 %v9200_v58, %v9016_v32 }
 0x1b9   :  { %885 = vrot.lane.b32.xlu0 %v863_v61, %s15731_s25  ;;  %v800_v61 = vmul.f32 %v9121_v44, %v9006_v27 }
 0x1bb   :  { %999 = vrot.lane.b32.xlu2 %v978_v2, %s15729_s27  ;;  %937 = vrot.lane.b32.xlu1 %v918_v29, %s15737_s26  ;;  %v9515_v13 = vpop.permute.xlu0 %525  ;;  %v690_v2 = vmul.f32 %v9104_v34, %v9026_v38  ;;  %v805_v34 = vmul.f32 %v9121_v44, %v8992_v18 }
 0x1bc   :  { %15990 = vst [vmem:[#allocation56_spill] sm:$0xff] %v9515_v13 }
 0x1bd   :  { %v9517_v47 = vpop.permute.xlu1 %479  ;;  %v9519_v50 = vpop.permute.xlu2 %765 }
 0x1be   :  { %15991 = vst [vmem:[#allocation57_spill] sm:$0xff] %v9519_v50 }
 0x1c1   :  { %1055 = vrot.lane.b32.xlu0 %v1035_v11, %s15727_s28  ;;  %v1034_v11 = vmul.f32 %v9200_v58, %v9004_v26 }
 0x1c3   :  { %817 = vrot.lane.b32.xlu2 %v800_v61, %s15646_s24  ;;  %713 = vrot.lane.b32.xlu1 %v690_v2, %s15636_s22  ;;  %v9530_v29 = vpop.permute.xlu0 %761  ;;  %s15725_s22 = smov 29  }
 0x1c4   :  { %15992 = vst [vmem:[#allocation58_spill] sm:$0xff] %v9530_v29 }
 0x1c5   :  { %v9532_v13 = vpop.permute.xlu1 %649  ;;  %v9534_v50 = vpop.permute.xlu2 %583 }
 0x1c6   :  { %15993 = vst [vmem:[#allocation59_spill] sm:$0xff] %v9532_v13 }
 0x1c7   :  { %15994 = vst [vmem:[#allocation60_spill] sm:$0xff] %v9534_v50  ;;  %v1091_v50 = vmul.f32 %v9303_v10, %v8994_v19 }
 0x1c9   :  { %873 = vrot.lane.b32.xlu0 %v857_v37, %s15731_s25  ;;  %v15640_v37 = vmov 20  }
 0x1ca   :  { %8687 = vset.pattern.permute.xlu0 %v15640_v37  ;;  %v1094_v37 = vmul.f32 %v9303_v10, %v9014_v31 }
 0x1cb   :  { %1053 = vrot.lane.b32.xlu2 %v1034_v11, %s15727_s28  ;;  %827 = vrot.lane.b32.xlu1 %v805_v34, %s15646_s24  ;;  %v9545_v61 = vpop.permute.xlu0 %767  ;;  %v806_v11 = vmul.f32 %v9121_v44, %v9026_v38  ;;  %v977_v34 = vmul.f32 %v9273_v12, %v9016_v32  ;;  %v1033_v44 = vmul.f32 %v9200_v58, %v8994_v19 }
 0x1cc   :  { %15995 = vst [vmem:[#allocation61_spill] sm:$0xff] %v9545_v61 }
 0x1cd   :  { %v9547_v2 = vpop.permute.xlu1 %467  ;;  %v9549_v29 = vpop.permute.xlu2 %819 }
 0x1ce   :  { %15996 = vst [vmem:[#allocation62_spill] sm:$0xff] %v9547_v2 }
 0x1cf   :  { %15997 = vst [vmem:[#allocation63_spill] sm:$0xff] %v9549_v29 }
 0x1d1   :  { %1109 = vrot.lane.b32.xlu0 %v1091_v50, %s15725_s22  ;;  %v921_v50 = vmul.f32 %v9243_v14, %v8992_v18 }
 0x1d3   :  { %829 = vrot.lane.b32.xlu2 %v806_v11, %s15646_s24  ;;  %997 = vrot.lane.b32.xlu1 %v977_v34, %s15729_s27  ;;  %v9561_v29 = vpop.permute.xlu0 %585 }
 0x1d4   :  { %15998 = vst [vmem:[#allocation64_spill] sm:$0xff] %v9561_v29  ;;  %v916_v29 = vmul.f32 %v9243_v14, %v9006_v27 }
 0x1d5   :  { %v9563_v13 = vpop.permute.xlu1 %703  ;;  %v9565_v2 = vpop.permute.xlu2 %825 }
 0x1d6   :  { %15999 = vst [vmem:[#allocation65_spill] sm:$0xff] %v9563_v13 }
 0x1d7   :  { %16000 = vst [vmem:[#allocation66_spill] sm:$0xff] %v9565_v2 }
 0x1d9   :  { %1115 = vrot.lane.b32.xlu0 %v1094_v37, %s15725_s22  ;;  %v1093_v37 = vmul.f32 %v9303_v10, %v9016_v32 }
 0x1db   :  { %943 = vrot.lane.b32.xlu2 %v921_v50, %s15737_s26  ;;  %815 = vrot.lane.b32.xlu1 %v799_v7, %s15646_s24  ;;  %v9576_v11 = vpop.permute.xlu0 %821  ;;  %s15723_s24 = smov 28  }
 0x1dc   :  { %16001 = vst [vmem:[#allocation67_spill] sm:$0xff] %v9576_v11 }
 0x1dd   :  { %v9578_v34 = vpop.permute.xlu1 %709  ;;  %v9580_v13 = vpop.permute.xlu2 %643 }
 0x1de   :  { %16002 = vst [vmem:[#allocation68_spill] sm:$0xff] %v9578_v34 }
 0x1df   :  { %16003 = vst [vmem:[#allocation69_spill] sm:$0xff] %v9580_v13  ;;  %v1150_v13 = vmul.f32 %v9219_v39, %v9004_v26 }
 0x1e1   :  { %933 = vrot.lane.b32.xlu0 %v916_v29, %s15737_s26  ;;  %v1036_v29 = vmul.f32 %v9200_v58, %v9014_v31 }
 0x1e3   :  { %1113 = vrot.lane.b32.xlu2 %v1093_v37, %s15725_s22  ;;  %1051 = vrot.lane.b32.xlu1 %v1033_v44, %s15727_s28  ;;  %v9591_v7 = vpop.permute.xlu0 %597  ;;  %v915_v37 = vmul.f32 %v9243_v14, %v8996_v20 }
 0x1e4   :  { %16004 = vst [vmem:[#allocation70_spill] sm:$0xff] %v9591_v7 }
 0x1e5   :  { %v9593_v50 = vpop.permute.xlu1 %527  ;;  %v9595_v11 = vpop.permute.xlu2 %879 }
 0x1e6   :  { %16005 = vst [vmem:[#allocation71_spill] sm:$0xff] %v9593_v50  ;;  %v1149_v50 = vmul.f32 %v9219_v39, %v8994_v19  ;;  %v1152_v19 = vmul.f32 %v9219_v39, %v9014_v31  ;;  %v973_v31 = vmul.f32 %v9273_v12, %v8996_v20 }
 0x1e7   :  { %16006 = vst [vmem:[#allocation72_spill] sm:$0xff] %v9595_v11 }
 0x1e9   :  { %1169 = vrot.lane.b32.xlu0 %v1150_v13, %s15723_s24  ;;  %v858_v13 = vmul.f32 %v9086_v24, %v9006_v27 }
 0x1eb   :  { %1057 = vrot.lane.b32.xlu1 %v1036_v29, %s15727_s28  ;;  %931 = vrot.lane.b32.xlu2 %v915_v37, %s15737_s26  ;;  %v9606_v44 = vpop.permute.xlu0 %711 }
 0x1ec   :  { %16007 = vst [vmem:[#allocation73_spill] sm:$0xff] %v9606_v44 }
 0x1ed   :  { %v9608_v7 = vpop.permute.xlu1 %763  ;;  %v9610_v11 = vpop.permute.xlu2 %655 }
 0x1ee   :  { %16008 = vst [vmem:[#allocation74_spill] sm:$0xff] %v9608_v7  ;;  %v1032_v7 = vmul.f32 %v9200_v58, %v9006_v27 }
 0x1ef   :  { %16009 = vst [vmem:[#allocation75_spill] sm:$0xff] %v9610_v11  ;;  %v980_v11 = vmul.f32 %v9273_v12, %v9026_v38 }
 0x1f1   :  { %1204 = vperm.xlu0 %8687, %v8955_v0   ;;  %v1092_v0 = vmul.f32 %v9303_v10, %v9004_v26  ;;  %v864_v26 = vmul.f32 %v9086_v24, %v9026_v38 }
 0x1f3   :  { %875 = vrot.lane.b32.xlu1 %v858_v13, %s15731_s25  ;;  %1167 = vrot.lane.b32.xlu2 %v1149_v50, %s15723_s24  ;;  %v9619_v29 = vpop.permute.xlu0 %881  ;;  %v16013_v13 = vmov 3  }
 0x1f4   :  { %16010 = vst [vmem:[#allocation76_spill] sm:$0xff] %v9619_v29 }
 0x1f5   :  { %v9621_v37 = vpop.permute.xlu1 %539  ;;  %v9623_v57 = vpop.permute.xlu2 %769 }
 0x1f6   :  { %16011 = vst [vmem:[#allocation77_spill] sm:$0xff] %v9621_v37 }
 0x1f7   :  { %16012 = vst [vmem:[#allocation78_spill] sm:$0xff] %v9623_v57 }
 0x1f9   :  { %1003 = vrot.lane.b32.xlu0 %v980_v11, %s15729_s27  ;;  %v1095_v11 = vmul.f32 %v9303_v10, %v8992_v18 }
 0x1fa   :  { %8721 = vset.pattern.permute.xlu0 %v16013_v13 }
 0x1fb   :  { %1111 = vrot.lane.b32.xlu1 %v1092_v0, %s15725_s22  ;;  %1173 = vrot.lane.b32.xlu2 %v1152_v19, %s15723_s24  ;;  %v9635_v50 = vpop.permute.xlu0 %699  ;;  %v9651_v0 = vld [vmem:[%s15573_s0 + $0x2] ss:$2 sm:$0xff] }
 0x1fc   :  { %16014 = vst [vmem:[#allocation79_spill] sm:$0xff] %v9635_v50  ;;  %v9662_v24 = vperm.slane %v9651_v0, 4  ;;  %v979_v50 = vmul.f32 %v9273_v12, %v8992_v18 }
 0x1fd   :  { %v9637_v29 = vpop.permute.xlu1 %653  ;;  %v9639_v37 = vpop.permute.xlu2 %939 }
 0x1fe   :  { %16015 = vst [vmem:[#allocation80_spill] sm:$0xff] %v9639_v37  ;;  %v1263_v37 = vmul.f32 %v9662_v24, %v9262_v36 }
 0x201   :  { %1117 = vrot.lane.b32.xlu0 %v1095_v11, %s15725_s22 }
 0x203   :  { %887 = vrot.lane.b32.xlu1 %v864_v26, %s15731_s25  ;;  %989 = vrot.lane.b32.xlu2 %v973_v31, %s15729_s27  ;;  %v9655_v19 = vpop.permute.xlu0 %935  ;;  %v1037_v26 = vmul.f32 %v9200_v58, %v8992_v18  ;;  %s15743_s25 = smov 116  }
 0x204   :  { %16016 = vst [vmem:[#allocation81_spill] sm:$0xff] %v9655_v19 }
 0x205   :  { %v9657_v13 = vpop.permute.xlu1 %823  ;;  %v9659_v11 = vpop.permute.xlu2 %757 }
 0x206   :  { %16017 = vst [vmem:[#allocation82_spill] sm:$0xff] %v9657_v13  ;;  %v1089_v13 = vmul.f32 %v9303_v10, %v8996_v20 }
 0x207   :  { %16018 = vst [vmem:[#allocation83_spill] sm:$0xff] %v9659_v11 }
 0x209   :  { %1283 = vrot.lane.b32.xlu0 %v1263_v37, %s8812_s29  ;;  %v1151_v37 = vmul.f32 %v9219_v39, %v9016_v32  ;;  %v9700_v32 = vperm.slane %v9651_v0, 3 }
 0x20b   :  { %1001 = vrot.lane.b32.xlu1 %v979_v50, %s15729_s27  ;;  %1059 = vrot.lane.b32.xlu2 %v1037_v26, %s15727_s28  ;;  %v9673_v31 = vpop.permute.xlu0 %941  ;;  %v9691_v26 = vperm.slane %v9651_v0, 2 }
 0x20c   :  { %16019 = vst [vmem:[#allocation84_spill] sm:$0xff] %v9673_v31 }
 0x20d   :  { %v9675_v19 = vpop.permute.xlu1 %641  ;;  %v9677_v11 = vpop.permute.xlu2 %993 }
 0x20e   :  { %16020 = vst [vmem:[#allocation85_spill] sm:$0xff] %v9675_v19 }
 0x20f   :  { %16021 = vst [vmem:[#allocation86_spill] sm:$0xff] %v9677_v11 }
 0x211   :  { %1105 = vrot.lane.b32.xlu0 %v1089_v13, %s15725_s22  ;;  %v1318_v13 = vmul.f32 %v9322_v63, %v9691_v26 }
 0x213   :  { %1171 = vrot.lane.b32.xlu1 %v1151_v37, %s15723_s24  ;;  %1049 = vrot.lane.b32.xlu2 %v1032_v7, %s15727_s28  ;;  %v9688_v50 = vpop.permute.xlu0 %759  ;;  %v922_v7 = vmul.f32 %v9243_v14, %v9026_v38  ;;  %v1262_v37 = vmul.f32 %v9700_v32, %v9262_v36  ;;  %v974_v14 = vmul.f32 %v9273_v12, %v9006_v27 }
 0x214   :  { %16022 = vst [vmem:[#allocation87_spill] sm:$0xff] %v9688_v50  ;;  %v9712_v50 = vperm.slane %v9651_v0, 5  ;;  %v1031_v12 = vmul.f32 %v9200_v58, %v8996_v20 }
 0x215   :  { %v9693_v11 = vpop.permute.xlu1 %877  ;;  %v9695_v19 = vpop.permute.xlu2 %999 }
 0x216   :  { %16023 = vst [vmem:[#allocation88_spill] sm:$0xff] %v9693_v11 }
 0x217   :  { %16024 = vst [vmem:[#allocation89_spill] sm:$0xff] %v9695_v19 }
 0x219   :  { %1336 = vrot.lane.b32.xlu0 %v1318_v13, %s8813_s30  ;;  %v1321_v13 = vmul.f32 %v9322_v63, %v9712_v50 }
 0x21b   :  { %945 = vrot.lane.b32.xlu1 %v922_v7, %s15737_s26  ;;  %1281 = vrot.lane.b32.xlu2 %v1262_v37, %s8812_s29  ;;  %v9709_v11 = vpop.permute.xlu0 %995  ;;  %v1038_v7 = vmul.f32 %v9200_v58, %v9026_v38  ;;  %v1320_v58 = vmul.f32 %v9322_v63, %v9662_v24  ;;  %s15783_s26 = smov 114  }
 0x21c   :  { %16025 = vst [vmem:[#allocation90_spill] sm:$0xff] %v9709_v11 }
 0x21d   :  { %v9714_v40 = vpop.permute.xlu1 %883  ;;  %v9716_v52 = vpop.permute.xlu2 %817 }
 0x21e   :  { %16026 = vst [vmem:[#allocation91_spill] sm:$0xff] %v9714_v40 }
 0x21f   :  { %16027 = vst [vmem:[#allocation92_spill] sm:$0xff] %v9716_v52 }
 0x221   :  { %1342 = vrot.lane.b32.xlu0 %v1321_v13, %s8813_s30  ;;  %v1153_v13 = vmul.f32 %v9219_v39, %v8992_v18  ;;  %v1261_v18 = vmul.f32 %v9691_v26, %v9262_v36 }
 0x223   :  { %991 = vrot.lane.b32.xlu1 %v974_v14, %s15729_s27  ;;  %1061 = vrot.lane.b32.xlu2 %v1038_v7, %s15727_s28  ;;  %v9727_v37 = vpop.permute.xlu0 %771  ;;  %s15765_s27 = smov 86  }
 0x224   :  { %16028 = vst [vmem:[#allocation93_spill] sm:$0xff] %v9727_v37 }
 0x225   :  { %v9729_v11 = vpop.permute.xlu1 %701  ;;  %v9731_v52 = vpop.permute.xlu2 %1053 }
 0x226   :  { %16029 = vst [vmem:[#allocation94_spill] sm:$0xff] %v9729_v11  ;;  %v1434_v11 = vmul.f32 %v9337_v3, %v9662_v24 }
 0x227   :  { %16030 = vst [vmem:[#allocation95_spill] sm:$0xff] %v9731_v52  ;;  %v1377_v52 = vmul.f32 %v9234_v60, %v9662_v24  ;;  %v9797_v24 = vperm.slane %v9651_v0, 1 }
 0x229   :  { %1165 = vrot.lane.b32.xlu0 %v1148_v59, %s15723_s24 }
 0x22b   :  { %1047 = vrot.lane.b32.xlu1 %v1031_v12, %s15727_s28  ;;  %1175 = vrot.lane.b32.xlu2 %v1153_v13, %s15723_s24  ;;  %v9742_v14 = vpop.permute.xlu0 %885  ;;  %s15757_s28 = smov 56  }
 0x22c   :  { %16031 = vst [vmem:[#allocation96_spill] sm:$0xff] %v9742_v14 }
 0x22d   :  { %v9744_v7 = vpop.permute.xlu2 %829  ;;  %v9746_v37 = vpop.permute.xlu1 %937 }
 0x22e   :  { %16032 = vst [vmem:[#allocation97_spill] sm:$0xff] %v9744_v7  ;;  %v9764_v7 = vperm.slane %v9651_v0, 6 }
 0x22f   :  { %16033 = vst [vmem:[#allocation98_spill] sm:$0xff] %v9746_v37  ;;  %v1147_v37 = vmul.f32 %v9219_v39, %v8996_v20  ;;  %v1376_v20 = vmul.f32 %v9234_v60, %v9700_v32 }
 0x231   :  { %1397 = vrot.lane.b32.xlu0 %v1377_v52, %s8816_s14  ;;  %v1265_v52 = vmul.f32 %v9764_v7, %v9262_v36 }
 0x233   :  { %1340 = vrot.lane.b32.xlu2 %v1320_v58, %s8813_s30  ;;  %1279 = vrot.lane.b32.xlu1 %v1261_v18, %s8812_s29  ;;  %v9757_v59 = vpop.permute.xlu0 %1055  ;;  %v1264_v58 = vmul.f32 %v9712_v50, %v9262_v36 }
 0x234   :  { %16034 = vst [vmem:[#allocation99_spill] sm:$0xff] %v9757_v59 }
 0x235   :  { %v9759_v12 = vpop.permute.xlu2 %943  ;;  %v9761_v13 = vpop.permute.xlu1 %713 }
 0x236   :  { %16035 = vst [vmem:[#allocation100_spill] sm:$0xff] %v9759_v12 }
 0x237   :  { %16036 = vst [vmem:[#allocation101_spill] sm:$0xff] %v9761_v13 }
 0x239   :  { %1287 = vrot.lane.b32.xlu0 %v1265_v52, %s8812_s29  ;;  %v1090_v52 = vmul.f32 %v9303_v10, %v9006_v27  ;;  %v1154_v27 = vmul.f32 %v9219_v39, %v9026_v38  ;;  %v9820_v39 = vperm.slane %v9651_v0, 7 }
 0x23b   :  { %1163 = vrot.lane.b32.xlu2 %v1147_v37, %s15723_s24  ;;  %1285 = vrot.lane.b32.xlu1 %v1264_v58, %s8812_s29  ;;  %v9775_v18 = vpop.permute.xlu0 %873 }
 0x23c   :  { %16037 = vst [vmem:[#allocation102_spill] sm:$0xff] %v9775_v18 }
 0x23d   :  { %v9777_v59 = vpop.permute.xlu2 %1113  ;;  %v9779_v13 = vpop.permute.xlu1 %827 }
 0x23e   :  { %16038 = vst [vmem:[#allocation103_spill] sm:$0xff] %v9777_v59 }
 0x23f   :  { %16039 = vst [vmem:[#allocation104_spill] sm:$0xff] %v9779_v13 }
 0x241   :  { %1454 = vrot.lane.b32.xlu0 %v1434_v11, %s8820_s15  ;;  %v1260_v11 = vmul.f32 %v9797_v24, %v9262_v36 }
 0x243   :  { %1395 = vrot.lane.b32.xlu2 %v1376_v20, %s8816_s14  ;;  %1107 = vrot.lane.b32.xlu1 %v1090_v52, %s15725_s22  ;;  %v9790_v37 = vpop.permute.xlu0 %1109  ;;  %v1319_v20 = vmul.f32 %v9322_v63, %v9700_v32 }
 0x244   :  { %16040 = vst [vmem:[#allocation105_spill] sm:$0xff] %v9790_v37  ;;  %v9813_v37 = vld [vmem:[%s15573_s0] ss:$2 sm:$0xff] }
 0x245   :  { %v9792_v58 = vpop.permute.xlu1 %997  ;;  %v9794_v59 = vpop.permute.xlu2 %931  ;;  %v58_v18 = vperm.slane %v9813_v37, 5 }
 0x246   :  { %16041 = vst [vmem:[#allocation106_spill] sm:$0xff] %v9792_v58  ;;  %v1096_v58 = vmul.f32 %v9303_v10, %v9026_v38 }
 0x247   :  { %16042 = vst [vmem:[#allocation107_spill] sm:$0xff] %v9794_v59 }
 0x249   :  { %1277 = vrot.lane.b32.xlu0 %v1260_v11, %s8812_s29 }
 0x24b   :  { %1177 = vrot.lane.b32.xlu2 %v1154_v27, %s15723_s24  ;;  %1338 = vrot.lane.b32.xlu1 %v1319_v20, %s8813_s30  ;;  %v9808_v52 = vpop.permute.xlu0 %1115  ;;  %v1266_v27 = vmul.f32 %v9820_v39, %v9262_v36  ;;  %v1433_v20 = vmul.f32 %v9337_v3, %v9700_v32  ;;  %v199_v32 = vsel %vm193_vm1, %v9153_v23, %v9183_v21  ;;  %s15771_s24 = smov 98  }
 0x24c   :  { %16043 = vst [vmem:[#allocation108_spill] sm:$0xff] %v9808_v52 }
 0x24d   :  { %v9815_v59 = vpop.permute.xlu1 %815  ;;  %v9817_v11 = vpop.permute.xlu2 %1167 }
 0x24e   :  { %16044 = vst [vmem:[#allocation109_spill] sm:$0xff] %v9815_v59  ;;  %v72_v59 = vmul.f32 %v58_v18, %v8987_v16  ;;  %v257_v18 = vsel %vm15718_vm2, %v9185_v22, %v9228_v46 }
 0x24f   :  { %16045 = vst [vmem:[#allocation110_spill] sm:$0xff] %v9817_v11  ;;  %v141_v11 = vsel %vm135_vm0, %v9126_v48, %v9139_v55 }
 0x251   :  { %1289 = vrot.lane.b32.xlu0 %v1266_v27, %s8812_s29  ;;  %v155_v27 = vadd.f32 %v141_v11, %v72_v59  ;;  %v315_v59 = vsel %vm15717_vm3, %v9264_v51, %v9309_v17 }
 0x253   :  { %1452 = vrot.lane.b32.xlu2 %v1433_v20, %s8820_s15  ;;  %1119 = vrot.lane.b32.xlu1 %v1096_v58, %s15725_s22  ;;  %v9836_v9 = vpop.permute.xlu0 %933  ;;  %v213_v48 = vadd.f32 %v199_v32, %v155_v27  ;;  %v1379_v58 = vmul.f32 %v9234_v60, %v9764_v7  ;;  %v9851_v20 = vperm.slane %v9651_v0, 0  ;;  %v373_v27 = vsel %vm367_vm4, %v9307_v6, %v9365_v54  ;;  %s15739_s22 = smov 122  }
 0x254   :  { %16046 = vst [vmem:[#allocation111_spill] sm:$0xff] %v9836_v9 }
 0x255   :  { %v9841_v10 = vpop.permute.xlu1 %1051  ;;  %v9843_v38 = vpop.permute.xlu2 %1173  ;;  %v271_v11 = vadd.f32 %v257_v18, %v213_v48  ;;  %v1259_v32 = vmul.f32 %v9851_v20, %v9262_v36  ;;  %v431_v18 = vsel %vm425_vm5, %v9399_v4, %v9382_v5 }
 0x256   :  { %16047 = vst [vmem:[#allocation112_spill] sm:$0xff] %v9841_v10  ;;  %v1375_v10 = vmul.f32 %v9234_v60, %v9691_v26 }
 0x257   :  { %16048 = vst [vmem:[#allocation113_spill] sm:$0xff] %v9843_v38  ;;  %v329_v0 = vadd.f32 %v315_v59, %v271_v11  ;;  %v489_v59 = vsel %vm483_vm6, %v9350_v15, %v9517_v47 }
 0x259   :  { %1401 = vrot.lane.b32.xlu0 %v1379_v58, %s8816_s14  ;;  %v387_v58 = vadd.f32 %v373_v27, %v329_v0  ;;  %v1378_v27 = vmul.f32 %v9234_v60, %v9712_v50 }
 0x25b   :  { %1393 = vrot.lane.b32.xlu1 %v1375_v10, %s8816_s14  ;;  %1275 = vrot.lane.b32.xlu2 %v1259_v32, %s8812_s29  ;;  %v9866_v48 = vpop.permute.xlu0 %1169  ;;  %v445_v11 = vadd.f32 %v431_v18, %v387_v58  ;;  %v1374_v10 = vmul.f32 %v9234_v60, %v9797_v24  ;;  %v1483_v32 = vld [vmem:[%s15575_s2] sm:$0x3f]  ;;  %v547_v18 = vsel %vm541_vm7, %v9457_v28, %v9485_v43 }
 0x25c   :  { %16049 = vst [vmem:[#allocation114_spill] sm:$0xff] %v9866_v48 }
 0x25d   :  { %v9871_v9 = vpop.permute.xlu1 %1057  ;;  %v9873_v36 = vpop.permute.xlu2 %989  ;;  %v503_v48 = vadd.f32 %v489_v59, %v445_v11  ;;  %v1430_v59 = vmul.f32 %v9337_v3, %v9851_v20  ;;  %v605_v11 = vsel %vm599_vm8, %v9425_v56, %v9504_v35  ;;  %v16055_v56 = vmov 2  }
 0x25e   :  { %16050 = vst [vmem:[#allocation115_spill] sm:$0xff] %v9871_v9 }
 0x25f   :  { %16051 = vst [vmem:[#allocation116_spill] sm:$0xff] %v9873_v36  ;;  %v561_v58 = vadd.f32 %v547_v18, %v503_v48  ;;  %v1432_v48 = vmul.f32 %v9337_v3, %v9691_v26  ;;  %v721_v26 = vsel %vm15722_vm10, %v9578_v34, %v9606_v44  ;;  %v253_v34 = vsel %vm15718_vm2, %v9245_v25, %v9170_v45 }
 0x261   :  { %1391 = vrot.lane.b32.xlu0 %v1374_v10, %s8816_s14  ;;  %v663_v10 = vsel %vm15721_vm9, %v9444_v8, %v9637_v29 }
 0x263   :  { %1399 = vrot.lane.b32.xlu1 %v1378_v27, %s8816_s14  ;;  %1486 = vperm.xlu2 %8688, %v1483_v32   ;;  %v9887_v0 = vpop.permute.xlu0 %1204  ;;  %v619_v32 = vadd.f32 %v605_v11, %v561_v58  ;;  %v1317_v27 = vmul.f32 %v9322_v63, %v9797_v24  ;;  %v1435_v11 = vmul.f32 %v9337_v3, %v9712_v50 }
 0x264   :  { %16052 = vst [vmem:[#allocation117_spill] sm:$0xff] %v9887_v0 }
 0x265   :  { %v9892_v36 = vpop.permute.xlu1 %875  ;;  %v9894_v4 = vpop.permute.xlu2 %1059  ;;  %v677_v18 = vadd.f32 %v663_v10, %v619_v32  ;;  %v1373_v10 = vmul.f32 %v9234_v60, %v9851_v20  ;;  %v837_v32 = vsel %vm831_vm12, %v9565_v2, %v9779_v13  ;;  %v195_v2 = vsel %vm193_vm1, %v9202_v62, %v9137_v53 }
 0x266   :  { %16053 = vst [vmem:[#allocation118_spill] sm:$0xff] %v9894_v4 }
 0x269   :  { %1446 = vrot.lane.b32.xlu0 %v1430_v59, %s8820_s15  ;;  %v735_v59 = vadd.f32 %v721_v26, %v677_v18 }
 0x26b   :  { %1450 = vrot.lane.b32.xlu1 %v1432_v48, %s8820_s15  ;;  %1334 = vrot.lane.b32.xlu2 %v1317_v27, %s8813_s30  ;;  %v9911_v28 = vpop.permute.xlu0 %1003 }
 0x26c   :  { %16054 = vst [vmem:[#allocation119_spill] sm:$0xff] %v9911_v28  ;;  %8720 = vset.pattern.permute.xlu2 %v16055_v56  ;;  %v779_v56 = vsel %vm773_vm11, %v9545_v61, %v9623_v57  ;;  %v895_v61 = vsel %vm15685_vm13, %v9714_v40, %v9742_v14  ;;  %vm15690_vm13 = vcmask 244736   ;;  %v1316_v40 = vmul.f32 %v9322_v63, %v9851_v20  ;;  %v16095_v57 = vld [vmem:[#allocation48_spill] sm:$0xff] }
 0x26d   :  { %v9914_v8 = vpop.permute.xlu1 %1111  ;;  %v9916_v58 = vpop.permute.xlu2 %1049  ;;  %v793_v48 = vadd.f32 %v779_v56, %v735_v59  ;;  %v1322_v59 = vmul.f32 %v9322_v63, %v9764_v7  ;;  %v953_v56 = vsel %vm947_vm14, %v9673_v31, %v9759_v12  ;;  %v1069_v31 = vsel %vm15690_vm13, %v9871_v9, %v9894_v4  ;;  %v16071_v12 = vld [vmem:[#allocation27_spill] sm:$0xff] }
 0x26e   :  { %16056 = vst [vmem:[#allocation120_spill] sm:$0xff] %v9914_v8  ;;  %vm1121_vm13 = vcmask 236544   ;;  %v16096_v8 = vld [vmem:[#allocation44_spill] sm:$0xff] }
 0x26f   :  { %16057 = vst [vmem:[#allocation121_spill] sm:$0xff] %v9916_v58  ;;  %v851_v18 = vadd.f32 %v837_v32, %v793_v48 }
 0x271   :  { %v909_v28 = vadd.f32 %v895_v61, %v851_v18  ;;  %v54_v18 = vperm.slane %v9813_v37, 1 }
 0x273   :  { %1456 = vrot.lane.b32.xlu1 %v1435_v11, %s8820_s15  ;;  %1389 = vrot.lane.b32.xlu2 %v1373_v10, %s8816_s14  ;;  %v9933_v27 = vpop.permute.xlu0 %1117  ;;  %v1380_v11 = vmul.f32 %v9234_v60, %v9820_v39  ;;  %v967_v61 = vadd.f32 %v953_v56, %v909_v28  ;;  %v9968_v28 = vld [vmem:[%s15573_s0 + $0x2] ss:$2 sm:$0xff]  ;;  %v68_v9 = vmul.f32 %v54_v18, %v8987_v16 }
 0x274   :  { %16058 = vst [vmem:[#allocation122_spill] sm:$0xff] %v9933_v27  ;;  %v1127_v18 = vsel %vm1121_vm13, %v9808_v52, %v9933_v27 }
 0x275   :  { %v9935_v50 = vpop.permute.xlu1 %887  ;;  %v9937_v26 = vpop.permute.xlu2 %1281  ;;  %16064 = vst [vmem:[#allocation128_spill] sm:$0xff] %v9968_v28 }
 0x276   :  { %16059 = vst [vmem:[#allocation123_spill] sm:$0xff] %v9935_v50 }
 0x277   :  { %16060 = vst [vmem:[#allocation124_spill] sm:$0xff] %v9937_v26 }
 0x27b   :  { %1344 = vrot.lane.b32.xlu1 %v1322_v59, %s8813_s30  ;;  %1403 = vrot.lane.b32.xlu2 %v1380_v11, %s8816_s14  ;;  %v9948_v10 = vpop.permute.xlu0 %1283  ;;  %v56_v11 = vperm.slane %v9813_v37, 3 }
 0x27c   :  { %16061 = vst [vmem:[#allocation125_spill] sm:$0xff] %v9948_v10  ;;  %v16070_v10 = vld [vmem:[#allocation17_spill] sm:$0xff] }
 0x27d   :  { %v9953_v32 = vpop.permute.xlu1 %1001  ;;  %v9955_v48 = vpop.permute.xlu2 %1061  ;;  %v70_v20 = vmul.f32 %v56_v11, %v8987_v16  ;;  %v311_v14 = vsel %vm15717_vm3, %v16071_v12, %v16070_v10 }
 0x27e   :  { %16062 = vst [vmem:[#allocation126_spill] sm:$0xff] %v9953_v32  ;;  %v1011_v60 = vsel %vm15693_vm15, %v9695_v19, %v9953_v32  ;;  %v1437_v19 = vmul.f32 %v9337_v3, %v9820_v39  ;;  %vm1179_vm15 = vcmask 228352   ;;  %v197_v32 = vsel %vm193_vm1, %v9168_v42, %v9215_v1 }
 0x27f   :  { %16063 = vst [vmem:[#allocation127_spill] sm:$0xff] %v9955_v48  ;;  %v1025_v59 = vadd.f32 %v1011_v60, %v967_v61  ;;  %v1213_v61 = vperm.slane %v9968_v28, 5  ;;  %v137_v60 = vsel %vm135_vm0, %v9157_v30, %v9101_v33 }
 0x280   :  { %v151_v4 = vadd.f32 %v137_v60, %v68_v9  ;;  %v53_v60 = vperm.slane %v9813_v37, 0 }
 0x281   :  { %v1083_v56 = vadd.f32 %v1069_v31, %v1025_v59  ;;  %v139_v59 = vsel %vm135_vm0, %v9113_v41, %v9172_v49  ;;  %v1227_v11 = vmul.f32 %v1213_v61, %v9887_v0  ;;  %v1323_v0 = vmul.f32 %v9322_v63, %v9820_v39  ;;  %v16078_v63 = vld [vmem:[#allocation12_spill] sm:$0xff] }
 0x282   :  { %v153_v52 = vadd.f32 %v139_v59, %v70_v20  ;;  %v209_v27 = vadd.f32 %v195_v2, %v151_v4  ;;  %v16074_v2 = vld [vmem:[#allocation28_spill] sm:$0xff]  ;;  %v16076_v59 = vld [vmem:[#allocation22_spill] sm:$0xff]  ;;  %v194_v39 = vsel %vm193_vm1, %v16078_v63, %v9202_v62  ;;  %v59_v63 = vperm.slane %v9813_v37, 6 }
 0x283   :  { %1332 = vrot.lane.b32.xlu1 %v1316_v40, %s8813_s30  ;;  %1460 = vrot.lane.b32.xlu2 %v1437_v19, %s8820_s15  ;;  %v9981_v31 = vpop.permute.xlu0 %1105  ;;  %v1141_v48 = vadd.f32 %v1127_v18, %v1083_v56  ;;  %v16068_v56 = vld [vmem:[#allocation18_spill] sm:$0xff]  ;;  %v16069_v18 = vld [vmem:[#allocation15_spill] sm:$0xff] }
 0x284   :  { %16065 = vst [vmem:[#allocation129_spill] sm:$0xff] %v9981_v31  ;;  %v255_v61 = vsel %vm15718_vm2, %v16069_v18, %v16068_v56  ;;  %v211_v50 = vadd.f32 %v197_v32, %v153_v52  ;;  %v267_v31 = vadd.f32 %v253_v34, %v209_v27  ;;  %v67_v52 = vmul.f32 %v53_v60, %v8987_v16 }
 0x285   :  { %v9993_v40 = vpop.permute.xlu1 %1171  ;;  %v9995_v19 = vpop.permute.xlu2 %1175 }
 0x286   :  { %16066 = vst [vmem:[#allocation130_spill] sm:$0xff] %v9993_v40  ;;  %v1185_v9 = vsel %vm1179_vm15, %v9843_v38, %v9995_v19  ;;  %v16073_v38 = vld [vmem:[#allocation11_spill] sm:$0xff]  ;;  %v269_v34 = vadd.f32 %v255_v61, %v211_v50  ;;  %v325_v27 = vadd.f32 %v311_v14, %v267_v31  ;;  %v16084_v14 = vld [vmem:[#allocation14_spill] sm:$0xff]  ;;  %v55_v50 = vperm.slane %v9813_v37, 2 }
 0x287   :  { %16067 = vst [vmem:[#allocation131_spill] sm:$0xff] %v9995_v19  ;;  %v1199_v26 = vadd.f32 %v1185_v9, %v1141_v48  ;;  %v136_v4 = vsel %vm135_vm0, %v16073_v38, %v9157_v30  ;;  %v16075_v48 = vld [vmem:[#allocation19_spill] sm:$0xff]  ;;  %v16077_v9 = vld [vmem:[#allocation50_spill] sm:$0xff]  ;;  %v57_v61 = vperm.slane %v9813_v37, 4 }
 0x288   :  { %v313_v20 = vsel %vm15717_vm3, %v16075_v48, %v16074_v2  ;;  %v369_v19 = vsel %vm367_vm4, %v16077_v9, %v16076_v59  ;;  %v16080_v30 = vld [vmem:[#allocation31_spill] sm:$0xff] }
 0x289   :  { %v10016_v13 = vadd.f32 %v1227_v11, %v1199_v26  ;;  %v16079_v26 = vld [vmem:[#allocation20_spill] sm:$0xff]  ;;  %v150_v11 = vadd.f32 %v136_v4, %v67_v52  ;;  %v383_v58 = vadd.f32 %v369_v19, %v325_v27  ;;  %v16085_v4 = vld [vmem:[#allocation41_spill] sm:$0xff]  ;;  %v16087_v52 = vld [vmem:[#allocation43_spill] sm:$0xff] }
 0x28a   :  { %v371_v38 = vsel %vm367_vm4, %v16080_v30, %v16079_v26  ;;  %v310_v19 = vsel %vm15717_vm3, %v16085_v4, %v16071_v12  ;;  %v16092_v4 = vld [vmem:[#allocation34_spill] sm:$0xff] }
 0x28b   :  { %16072 = vst [vmem:[#allocation18_spill] sm:$0xff] %v10016_v13  ;;  %1346 = vrot.lane.b32.xlu1 %v1323_v0, %s8813_s30  ;;  %v10035_v32 = vpop.permute.xlu0 %1336  ;;  %v327_v13 = vadd.f32 %v313_v20, %v269_v34  ;;  %v252_v0 = vsel %vm15718_vm2, %v16084_v14, %v9245_v25  ;;  %v208_v62 = vadd.f32 %v194_v39, %v150_v11  ;;  %v16086_v20 = vld [vmem:[#allocation33_spill] sm:$0xff]  ;;  %v16088_v39 = vld [vmem:[#allocation24_spill] sm:$0xff]  ;;  %v16091_v14 = vld [vmem:[#allocation39_spill] sm:$0xff] }
 0x28c   :  { %16081 = vst [vmem:[#allocation15_spill] sm:$0xff] %v10035_v32  ;;  %v427_v34 = vsel %vm425_vm5, %v16087_v52, %v16086_v20  ;;  %v1436_v25 = vmul.f32 %v9337_v3, %v9764_v7  ;;  %v16090_v11 = vld [vmem:[#allocation25_spill] sm:$0xff] }
 0x28d   :  { %v10037_v40 = vpop.permute.xlu1 %945  ;;  %v10039_v60 = vpop.permute.xlu2 %1340  ;;  %v385_v31 = vadd.f32 %v371_v38, %v327_v13  ;;  %v266_v27 = vadd.f32 %v252_v0, %v208_v62  ;;  %v441_v32 = vadd.f32 %v427_v34, %v383_v58  ;;  %v138_v13 = vsel %vm135_vm0, %v9101_v33, %v9113_v41  ;;  %v16089_v38 = vld [vmem:[#allocation23_spill] sm:$0xff]  ;;  %v16093_v62 = vld [vmem:[#allocation13_spill] sm:$0xff] }
 0x28e   :  { %16082 = vst [vmem:[#allocation17_spill] sm:$0xff] %v10037_v40  ;;  %v429_v37 = vsel %vm425_vm5, %v16089_v38, %v16088_v39  ;;  %v487_v12 = vsel %vm483_vm6, %v16091_v14, %v16090_v11  ;;  %v368_v0 = vsel %vm367_vm4, %v16092_v4, %v16077_v9  ;;  %v69_v58 = vmul.f32 %v55_v50, %v8987_v16  ;;  %v16094_v40 = vld [vmem:[#allocation26_spill] sm:$0xff]  ;;  %v16097_v9 = vld [vmem:[#allocation71_spill] sm:$0xff] }
 0x28f   :  { %16083 = vst [vmem:[#allocation27_spill] sm:$0xff] %v10039_v60  ;;  %v142_v7 = vsel %vm135_vm0, %v9139_v55, %v16093_v62  ;;  %v443_v34 = vadd.f32 %v429_v37, %v385_v31  ;;  %v324_v33 = vadd.f32 %v310_v19, %v266_v27  ;;  %v71_v41 = vmul.f32 %v57_v61, %v8987_v16  ;;  %v16098_v27 = vld [vmem:[#allocation10_spill] sm:$0xff]  ;;  %v16100_v37 = vld [vmem:[#allocation21_spill] sm:$0xff] }
 0x290   :  { %v73_v60 = vmul.f32 %v59_v63, %v8987_v16  ;;  %v485_v28 = vsel %vm483_vm6, %v16095_v57, %v16094_v40  ;;  %v543_v50 = vsel %vm541_vm7, %v16097_v9, %v16096_v8  ;;  %v152_v4 = vadd.f32 %v138_v13, %v69_v58 }
 0x291   :  { %v501_v39 = vadd.f32 %v487_v12, %v443_v34  ;;  %v382_v44 = vadd.f32 %v368_v0, %v324_v33  ;;  %v499_v55 = vadd.f32 %v485_v28, %v441_v32  ;;  %v140_v16 = vsel %vm135_vm0, %v9172_v49, %v16098_v27  ;;  %v16109_v27 = vld [vmem:[#allocation59_spill] sm:$0xff] }
 0x292   :  { %v196_v61 = vsel %vm193_vm1, %v9137_v53, %v9168_v42  ;;  %v156_v63 = vadd.f32 %v142_v7, %v73_v60  ;;  %v198_v28 = vsel %vm193_vm1, %v9215_v1, %v9153_v23  ;;  %v254_v32 = vsel %vm15718_vm2, %v9170_v45, %v16069_v18  ;;  %v16102_v53 = vld [vmem:[#allocation32_spill] sm:$0xff]  ;;  %v16103_v42 = vld [vmem:[#allocation29_spill] sm:$0xff]  ;;  %v16105_v1 = vld [vmem:[#allocation35_spill] sm:$0xff] }
 0x293   :  { %1458 = vrot.lane.b32.xlu1 %v1436_v25, %s8820_s15  ;;  %v16099_v25 = vld [vmem:[#allocation16_spill] sm:$0xff]  ;;  %v258_v49 = vsel %vm15718_vm2, %v9228_v46, %v16100_v37  ;;  %v557_v12 = vadd.f32 %v543_v50, %v499_v55  ;;  %v10102_v0 = vpop.permute.xlu0 %1342  ;;  %v545_v60 = vsel %vm541_vm7, %v16103_v42, %v16102_v53  ;;  %v16107_v45 = vld [vmem:[#allocation62_spill] sm:$0xff]  ;;  %v1431_v33 = vmul.f32 %v9337_v3, %v9797_v24  ;;  %v16111_v37 = vld [vmem:[#allocation37_spill] sm:$0xff] }
 0x294   :  { %v200_v13 = vsel %vm193_vm1, %v9183_v21, %v16099_v25  ;;  %16101 = vst [vmem:[#allocation11_spill] sm:$0xff] %v10102_v0  ;;  %v16104_v21 = vld [vmem:[#allocation38_spill] sm:$0xff]  ;;  %v16106_v23 = vld [vmem:[#allocation52_spill] sm:$0xff]  ;;  %v484_v18 = vsel %vm483_vm6, %v16107_v45, %v16095_v57  ;;  %v559_v7 = vadd.f32 %v545_v60, %v501_v39  ;;  %v154_v24 = vadd.f32 %v140_v16, %v71_v41  ;;  %v16114_v60 = vld [vmem:[#allocation55_spill] sm:$0xff] }
 0x295   :  { %v10080_v31 = vpop.permute.xlu1 %991  ;;  %v10082_v19 = vpop.permute.xlu2 %1163  ;;  %v426_v58 = vsel %vm425_vm5, %v16104_v21, %v16087_v52  ;;  %v603_v62 = vsel %vm599_vm8, %v16106_v23, %v16105_v1  ;;  %v214_v46 = vadd.f32 %v200_v13, %v156_v63  ;;  %v16108_v50 = vld [vmem:[#allocation30_spill] sm:$0xff]  ;;  %v16112_v21 = vld [vmem:[#allocation64_spill] sm:$0xff]  ;;  %v312_v16 = vsel %vm15717_vm3, %v16070_v10, %v16075_v48 }
 0x296   :  { %v440_v34 = vadd.f32 %v426_v58, %v382_v44  ;;  %v316_v55 = vsel %vm15717_vm3, %v9309_v17, %v16108_v50  ;;  %v16110_v52 = vld [vmem:[#allocation46_spill] sm:$0xff]  ;;  %v601_v0 = vsel %vm599_vm8, %v16112_v21, %v16111_v37  ;;  %v16113_v57 = vld [vmem:[#allocation56_spill] sm:$0xff]  ;;  %v617_v63 = vadd.f32 %v603_v62, %v559_v7 }
 0x297   :  { %v661_v25 = vsel %vm15721_vm9, %v16110_v52, %v16109_v27  ;;  %v542_v39 = vsel %vm541_vm7, %v16113_v57, %v16097_v9  ;;  %v272_v44 = vadd.f32 %v258_v49, %v214_v46  ;;  %v615_v3 = vadd.f32 %v601_v0, %v557_v12  ;;  %v16115_v62 = vld [vmem:[#allocation42_spill] sm:$0xff]  ;;  %v16117_v0 = vld [vmem:[#allocation65_spill] sm:$0xff] }
 0x298   :  { %v498_v13 = vadd.f32 %v484_v18, %v440_v34  ;;  %v210_v17 = vadd.f32 %v196_v61, %v152_v4  ;;  %v374_v58 = vsel %vm367_vm4, %v9365_v54, %v16114_v60  ;;  %v675_v50 = vadd.f32 %v661_v25, %v617_v63  ;;  %v16116_v18 = vld [vmem:[#allocation69_spill] sm:$0xff]  ;;  %v16118_v41 = vld [vmem:[#allocation94_spill] sm:$0xff]  ;;  %v16121_v34 = vld [vmem:[#allocation60_spill] sm:$0xff] }
 0x299   :  { %v330_v45 = vadd.f32 %v316_v55, %v272_v44  ;;  %v212_v9 = vadd.f32 %v198_v28, %v154_v24  ;;  %v659_v12 = vsel %vm15721_vm9, %v16116_v18, %v16115_v62  ;;  %v717_v4 = vsel %vm15722_vm10, %v16118_v41, %v16117_v0  ;;  %v16119_v28 = vld [vmem:[#allocation54_spill] sm:$0xff]  ;;  %v16122_v55 = vld [vmem:[#allocation57_spill] sm:$0xff]  ;;  %v16128_v60 = vld [vmem:[#allocation67_spill] sm:$0xff] }
 0x29a   :  { %v556_v27 = vadd.f32 %v542_v39, %v498_v13  ;;  %v268_v49 = vadd.f32 %v254_v32, %v210_v17  ;;  %v256_v54 = vsel %vm15718_vm2, %v16068_v56, %v9185_v22  ;;  %v673_v46 = vadd.f32 %v659_v12, %v615_v3  ;;  %v16120_v32 = vld [vmem:[#allocation51_spill] sm:$0xff]  ;;  %v16123_v25 = vld [vmem:[#allocation74_spill] sm:$0xff]  ;;  %v16124_v22 = vld [vmem:[#allocation85_spill] sm:$0xff] }
 0x29b   :  { %1448 = vrot.lane.b32.xlu1 %v1431_v33, %s8820_s15  ;;  %v388_v61 = vadd.f32 %v374_v58, %v330_v45  ;;  %v719_v7 = vsel %vm15722_vm10, %v16120_v32, %v16119_v28  ;;  %v600_v33 = vsel %vm599_vm8, %v16121_v34, %v16112_v21  ;;  %v777_v57 = vsel %vm773_vm11, %v16123_v25, %v16122_v55  ;;  %v10165_v63 = vpop.permute.xlu0 %1165  ;;  %v16125_v13 = vld [vmem:[#allocation49_spill] sm:$0xff]  ;;  %v16127_v17 = vld [vmem:[#allocation82_spill] sm:$0xff]  ;;  %v16129_v45 = vld [vmem:[#allocation79_spill] sm:$0xff] }
 0x29c   :  { %v658_v56 = vsel %vm15721_vm9, %v16124_v22, %v16116_v18  ;;  %v314_v10 = vsel %vm15717_vm3, %v16074_v2, %v9264_v51  ;;  %v733_v48 = vadd.f32 %v719_v7, %v675_v50  ;;  %v614_v39 = vadd.f32 %v600_v33, %v556_v27  ;;  %v16126_v3 = vld [vmem:[#allocation53_spill] sm:$0xff]  ;;  %v16132_v7 = vld [vmem:[#allocation87_spill] sm:$0xff] }
 0x29d   :  { %v10134_v1 = vpop.permute.xlu1 %1047  ;;  %v10136_v52 = vpop.permute.xlu2 %1395  ;;  %v731_v44 = vadd.f32 %v717_v4, %v673_v46  ;;  %v432_v21 = vsel %vm425_vm5, %v9382_v5, %v16125_v13  ;;  %v490_v24 = vsel %vm483_vm6, %v9517_v47, %v16126_v3  ;;  %v835_v58 = vsel %vm831_vm12, %v16128_v60, %v16127_v17  ;;  %v16130_v4 = vld [vmem:[#allocation77_spill] sm:$0xff]  ;;  %v16131_v46 = vld [vmem:[#allocation58_spill] sm:$0xff] }
 0x29e   :  { %v716_v51 = vsel %vm15722_vm10, %v16129_v45, %v16118_v41  ;;  %v370_v2 = vsel %vm367_vm4, %v16076_v59, %v16080_v30  ;;  %v446_v27 = vadd.f32 %v432_v21, %v388_v61  ;;  %v791_v50 = vadd.f32 %v777_v57, %v733_v48  ;;  %v16137_v57 = vld [vmem:[#allocation83_spill] sm:$0xff]  ;;  %v16141_v21 = vld [vmem:[#allocation98_spill] sm:$0xff] }
 0x29f   :  { %v672_v18 = vadd.f32 %v658_v56, %v614_v39  ;;  %v270_v5 = vadd.f32 %v256_v54, %v212_v9  ;;  %v326_v12 = vadd.f32 %v312_v16, %v268_v49  ;;  %v548_v47 = vsel %vm541_vm7, %v9485_v43, %v16130_v4  ;;  %v16134_v49 = vld [vmem:[#allocation76_spill] sm:$0xff]  ;;  %v16138_v48 = vld [vmem:[#allocation63_spill] sm:$0xff] }
 0x2a0   :  { %v775_v34 = vsel %vm773_vm11, %v16132_v7, %v16131_v46  ;;  %v504_v33 = vadd.f32 %v490_v24, %v446_v27  ;;  %v849_v22 = vadd.f32 %v835_v58, %v791_v50  ;;  %v428_v9 = vsel %vm425_vm5, %v16086_v20, %v16089_v38  ;;  %v16135_v43 = vld [vmem:[#allocation72_spill] sm:$0xff]  ;;  %v16142_v58 = vld [vmem:[#allocation109_spill] sm:$0xff] }
 0x2a1   :  { %v730_v41 = vadd.f32 %v716_v51, %v672_v18  ;;  %v789_v13 = vadd.f32 %v775_v34, %v731_v44  ;;  %v328_v59 = vadd.f32 %v314_v10, %v270_v5  ;;  %v384_v30 = vadd.f32 %v370_v2, %v326_v12  ;;  %v16139_v39 = vld [vmem:[#allocation92_spill] sm:$0xff]  ;;  %v16144_v18 = vld [vmem:[#allocation70_spill] sm:$0xff]  ;;  %v16145_v12 = vld [vmem:[#allocation75_spill] sm:$0xff] }
 0x2a2   :  { %vm16136_vm3 = vcmask 490496   ;;  %v562_v16 = vadd.f32 %v548_v47, %v504_v33  ;;  %v774_v56 = vsel %vm773_vm11, %v16137_v57, %v16132_v7  ;;  %v833_v10 = vsel %vm831_vm12, %v16139_v39, %v16138_v48  ;;  %v16140_v44 = vld [vmem:[#allocation80_spill] sm:$0xff]  ;;  %v16146_v47 = vld [vmem:[#allocation106_spill] sm:$0xff] }
 0x2a3   :  { %v893_v54 = vsel %vm16136_vm3, %v16135_v43, %v16134_v49  ;;  %v951_v24 = vsel %vm947_vm14, %v16141_v21, %v16140_v44  ;;  %v832_v20 = vsel %vm831_vm12, %v16142_v58, %v16139_v39  ;;  %v16143_v38 = vld [vmem:[#allocation88_spill] sm:$0xff]  ;;  %v486_v51 = vsel %vm483_vm6, %v16094_v40, %v16091_v14  ;;  %v16147_v7 = vld [vmem:[#allocation90_spill] sm:$0xff]  ;;  %v16151_v39 = vld [vmem:[#allocation73_spill] sm:$0xff] }
 0x2a4   :  { %v891_v45 = vsel %vm16136_vm3, %v9892_v36, %v16143_v38  ;;  %v907_v2 = vadd.f32 %v893_v54, %v849_v22  ;;  %v788_v27 = vadd.f32 %v774_v56, %v730_v41  ;;  %v847_v50 = vadd.f32 %v833_v10, %v789_v13  ;;  %v16149_v33 = vld [vmem:[#allocation102_spill] sm:$0xff]  ;;  %v10228_v13 = vpop.permute.xlu0 %1397  ;;  %v16150_v56 = vld [vmem:[#allocation101_spill] sm:$0xff] }
 0x2a5   :  { %v10188_v3 = vpop.permute.xlu1 %1279  ;;  %v10190_v61 = vpop.permute.xlu2 %1177  ;;  %v606_v5 = vsel %vm599_vm8, %v9504_v35, %v16144_v18  ;;  %v664_v4 = vsel %vm15721_vm9, %v9637_v29, %v16145_v12  ;;  %vm16148_vm2 = vcmask 252928   ;;  %v890_v57 = vsel %vm16136_vm3, %v16149_v33, %v9892_v36  ;;  %v16159_v18 = vld [vmem:[#allocation95_spill] sm:$0xff] }
 0x2a6   :  { %16133 = vst [vmem:[#allocation28_spill] sm:$0xff] %v10188_v3  ;;  %v1009_v34 = vsel %vm16148_vm2, %v16147_v7, %v16146_v47  ;;  %v620_v40 = vadd.f32 %v606_v5, %v562_v16  ;;  %v965_v14 = vadd.f32 %v951_v24, %v907_v2  ;;  %v846_v22 = vadd.f32 %v832_v20, %v788_v27  ;;  %v16154_v2 = vld [vmem:[#allocation24_spill] sm:$0xff]  ;;  %v16162_v33 = vld [vmem:[#allocation103_spill] sm:$0xff] }
 0x2a7   :  { %v905_v41 = vadd.f32 %v891_v45, %v847_v50  ;;  %v372_v35 = vsel %vm367_vm4, %v16079_v26, %v9307_v6  ;;  %v488_v29 = vsel %vm483_vm6, %v16090_v11, %v9350_v15  ;;  %v442_v54 = vadd.f32 %v428_v9, %v384_v30  ;;  %v16153_v45 = vld [vmem:[#allocation36_spill] sm:$0xff]  ;;  %v16155_v26 = vld [vmem:[#allocation81_spill] sm:$0xff]  ;;  %v16156_v50 = vld [vmem:[#allocation111_spill] sm:$0xff] }
 0x2a8   :  { %v722_v10 = vsel %vm15722_vm10, %v16151_v39, %v16150_v56  ;;  %v386_v36 = vadd.f32 %v372_v35, %v328_v59  ;;  %v678_v16 = vadd.f32 %v664_v4, %v620_v40  ;;  %v1023_v24 = vadd.f32 %v1009_v34, %v965_v14  ;;  %v16157_v11 = vld [vmem:[#allocation86_spill] sm:$0xff]  ;;  %v16158_v9 = vld [vmem:[#allocation99_spill] sm:$0xff]  ;;  %v16164_v14 = vld [vmem:[#allocation128_spill] sm:$0xff] }
 0x2a9   :  { %v904_v58 = vadd.f32 %v890_v57, %v846_v22  ;;  %v430_v27 = vsel %vm425_vm5, %v16154_v2, %v16153_v45  ;;  %v500_v6 = vadd.f32 %v486_v51, %v442_v54  ;;  %v949_v15 = vsel %vm947_vm14, %v16156_v50, %v16155_v26  ;;  %v16161_v51 = vld [vmem:[#allocation107_spill] sm:$0xff]  ;;  %v16163_v57 = vld [vmem:[#allocation120_spill] sm:$0xff]  ;;  %v16167_v45 = vld [vmem:[#allocation78_spill] sm:$0xff] }
 0x2aa   :  { %v1007_v30 = vsel %vm16148_vm2, %v10080_v31, %v16157_v11  ;;  %v544_v59 = vsel %vm541_vm7, %v16096_v8, %v16103_v42  ;;  %vm16160_vm3 = vcmask 244736   ;;  %v736_v12 = vadd.f32 %v722_v10, %v678_v16  ;;  %v16165_v35 = vld [vmem:[#allocation116_spill] sm:$0xff]  ;;  %v16166_v16 = vld [vmem:[#allocation93_spill] sm:$0xff] }
 0x2ab   :  { %v1067_v5 = vsel %vm16160_vm3, %v16159_v18, %v16158_v9  ;;  %v963_v4 = vadd.f32 %v949_v15, %v905_v41  ;;  %v948_v34 = vsel %vm947_vm14, %v16161_v51, %v16156_v50  ;;  %v1125_v40 = vsel %vm1121_vm13, %v16163_v57, %v16162_v33  ;;  %v16168_v50 = vld [vmem:[#allocation130_spill] sm:$0xff] }
 0x2ac   :  { %v1211_v22 = vperm.slane %v16164_v14, 3  ;;  %v1006_v8 = vsel %vm16148_vm2, %v16165_v35, %v10080_v31  ;;  %v444_v54 = vadd.f32 %v430_v27, %v386_v36  ;;  %v1081_v56 = vadd.f32 %v1067_v5, %v1023_v24  ;;  %v16169_v15 = vld [vmem:[#allocation114_spill] sm:$0xff]  ;;  %v16171_v27 = vld [vmem:[#allocation97_spill] sm:$0xff]  ;;  %vm16174_vm2 = vmmov %vm16160_vm3 }
 0x2ad   :  { %v10239_v20 = vpop.permute.xlu1 %1285  ;;  %v10266_v42 = vpop.permute.xlu2 %1452  ;;  %v962_v39 = vadd.f32 %v948_v34, %v904_v58  ;;  %v1021_v41 = vadd.f32 %v1007_v30, %v963_v4  ;;  %v558_v10 = vadd.f32 %v544_v59, %v500_v6  ;;  %v780_v2 = vsel %vm773_vm11, %v16167_v45, %v16166_v16  ;;  %v16172_v6 = vld [vmem:[#allocation104_spill] sm:$0xff]  ;;  %v16175_v4 = vld [vmem:[#allocation117_spill] sm:$0xff] }
 0x2ae   :  { %16152 = vst [vmem:[#allocation19_spill] sm:$0xff] %v10239_v20  ;;  %v1183_v51 = vsel %vm1179_vm15, %v16169_v15, %v16168_v50  ;;  %v16170_v20 = vld [vmem:[#allocation121_spill] sm:$0xff]  ;;  %v602_v31 = vsel %vm599_vm8, %v16111_v37, %v16106_v23  ;;  %v794_v36 = vadd.f32 %v780_v2, %v736_v12  ;;  %v1139_v24 = vadd.f32 %v1125_v40, %v1081_v56  ;;  %v16173_v59 = vld [vmem:[#allocation112_spill] sm:$0xff]  ;;  %v10288_v45 = vpop.permute.xlu0 %1287 }
 0x2af   :  { %v1064_v3 = vsel %vm16160_vm3, %v10134_v1, %v16170_v20  ;;  %v1020_v58 = vadd.f32 %v1006_v8, %v962_v39  ;;  %v838_v30 = vsel %vm831_vm12, %v16172_v6, %v16171_v27  ;;  %v1065_v5 = vsel %vm16174_vm2, %v16170_v20, %v16173_v59  ;;  %v16176_v8 = vld [vmem:[#allocation47_spill] sm:$0xff]  ;;  %v16177_v39 = vld [vmem:[#allocation129_spill] sm:$0xff]  ;;  %v16180_v6 = vld [vmem:[#allocation96_spill] sm:$0xff] }
 0x2b0   :  { %v1225_v34 = vmul.f32 %v1211_v22, %v16175_v4  ;;  %v1208_v35 = vperm.slane %v16164_v14, 0  ;;  %v1197_v1 = vadd.f32 %v1183_v51, %v1139_v24  ;;  %v1079_v37 = vadd.f32 %v1065_v5, %v1021_v41  ;;  %v16178_v2 = vld [vmem:[#allocation105_spill] sm:$0xff] }
 0x2b1   :  { %v1078_v16 = vadd.f32 %v1064_v3, %v1020_v58  ;;  %v1209_v12 = vperm.slane %v16164_v14, 1  ;;  %v502_v40 = vadd.f32 %v488_v29, %v444_v54  ;;  %v546_v56 = vsel %vm541_vm7, %v16102_v53, %v16176_v8  ;;  %v16179_v58 = vld [vmem:[#allocation123_spill] sm:$0xff]  ;;  %v16182_v54 = vld [vmem:[#allocation110_spill] sm:$0xff] }
 0x2b2   :  { %v616_v27 = vadd.f32 %v602_v31, %v558_v10  ;;  %v852_v51 = vadd.f32 %v838_v30, %v794_v36  ;;  %vm16181_vm3 = vcmask 490496   ;;  %v1180_v29 = vsel %vm1179_vm15, %v10082_v19, %v10165_v63  ;;  %v16183_v36 = vld [vmem:[#allocation46_spill] sm:$0xff] }
 0x2b3   :  { %v896_v41 = vsel %vm16181_vm3, %v16180_v6, %v16179_v58  ;;  %v1181_v53 = vsel %vm1179_vm15, %v10165_v63, %v16182_v54  ;;  %v1222_v5 = vmul.f32 %v1208_v35, %v16175_v4  ;;  %v1232_v8 = vadd.f32 %v1225_v34, %v1197_v1  ;;  %v16188_v58 = vld [vmem:[#allocation40_spill] sm:$0xff]  ;;  %v16190_v6 = vld [vmem:[#allocation45_spill] sm:$0xff] }
 0x2b4   :  { %v1223_v31 = vmul.f32 %v1209_v12, %v16175_v4  ;;  %v660_v30 = vsel %vm15721_vm9, %v16115_v62, %v16183_v36  ;;  %v718_v19 = vsel %vm15722_vm10, %v16117_v0, %v16120_v32  ;;  %v910_v35 = vadd.f32 %v896_v41, %v852_v51  ;;  %v16191_v41 = vld [vmem:[#allocation59_spill] sm:$0xff] }
 0x2b5   :  { %v1108_v23 = vpop.permute.xlu1 %1107  ;;  %v674_v34 = vadd.f32 %v660_v30, %v616_v27  ;;  %v776_v62 = vsel %vm773_vm11, %v16131_v46, %v16123_v25  ;;  %v16189_v27 = vld [vmem:[#allocation35_spill] sm:$0xff]  ;;  %v16195_v30 = vld [vmem:[#allocation126_spill] sm:$0xff]  ;;  %vm16196_vm2 = vcmask 252928   ;;  %vm16197_vm3 = vcmask 1022976  }
 0x2b6   :  { %v1122_v20 = vsel %vm1121_vm13, %v16177_v39, %v1108_v23  ;;  %v1123_v22 = vsel %vm1121_vm13, %v1108_v23, %v16178_v2  ;;  %v16185_v39 = vld [vmem:[#allocation100_spill] sm:$0xff]  ;;  %v604_v51 = vsel %vm599_vm8, %v16189_v27, %v16188_v58  ;;  %v16194_v36 = vld [vmem:[#allocation119_spill] sm:$0xff]  ;;  %v16201_v58 = vld [vmem:[#allocation118_spill] sm:$0xff] }
 0x2b7   :  { %v1136_v3 = vadd.f32 %v1122_v20, %v1078_v16  ;;  %v1137_v24 = vadd.f32 %v1123_v22, %v1079_v37  ;;  %v560_v16 = vadd.f32 %v546_v56, %v502_v40  ;;  %v16184_v37 = vld [vmem:[#allocation17_spill] sm:$0xff]  ;;  %v10318_v20 = vpop.permute.xlu2 %1275  ;;  %v16187_v56 = vld [vmem:[#allocation124_spill] sm:$0xff]  ;;  %v732_v32 = vadd.f32 %v718_v19, %v674_v34 }
 0x2b8   :  { %v954_v63 = vsel %vm947_vm14, %v16185_v39, %v16184_v37  ;;  %v16186_v40 = vld [vmem:[#allocation125_spill] sm:$0xff]  ;;  %v1012_v19 = vsel %vm16196_vm2, %v16195_v30, %v16194_v36  ;;  %v1408_v37 = vsel %vm16197_vm3, %v10136_v52, %v10228_v13  ;;  %vm16202_vm2 = vcmask 244736   ;;  %v16206_v36 = vld [vmem:[#allocation91_spill] sm:$0xff] }
 0x2b9   :  { %v1194_v23 = vadd.f32 %v1180_v29, %v1136_v3  ;;  %v1195_v10 = vadd.f32 %v1181_v53, %v1137_v24  ;;  %v1294_v0 = vsel %vm135_vm0, %v16187_v56, %v16186_v40  ;;  %v968_v22 = vadd.f32 %v954_v63, %v910_v35  ;;  %v16192_v53 = vld [vmem:[#allocation27_spill] sm:$0xff]  ;;  %vm16209_vm3 = vmmov %vm16202_vm2 }
 0x2ba   :  { %v1308_v24 = vadd.f32 %v1294_v0, %v1232_v8  ;;  %v662_v29 = vsel %vm15721_vm9, %v16191_v41, %v16190_v6  ;;  %v618_v46 = vadd.f32 %v604_v51, %v560_v16  ;;  %v834_v16 = vsel %vm831_vm12, %v16138_v48, %v16128_v60  ;;  %v16203_v41 = vld [vmem:[#allocation61_spill] sm:$0xff] }
 0x2bb   :  { %v10320_v1 = vadd.f32 %v1222_v5, %v1194_v23  ;;  %v10322_v12 = vadd.f32 %v1223_v31, %v1195_v10  ;;  %v790_v5 = vadd.f32 %v776_v62, %v732_v32  ;;  %v10341_v23 = vpop.permute.xlu0 %1454  ;;  %v16193_v31 = vld [vmem:[#allocation68_spill] sm:$0xff]  ;;  %v1026_v63 = vadd.f32 %v1012_v19, %v968_v22  ;;  %v16207_v19 = vld [vmem:[#allocation131_spill] sm:$0xff] }
 0x2bc   :  { %v720_v8 = vsel %vm15722_vm10, %v16119_v28, %v16193_v31  ;;  %v676_v39 = vadd.f32 %v662_v29, %v618_v46  ;;  %vm16198_vm9 = vcmask 490496   ;;  %vm16199_vm10 = vcmask 1014784  }
 0x2bd   :  { %v10330_v3 = vpop.permute.xlu1 %1338  ;;  %v892_v35 = vsel %vm16198_vm9, %v16143_v38, %v16135_v43  ;;  %v1465_v28 = vsel %vm16199_vm10, %v10266_v42, %v10341_v23  ;;  %v848_v0 = vadd.f32 %v834_v16, %v790_v5  ;;  %v950_v22 = vsel %vm947_vm14, %v16155_v26, %v16141_v21  ;;  %v16205_v26 = vld [vmem:[#allocation122_spill] sm:$0xff] }
 0x2be   :  { %v1351_v25 = vsel %vm193_vm1, %v10330_v3, %v16192_v53  ;;  %v734_v62 = vadd.f32 %v720_v8, %v676_v39  ;;  %v1214_v6 = vperm.slane %v16164_v14, 6  ;;  %v778_v29 = vsel %vm773_vm11, %v16122_v55, %v16203_v41  ;;  %v16217_v41 = vld [vmem:[#allocation28_spill] sm:$0xff] }
 0x2bf   :  { %v1365_v10 = vadd.f32 %v1351_v25, %v1308_v24  ;;  %v16200_v24 = vld [vmem:[#allocation127_spill] sm:$0xff]  ;;  %v10367_v60 = vpop.permute.xlu2 %1486  ;;  %v906_v48 = vadd.f32 %v892_v35, %v848_v0  ;;  %v16204_v25 = vld [vmem:[#allocation66_spill] sm:$0xff]  ;;  %v894_v30 = vsel %vm16198_vm9, %v16134_v49, %v16206_v36  ;;  %vm16208_vm10 = vcmask 252928   ;;  %v16210_v0 = vld [vmem:[#allocation84_spill] sm:$0xff] }
 0x2c0   :  { %v1070_v27 = vsel %vm16202_vm2, %v16201_v58, %v16200_v24  ;;  %v836_v21 = vsel %vm831_vm12, %v16127_v17, %v16204_v25  ;;  %v792_v5 = vadd.f32 %v778_v29, %v734_v62  ;;  %v1228_v17 = vmul.f32 %v1214_v6, %v16175_v4  ;;  %vm16212_vm2 = vmmov %vm16208_vm10  ;;  %v16213_v24 = vld [vmem:[#allocation115_spill] sm:$0xff]  ;;  %v16216_v6 = vld [vmem:[#allocation113_spill] sm:$0xff] }
 0x2c1   :  { %v1422_v34 = vadd.f32 %v1408_v37, %v1365_v10  ;;  %v1084_v51 = vadd.f32 %v1070_v27, %v1026_v63  ;;  %v964_v10 = vadd.f32 %v950_v22, %v906_v48  ;;  %v1186_v37 = vsel %vm1179_vm15, %v16207_v19, %v10190_v61  ;;  %vm16214_vm9 = vmmov %vm16209_vm3  ;;  %v16218_v25 = vld [vmem:[#allocation15_spill] sm:$0xff] }
 0x2c2   :  { %v850_v55 = vadd.f32 %v836_v21, %v792_v5  ;;  %v1008_v63 = vsel %vm16208_vm10, %v16157_v11, %v16147_v7  ;;  %v1124_v61 = vsel %vm1121_vm13, %v16178_v2, %v16163_v57  ;;  %v16211_v7 = vld [vmem:[#allocation89_spill] sm:$0xff]  ;;  %v1210_v22 = vperm.slane %v16164_v14, 2  ;;  %v16222_v19 = vld [vmem:[#allocation11_spill] sm:$0xff] }
 0x2c3   :  { %v1479_v32 = vadd.f32 %v1465_v28, %v1422_v34  ;;  %v1066_v34 = vsel %vm16209_vm3, %v16173_v59, %v16159_v18  ;;  %v1022_v35 = vadd.f32 %v1008_v63, %v964_v10  ;;  %v1010_v11 = vsel %vm16212_vm2, %v16146_v47, %v16211_v7 }
 0x2c4   :  { %v908_v16 = vadd.f32 %v894_v30, %v850_v55  ;;  %v1068_v58 = vsel %vm16214_vm9, %v16158_v9, %v16213_v24  ;;  %v1182_v2 = vsel %vm1179_vm15, %v16182_v54, %v16169_v15  ;;  %v1184_v9 = vsel %vm1179_vm15, %v16168_v50, %v16216_v6  ;;  %v16220_v50 = vld [vmem:[#allocation19_spill] sm:$0xff] }
 0x2c5   :  { %v1492_v43 = vadd.f32 %v10367_v60, %v1479_v32  ;;  %v1120_v38 = vpop.permute.xlu1 %1119  ;;  %v1080_v28 = vadd.f32 %v1066_v34, %v1022_v35  ;;  %v952_v32 = vsel %vm947_vm14, %v16140_v44, %v16210_v0  ;;  %v1224_v44 = vmul.f32 %v1210_v22, %v16175_v4 }
 0x2c6   :  { %v1128_v46 = vsel %vm1121_vm13, %v16205_v26, %v1120_v38  ;;  %v966_v18 = vadd.f32 %v952_v32, %v908_v16  ;;  %v16215_v38 = vld [vmem:[#allocation108_spill] sm:$0xff]  ;;  %v1293_v29 = vsel %vm135_vm0, %v16217_v41, %v16187_v56  ;;  %v1350_v21 = vsel %vm193_vm1, %v16218_v25, %v10330_v3 }
 0x2c7   :  { %v1499_v31 = vmax.f32 %v1492_v43, 0.0  ;;  %v1142_v8 = vadd.f32 %v1128_v46, %v1084_v51  ;;  %v1138_v59 = vadd.f32 %v1124_v61, %v1080_v28  ;;  %v1212_v43 = vperm.slane %v16164_v14, 4  ;;  %v1335_v34 = vpop.permute.xlu2 %1334 }
 0x2c8   :  { %v1024_v57 = vadd.f32 %v1010_v11, %v966_v18  ;;  %v1126_v51 = vsel %vm1121_vm13, %v16162_v33, %v16215_v38  ;;  %vm16219_vm10 = vcmask 1022976   ;;  %v1295_v10 = vsel %vm135_vm0, %v16186_v40, %v16220_v50 }
 0x2c9   :  { %1506 = vst [vmem:[#allocation2 + $0x10] sm:$0x3f] %v1499_v31  ;;  %v1200_v39 = vadd.f32 %v1186_v37, %v1142_v8  ;;  %v1196_v48 = vadd.f32 %v1182_v2, %v1138_v59  ;;  %v1226_v46 = vmul.f32 %v1212_v43, %v16175_v4  ;;  %vm16221_vm3 = vcmask 1014784   ;;  %vm16223_vm2 = vmmov %vm16219_vm10  ;;  %v16225_v2 = vld [vmem:[#allocation18_spill] sm:$0xff] }
 0x2ca   :  { %v1082_v27 = vadd.f32 %v1068_v58, %v1024_v57  ;;  %vm16224_vm9 = vmmov %vm16221_vm3  ;;  %v1296_v59 = vsel %vm135_vm0, %v16220_v50, %v10288_v45 }
 0x2cb   :  { %v10392_v49 = vadd.f32 %v1228_v17, %v1200_v39  ;;  %v1231_v54 = vadd.f32 %v1224_v44, %v1196_v48  ;;  %v1278_v39 = vpop.permute.xlu0 %1277 }
 0x2cc   :  { %v1140_v15 = vadd.f32 %v1126_v51, %v1082_v27  ;;  %v1310_v27 = vadd.f32 %v1296_v59, %v16225_v2  ;;  %v1291_v51 = vsel %vm135_vm0, %v10318_v20, %v1278_v39  ;;  %v1721_v59 = vld [vmem:[%s15576_s3 + $0x3d0] sm:$0xff] }
 0x2cd   :  { %v10397_v62 = vpop.permute.xlu1 %1393  ;;  %v1307_v26 = vadd.f32 %v1293_v29, %v1231_v54  ;;  %v1621_v2 = vld [vmem:[%s15576_s3 + $0xb0] sm:$0xff] }
 0x2ce   :  { %v1198_v14 = vadd.f32 %v1184_v9, %v1140_v15  ;;  %v1407_v33 = vsel %vm16219_vm10, %v10397_v62, %v10136_v52  ;;  %v1352_v52 = vsel %vm193_vm1, %v16192_v53, %v16222_v19  ;;  %vm16226_vm10 = vmmov %vm16223_vm2 }
 0x2cf   :  { %v1364_v5 = vadd.f32 %v1350_v21, %v1307_v26  ;;  %v1390_v7 = vpop.permute.xlu2 %1389  ;;  %v1292_v21 = vsel %vm135_vm0, %v1278_v39, %v16217_v41 }
 0x2d0   :  { %v1233_v56 = vadd.f32 %v1226_v46, %v1198_v14  ;;  %v10449_v53 = vld [vmem:[#allocation2 + $0x10] sm:$0x3f]  ;;  %v1305_v46 = vadd.f32 %v1291_v51, %v10320_v1 }
 0x2d1   :  { %v1421_v31 = vadd.f32 %v1407_v33, %v1364_v5  ;;  %v1306_v5 = vadd.f32 %v1292_v21, %v10322_v12 }
 0x2d2   :  { %v1309_v36 = vadd.f32 %v1295_v10, %v1233_v56 }
 0x2d3   :  { %v1290_v32 = vpop.permute.xlu0 %1289 }
 0x2d4   :  { %v1366_v40 = vadd.f32 %v1352_v52, %v1309_v36  ;;  %v1297_v24 = vsel %vm135_vm0, %v10288_v45, %v1290_v32  ;;  %v1627_v32 = vld [vmem:[%s15576_s3 + $0xe0] sm:$0xff] }
 0x2d5   :  { %v1400_v47 = vpop.permute.xlu1 %1399  ;;  %v1311_v48 = vadd.f32 %v1297_v24, %v10392_v49  ;;  %v1655_v24 = vld [vmem:[%s15576_s3 + $0x1c0] sm:$0xff] }
 0x2d6   :  { %v1409_v37 = vsel %vm16223_vm2, %v10228_v13, %v1400_v47 }
 0x2d7   :  { %v1423_v17 = vadd.f32 %v1409_v37, %v1366_v40  ;;  %v1404_v18 = vpop.permute.xlu2 %1403 }
 0x2dd   :  { %v10433_v8 = vpop.permute.xlu1 %1450 }
 0x2de   :  { %v1464_v3 = vsel %vm16221_vm3, %v10433_v8, %v10266_v42  ;;  %vm16227_vm3 = vmmov %vm16223_vm2 }
 0x2df   :  { %v1478_v30 = vadd.f32 %v1464_v3, %v1421_v31  ;;  %v1461_v45 = vpop.permute.xlu2 %1460  ;;  %vm16228_vm2 = vmmov %vm16224_vm9 }
 0x2e1   :  { %v1491_v4 = vadd.f32 %v10367_v60, %v1478_v30 }
 0x2e3   :  { %v1498_v55 = vmax.f32 %v1491_v4, 0.0 }
 0x2e5   :  { %1505 = vst [vmem:[#allocation2 + $0x18] sm:$0x3f] %v1498_v55  ;;  %v1457_v63 = vpop.permute.xlu1 %1456 }
 0x2e6   :  { %v1466_v42 = vsel %vm16224_vm9, %v10341_v23, %v1457_v63  ;;  %v1402_v23 = vpop.permute.xlu0 %1401  ;;  %vm16229_vm9 = vmmov %vm16228_vm2 }
 0x2e7   :  { %v1480_v16 = vadd.f32 %v1466_v42, %v1423_v17  ;;  %v1410_v6 = vsel %vm16226_vm10, %v1400_v47, %v1402_v23  ;;  %v1411_v9 = vsel %vm16227_vm3, %v1402_v23, %v1404_v18  ;;  %v1349_v47 = vsel %vm193_vm1, %v1335_v34, %v16218_v25  ;;  %vm16230_vm10 = vmmov %vm16227_vm3  ;;  %v1625_v23 = vld [vmem:[%s15576_s3 + $0xd0] sm:$0xff] }
 0x2e8   :  { %v1363_v31 = vadd.f32 %v1349_v47, %v1306_v5  ;;  %v1657_v18 = vld [vmem:[%s15576_s3 + $0x1d0] sm:$0xff]  ;;  %v1647_v47 = vld [vmem:[%s15576_s3 + $0x180] sm:$0xff] }
 0x2e9   :  { %v1493_v35 = vadd.f32 %v10367_v60, %v1480_v16  ;;  %v1711_v5 = vld [vmem:[%s15576_s3 + $0x380] sm:$0xff] }
 0x2eb   :  { %v1500_v61 = vmax.f32 %v1493_v35, 0.0 }
 0x2ec   :  { %v10447_v28 = vld [vmem:[#allocation2 + $0x18] sm:$0x3f] }
 0x2ed   :  { %1507 = vst [vmem:[#allocation2 + $0x8] sm:$0x3f] %v1500_v61  ;;  %v1345_v13 = vpop.permute.xlu1 %1344  ;;  %v8689_v0 = vpack.i.bf16 %v10449_v53, %v10447_v28  ;;  %v1629_v61 = vld [vmem:[%s15576_s3 + $0xf0] sm:$0xff] }
 0x2ee   :  { %v1353_v58 = vsel %vm193_vm1, %v16222_v19, %v1345_v13  ;;  %v1392_v38 = vpop.permute.xlu0 %1391  ;;  %1825 = vmatpush.msra.mxu0 %v1629_v61  ;;  %v1677_v61 = vld [vmem:[%s15576_s3 + $0x270] sm:$0xff] }
 0x2ef   :  { %8690 = vrot.lane.b32.xlu0 %v8689_v0, %s8812_s29  ;;  %v1367_v44 = vadd.f32 %v1353_v58, %v1310_v27  ;;  %v1406_v56 = vsel %vm16230_vm10, %v1392_v38, %v10397_v62  ;;  %v1405_v1 = vsel %vm16227_vm3, %v1390_v7, %v1392_v38  ;;  %v1725_v0 = vld [vmem:[%s15576_s3 + $0x3f0] sm:$0xff]  ;;  %v1659_v7 = vld [vmem:[%s15576_s3 + $0x1e0] sm:$0xff]  ;;  %vm15787_vm10 = vcmask 1046528  }
 0x2f0   :  { %v1420_v30 = vadd.f32 %v1406_v56, %v1363_v31  ;;  %1885 = vmatpush.msra.mxu3 %v1725_v0  ;;  %1826 = vmatpush.msra.mxu0 %v1627_v32  ;;  %v1693_v58 = vld [vmem:[%s15576_s3 + $0x2f0] sm:$0xff]  ;;  %vm15932_vm3 = vcmask 1045504  }
 0x2f1   :  { %v1424_v54 = vadd.f32 %v1410_v6, %v1367_v44  ;;  %v1653_v27 = vld [vmem:[%s15576_s3 + $0x1b0] sm:$0xff]  ;;  %1865 = vmatpush.msra.mxu2 %v1693_v58  ;;  %v1619_v6 = vld [vmem:[%s15576_s3 + $0xa0] sm:$0xff] }
 0x2f2   :  { %1827 = vmatpush.msra.mxu0 %v1625_v23  ;;  %v1717_v44 = vld [vmem:[%s15576_s3 + $0x3b0] sm:$0xff]  ;;  %v1703_v23 = vld [vmem:[%s15576_s3 + $0x340] sm:$0xff] }
 0x2f3   :  { %v1603_v58 = vld [vmem:[%s15576_s3 + $0x20] sm:$0xff] }
 0x2f5   :  { %v1333_v11 = vpop.permute.xlu1 %1332 }
 0x2f6   :  { %v1348_v14 = vsel %vm193_vm1, %v1333_v11, %v1335_v34  ;;  %v1447_v4 = vpop.permute.xlu0 %1446  ;;  %v1723_v11 = vld [vmem:[%s15576_s3 + $0x3e0] sm:$0xff] }
 0x2f7   :  { %v1362_v50 = vadd.f32 %v1348_v14, %v1305_v46  ;;  %1886 = vmatpush.msra.mxu3 %v1723_v11  ;;  %v1713_v46 = vld [vmem:[%s15576_s3 + $0x390] sm:$0xff]  ;;  %v1639_v11 = vld [vmem:[%s15576_s3 + $0x140] sm:$0xff] }
 0x2f9   :  { %v1419_v19 = vadd.f32 %v1405_v1, %v1362_v50  ;;  %1887 = vmatpush.msra.mxu3 %v1721_v59  ;;  %v1683_v50 = vld [vmem:[%s15576_s3 + $0x2a0] sm:$0xff]  ;;  %v1681_v1 = vld [vmem:[%s15576_s3 + $0x290] sm:$0xff] }
 0x2fa   :  { %v1637_v59 = vld [vmem:[%s15576_s3 + $0x130] sm:$0xff] }
 0x2fd   :  { %v1347_v22 = vpop.permute.xlu1 %1346 }
 0x2fe   :  { %v1354_v57 = vsel %vm193_vm1, %v1345_v13, %v1347_v22  ;;  %v1661_v13 = vld [vmem:[%s15576_s3 + $0x1f0] sm:$0xff]  ;;  %v1623_v22 = vld [vmem:[%s15576_s3 + $0xc0] sm:$0xff] }
 0x2ff   :  { %v1368_v43 = vadd.f32 %v1354_v57, %v1311_v48  ;;  %1845 = vmatpush.msra.mxu1 %v1661_v13  ;;  %v1719_v57 = vld [vmem:[%s15576_s3 + $0x3c0] sm:$0xff]  ;;  %1828 = vmatpush.msra.mxu0 %v1623_v22  ;;  %v1701_v22 = vld [vmem:[%s15576_s3 + $0x330] sm:$0xff] }
 0x300   :  { %v1691_v48 = vld [vmem:[%s15576_s3 + $0x2e0] sm:$0xff]  ;;  %1888 = vmatpush.msra.mxu3 %v1719_v57 }
 0x301   :  { %v1425_v29 = vadd.f32 %v1411_v9, %v1368_v43  ;;  %1846 = vmatpush.msra.mxu1 %v1659_v7  ;;  %v1689_v43 = vld [vmem:[%s15576_s3 + $0x2d0] sm:$0xff]  ;;  %v1651_v9 = vld [vmem:[%s15576_s3 + $0x1a0] sm:$0xff]  ;;  %1866 = vmatpush.msra.mxu2 %v1691_v48 }
 0x302   :  { %1829 = vmatpush.msra.mxu0 %v1621_v2  ;;  %1889 = vmatpush.msra.mxu3 %v1717_v44  ;;  %v1607_v7 = vld [vmem:[%s15576_s3 + $0x40] sm:$0xff]  ;;  %v1601_v48 = vld [vmem:[%s15576_s3 + $0x10] sm:$0xff] }
 0x303   :  { %1847 = vmatpush.msra.mxu1 %v1657_v18  ;;  %1867 = vmatpush.msra.mxu2 %v1689_v43  ;;  %v1605_v18 = vld [vmem:[%s15576_s3 + $0x30] sm:$0xff]  ;;  %v1635_v57 = vld [vmem:[%s15576_s3 + $0x120] sm:$0xff] }
 0x304   :  { %1830 = vmatpush.msra.mxu0 %v1619_v6  ;;  %v1699_v2 = vld [vmem:[%s15576_s3 + $0x320] sm:$0xff]  ;;  %v1633_v44 = vld [vmem:[%s15576_s3 + $0x110] sm:$0xff] }
 0x305   :  { %v1459_v15 = vpop.permute.xlu1 %1458  ;;  %1848 = vmatpush.msra.mxu1 %v1655_v24  ;;  %v1675_v24 = vld [vmem:[%s15576_s3 + $0x260] sm:$0xff]  ;;  %v1697_v43 = vld [vmem:[%s15576_s3 + $0x310] sm:$0xff] }
 0x306   :  { %v1467_v49 = vsel %vm16228_vm2, %v1457_v63, %v1459_v15  ;;  %v1468_v26 = vsel %vm16229_vm9, %v1459_v15, %v1461_v45  ;;  %vm16231_vm9 = vmmov %vm16228_vm2  ;;  %v10487_v63 = vld [vmem:[#allocation2 + $0x8] sm:$0x3f]  ;;  %v1715_v45 = vld [vmem:[%s15576_s3 + $0x3a0] sm:$0xff] }
 0x307   :  { %v1481_v20 = vadd.f32 %v1467_v49, %v1424_v54  ;;  %v1482_v33 = vadd.f32 %v1468_v26, %v1425_v29  ;;  %1849 = vmatpush.msra.mxu1 %v1653_v27  ;;  %v1687_v29 = vld [vmem:[%s15576_s3 + $0x2c0] sm:$0xff]  ;;  %v1617_v15 = vld [vmem:[%s15576_s3 + $0x90] sm:$0xff]  ;;  %1890 = vmatpush.msra.mxu3 %v1715_v45 }
 0x308   :  { %v1649_v54 = vld [vmem:[%s15576_s3 + $0x190] sm:$0xff]  ;;  %1868 = vmatpush.msra.mxu2 %v1687_v29  ;;  %1831 = vmatpush.msra.mxu0 %v1617_v15  ;;  %v1695_v45 = vld [vmem:[%s15576_s3 + $0x300] sm:$0xff]  ;;  %v1630_v15 = vld [vmem:[%s15576_s3 + $0xf8] sm:$0xff] }
 0x309   :  { %v1494_v10 = vadd.f32 %v10367_v60, %v1481_v20  ;;  %v1495_v41 = vadd.f32 %v10367_v60, %v1482_v33  ;;  %1850 = vmatpush.msra.mxu1 %v1651_v9  ;;  %v1685_v20 = vld [vmem:[%s15576_s3 + $0x2b0] sm:$0xff]  ;;  %v1615_v33 = vld [vmem:[%s15576_s3 + $0x80] sm:$0xff]  ;;  %1891 = vmatpush.msra.mxu3 %v1713_v46 }
 0x30a   :  { %1869 = vmatpush.msra.mxu2 %v1685_v20  ;;  %1832 = vmatpush.msra.mxu0 %v1615_v33  ;;  %v1673_v27 = vld [vmem:[%s15576_s3 + $0x250] sm:$0xff]  ;;  %v1631_v9 = vld [vmem:[%s15576_s3 + $0x100] sm:$0xff]  ;;  %v1626_v33 = vld [vmem:[%s15576_s3 + $0xd8] sm:$0xff] }
 0x30b   :  { %v1501_v3 = vmax.f32 %v1494_v10, 0.0  ;;  %v1502_v36 = vmax.f32 %v1495_v41, 0.0  ;;  %1851 = vmatpush.msra.mxu1 %v1649_v54  ;;  %v1613_v10 = vld [vmem:[%s15576_s3 + $0x70] sm:$0xff]  ;;  %1892 = vmatpush.msra.mxu3 %v1711_v5  ;;  %v1751_v5 = vld [vmem:[%s15576_s3 + $0x4c0] sm:$0xff] }
 0x30c   :  { %v1645_v41 = vld [vmem:[%s15576_s3 + $0x170] sm:$0xff]  ;;  %1870 = vmatpush.msra.mxu2 %v1683_v50  ;;  %1833 = vmatpush.msra.mxu0 %v1613_v10  ;;  %v1783_v50 = vld [vmem:[%s15576_s3 + $0x5c0] sm:$0xff]  ;;  %v1624_v10 = vld [vmem:[%s15576_s3 + $0xc8] sm:$0xff] }
 0x30d   :  { %1508 = vst [vmem:[#allocation2 + $0x20] sm:$0x3f] %v1501_v3  ;;  %v1449_v25 = vpop.permute.xlu1 %1448  ;;  %1852 = vmatpush.msra.mxu1 %v1647_v47  ;;  %v1757_v29 = vld [vmem:[%s15576_s3 + $0x4f0] sm:$0xff] }
 0x30e   :  { %1509 = vst [vmem:[#allocation2 + $0x28] sm:$0x3f] %v1502_v36  ;;  %v1462_v12 = vsel %vm16228_vm2, %v1447_v4, %v1449_v25  ;;  %v1463_v52 = vsel %vm16231_vm9, %v1449_v25, %v10433_v8  ;;  %v1709_v36 = vld [vmem:[%s15576_s3 + $0x370] sm:$0xff]  ;;  %v1611_v4 = vld [vmem:[%s15576_s3 + $0x60] sm:$0xff]  ;;  %1871 = vmatpush.msra.mxu2 %v1681_v1  ;;  %vm15931_vm2 = vcmask 48128  }
 0x30f   :  { %v1476_v37 = vadd.f32 %v1462_v12, %v1419_v19  ;;  %v1477_v40 = vadd.f32 %v1463_v52, %v1420_v30  ;;  %v1643_v19 = vld [vmem:[%s15576_s3 + $0x160] sm:$0xff]  ;;  %1853 = vmatpush.msra.mxu1 %v1645_v41  ;;  %1893 = vmatpush.msra.mxu3 %v1709_v36  ;;  %v1669_v54 = vld [vmem:[%s15576_s3 + $0x230] sm:$0xff]  ;;  %v1622_v36 = vld [vmem:[%s15576_s3 + $0xb8] sm:$0xff] }
 0x310   :  { %v1707_v52 = vld [vmem:[%s15576_s3 + $0x360] sm:$0xff]  ;;  %1834 = vmatpush.msra.mxu0 %v1611_v4  ;;  %v1753_v46 = vld [vmem:[%s15576_s3 + $0x4d0] sm:$0xff] }
 0x311   :  { %v1489_v62 = vadd.f32 %v10367_v60, %v1476_v37  ;;  %v1490_v55 = vadd.f32 %v10367_v60, %v1477_v40  ;;  %v1679_v37 = vld [vmem:[%s15576_s3 + $0x280] sm:$0xff]  ;;  %1854 = vmatpush.msra.mxu1 %v1643_v19  ;;  %1894 = vmatpush.msra.mxu3 %v1707_v52  ;;  %v1785_v20 = vld [vmem:[%s15576_s3 + $0x5d0] sm:$0xff]  ;;  %v1620_v19 = vld [vmem:[%s15576_s3 + $0xa8] sm:$0xff] }
 0x312   :  { %1872 = vmatpush.msra.mxu2 %v1679_v37  ;;  %v1665_v47 = vld [vmem:[%s15576_s3 + $0x210] sm:$0xff]  ;;  %v1663_v41 = vld [vmem:[%s15576_s3 + $0x200] sm:$0xff]  ;;  %v1618_v37 = vld [vmem:[%s15576_s3 + $0x98] sm:$0xff] }
 0x313   :  { %v1496_v39 = vmax.f32 %v1489_v62, 0.0  ;;  %v1497_v17 = vmax.f32 %v1490_v55, 0.0  ;;  %v1747_v1 = vld [vmem:[%s15576_s3 + $0x4a0] sm:$0xff]  ;;  %v1809_v52 = vld [vmem:[%s15576_s3 + $0x690] sm:$0xff] }
 0x314   :  { %v10489_v42 = vld [vmem:[#allocation2 + $0x20] sm:$0x3f]  ;;  %1873 = vmatpush.msra.mxu2 %v1677_v61  ;;  %v1811_v4 = vld [vmem:[%s15576_s3 + $0x6a0] sm:$0xff]  ;;  %v1614_v61 = vld [vmem:[%s15576_s3 + $0x78] sm:$0xff] }
 0x315   :  { %1503 = vst [vmem:[#allocation2 + $0x30] sm:$0x3f] %v1496_v39  ;;  %v10491_v34 = vld [vmem:[#allocation2 + $0x28] sm:$0x3f]  ;;  %v8694_v16 = vpack.i.bf16 %v10489_v42, %v10487_v63 }
 0x316   :  { %1504 = vst [vmem:[#allocation2] sm:$0x3f] %v1497_v17  ;;  %1536 = vrot.lane.b32.xlu0 %v10491_v34, %s8812_s29  ;;  %v1609_v17 = vld [vmem:[%s15576_s3 + $0x50] sm:$0xff]  ;;  %1874 = vmatpush.msra.mxu2 %v1675_v24  ;;  %v1767_v24 = vld [vmem:[%s15576_s3 + $0x540] sm:$0xff] }
 0x317   :  { %8695 = vrot.lane.b32.xlu1 %v8694_v16, %s8812_s29  ;;  %v1641_v16 = vld [vmem:[%s15576_s3 + $0x150] sm:$0xff]  ;;  %1835 = vmatpush.msra.mxu0 %v1609_v17  ;;  %v1775_v17 = vld [vmem:[%s15576_s3 + $0x580] sm:$0xff] }
 0x318   :  { %1855 = vmatpush.msra.mxu1 %v1641_v16  ;;  %1875 = vmatpush.msra.mxu2 %v1673_v27  ;;  %v1807_v16 = vld [vmem:[%s15576_s3 + $0x680] sm:$0xff]  ;;  %v1765_v27 = vld [vmem:[%s15576_s3 + $0x530] sm:$0xff] }
 0x319   :  { %1836 = vmatpush.msra.mxu0 %v1607_v7  ;;  %v1739_v7 = vld [vmem:[%s15576_s3 + $0x460] sm:$0xff] }
 0x31a   :  { %1856 = vmatpush.msra.mxu1 %v1639_v11  ;;  %v1771_v11 = vld [vmem:[%s15576_s3 + $0x560] sm:$0xff] }
 0x31b   :  { %1837 = vmatpush.msra.mxu0 %v1605_v18  ;;  %v1801_v18 = vld [vmem:[%s15576_s3 + $0x650] sm:$0xff] }
 0x31c   :  { %v10498_v8 = vld [vmem:[#allocation2 + $0x30] sm:$0x3f]  ;;  %1857 = vmatpush.msra.mxu1 %v1637_v59 }
 0x31d   :  { %v10500_v60 = vld [vmem:[#allocation2] sm:$0x3f]  ;;  %1838 = vmatpush.msra.mxu0 %v1603_v58  ;;  %v1610_v59 = vld [vmem:[%s15576_s3 + $0x58] sm:$0xff]  ;;  %v1799_v58 = vld [vmem:[%s15576_s3 + $0x640] sm:$0xff] }
 0x31e   :  { %v8699_v35 = vpack.i.bf16 %v10500_v60, %v10498_v8  ;;  %1858 = vmatpush.msra.mxu1 %v1635_v57  ;;  %v1608_v57 = vld [vmem:[%s15576_s3 + $0x48] sm:$0xff] }
 0x31f   :  { %1839 = vmatpush.msra.mxu0 %v1601_v48  ;;  %v1797_v48 = vld [vmem:[%s15576_s3 + $0x630] sm:$0xff] }
 0x320   :  { %8700 = vrot.lane.b32.xlu2 %v8699_v35, %s8812_s29  ;;  %1859 = vmatpush.msra.mxu1 %v1633_v44  ;;  %v1606_v44 = vld [vmem:[%s15576_s3 + $0x38] sm:$0xff] }
 0x322   :  { %1860 = vmatpush.msra.mxu1 %v1631_v9  ;;  %v1604_v9 = vld [vmem:[%s15576_s3 + $0x28] sm:$0xff] }
 0x361   :  { %v8691_v38 = vpop.permute.xlu0 %8690 }
 0x362   :  { %v8693_v21 = vunpack.i.h.bf16 %v8691_v38  ;;  %v8692_v14 = vunpack.i.l.bf16 %v8691_v38  ;;  %v1671_v38 = vld [vmem:[%s15576_s3 + $0x240] sm:$0xff] }
 0x363   :  { %1876 = vmatpush.msra.mxu2 %v1671_v38  ;;  %v1763_v38 = vld [vmem:[%s15576_s3 + $0x520] sm:$0xff] }
 0x364   :  { %v1540_v56 = vsel %vm135_vm0, %v8692_v14, %v8693_v21 }
 0x365   :  { %v10623_v40 = vmax.f32 %v10447_v28, %v1540_v56  ;;  %1877 = vmatpush.msra.mxu2 %v1669_v54  ;;  %v1749_v56 = vld [vmem:[%s15576_s3 + $0x4b0] sm:$0xff]  ;;  %v1727_v54 = vld [vmem:[%s15576_s3 + $0x400] sm:$0xff] }
 0x37a   :  { %v8701_v51 = vpop.permute.xlu2 %8700 }
 0x37b   :  { %v8703_v49 = vunpack.i.h.bf16 %v8701_v51  ;;  %v8702_v26 = vunpack.i.l.bf16 %v8701_v51  ;;  %v1599_v51 = vld [vmem:[%s15576_s3] sm:$0xff] }
 0x37c   :  { %1840 = vmatpush.msra.mxu0 %v1599_v51  ;;  %v1795_v51 = vld [vmem:[%s15576_s3 + $0x620] sm:$0xff] }
 0x37d   :  { %v1539_v31 = vsel %vm135_vm0, %v8703_v49, %v8692_v14  ;;  %v1538_v3 = vsel %vm135_vm0, %v8702_v26, %v8703_v49  ;;  %v1787_v14 = vld [vmem:[%s15576_s3 + $0x5e0] sm:$0xff]  ;;  %v1628_v49 = vld [vmem:[%s15576_s3 + $0xe8] sm:$0xff] }
 0x37e   :  { %v10626_v62 = vmax.f32 %v10500_v60, %v1539_v31  ;;  %v10629_v55 = vmax.f32 %v10498_v8, %v1538_v3  ;;  %v1705_v8 = vld [vmem:[%s15576_s3 + $0x350] sm:$0xff]  ;;  %1905 = vmatpush.msrb.mxu0 %v1757_v29  ;;  %v1667_v26 = vld [vmem:[%s15576_s3 + $0x220] sm:$0xff] }
 0x37f   :  { %1895 = vmatpush.msra.mxu3 %v1705_v8  ;;  %1878 = vmatpush.msra.mxu2 %v1667_v26  ;;  %v1781_v31 = vld [vmem:[%s15576_s3 + $0x5b0] sm:$0xff] }
 0x380   :  { %v1813_v3 = vld [vmem:[%s15576_s3 + $0x6b0] sm:$0x7f] }
 0x381   :  { %1896 = vmatpush.msra.mxu3 %v1703_v23  ;;  %1879 = vmatpush.msra.mxu2 %v1665_v47  ;;  %v1805_v8 = vld [vmem:[%s15576_s3 + $0x670] sm:$0xff] }
 0x382   :  { %v1769_v23 = vld [vmem:[%s15576_s3 + $0x550] sm:$0xff] }
 0x383   :  { %1897 = vmatpush.msra.mxu3 %v1701_v22  ;;  %1880 = vmatpush.msra.mxu2 %v1663_v41  ;;  %v1735_v22 = vld [vmem:[%s15576_s3 + $0x440] sm:$0xff]  ;;  %v1761_v29 = vld [vmem:[%s15576_s3 + $0x510] sm:$0xff] }
 0x385   :  { %1898 = vmatpush.msra.mxu3 %v1699_v2  ;;  %8254 = vmatpush.msk.msrb.mxu2 %vm15787_vm10, %v1813_v3  ;;  %v1733_v2 = vld [vmem:[%s15576_s3 + $0x430] sm:$0xff] }
 0x387   :  { %1899 = vmatpush.msra.mxu3 %v1697_v43  ;;  %1950 = vmatpush.msrb.mxu2 %v1811_v4  ;;  %v1731_v43 = vld [vmem:[%s15576_s3 + $0x420] sm:$0xff] }
 0x388   :  { %v1537_v39 = vpop.permute.xlu0 %1536 }
 0x389   :  { %v8696_v30 = vpop.permute.xlu1 %8695  ;;  %v10713_v6 = vmax.f32 %v10491_v34, %v1537_v39  ;;  %v1789_v34 = vld [vmem:[%s15576_s3 + $0x5f0] sm:$0xff]  ;;  %1900 = vmatpush.msra.mxu3 %v1695_v45  ;;  %1951 = vmatpush.msrb.mxu2 %v1809_v52 }
 0x38a   :  { %v8698_v25 = vunpack.i.h.bf16 %v8696_v30  ;;  %v8697_v12 = vunpack.i.l.bf16 %v8696_v30  ;;  %1925 = vmatpush.msrb.mxu1 %v1789_v34  ;;  %v1779_v30 = vld [vmem:[%s15576_s3 + $0x5a0] sm:$0xff]  ;;  %v1729_v45 = vld [vmem:[%s15576_s3 + $0x410] sm:$0xff] }
 0x38b   :  { %1965 = vmatpush.msrb.mxu3 %v1630_v15  ;;  %1952 = vmatpush.msrb.mxu2 %v1807_v16  ;;  %v1793_v34 = vld [vmem:[%s15576_s3 + $0x610] sm:$0xff]  ;;  %v1602_v15 = vld [vmem:[%s15576_s3 + $0x18] sm:$0xff] }
 0x38c   :  { %v1541_v28 = vsel %vm135_vm0, %v8693_v21, %v8697_v12  ;;  %v1542_v35 = vsel %vm135_vm0, %v8697_v12, %v8698_v25  ;;  %v1543_v60 = vsel %vm135_vm0, %v8698_v25, %v1537_v39  ;;  %v1755_v21 = vld [vmem:[%s15576_s3 + $0x4e0] sm:$0xff]  ;;  %1926 = vmatpush.msrb.mxu1 %v1787_v14  ;;  %v1745_v25 = vld [vmem:[%s15576_s3 + $0x490] sm:$0xff]  ;;  %v1690_v16 = vld [vmem:[%s15576_s3 + $0x2d8] sm:$0xff] }
 0x38d   :  { %v10647_v13 = vmax.f32 %v10449_v53, %v1541_v28  ;;  %v10650_v0 = vmax.f32 %v10487_v63, %v1542_v35  ;;  %v10653_v32 = vmax.f32 %v10489_v42, %v1543_v60  ;;  %1906 = vmatpush.msrb.mxu0 %v1755_v21  ;;  %1966 = vmatpush.msrb.mxu3 %v1628_v49  ;;  %v1777_v12 = vld [vmem:[%s15576_s3 + $0x590] sm:$0xff]  ;;  %v1743_v39 = vld [vmem:[%s15576_s3 + $0x480] sm:$0xff]  ;;  %v1616_v28 = vld [vmem:[%s15576_s3 + $0x88] sm:$0xff] }
 0x38e   :  { %1927 = vmatpush.msrb.mxu1 %v1785_v20  ;;  %v1741_v35 = vld [vmem:[%s15576_s3 + $0x470] sm:$0xff]  ;;  %1953 = vmatpush.msrb.mxu2 %v1805_v8  ;;  %v1759_v21 = vld [vmem:[%s15576_s3 + $0x500] sm:$0xff]  ;;  %v1600_v49 = vld [vmem:[%s15576_s3 + $0x8] sm:$0xff] }
 0x38f   :  { %v8704_v53 = vpack.i.bf16 %v10647_v13, %v10623_v40  ;;  %v8714_v63 = vpack.i.bf16 %v10653_v32, %v10626_v62  ;;  %v8709_v42 = vpack.i.bf16 %v10629_v55, %v10650_v0  ;;  %1907 = vmatpush.msrb.mxu0 %v1753_v46  ;;  %1967 = vmatpush.msrb.mxu3 %v1626_v33  ;;  %v1773_v60 = vld [vmem:[%s15576_s3 + $0x570] sm:$0xff]  ;;  %v1791_v14 = vld [vmem:[%s15576_s3 + $0x600] sm:$0xff]  ;;  %v1656_v8 = vld [vmem:[%s15576_s3 + $0x1c8] sm:$0xff] }
 0x390   :  { %1928 = vmatpush.msrb.mxu1 %v1783_v50 }
 0x391   :  { %8705 = vrot.lane.b32.xlu1 %v8704_v53, %s15741_s16  ;;  %8715 = vrot.lane.b32.xlu0 %v8714_v63, %s15741_s16  ;;  %v1803_v53 = vld [vmem:[%s15576_s3 + $0x660] sm:$0xff]  ;;  %v1612_v63 = vld [vmem:[%s15576_s3 + $0x68] sm:$0xff] }
 0x392   :  { %8710 = vrot.lane.b32.xlu2 %v8709_v42, %s15741_s16  ;;  %1908 = vmatpush.msrb.mxu0 %v1751_v5  ;;  %v1737_v42 = vld [vmem:[%s15576_s3 + $0x450] sm:$0xff] }
 0x393   :  { %1968 = vmatpush.msrb.mxu3 %v1624_v10  ;;  %1929 = vmatpush.msrb.mxu1 %v1781_v31 }
 0x394   :  { %1909 = vmatpush.msrb.mxu0 %v1749_v56  ;;  %1954 = vmatpush.msrb.mxu2 %v1803_v53  ;;  %v1752_v53 = vld [vmem:[%s15576_s3 + $0x4c8] sm:$0xff] }
 0x395   :  { %1969 = vmatpush.msrb.mxu3 %v1622_v36  ;;  %1930 = vmatpush.msrb.mxu1 %v1779_v30 }
 0x396   :  { %1910 = vmatpush.msrb.mxu0 %v1747_v1  ;;  %1955 = vmatpush.msrb.mxu2 %v1801_v18  ;;  %v1654_v18 = vld [vmem:[%s15576_s3 + $0x1b8] sm:$0xff] }
 0x397   :  { %1970 = vmatpush.msrb.mxu3 %v1620_v19  ;;  %1931 = vmatpush.msrb.mxu1 %v1777_v12  ;;  %v1662_v19 = vld [vmem:[%s15576_s3 + $0x1f8] sm:$0xff]  ;;  %v1692_v12 = vld [vmem:[%s15576_s3 + $0x2e8] sm:$0xff] }
 0x398   :  { %1911 = vmatpush.msrb.mxu0 %v1745_v25  ;;  %1956 = vmatpush.msrb.mxu2 %v1799_v58  ;;  %v1694_v25 = vld [vmem:[%s15576_s3 + $0x2f8] sm:$0xff]  ;;  %v1748_v58 = vld [vmem:[%s15576_s3 + $0x4a8] sm:$0xff] }
 0x399   :  { %1577 = vrot.lane.b32.xlu1 %v10713_v6, %s15741_s16  ;;  %1971 = vmatpush.msrb.mxu3 %v1618_v37  ;;  %v1724_v37 = vld [vmem:[%s15576_s3 + $0x3e8] sm:$0xff]  ;;  %s15747_s16 = smov 80  }
 0x39a   :  { %1912 = vmatpush.msrb.mxu0 %v1743_v39  ;;  %1932 = vmatpush.msrb.mxu1 %v1775_v17  ;;  %v1756_v39 = vld [vmem:[%s15576_s3 + $0x4e8] sm:$0xff]  ;;  %v1658_v17 = vld [vmem:[%s15576_s3 + $0x1d8] sm:$0xff] }
 0x39b   :  { %1972 = vmatpush.msrb.mxu3 %v1616_v28  ;;  %1957 = vmatpush.msrb.mxu2 %v1797_v48  ;;  %v1722_v28 = vld [vmem:[%s15576_s3 + $0x3d8] sm:$0xff] }
 0x39c   :  { %1913 = vmatpush.msrb.mxu0 %v1741_v35  ;;  %1933 = vmatpush.msrb.mxu1 %v1773_v60  ;;  %v1754_v35 = vld [vmem:[%s15576_s3 + $0x4d8] sm:$0xff] }
 0x39d   :  { %1973 = vmatpush.msrb.mxu3 %v1614_v61  ;;  %1958 = vmatpush.msrb.mxu2 %v1795_v51  ;;  %v1688_v61 = vld [vmem:[%s15576_s3 + $0x2c8] sm:$0xff]  ;;  %v1746_v48 = vld [vmem:[%s15576_s3 + $0x498] sm:$0xff] }
 0x39e   :  { %1914 = vmatpush.msrb.mxu0 %v1739_v7  ;;  %1934 = vmatpush.msrb.mxu1 %v1771_v11  ;;  %v1720_v11 = vld [vmem:[%s15576_s3 + $0x3c8] sm:$0xff] }
 0x39f   :  { %1974 = vmatpush.msrb.mxu3 %v1612_v63  ;;  %1959 = vmatpush.msrb.mxu2 %v1793_v34  ;;  %v1744_v51 = vld [vmem:[%s15576_s3 + $0x488] sm:$0xff]  ;;  %v1742_v34 = vld [vmem:[%s15576_s3 + $0x478] sm:$0xff] }
 0x3a0   :  { %1915 = vmatpush.msrb.mxu0 %v1737_v42  ;;  %1935 = vmatpush.msrb.mxu1 %v1769_v23 }
 0x3a1   :  { %1975 = vmatpush.msrb.mxu3 %v1610_v59  ;;  %1960 = vmatpush.msrb.mxu2 %v1791_v14  ;;  %v1686_v59 = vld [vmem:[%s15576_s3 + $0x2b8] sm:$0xff]  ;;  %v1740_v14 = vld [vmem:[%s15576_s3 + $0x468] sm:$0xff] }
 0x3a2   :  { %1916 = vmatpush.msrb.mxu0 %v1735_v22  ;;  %1936 = vmatpush.msrb.mxu1 %v1767_v24  ;;  %v1684_v22 = vld [vmem:[%s15576_s3 + $0x2a8] sm:$0xff] }
 0x3a3   :  { %1976 = vmatpush.msrb.mxu3 %v1608_v57  ;;  %v1716_v24 = vld [vmem:[%s15576_s3 + $0x3a8] sm:$0xff]  ;;  %v1650_v57 = vld [vmem:[%s15576_s3 + $0x198] sm:$0xff] }
 0x3a4   :  { %1917 = vmatpush.msrb.mxu0 %v1733_v2  ;;  %1937 = vmatpush.msrb.mxu1 %v1765_v27  ;;  %v1682_v2 = vld [vmem:[%s15576_s3 + $0x298] sm:$0xff] }
 0x3a5   :  { %1977 = vmatpush.msrb.mxu3 %v1606_v44  ;;  %v1714_v27 = vld [vmem:[%s15576_s3 + $0x398] sm:$0xff]  ;;  %v1648_v44 = vld [vmem:[%s15576_s3 + $0x188] sm:$0xff] }
 0x3a6   :  { %1918 = vmatpush.msrb.mxu0 %v1731_v43  ;;  %1938 = vmatpush.msrb.mxu1 %v1763_v38  ;;  %v1680_v43 = vld [vmem:[%s15576_s3 + $0x288] sm:$0xff] }
 0x3a7   :  { %1978 = vmatpush.msrb.mxu3 %v1604_v9  ;;  %v1712_v38 = vld [vmem:[%s15576_s3 + $0x388] sm:$0xff]  ;;  %v1646_v9 = vld [vmem:[%s15576_s3 + $0x178] sm:$0xff] }
 0x3a8   :  { %1919 = vmatpush.msrb.mxu0 %v1729_v45  ;;  %1939 = vmatpush.msrb.mxu1 %v1761_v29  ;;  %v1678_v45 = vld [vmem:[%s15576_s3 + $0x278] sm:$0xff] }
 0x3a9   :  { %1979 = vmatpush.msrb.mxu3 %v1602_v15  ;;  %v1710_v29 = vld [vmem:[%s15576_s3 + $0x378] sm:$0xff]  ;;  %v1644_v15 = vld [vmem:[%s15576_s3 + $0x168] sm:$0xff] }
 0x3aa   :  { %1920 = vmatpush.msrb.mxu0 %v1727_v54  ;;  %1940 = vmatpush.msrb.mxu1 %v1759_v21  ;;  %v1676_v54 = vld [vmem:[%s15576_s3 + $0x268] sm:$0xff] }
 0x3ab   :  { %1980 = vmatpush.msrb.mxu3 %v1600_v49  ;;  %v1708_v21 = vld [vmem:[%s15576_s3 + $0x368] sm:$0xff]  ;;  %v1642_v49 = vld [vmem:[%s15576_s3 + $0x158] sm:$0xff] }
 0x3ec   :  { %v8711_v26 = vpop.permute.xlu2 %8710 }
 0x3ed   :  { %v8713_v46 = vunpack.i.h.bf16 %v8711_v26  ;;  %v8712_v47 = vunpack.i.l.bf16 %v8711_v26  ;;  %v1674_v26 = vld [vmem:[%s15576_s3 + $0x258] sm:$0xff] }
 0x403   :  { %v8706_v20 = vpop.permute.xlu1 %8705  ;;  %v8716_v33 = vpop.permute.xlu0 %8715 }
 0x404   :  { %v8708_v5 = vunpack.i.h.bf16 %v8706_v20  ;;  %v8707_v50 = vunpack.i.l.bf16 %v8706_v20  ;;  %v8717_v10 = vunpack.i.l.bf16 %v8716_v33  ;;  %v1738_v20 = vld [vmem:[%s15576_s3 + $0x458] sm:$0xff] }
 0x406   :  { %v1579_v41 = vsel %vm367_vm4, %v8713_v46, %v8717_v10  ;;  %v1580_v56 = vsel %vm367_vm4, %v8717_v10, %v8707_v50  ;;  %v1581_v31 = vsel %vm367_vm4, %v8707_v50, %v8708_v5  ;;  %v1582_v3 = vsel %vm367_vm4, %v8708_v5, %v8712_v47  ;;  %v1706_v46 = vld [vmem:[%s15576_s3 + $0x358] sm:$0xff]  ;;  %v1704_v5 = vld [vmem:[%s15576_s3 + $0x348] sm:$0xff] }
 0x407   :  { %v1592_v36 = vmax.f32 %v10629_v55, %v1579_v41  ;;  %v10922_v1 = vmax.f32 %v10626_v62, %v1580_v56  ;;  %v10925_v30 = vmax.f32 %v10623_v40, %v1581_v31  ;;  %v10928_v4 = vmax.f32 %v10647_v13, %v1582_v3  ;;  %v1726_v62 = vld [vmem:[%s15576_s3 + $0x3f8] sm:$0xff]  ;;  %v1660_v13 = vld [vmem:[%s15576_s3 + $0x1e8] sm:$0xff] }
 0x408   :  { %v1758_v40 = vld [vmem:[%s15576_s3 + $0x4f8] sm:$0xff]  ;;  %v8718_v55 = vunpack.i.h.bf16 %v8716_v33  ;;  %v1640_v33 = vld [vmem:[%s15576_s3 + $0x148] sm:$0xff] }
 0x409   :  { %1841 = vmatmul.f32.vlgmr.msra.gmra.mxu0 %v1592_v36  ;;  %1861 = vmatmul.f32.vlgmr.msra.gmra.mxu1 %v10922_v1  ;;  %v1736_v50 = vld [vmem:[%s15576_s3 + $0x448] sm:$0xff]  ;;  %v1638_v10 = vld [vmem:[%s15576_s3 + $0x138] sm:$0xff] }
 0x40a   :  { %1881 = vmatmul.f32.vlgmr.msra.gmra.mxu2 %v10925_v30  ;;  %1901 = vmatmul.f32.vlgmr.msra.gmra.mxu3 %v10928_v4  ;;  %v1583_v7 = vsel %vm367_vm4, %v8712_v47, %v8718_v55  ;;  %v1672_v47 = vld [vmem:[%s15576_s3 + $0x248] sm:$0xff]  ;;  %v1670_v41 = vld [vmem:[%s15576_s3 + $0x238] sm:$0xff] }
 0x40b   :  { %1985 = vmatpush.msra.mxu2 %v1662_v19  ;;  %2005 = vmatpush.msra.mxu0 %v1694_v25  ;;  %v1578_v52 = vpop.permute.xlu1 %1577  ;;  %v10984_v63 = vmax.f32 %v10650_v0, %v1583_v7  ;;  %v1718_v0 = vld [vmem:[%s15576_s3 + $0x3b8] sm:$0xff]  ;;  %v1636_v3 = vld [vmem:[%s15576_s3 + $0x128] sm:$0xff] }
 0x40c   :  { %2025 = vmatpush.msra.mxu1 %v1726_v62  ;;  %2045 = vmatpush.msra.mxu3 %v1758_v40  ;;  %v1584_v60 = vsel %vm367_vm4, %v8718_v55, %v1578_v52  ;;  %v10990_v23 = vmax.f32 %v10713_v6, %v1578_v52  ;;  %v1652_v6 = vld [vmem:[%s15576_s3 + $0x1a8] sm:$0xff]  ;;  %v1702_v56 = vld [vmem:[%s15576_s3 + $0x338] sm:$0xff] }
 0x40d   :  { %1986 = vmatpush.msra.mxu2 %v1660_v13  ;;  %2006 = vmatpush.msra.mxu0 %v1692_v12  ;;  %v10987_v42 = vmax.f32 %v10653_v32, %v1584_v60  ;;  %v1750_v32 = vld [vmem:[%s15576_s3 + $0x4b8] sm:$0xff]  ;;  %v1700_v19 = vld [vmem:[%s15576_s3 + $0x328] sm:$0xff]  ;;  %v11159_v60 = vld [vmem:[%s15577_s4] sm:$0xff] }
 0x40e   :  { %2026 = vmatpush.msra.mxu1 %v1724_v37  ;;  %2046 = vmatpush.msra.mxu3 %v1756_v39  ;;  %v1734_v31 = vld [vmem:[%s15576_s3 + $0x438] sm:$0xff]  ;;  %v1732_v25 = vld [vmem:[%s15576_s3 + $0x428] sm:$0xff] }
 0x40f   :  { %1987 = vmatpush.msra.mxu2 %v1658_v17  ;;  %2007 = vmatpush.msra.mxu0 %v1690_v16  ;;  %v1634_v62 = vld [vmem:[%s15576_s3 + $0x118] sm:$0xff]  ;;  %v1632_v12 = vld [vmem:[%s15576_s3 + $0x108] sm:$0xff] }
 0x410   :  { %2027 = vmatpush.msra.mxu1 %v1722_v28  ;;  %2047 = vmatpush.msra.mxu3 %v1754_v35  ;;  %v1666_v40 = vld [vmem:[%s15576_s3 + $0x218] sm:$0xff]  ;;  %v1664_v52 = vld [vmem:[%s15576_s3 + $0x208] sm:$0xff] }
 0x411   :  { %1988 = vmatpush.msra.mxu2 %v1656_v8  ;;  %2008 = vmatpush.msra.mxu0 %v1688_v61  ;;  %v1698_v55 = vld [vmem:[%s15576_s3 + $0x318] sm:$0xff]  ;;  %v1696_v37 = vld [vmem:[%s15576_s3 + $0x308] sm:$0xff] }
 0x412   :  { %2028 = vmatpush.msra.mxu1 %v1720_v11  ;;  %2048 = vmatpush.msra.mxu3 %v1752_v53  ;;  %v1730_v13 = vld [vmem:[%s15576_s3 + $0x418] sm:$0xff]  ;;  %v1728_v39 = vld [vmem:[%s15576_s3 + $0x408] sm:$0xff] }
 0x413   :  { %1921 = vmatmul.f32.vlgmr.msrb.gmra.mxu0 %v10984_v63  ;;  %1941 = vmatmul.f32.vlgmr.msrb.gmra.mxu1 %v10987_v42  ;;  %v1790_v17 = vld [vmem:[%s15576_s3 + $0x5f8] sm:$0xff]  ;;  %v1788_v28 = vld [vmem:[%s15576_s3 + $0x5e8] sm:$0xff] }
 0x414   :  { %8255 = vmatmul.msk.f32.vlgmr.msrb.gmra.mxu2 %vm425_vm5, %v10990_v23  ;;  %1981 = vmatmul.f32.vlgmr.msrb.gmra.mxu3 %v1592_v36  ;;  %v1668_v36 = vld [vmem:[%s15576_s3 + $0x228] sm:$0xff]  ;;  %v1814_v16 = vld [vmem:[%s15576_s3 + $0x6b8] sm:$0x7f] }
 0x415   :  { %1989 = vmatpush.msra.mxu2 %v1654_v18  ;;  %2009 = vmatpush.msra.mxu0 %v1686_v59  ;;  %v1812_v35 = vld [vmem:[%s15576_s3 + $0x6a8] sm:$0xff]  ;;  %v1782_v7 = vld [vmem:[%s15576_s3 + $0x5b8] sm:$0xff] }
 0x416   :  { %2029 = vmatpush.msra.mxu1 %v1718_v0  ;;  %2049 = vmatpush.msra.mxu3 %v1750_v32  ;;  %v1784_v8 = vld [vmem:[%s15576_s3 + $0x5c8] sm:$0xff]  ;;  %v1806_v11 = vld [vmem:[%s15576_s3 + $0x678] sm:$0xff] }
 0x417   :  { %1990 = vmatpush.msra.mxu2 %v1652_v6  ;;  %2010 = vmatpush.msra.mxu0 %v1684_v22  ;;  %v1808_v61 = vld [vmem:[%s15576_s3 + $0x688] sm:$0xff]  ;;  %v1778_v18 = vld [vmem:[%s15576_s3 + $0x598] sm:$0xff] }
 0x418   :  { %2030 = vmatpush.msra.mxu1 %v1716_v24  ;;  %2050 = vmatpush.msra.mxu3 %v1748_v58  ;;  %v1780_v53 = vld [vmem:[%s15576_s3 + $0x5a8] sm:$0xff]  ;;  %v1802_v59 = vld [vmem:[%s15576_s3 + $0x658] sm:$0xff] }
 0x419   :  { %1991 = vmatpush.msra.mxu2 %v1650_v57  ;;  %2011 = vmatpush.msra.mxu0 %v1682_v2  ;;  %v1776_v0 = vld [vmem:[%s15576_s3 + $0x588] sm:$0xff]  ;;  %v1774_v6 = vld [vmem:[%s15576_s3 + $0x578] sm:$0xff] }
 0x41a   :  { %2031 = vmatpush.msra.mxu1 %v1714_v27  ;;  %2051 = vmatpush.msra.mxu3 %v1746_v48  ;;  %v1800_v32 = vld [vmem:[%s15576_s3 + $0x648] sm:$0xff]  ;;  %v1798_v22 = vld [vmem:[%s15576_s3 + $0x638] sm:$0xff] }
 0x41b   :  { %1992 = vmatpush.msra.mxu2 %v1648_v44  ;;  %2012 = vmatpush.msra.mxu0 %v1680_v43  ;;  %v1772_v24 = vld [vmem:[%s15576_s3 + $0x568] sm:$0xff]  ;;  %v1770_v57 = vld [vmem:[%s15576_s3 + $0x558] sm:$0xff] }
 0x41c   :  { %2032 = vmatpush.msra.mxu1 %v1712_v38  ;;  %2052 = vmatpush.msra.mxu3 %v1744_v51  ;;  %v1796_v58 = vld [vmem:[%s15576_s3 + $0x628] sm:$0xff]  ;;  %v1794_v2 = vld [vmem:[%s15576_s3 + $0x618] sm:$0xff] }
 0x41d   :  { %1993 = vmatpush.msra.mxu2 %v1646_v9  ;;  %2013 = vmatpush.msra.mxu0 %v1678_v45  ;;  %v1768_v27 = vld [vmem:[%s15576_s3 + $0x548] sm:$0xff]  ;;  %v1766_v44 = vld [vmem:[%s15576_s3 + $0x538] sm:$0xff] }
 0x41e   :  { %2033 = vmatpush.msra.mxu1 %v1710_v29  ;;  %2053 = vmatpush.msra.mxu3 %v1742_v34  ;;  %v1792_v48 = vld [vmem:[%s15576_s3 + $0x608] sm:$0xff]  ;;  %v1762_v38 = vld [vmem:[%s15576_s3 + $0x518] sm:$0xff] }
 0x41f   :  { %1994 = vmatpush.msra.mxu2 %v1644_v15  ;;  %2014 = vmatpush.msra.mxu0 %v1676_v54  ;;  %v1764_v43 = vld [vmem:[%s15576_s3 + $0x528] sm:$0xff] }
 0x420   :  { %2034 = vmatpush.msra.mxu1 %v1708_v21  ;;  %2054 = vmatpush.msra.mxu3 %v1740_v14 }
 0x421   :  { %1995 = vmatpush.msra.mxu2 %v1642_v49  ;;  %2015 = vmatpush.msra.mxu0 %v1674_v26 }
 0x422   :  { %2035 = vmatpush.msra.mxu1 %v1706_v46  ;;  %2055 = vmatpush.msra.mxu3 %v1738_v20 }
 0x423   :  { %1996 = vmatpush.msra.mxu2 %v1640_v33  ;;  %2016 = vmatpush.msra.mxu0 %v1672_v47 }
 0x424   :  { %2036 = vmatpush.msra.mxu1 %v1704_v5  ;;  %2056 = vmatpush.msra.mxu3 %v1736_v50 }
 0x425   :  { %1997 = vmatpush.msra.mxu2 %v1638_v10  ;;  %2017 = vmatpush.msra.mxu0 %v1670_v41 }
 0x426   :  { %2037 = vmatpush.msra.mxu1 %v1702_v56  ;;  %2057 = vmatpush.msra.mxu3 %v1734_v31 }
 0x427   :  { %1998 = vmatpush.msra.mxu2 %v1636_v3  ;;  %2018 = vmatpush.msra.mxu0 %v1668_v36 }
 0x428   :  { %2038 = vmatpush.msra.mxu1 %v1700_v19  ;;  %2058 = vmatpush.msra.mxu3 %v1732_v25 }
 0x429   :  { %1999 = vmatpush.msra.mxu2 %v1634_v62  ;;  %2019 = vmatpush.msra.mxu0 %v1666_v40 }
 0x42a   :  { %2039 = vmatpush.msra.mxu1 %v1698_v55  ;;  %2059 = vmatpush.msra.mxu3 %v1730_v13 }
 0x42b   :  { %2000 = vmatpush.msra.mxu2 %v1632_v12  ;;  %2020 = vmatpush.msra.mxu0 %v1664_v52 }
 0x42c   :  { %2040 = vmatpush.msra.mxu1 %v1696_v37  ;;  %2060 = vmatpush.msra.mxu3 %v1728_v39 }
 0x42d   :  { %2001 = vmatmul.f32.vlgmr.msra.gmra.mxu2 %v10922_v1  ;;  %2021 = vmatmul.f32.vlgmr.msra.gmra.mxu0 %v10925_v30  ;;  %v11164_v1 = vld [vmem:[%s15577_s4 + $0x10] sm:$0xff]  ;;  %v1786_v30 = vld [vmem:[%s15576_s3 + $0x5d8] sm:$0xff] }
 0x42e   :  { %2041 = vmatmul.f32.vlgmr.msra.gmra.mxu1 %v10928_v4  ;;  %2061 = vmatmul.f32.vlgmr.msra.gmra.mxu3 %v10984_v63  ;;  %v1810_v4 = vld [vmem:[%s15576_s3 + $0x698] sm:$0xff]  ;;  %v1804_v63 = vld [vmem:[%s15576_s3 + $0x668] sm:$0xff] }
 0x42f   :  { %2065 = vmatpush.msrb.mxu2 %v1790_v17  ;;  %8256 = vmatpush.msk.msrb.mxu0 %vm15787_vm10, %v1814_v16  ;;  %vm16234_vm10 = vcmask 1022976  }
 0x430   :  { %2113 = vrot.lane.b32.xlu1 %v11159_v60, %s15739_s22  ;;  %2115 = vrot.lane.b32.xlu2 %v11164_v1, %s15739_s22  ;;  %s15939_s22 = smov 68  }
 0x431   :  { %2066 = vmatpush.msrb.mxu2 %v1788_v28  ;;  %2090 = vmatpush.msrb.mxu0 %v1812_v35 }
 0x432   :  { %2236 = vrot.lane.b32.xlu0 %v11164_v1, %s15743_s25 }
 0x433   :  { %2067 = vmatpush.msrb.mxu2 %v1786_v30  ;;  %2091 = vmatpush.msrb.mxu0 %v1810_v4 }
 0x435   :  { %2068 = vmatpush.msrb.mxu2 %v1784_v8  ;;  %2092 = vmatpush.msrb.mxu0 %v1808_v61 }
 0x437   :  { %2069 = vmatpush.msrb.mxu2 %v1782_v7  ;;  %2093 = vmatpush.msrb.mxu0 %v1806_v11 }
 0x438   :  { %2368 = vrot.lane.b32.xlu1 %v11159_v60, %s15749_s19  ;;  %2234 = vrot.lane.b32.xlu2 %v11159_v60, %s15743_s25  ;;  %s15759_s25 = smov 99  }
 0x439   :  { %2070 = vmatpush.msrb.mxu2 %v1780_v53  ;;  %2094 = vmatpush.msrb.mxu0 %v1804_v63 }
 0x43a   :  { %2503 = vrot.lane.b32.xlu0 %v11159_v60, %s8829_s20 }
 0x43b   :  { %2071 = vmatpush.msrb.mxu2 %v1778_v18  ;;  %2095 = vmatpush.msrb.mxu0 %v1802_v59 }
 0x43d   :  { %2072 = vmatpush.msrb.mxu2 %v1776_v0  ;;  %2096 = vmatpush.msrb.mxu0 %v1800_v32 }
 0x43f   :  { %2073 = vmatpush.msrb.mxu2 %v1774_v6  ;;  %2097 = vmatpush.msrb.mxu0 %v1798_v22 }
 0x440   :  { %2303 = vrot.lane.b32.xlu1 %v11164_v1, %s15779_s18  ;;  %2301 = vrot.lane.b32.xlu2 %v11159_v60, %s15779_s18 }
 0x441   :  { %2074 = vmatpush.msrb.mxu2 %v1772_v24  ;;  %2098 = vmatpush.msrb.mxu0 %v1796_v58 }
 0x442   :  { %2437 = vrot.lane.b32.xlu0 %v11164_v1, %s15771_s24 }
 0x443   :  { %2075 = vmatpush.msrb.mxu2 %v1770_v57  ;;  %2099 = vmatpush.msrb.mxu0 %v1794_v2 }
 0x445   :  { %2076 = vmatpush.msrb.mxu2 %v1768_v27  ;;  %2100 = vmatpush.msrb.mxu0 %v1792_v48 }
 0x446   :  { %8257 = vmatmul.msk.f32.vlgmr.msrb.gmra.mxu0 %vm425_vm5, %v10990_v23  ;;  %v1760_v23 = vld [vmem:[%s15576_s3 + $0x508] sm:$0xff] }
 0x447   :  { %2077 = vmatpush.msrb.mxu2 %v1766_v44 }
 0x448   :  { %2435 = vrot.lane.b32.xlu1 %v11159_v60, %s15771_s24  ;;  %2370 = vrot.lane.b32.xlu2 %v11164_v1, %s15749_s19  ;;  %s15755_s19 = smov 100  }
 0x449   :  { %2078 = vmatpush.msrb.mxu2 %v1764_v43 }
 0x44a   :  { %2571 = vrot.lane.b32.xlu0 %v11159_v60, %s15765_s27 }
 0x44b   :  { %2079 = vmatpush.msrb.mxu2 %v1762_v38 }
 0x44d   :  { %2080 = vmatpush.msrb.mxu2 %v1760_v23 }
 0x44e   :  { %2081 = vmatmul.f32.vlgmr.msrb.gmra.mxu2 %v10987_v42 }
 0x450   :  { %2505 = vrot.lane.b32.xlu1 %v11164_v1, %s8829_s20  ;;  %2639 = vrot.lane.b32.xlu2 %v11159_v60, %s15747_s16 }
 0x452   :  { %2641 = vrot.lane.b32.xlu0 %v11164_v1, %s15747_s16  ;;  %s15751_s16 = smov 113  }
 0x458   :  { %2775 = vrot.lane.b32.xlu1 %v11159_v60, %s15939_s22  ;;  %2573 = vrot.lane.b32.xlu2 %v11164_v1, %s15765_s27 }
 0x45a   :  { %2911 = vrot.lane.b32.xlu0 %v11159_v60, %s15757_s28 }
 0x460   :  { %2709 = vrot.lane.b32.xlu1 %v11164_v1, %s15745_s17  ;;  %2707 = vrot.lane.b32.xlu2 %v11159_v60, %s15745_s17  ;;  %s8854_s17 = smov 112  }
 0x468   :  { %2843 = vrot.lane.b32.xlu1 %v11159_v60, %s15891_s23  ;;  %2777 = vrot.lane.b32.xlu2 %v11164_v1, %s15939_s22 }
 0x486   :  { %v1842_v42 = vpop.f32.mrf.mxu0  ;;  %v1862_v51 = vpop.f32.mrf.mxu1 }
 0x487   :  { %v1863_v9 = vadd.f32 %v1862_v51, %v1842_v42 }
 0x48a   :  { %v11310_v33 = vpop.permute.xlu2 %2115 }
 0x48d   :  { %v1882_v45 = vpop.f32.mrf.mxu2  ;;  %v1902_v34 = vpop.f32.mrf.mxu3 }
 0x48e   :  { %v1883_v29 = vadd.f32 %v1882_v45, %v1863_v9  ;;  %v11469_v9 = vld [vmem:[%s15577_s4 + $0x8] sm:$0xff] }
 0x490   :  { %v1903_v15 = vadd.f32 %v1902_v34, %v1883_v29  ;;  %v1922_v54 = vpop.f32.mrf.mxu0  ;;  %v1942_v14 = vpop.f32.mrf.mxu1 }
 0x492   :  { %v1923_v21 = vadd.f32 %v1922_v54, %v1903_v15  ;;  %v11314_v41 = vpop.permute.xlu2 %2234 }
 0x494   :  { %v1943_v49 = vadd.f32 %v1942_v14, %v1923_v21 }
 0x497   :  { %v1962_v26 = vpop.f32.mrf.mxu2  ;;  %v1982_v5 = vpop.f32.mrf.mxu3 }
 0x498   :  { %v1963_v46 = vadd.f32 %v1962_v26, %v1943_v49 }
 0x49a   :  { %2105 = vst [vmem:[#allocation3] sm:$0x3f] %v1963_v46  ;;  %v11316_v25 = vpop.permute.xlu2 %2301 }
 0x4a1   :  { %v11286_v20 = vld [vmem:[#allocation3] sm:$0x3f] }
 0x4a2   :  { %2439 = vrot.lane.b32.xlu1 %v11286_v20, %s15783_s26  ;;  %2238 = vrot.lane.b32.xlu0 %v11286_v20, %s8813_s30  ;;  %v11318_v12 = vpop.permute.xlu2 %2370  ;;  %v11328_v37 = vpop.permute.xlu1 %2113 }
 0x4a3   :  { %2119 = vrot.lane.b32.xlu2 %v11286_v20, %s8812_s29 }
 0x4a4   :  { %v11340_v16 = vpop.permute.xlu0 %2236 }
 0x4aa   :  { %2643 = vrot.lane.b32.xlu1 %v11286_v20, %s15753_s21  ;;  %2372 = vrot.lane.b32.xlu0 %v11286_v20, %s8820_s15  ;;  %v2022_v10 = vpop.f32.mrf.mxu0  ;;  %v11330_v39 = vpop.permute.xlu2 %2639 }
 0x4ab   :  { %2305 = vrot.lane.b32.xlu2 %v11286_v20, %s8816_s14  ;;  %v2042_v31 = vpop.f32.mrf.mxu1  ;;  %v11338_v17 = vpop.permute.xlu1 %2368 }
 0x4ac   :  { %v11358_v30 = vpop.permute.xlu0 %2503 }
 0x4b0   :  { %v2002_v47 = vpop.f32.mrf.mxu2 }
 0x4b1   :  { %v2003_v50 = vadd.f32 %v2002_v47, %v1982_v5  ;;  %v2062_v36 = vpop.f32.mrf.mxu3 }
 0x4b2   :  { %2847 = vrot.lane.b32.xlu1 %v11286_v20, %s15759_s25  ;;  %2575 = vrot.lane.b32.xlu0 %v11286_v20, %s8854_s17  ;;  %v11346_v28 = vpop.permute.xlu2 %2573 }
 0x4b3   :  { %2507 = vrot.lane.b32.xlu2 %v11286_v20, %s15751_s16  ;;  %v2023_v56 = vadd.f32 %v2022_v10, %v2003_v50  ;;  %v11356_v35 = vpop.permute.xlu1 %2303 }
 0x4b4   :  { %v11370_v61 = vpop.permute.xlu0 %2437 }
 0x4b5   :  { %v2043_v3 = vadd.f32 %v2042_v31, %v2023_v56 }
 0x4b7   :  { %v2063_v19 = vadd.f32 %v2062_v36, %v2043_v3 }
 0x4ba   :  { %2779 = vrot.lane.b32.xlu0 %v11286_v20, %s15755_s19  ;;  %v11360_v4 = vpop.permute.xlu2 %2707 }
 0x4bb   :  { %2711 = vrot.lane.b32.xlu2 %v11286_v20, %s15779_s18  ;;  %v11368_v8 = vpop.permute.xlu1 %2435 }
 0x4bc   :  { %v11382_v53 = vpop.permute.xlu0 %2571 }
 0x4c2   :  { %v11372_v7 = vpop.permute.xlu2 %2777 }
 0x4c3   :  { %2915 = vrot.lane.b32.xlu2 %v11286_v20, %s15771_s24  ;;  %v2102_v55 = vpop.f32.mrf.mxu0  ;;  %v11380_v11 = vpop.permute.xlu1 %2505 }
 0x4c4   :  { %v11394_v59 = vpop.permute.xlu0 %2641 }
 0x4cb   :  { %v11392_v18 = vpop.permute.xlu1 %2775 }
 0x4cc   :  { %v11412_v6 = vpop.permute.xlu0 %2911 }
 0x4d1   :  { %v2082_v62 = vpop.f32.mrf.mxu2 }
 0x4d2   :  { %v2083_v40 = vadd.f32 %v2082_v62, %v2063_v19 }
 0x4d3   :  { %v11410_v32 = vpop.permute.xlu1 %2709 }
 0x4d4   :  { %v2103_v13 = vadd.f32 %v2102_v55, %v2083_v40 }
 0x4d6   :  { %2106 = vst [vmem:[#allocation3 + $0x8] sm:$0x3f] %v2103_v13 }
 0x4db   :  { %v11422_v24 = vpop.permute.xlu1 %2843 }
 0x4dd   :  { %v11320_v52 = vld [vmem:[#allocation3 + $0x8] sm:$0x3f] }
 0x4de   :  { %2240 = vrot.lane.b32.xlu1 %v11320_v52, %s8813_s30  ;;  %2121 = vrot.lane.b32.xlu0 %v11320_v52, %s8812_s29 }
 0x4df   :  { %2509 = vrot.lane.b32.xlu2 %v11320_v52, %s15751_s16  ;;  %s15763_s16 = smov 97  }
 0x4e6   :  { %2307 = vrot.lane.b32.xlu1 %v11320_v52, %s8816_s14  ;;  %2374 = vrot.lane.b32.xlu0 %v11320_v52, %s8820_s15 }
 0x4e7   :  { %2577 = vrot.lane.b32.xlu2 %v11320_v52, %s8854_s17 }
 0x4ee   :  { %2645 = vrot.lane.b32.xlu1 %v11320_v52, %s15753_s21  ;;  %2441 = vrot.lane.b32.xlu0 %v11320_v52, %s15783_s26  ;;  %s15767_s21 = smov 44   ;;  %s15822_s26 = smov 71  }
 0x4ef   :  { %2917 = vrot.lane.b32.xlu2 %v11320_v52, %s15771_s24  ;;  %s15889_s24 = smov 82  }
 0x4f6   :  { %2713 = vrot.lane.b32.xlu1 %v11320_v52, %s15779_s18  ;;  %2781 = vrot.lane.b32.xlu0 %v11320_v52, %s15755_s19  ;;  %s16232_s19 = smov 96   ;;  %s15793_s18 = smov 14  }
 0x4f7   :  { %2985 = vrot.lane.b32.xlu2 %v11320_v52, %s15763_s16 }
 0x4fd   :  { %v11384_v63 = vpop.permute.xlu2 %2119 }
 0x4fe   :  { %2913 = vrot.lane.b32.xlu1 %v11164_v1, %s15757_s28  ;;  %2849 = vrot.lane.b32.xlu0 %v11320_v52, %s15759_s25  ;;  %s15761_s28 = smov 50   ;;  %s15769_s25 = smov 38  }
 0x4ff   :  { %3047 = vrot.lane.b32.xlu2 %v11159_v60, %s15767_s21 }
 0x505   :  { %v11400_v0 = vpop.permute.xlu2 %2305 }
 0x506   :  { %3053 = vrot.lane.b32.xlu1 %v11320_v52, %s16232_s19  ;;  %2845 = vrot.lane.b32.xlu0 %v11164_v1, %s15891_s23 }
 0x507   :  { %2981 = vrot.lane.b32.xlu2 %v11164_v1, %s15761_s28 }
 0x50d   :  { %v11414_v22 = vpop.permute.xlu2 %2507 }
 0x50e   :  { %3051 = vrot.lane.b32.xlu1 %v11286_v20, %s16232_s19  ;;  %2979 = vrot.lane.b32.xlu0 %v11159_v60, %s15761_s28  ;;  %s16233_s28 = smov 32  }
 0x50f   :  { %3114 = vrot.lane.b32.xlu2 %v11159_v60, %s15769_s25 }
 0x514   :  { %v2239_v58 = vpop.permute.xlu0 %2238  ;;  %v11432_v2 = vpop.permute.xlu1 %2439 }
 0x515   :  { %v11424_v57 = vpop.permute.xlu2 %2711 }
 0x516   :  { %3120 = vrot.lane.b32.xlu1 %v11320_v52, %s15765_s27  ;;  %2983 = vrot.lane.b32.xlu0 %v11286_v20, %s15763_s16  ;;  %s15775_s16 = smov 85  }
 0x517   :  { %3118 = vrot.lane.b32.xlu2 %v11286_v20, %s15765_s27  ;;  %s15773_s27 = smov 83  }
 0x51c   :  { %v2373_v27 = vpop.permute.xlu0 %2372  ;;  %v11444_v43 = vpop.permute.xlu1 %2643 }
 0x51d   :  { %v11434_v48 = vpop.permute.xlu2 %2915 }
 0x51e   :  { %3182 = vrot.lane.b32.xlu1 %v11159_v60, %s16233_s28  ;;  %3049 = vrot.lane.b32.xlu0 %v11164_v1, %s15767_s21  ;;  %s15785_s21 = smov 26  }
 0x51f   :  { %3184 = vrot.lane.b32.xlu2 %v11164_v1, %s16233_s28 }
 0x524   :  { %v11446_v38 = vpop.permute.xlu0 %2575  ;;  %v11462_v42 = vpop.permute.xlu1 %2847 }
 0x526   :  { %3116 = vrot.lane.b32.xlu1 %v11164_v1, %s15769_s25  ;;  %3188 = vrot.lane.b32.xlu0 %v11320_v52, %s15775_s16  ;;  %s15777_s25 = smov 84  }
 0x527   :  { %3324 = vrot.lane.b32.xlu2 %v11320_v52, %s15773_s27 }
 0x52c   :  { %v11464_v51 = vpop.permute.xlu0 %2779 }
 0x52e   :  { %3250 = vrot.lane.b32.xlu1 %v11159_v60, %s15785_s21  ;;  %3186 = vrot.lane.b32.xlu0 %v11286_v20, %s15775_s16  ;;  %s15788_s16 = smov 8  }
 0x52f   :  { %3322 = vrot.lane.b32.xlu2 %v11286_v20, %s15773_s27  ;;  %s15781_s27 = smov 20  }
 0x536   :  { %3254 = vrot.lane.b32.xlu1 %v11286_v20, %s15777_s25  ;;  %3256 = vrot.lane.b32.xlu0 %v11320_v52, %s15777_s25  ;;  %s15870_s25 = smov 72  }
 0x537   :  { %3392 = vrot.lane.b32.xlu2 %v11320_v52, %s15889_s24 }
 0x539   :  { %v11442_v44 = vpop.permute.xlu2 %2509 }
 0x53e   :  { %3320 = vrot.lane.b32.xlu1 %v11164_v1, %s15781_s27  ;;  %3318 = vrot.lane.b32.xlu0 %v11159_v60, %s15781_s27  ;;  %s15791_s27 = smov 70  }
 0x53f   :  { %3454 = vrot.lane.b32.xlu2 %v11159_v60, %s15788_s16 }
 0x541   :  { %v11458_v23 = vpop.permute.xlu2 %2577 }
 0x546   :  { %3460 = vrot.lane.b32.xlu1 %v11320_v52, %s15870_s25  ;;  %3252 = vrot.lane.b32.xlu0 %v11164_v1, %s15785_s21  ;;  %s15797_s21 = smov 2  }
 0x547   :  { %3388 = vrot.lane.b32.xlu2 %v11164_v1, %s15793_s18 }
 0x549   :  { %v11477_v34 = vpop.permute.xlu2 %2917 }
 0x54e   :  { %3458 = vrot.lane.b32.xlu1 %v11286_v20, %s15870_s25  ;;  %3386 = vrot.lane.b32.xlu0 %v11159_v60, %s15793_s18  ;;  %s15814_s18 = smov 118   ;;  %s16351_s25 = smov 29  }
 0x54f   :  { %3532 = vrot.lane.b32.xlu2 %v11469_v9, %s15797_s21 }
 0x550   :  { %v2241_v45 = vpop.permute.xlu1 %2240  ;;  %v2122_v29 = vpop.permute.xlu0 %2121 }
 0x551   :  { %8576 = vmatpush.msk.msrb.mxu3 %vm15932_vm3, %v2122_v29  ;;  %8577 = vmatpush.msk.msra.mxu2 %vm15932_vm3, %v2241_v45  ;;  %v2123_v15 = vsel %vm135_vm0, %v11384_v63, %v2122_v29  ;;  %v2242_v54 = vsel %vm193_vm1, %v2239_v58, %v2241_v45  ;;  %v11512_v26 = vpop.permute.xlu2 %2985 }
 0x552   :  { %8258 = vmatpush.msk.msrb.mxu1 %vm15932_vm3, %v2123_v15  ;;  %8263 = vmatmul.msk.f32.vlgmr.msrb.gmra.mxu3 %vm15931_vm2, %v11310_v33  ;;  %v16246_v15 = vmov 18  }
 0x553   :  { %8267 = vmatpush.msk.msra.mxu3 %vm15932_vm3, %v11320_v52  ;;  %8270 = vmatpush.msk.msra.mxu0 %vm15932_vm3, %v2242_v54 }
 0x554   :  { %8275 = vmatmul.msk.f32.vlgmr.msra.gmra.mxu2 %vm15931_vm2, %v11340_v16  ;;  %8259 = vmatmul.msk.f32.vlgmr.msrb.gmra.mxu1 %vm15931_vm2, %v11328_v37 }
 0x555   :  { %8261 = vmatpush.msk.msra.mxu1 %vm15932_vm3, %v2122_v29  ;;  %8271 = vmatmul.msk.f32.vlgmr.msra.gmra.mxu0 %vm15931_vm2, %v11314_v41  ;;  %v16245_v29 = vmov 15  }
 0x556   :  { %8273 = vmatpush.msk.msrb.mxu0 %vm15932_vm3, %v2241_v45  ;;  %3530 = vrot.lane.b32.xlu1 %v11159_v60, %s15797_s21 }
 0x557   :  { %8264 = vmatpush.msk.msrb.mxu1 %vm15932_vm3, %v11286_v20  ;;  %3390 = vrot.lane.b32.xlu0 %v11286_v20, %s15889_s24  ;;  %s16711_s24 = smov 99  }
 0x558   :  { %3605 = vrot.lane.b32.xlu2 %v11469_v9, %s8820_s15  ;;  %v2308_v21 = vpop.permute.xlu1 %2307  ;;  %v2375_v14 = vpop.permute.xlu0 %2374 }
 0x559   :  { %v2376_v49 = vsel %vm16231_vm9, %v2373_v27, %v2375_v14  ;;  %8279 = vmatpush.msk.msrb.mxu3 %vm15932_vm3, %v2308_v21  ;;  %8285 = vmatpush.msk.msrb.mxu2 %vm15932_vm3, %v2375_v14  ;;  %vm15790_vm9 = vcmask 924672   ;;  %v11541_v50 = vpop.permute.xlu2 %3047  ;;  %v16239_v27 = vmov 10  }
 0x55a   :  { %8268 = vmatmul.msk.f32.vlgmr.msra.gmra.mxu3 %vm15931_vm2, %v11159_v60  ;;  %8282 = vmatpush.msk.msra.mxu0 %vm15932_vm3, %v2376_v49  ;;  %v2512_v5 = vsel %vm15790_vm9, %v11414_v22, %v11442_v44  ;;  %vm15796_vm9 = vcmask 932864   ;;  %v16237_v22 = vmov 7   ;;  %v16248_v49 = vmov 17  }
 0x55b   :  { %8297 = vmatpush.msk.msra.mxu2 %vm15932_vm3, %v11442_v44 }
 0x55c   :  { %8286 = vmatmul.msk.f32.vlgmr.msrb.gmra.mxu2 %vm15931_vm2, %v11338_v17  ;;  %8260 = vmatmul.msk.f32.gmra.mxu1 %vm15931_vm2, %v11310_v33  ;;  %v2309_v33 = vsel %vm16234_vm10, %v11400_v0, %v2308_v21  ;;  %vm15795_vm10 = vcmask 908288  }
 0x55d   :  { %8272 = vmatmul.msk.f32.gmra.mxu0 %vm15931_vm2, %v11340_v16 }
 0x55e   :  { %3611 = vrot.lane.b32.xlu1 %v11320_v52, %s15791_s27 }
 0x55f   :  { %3456 = vrot.lane.b32.xlu0 %v11164_v1, %s15788_s16  ;;  %s15816_s16 = smov 69  }
 0x560   :  { %3534 = vrot.lane.b32.xlu2 %v11164_v1, %s15797_s21  ;;  %v2646_v46 = vpop.permute.xlu1 %2645  ;;  %v2442_v47 = vpop.permute.xlu0 %2441 }
 0x561   :  { %8291 = vmatpush.msk.msra.mxu3 %vm15932_vm3, %v2442_v47  ;;  %8309 = vmatpush.msk.msrb.mxu2 %vm15932_vm3, %v2646_v46  ;;  %v2648_v31 = vsel %vm15795_vm10, %v11444_v43, %v2646_v46  ;;  %v2444_v3 = vsel %vm15796_vm9, %v11432_v2, %v2442_v47  ;;  %vm15800_vm10 = vcmask 916480   ;;  %vm15799_vm9 = vcmask 818176  }
 0x562   :  { %8269 = vmatmul.msk.f32.gmra.mxu3 %vm15931_vm2, %v11164_v1  ;;  %v16238_v2 = vmov 6  }
 0x564   :  { %8287 = vmatmul.msk.f32.gmra.mxu2 %vm15931_vm2, %v11318_v12  ;;  %8262 = vmatmul.msk.f32.vlgmr.msra.gmra.mxu1 %vm15931_vm2, %v11328_v37 }
 0x565   :  { %8274 = vmatmul.msk.f32.vlgmr.msrb.gmra.mxu0 %vm15931_vm2, %v11314_v41  ;;  %8276 = vmatpush.msk.msra.mxu1 %vm15932_vm3, %v2309_v33  ;;  %v11566_v41 = vld [vmem:[%s15577_s4 + $0x18] sm:$0xff]  ;;  %v16250_v33 = vmov 16  }
 0x566   :  { %8294 = vmatpush.msk.msrb.mxu0 %vm15932_vm3, %v2512_v5  ;;  %3609 = vrot.lane.b32.xlu1 %v11286_v20, %s15791_s27  ;;  %s16261_s27 = smov 94  }
 0x567   :  { %3543 = vrot.lane.b32.xlu0 %v11320_v52, %s15822_s26 }
 0x568   :  { %3679 = vrot.lane.b32.xlu2 %v11320_v52, %s15816_s16  ;;  %v11553_v10 = vpop.permute.xlu1 %2713  ;;  %v2782_v56 = vpop.permute.xlu0 %2781 }
 0x569   :  { %v2784_v13 = vsel %vm15799_vm9, %v11464_v51, %v2782_v56  ;;  %vm15801_vm9 = vcmask 801792   ;;  %v16243_v51 = vmov 13  }
 0x56a   :  { %8280 = vmatmul.msk.f32.vlgmr.msrb.gmra.mxu3 %vm15931_vm2, %v11316_v25 }
 0x56b   :  { %8303 = vmatpush.msk.msrb.mxu3 %vm15932_vm3, %v11458_v23 }
 0x56c   :  { %8298 = vmatmul.msk.f32.vlgmr.msra.gmra.mxu2 %vm15931_vm2, %v11358_v30  ;;  %8265 = vmatmul.msk.f32.vlgmr.msrb.gmra.mxu1 %vm15931_vm2, %v11159_v60  ;;  %v11577_v60 = vpop.permute.xlu2 %2981 }
 0x56d   :  { %8321 = vmatpush.msk.msra.mxu2 %vm15932_vm3, %v2782_v56  ;;  %8283 = vmatmul.msk.f32.vlgmr.msra.gmra.mxu0 %vm15931_vm2, %v11338_v17 }
 0x56e   :  { %8288 = vmatpush.msk.msrb.mxu1 %vm15932_vm3, %v2444_v3  ;;  %8306 = vmatpush.msk.msra.mxu0 %vm15932_vm3, %v2648_v31  ;;  %v16253_v3 = vmov 23  }
 0x56f   :  { %3607 = vrot.lane.b32.xlu1 %v11566_v41, %s8820_s15  ;;  %3541 = vrot.lane.b32.xlu0 %v11286_v20, %s15822_s26  ;;  %s16292_s26 = smov 63  }
 0x570   :  { %v11583_v36 = vpop.permute.xlu1 %2913  ;;  %v11585_v19 = vpop.permute.xlu0 %2849  ;;  %3741 = vrot.lane.b32.xlu2 %v11469_v9, %s8854_s17 }
 0x572   :  { %8281 = vmatmul.msk.f32.gmra.mxu3 %vm15931_vm2, %v11356_v35 }
 0x574   :  { %8299 = vmatmul.msk.f32.gmra.mxu2 %vm15931_vm2, %v11380_v11  ;;  %8266 = vmatmul.msk.f32.gmra.mxu1 %vm15931_vm2, %v11164_v1  ;;  %v11607_v55 = vpop.permute.xlu2 %3114  ;;  %v2580_v1 = vsel %vm15800_vm10, %v11446_v38, %v11458_v23  ;;  %vm15803_vm10 = vcmask 900096   ;;  %v16241_v38 = vmov 9  }
 0x575   :  { %8284 = vmatmul.msk.f32.gmra.mxu0 %vm15931_vm2, %v11318_v12 }
 0x577   :  { %3747 = vrot.lane.b32.xlu1 %v11320_v52, %s15939_s22  ;;  %3536 = vrot.lane.b32.xlu0 %v11566_v41, %s15797_s21  ;;  %s16257_s21 = smov 95  }
 0x578   :  { %v11601_v62 = vpop.permute.xlu1 %3053  ;;  %v11603_v40 = vpop.permute.xlu0 %2845  ;;  %3675 = vrot.lane.b32.xlu2 %v11566_v41, %s15814_s18 }
 0x57a   :  { %8292 = vmatmul.msk.f32.vlgmr.msra.gmra.mxu3 %vm15931_vm2, %v11368_v8 }
 0x57b   :  { %8315 = vmatpush.msk.msra.mxu3 %vm15932_vm3, %v11553_v10 }
 0x57c   :  { %8310 = vmatmul.msk.f32.vlgmr.msrb.gmra.mxu2 %vm15931_vm2, %v11330_v39  ;;  %8277 = vmatmul.msk.f32.vlgmr.msra.gmra.mxu1 %vm15931_vm2, %v11316_v25  ;;  %v11635_v25 = vld [vmem:[%s15574_s1] sm:$0x3f]  ;;  %v11642_v37 = vpop.permute.xlu2 %3118 }
 0x57d   :  { %8333 = vmatpush.msk.msrb.mxu2 %vm15932_vm3, %v11477_v34  ;;  %8295 = vmatmul.msk.f32.vlgmr.msrb.gmra.mxu0 %vm15931_vm2, %v11358_v30  ;;  %v16235_v30 = vmov 5  }
 0x57e   :  { %8300 = vmatpush.msk.msra.mxu1 %vm15932_vm3, %v2580_v1  ;;  %8318 = vmatpush.msk.msrb.mxu0 %vm15932_vm3, %v2784_v13  ;;  %v16254_v1 = vmov 21  }
 0x57f   :  { %3745 = vrot.lane.b32.xlu1 %v11286_v20, %s15939_s22  ;;  %3673 = vrot.lane.b32.xlu0 %v11469_v9, %s15814_s18  ;;  %v16244_v9 = vmov 11   ;;  %s16267_s18 = smov 93   ;;  %s16695_s22 = smov 104  }
 0x580   :  { %v3052_v12 = vpop.permute.xlu1 %3051  ;;  %v11637_v52 = vpop.permute.xlu0 %2979  ;;  %4170 = vperm.xlu2 %8720, %v11635_v25  }
 0x582   :  { %8293 = vmatmul.msk.f32.gmra.mxu3 %vm15931_vm2, %v11370_v61 }
 0x584   :  { %8311 = vmatmul.msk.f32.gmra.mxu2 %vm15931_vm2, %v11394_v59  ;;  %8278 = vmatmul.msk.f32.gmra.mxu1 %vm15931_vm2, %v11356_v35  ;;  %v2716_v35 = vsel %vm15803_vm10, %v11424_v57, %v11553_v10  ;;  %vm15804_vm10 = vcmask 695296   ;;  %v16251_v10 = vmov 0  }
 0x585   :  { %8296 = vmatmul.msk.f32.gmra.mxu0 %vm15931_vm2, %v11380_v11  ;;  %v11673_v11 = vpop.permute.xlu2 %3184 }
 0x587   :  { %4096 = vperm.xlu1 %8719, %v11635_v25   ;;  %3677 = vrot.lane.b32.xlu0 %v11286_v20, %s15816_s16  ;;  %v2920_v20 = vsel %vm15801_vm9, %v11434_v48, %v11477_v34  ;;  %vm15802_vm9 = vcmask 809984   ;;  %v16240_v48 = vmov 8   ;;  %s16282_s16 = smov 64  }
 0x588   :  { %v11653_v17 = vpop.permute.xlu1 %3120  ;;  %v11655_v16 = vpop.permute.xlu0 %2983  ;;  %8723 = vset.pattern.permute.xlu2 %v16235_v30 }
 0x589   :  { %4341 = vperm.xlu2 %8723, %v11635_v25  }
 0x58a   :  { %8304 = vmatmul.msk.f32.vlgmr.msrb.gmra.mxu3 %vm15931_vm2, %v11382_v53 }
 0x58b   :  { %8327 = vmatpush.msk.msrb.mxu3 %vm15932_vm3, %v11585_v19 }
 0x58c   :  { %8322 = vmatmul.msk.f32.vlgmr.msra.gmra.mxu2 %vm15931_vm2, %v11392_v18  ;;  %8289 = vmatmul.msk.f32.vlgmr.msrb.gmra.mxu1 %vm15931_vm2, %v11368_v8  ;;  %v16236_v8 = vmov 4  }
 0x58d   :  { %8345 = vmatpush.msk.msra.mxu2 %vm15932_vm3, %v11601_v62  ;;  %8307 = vmatmul.msk.f32.vlgmr.msra.gmra.mxu0 %vm15931_vm2, %v11330_v39  ;;  %v11699_v39 = vpop.permute.xlu2 %3324 }
 0x58e   :  { %8312 = vmatpush.msk.msrb.mxu1 %vm15932_vm3, %v2716_v35  ;;  %8330 = vmatpush.msk.msra.mxu0 %vm15932_vm3, %v2920_v20 }
 0x58f   :  { %3743 = vrot.lane.b32.xlu0 %v11566_v41, %s8854_s17  ;;  %8722 = vset.pattern.permute.xlu1 %v16236_v8 }
 0x590   :  { %v11684_v63 = vpop.permute.xlu1 %3182  ;;  %v11686_v0 = vpop.permute.xlu0 %3049  ;;  %4284 = vperm.xlu1 %8722, %v11635_v25  }
 0x591   :  { %8725 = vset.pattern.permute.xlu2 %v16237_v22 }
 0x592   :  { %8305 = vmatmul.msk.f32.gmra.mxu3 %vm15931_vm2, %v11346_v28  ;;  %4455 = vperm.xlu2 %8725, %v11635_v25  }
 0x594   :  { %8323 = vmatmul.msk.f32.gmra.mxu2 %vm15931_vm2, %v11372_v7  ;;  %8290 = vmatmul.msk.f32.gmra.mxu1 %vm15931_vm2, %v11370_v61  ;;  %v2852_v61 = vsel %vm15802_vm9, %v11462_v42, %v11585_v19  ;;  %vm15805_vm9 = vcmask 793600  }
 0x595   :  { %8308 = vmatmul.msk.f32.gmra.mxu0 %vm15931_vm2, %v11394_v59  ;;  %v3055_v59 = vsel %vm367_vm4, %v3052_v12, %v11601_v62  ;;  %v3323_v43 = vpop.permute.xlu2 %3322 }
 0x597   :  { %4227 = vperm.xlu0 %8721, %v11635_v25  }
 0x598   :  { %v11702_v58 = vpop.permute.xlu1 %3116  ;;  %v3189_v57 = vpop.permute.xlu0 %3188  ;;  %8724 = vset.pattern.permute.xlu1 %v16238_v2 }
 0x599   :  { %4398 = vperm.xlu1 %8724, %v11635_v25  }
 0x59a   :  { %8316 = vmatmul.msk.f32.vlgmr.msra.gmra.mxu3 %vm15931_vm2, %v11360_v4  ;;  %8728 = vset.pattern.permute.xlu2 %v16239_v27 }
 0x59b   :  { %8339 = vmatpush.msk.msra.mxu3 %vm15932_vm3, %v11512_v26  ;;  %4626 = vperm.xlu2 %8728, %v11635_v25  }
 0x59c   :  { %8334 = vmatmul.msk.f32.vlgmr.msrb.gmra.mxu2 %vm15931_vm2, %v11412_v6  ;;  %8301 = vmatmul.msk.f32.vlgmr.msra.gmra.mxu1 %vm15931_vm2, %v11382_v53 }
 0x59d   :  { %8357 = vmatpush.msk.msrb.mxu2 %vm15932_vm3, %v3189_v57  ;;  %8319 = vmatmul.msk.f32.vlgmr.msrb.gmra.mxu0 %vm15931_vm2, %v11392_v18  ;;  %v16242_v18 = vmov 12  }
 0x59e   :  { %8324 = vmatpush.msk.msra.mxu1 %vm15932_vm3, %v2852_v61  ;;  %8342 = vmatpush.msk.msrb.mxu0 %vm15932_vm3, %v3055_v59 }
 0x59f   :  { %8726 = vset.pattern.permute.xlu0 %v16240_v48  ;;  %v11916_v48 = vld [vmem:[%s15573_s0 + $0x1] ss:$2 sm:$0xff] }
 0x5a0   :  { %v11727_v44 = vpop.permute.xlu1 %3250  ;;  %v3187_v53 = vpop.permute.xlu0 %3186  ;;  %4512 = vperm.xlu0 %8726, %v11635_v25  }
 0x5a1   :  { %8727 = vset.pattern.permute.xlu1 %v16241_v38  ;;  %v3191_v45 = vsel %vm15804_vm10, %v3187_v53, %v3189_v57  ;;  %vm15807_vm10 = vcmask 703488   ;;  %v11927_v53 = vperm.slane %v11916_v48, 3 }
 0x5a2   :  { %8317 = vmatmul.msk.f32.gmra.mxu3 %vm15931_vm2, %v11410_v32  ;;  %4569 = vperm.xlu1 %8727, %v11635_v25  }
 0x5a3   :  { %8730 = vset.pattern.permute.xlu2 %v16242_v18 }
 0x5a4   :  { %8335 = vmatmul.msk.f32.gmra.mxu2 %vm15931_vm2, %v11583_v36  ;;  %8302 = vmatmul.msk.f32.gmra.mxu1 %vm15931_vm2, %v11346_v28  ;;  %v11751_v28 = vpop.permute.xlu2 %3392 }
 0x5a5   :  { %8320 = vmatmul.msk.f32.gmra.mxu0 %vm15931_vm2, %v11372_v7  ;;  %4740 = vperm.xlu2 %8730, %v11635_v25   ;;  %v2988_v7 = vsel %vm15805_vm9, %v11655_v16, %v11512_v26  ;;  %vm15806_vm9 = vcmask 678912   ;;  %v3123_v26 = vsel %vm15807_vm10, %v11642_v37, %v11653_v17  ;;  %vm15808_vm10 = vcmask 588800  }
 0x5a6   :  { %v3327_v46 = vsel %vm15806_vm9, %v3323_v43, %v11699_v39  ;;  %vm15809_vm9 = vcmask 687104   ;;  %v11930_v43 = vperm.slane %v11916_v48, 2 }
 0x5a8   :  { %v11742_v23 = vpop.permute.xlu1 %3254  ;;  %v11744_v42 = vpop.permute.xlu0 %3256  ;;  %8731 = vset.pattern.permute.xlu0 %v16243_v51 }
 0x5a9   :  { %4797 = vperm.xlu0 %8731, %v11635_v25  }
 0x5aa   :  { %8328 = vmatmul.msk.f32.vlgmr.msrb.gmra.mxu3 %vm15931_vm2, %v11422_v24  ;;  %8729 = vset.pattern.permute.xlu1 %v16244_v9 }
 0x5ab   :  { %8351 = vmatpush.msk.msrb.mxu3 %vm15932_vm3, %v11653_v17  ;;  %4683 = vperm.xlu1 %8729, %v11635_v25  }
 0x5ac   :  { %8346 = vmatmul.msk.f32.vlgmr.msra.gmra.mxu2 %vm15931_vm2, %v11541_v50  ;;  %8313 = vmatmul.msk.f32.vlgmr.msrb.gmra.mxu1 %vm15931_vm2, %v11360_v4  ;;  %v11785_v54 = vpop.permute.xlu2 %3454 }
 0x5ad   :  { %8369 = vmatpush.msk.msra.mxu2 %vm15932_vm3, %v11699_v39  ;;  %8331 = vmatmul.msk.f32.vlgmr.msra.gmra.mxu0 %vm15931_vm2, %v11412_v6  ;;  %v16247_v6 = vmov 14  }
 0x5ae   :  { %8336 = vmatpush.msk.msrb.mxu1 %vm15932_vm3, %v2988_v7  ;;  %8354 = vmatpush.msk.msra.mxu0 %vm15932_vm3, %v3191_v45  ;;  %v11954_v45 = vperm.slane %v11916_v48, 0 }
 0x5af   :  { %8733 = vset.pattern.permute.xlu2 %v16245_v29  ;;  %v11958_v29 = vperm.slane %v11916_v48, 5 }
 0x5b0   :  { %v11771_v34 = vpop.permute.xlu1 %3320  ;;  %v11773_v4 = vpop.permute.xlu0 %3318  ;;  %4911 = vperm.xlu2 %8733, %v11635_v25  }
 0x5b1   :  { %8736 = vset.pattern.permute.xlu0 %v16246_v15 }
 0x5b2   :  { %8329 = vmatmul.msk.f32.gmra.mxu3 %vm15931_vm2, %v11603_v40  ;;  %5082 = vperm.xlu0 %8736, %v11635_v25  }
 0x5b3   :  { %8732 = vset.pattern.permute.xlu1 %v16247_v6 }
 0x5b4   :  { %8347 = vmatmul.msk.f32.gmra.mxu2 %vm15931_vm2, %v11686_v0  ;;  %8314 = vmatmul.msk.f32.gmra.mxu1 %vm15931_vm2, %v11410_v32  ;;  %v16249_v32 = vmov 22   ;;  %v11813_v47 = vpop.permute.xlu2 %3388 }
 0x5b5   :  { %8332 = vmatmul.msk.f32.gmra.mxu0 %vm15931_vm2, %v11583_v36  ;;  %4854 = vperm.xlu1 %8732, %v11635_v25   ;;  %v3259_v36 = vsel %vm15809_vm9, %v11742_v23, %v11744_v42  ;;  %vm15811_vm9 = vcmask 670720  }
 0x5b8   :  { %v3461_v21 = vpop.permute.xlu1 %3460  ;;  %v11790_v14 = vpop.permute.xlu0 %3252  ;;  %8735 = vset.pattern.permute.xlu2 %v16248_v49 }
 0x5b9   :  { %5025 = vperm.xlu2 %8735, %v11635_v25  }
 0x5ba   :  { %8340 = vmatmul.msk.f32.vlgmr.msra.gmra.mxu3 %vm15931_vm2, %v11637_v52  ;;  %8740 = vset.pattern.permute.xlu0 %v16249_v32 }
 0x5bb   :  { %8363 = vmatpush.msk.msra.mxu3 %vm15932_vm3, %v11744_v42 }
 0x5bc   :  { %8358 = vmatmul.msk.f32.vlgmr.msrb.gmra.mxu2 %vm15931_vm2, %v11684_v63  ;;  %8325 = vmatmul.msk.f32.vlgmr.msra.gmra.mxu1 %vm15931_vm2, %v11422_v24  ;;  %v11833_v31 = vpop.permute.xlu2 %3532 }
 0x5bd   :  { %8381 = vmatpush.msk.msrb.mxu2 %vm15932_vm3, %v3461_v21  ;;  %8343 = vmatmul.msk.f32.vlgmr.msrb.gmra.mxu0 %vm15931_vm2, %v11541_v50  ;;  %v16252_v50 = vmov 19  }
 0x5be   :  { %8348 = vmatpush.msk.msra.mxu1 %vm15932_vm3, %v3123_v26  ;;  %8366 = vmatpush.msk.msrb.mxu0 %vm15932_vm3, %v3327_v46  ;;  %v16255_v26 = vmov 24  }
 0x5bf   :  { %8734 = vset.pattern.permute.xlu1 %v16250_v33 }
 0x5c0   :  { %v3459_v24 = vpop.permute.xlu1 %3458  ;;  %v11816_v5 = vpop.permute.xlu0 %3386  ;;  %4968 = vperm.xlu1 %8734, %v11635_v25  }
 0x5c1   :  { %8738 = vset.pattern.permute.xlu2 %v16251_v10  ;;  %v3463_v19 = vsel %vm15808_vm10, %v3459_v24, %v3461_v21  ;;  %vm15810_vm10 = vcmask 572416   ;;  %v11977_v21 = vperm.slane %v11916_v48, 1 }
 0x5c2   :  { %8341 = vmatmul.msk.f32.gmra.mxu3 %vm15931_vm2, %v11577_v60  ;;  %4062 = vperm.xlu2 %8738, %v11635_v25  }
 0x5c4   :  { %8359 = vmatmul.msk.f32.gmra.mxu2 %vm15931_vm2, %v11673_v11  ;;  %8326 = vmatmul.msk.f32.gmra.mxu1 %vm15931_vm2, %v11603_v40  ;;  %v11857_v12 = vpop.permute.xlu2 %3605 }
 0x5c5   :  { %8344 = vmatmul.msk.f32.gmra.mxu0 %vm15931_vm2, %v11686_v0 }
 0x5c8   :  { %8737 = vset.pattern.permute.xlu1 %v16252_v50  ;;  %v11830_v56 = vpop.permute.xlu1 %3530 }
 0x5c9   :  { %v3391_v41 = vpop.permute.xlu0 %3390  ;;  %5139 = vperm.xlu1 %8737, %v11635_v25  }
 0x5ca   :  { %8352 = vmatmul.msk.f32.vlgmr.msrb.gmra.mxu3 %vm15931_vm2, %v11607_v55  ;;  %8741 = vset.pattern.permute.xlu2 %v16253_v3 }
 0x5cb   :  { %8375 = vmatpush.msk.msrb.mxu3 %vm15932_vm3, %v11751_v28 }
 0x5cc   :  { %8370 = vmatmul.msk.f32.vlgmr.msra.gmra.mxu2 %vm15931_vm2, %v11773_v4  ;;  %8337 = vmatmul.msk.f32.vlgmr.msrb.gmra.mxu1 %vm15931_vm2, %v11637_v52  ;;  %v3535_v30 = vpop.permute.xlu2 %3534 }
 0x5cd   :  { %8355 = vmatmul.msk.f32.vlgmr.msra.gmra.mxu0 %vm15931_vm2, %v11684_v63  ;;  %8360 = vmatpush.msk.msrb.mxu1 %vm15932_vm3, %v3259_v36 }
 0x5ce   :  { %8378 = vmatpush.msk.msra.mxu0 %vm15932_vm3, %v3463_v19 }
 0x5d0   :  { %v3612_v62 = vpop.permute.xlu1 %3611 }
 0x5d1   :  { %v3457_v40 = vpop.permute.xlu0 %3456  ;;  %8739 = vset.pattern.permute.xlu1 %v16254_v1  ;;  %v2151_v13 = vpop.f32.mrf.mxu1  ;;  %8393 = vmatpush.msk.msra.mxu2 %vm15932_vm3, %v3612_v62 }
 0x5d2   :  { %8353 = vmatmul.msk.f32.gmra.mxu3 %vm15931_vm2, %v11702_v58  ;;  %5233 = vperm.xlu1 %8739, %v11635_v25   ;;  %v2268_v39 = vpop.f32.mrf.mxu0 }
 0x5d4   :  { %8371 = vmatmul.msk.f32.gmra.mxu2 %vm15931_vm2, %v11771_v34  ;;  %8338 = vmatmul.msk.f32.gmra.mxu1 %vm15931_vm2, %v11577_v60  ;;  %v3395_v60 = vsel %vm15811_vm9, %v3391_v41, %v11751_v28  ;;  %vm15813_vm9 = vcmask 556032  }
 0x5d5   :  { %8356 = vmatmul.msk.f32.gmra.mxu0 %vm15931_vm2, %v11673_v11 }
 0x5d8   :  { %v3610_v52 = vpop.permute.xlu1 %3609 }
 0x5d9   :  { %v3544_v37 = vpop.permute.xlu0 %3543  ;;  %v11865_v17 = vpop.f32.mrf.mxu1  ;;  %v3614_v16 = vsel %vm15810_vm10, %v3610_v52, %v3612_v62  ;;  %vm15812_vm10 = vcmask 580608  }
 0x5da   :  { %8364 = vmatmul.msk.f32.vlgmr.msra.gmra.mxu3 %vm15931_vm2, %v11727_v44  ;;  %8744 = vset.pattern.permute.xlu1 %v16251_v10 }
 0x5db   :  { %8387 = vmatpush.msk.msra.mxu3 %vm15932_vm3, %v3544_v37 }
 0x5dc   :  { %8382 = vmatmul.msk.f32.vlgmr.msrb.gmra.mxu2 %vm15931_vm2, %v11785_v54  ;;  %8349 = vmatmul.msk.f32.vlgmr.msra.gmra.mxu1 %vm15931_vm2, %v11607_v55  ;;  %v3680_v55 = vpop.permute.xlu2 %3679 }
 0x5dd   :  { %8367 = vmatmul.msk.f32.vlgmr.msrb.gmra.mxu0 %vm15931_vm2, %v11773_v4  ;;  %8372 = vmatpush.msk.msra.mxu1 %vm15932_vm3, %v3395_v60 }
 0x5de   :  { %8390 = vmatpush.msk.msrb.mxu0 %vm15932_vm3, %v3614_v16 }
 0x5e1   :  { %v11882_v20 = vpop.permute.xlu1 %3607  ;;  %v3542_v35 = vpop.permute.xlu0 %3541 }
 0x5e2   :  { %v11884_v11 = vpop.f32.mrf.mxu1  ;;  %8365 = vmatmul.msk.f32.gmra.mxu3 %vm15931_vm2, %v11790_v14  ;;  %v3546_v57 = vsel %vm15812_vm10, %v3542_v35, %v3544_v37  ;;  %vm15930_vm10 = vcmask 15360  }
 0x5e3   :  { %v3539_v38 = vsel %vm15930_vm10, %v11830_v56, %v11833_v31 }
 0x5e4   :  { %8383 = vmatmul.msk.f32.gmra.mxu2 %vm15931_vm2, %v3457_v40  ;;  %8350 = vmatmul.msk.f32.gmra.mxu1 %vm15931_vm2, %v11702_v58  ;;  %v3742_v2 = vpop.permute.xlu2 %3741 }
 0x5e5   :  { %8368 = vmatmul.msk.f32.gmra.mxu0 %vm15931_vm2, %v11771_v34 }
 0x5e9   :  { %v3748_v8 = vpop.permute.xlu1 %3747  ;;  %v3537_v63 = vpop.permute.xlu0 %3536 }
 0x5ea   :  { %v2205_v0 = vpop.f32.mrf.mxu1  ;;  %8405 = vmatpush.msk.msrb.mxu2 %vm15932_vm3, %v3748_v8  ;;  %8376 = vmatmul.msk.f32.vlgmr.msrb.gmra.mxu3 %vm15931_vm2, %v11816_v5  ;;  %v3540_v34 = vsel %vm15930_vm10, %v3535_v30, %v3537_v63 }
 0x5eb   :  { %v2206_v22 = vadd.f32 %v2205_v0, %v2151_v13  ;;  %8399 = vmatpush.msk.msrb.mxu3 %vm15932_vm3, %v3680_v55  ;;  %v12074_v0 = vperm.slane %v11916_v48, 7 }
 0x5ec   :  { %8394 = vmatmul.msk.f32.vlgmr.msra.gmra.mxu2 %vm15931_vm2, %v11857_v12  ;;  %8361 = vmatmul.msk.f32.vlgmr.msrb.gmra.mxu1 %vm15931_vm2, %v11727_v44  ;;  %v11924_v44 = vperm.slane %v11916_v48, 4  ;;  %v3676_v28 = vpop.permute.xlu2 %3675 }
 0x5ed   :  { %8379 = vmatmul.msk.f32.vlgmr.msra.gmra.mxu0 %vm15931_vm2, %v11785_v54  ;;  %8384 = vmatpush.msk.msrb.mxu1 %vm15932_vm3, %v3546_v57  ;;  %v11905_v58 = vadd.f32 %v2268_v39, %v2206_v22 }
 0x5f1   :  { %v3746_v27 = vpop.permute.xlu1 %3745  ;;  %v11907_v61 = vpop.permute.xlu0 %3673 }
 0x5f2   :  { %v3750_v59 = vsel %vm15813_vm9, %v3746_v27, %v3748_v8  ;;  %8377 = vmatmul.msk.f32.gmra.mxu3 %vm15931_vm2, %v11813_v47  ;;  %vm15929_vm9 = vcmask 564224  }
 0x5f3   :  { %8402 = vmatpush.msk.msra.mxu0 %vm15932_vm3, %v3750_v59 }
 0x5f4   :  { %8395 = vmatmul.msk.f32.gmra.mxu2 %vm15931_vm2, %v11882_v20  ;;  %8362 = vmatmul.msk.f32.gmra.mxu1 %vm15931_vm2, %v11790_v14  ;;  %v11970_v54 = vpop.permute.xlu2 %4170 }
 0x5f5   :  { %8380 = vmatmul.msk.f32.gmra.mxu0 %vm15931_vm2, %v3457_v40  ;;  %v4175_v14 = vmul.f32 %v11970_v54, %v11930_v43  ;;  %v4177_v49 = vmul.f32 %v11970_v54, %v11924_v44  ;;  %v4178_v33 = vmul.f32 %v11970_v54, %v11958_v29  ;;  %v4176_v24 = vmul.f32 %v11970_v54, %v11927_v53 }
 0x5f6   :  { %v4174_v41 = vmul.f32 %v11970_v54, %v11977_v21 }
 0x5f9   :  { %v11935_v18 = vpop.permute.xlu1 %4096  ;;  %v3678_v23 = vpop.permute.xlu0 %3677 }
 0x5fa   :  { %8388 = vmatmul.msk.f32.vlgmr.msra.gmra.mxu3 %vm15931_vm2, %v3539_v38  ;;  %v4120_v42 = vmul.f32 %v11924_v44, %v11935_v18  ;;  %v4119_v51 = vmul.f32 %v11927_v53, %v11935_v18  ;;  %v4118_v9 = vmul.f32 %v11930_v43, %v11935_v18  ;;  %v3682_v7 = vsel %vm15929_vm9, %v3678_v23, %v3680_v55 }
 0x5fb   :  { %v4116_v4 = vmul.f32 %v11954_v45, %v11935_v18  ;;  %v4121_v15 = vmul.f32 %v11958_v29, %v11935_v18  ;;  %v4117_v32 = vmul.f32 %v11977_v21, %v11935_v18  ;;  %v4123_v57 = vmul.f32 %v12074_v0, %v11935_v18 }
 0x5fc   :  { %8406 = vmatmul.msk.f32.vlgmr.msrb.gmra.mxu2 %vm15931_vm2, %v3742_v2  ;;  %4140 = vrot.lane.b32.xlu1 %v4120_v42, %s8812_s29  ;;  %v11993_v46 = vpop.permute.xlu2 %4341  ;;  %v12101_v42 = vperm.slane %v11916_v48, 6  ;;  %vm16477_vm9 = vcmask 1022976  }
 0x5fd   :  { %4138 = vrot.lane.b32.xlu0 %v4119_v51, %s8812_s29  ;;  %4136 = vrot.lane.b32.xlu2 %v4118_v9, %s8812_s29  ;;  %v4348_v8 = vmul.f32 %v11993_v46, %v11924_v44  ;;  %v4346_v22 = vmul.f32 %v11993_v46, %v11930_v43  ;;  %vm16479_vm10 = vmmov %vm16477_vm9 }
 0x5fe   :  { %8373 = vmatmul.msk.f32.vlgmr.msra.gmra.mxu1 %vm15931_vm2, %v11816_v5  ;;  %8391 = vmatmul.msk.f32.vlgmr.msrb.gmra.mxu0 %vm15931_vm2, %v11857_v12  ;;  %v4173_v5 = vmul.f32 %v11970_v54, %v11954_v45 }
 0x5ff   :  { %8396 = vmatpush.msk.msra.mxu1 %vm15932_vm3, %v3682_v7 }
 0x601   :  { %v3744_v6 = vpop.permute.xlu0 %3743 }
 0x602   :  { %8389 = vmatmul.msk.f32.gmra.mxu3 %vm15931_vm2, %v3540_v34  ;;  %v12022_v3 = vpop.permute.xlu1 %4284 }
 0x603   :  { %v4291_v12 = vmul.f32 %v12022_v3, %v11924_v44  ;;  %v4289_v37 = vmul.f32 %v12022_v3, %v11930_v43  ;;  %v4288_v30 = vmul.f32 %v12022_v3, %v11977_v21  ;;  %v4292_v35 = vmul.f32 %v12022_v3, %v11958_v29 }
 0x604   :  { %4132 = vrot.lane.b32.xlu1 %v4116_v4, %s8812_s29  ;;  %8407 = vmatmul.msk.f32.gmra.mxu2 %vm15931_vm2, %v3744_v6  ;;  %v12015_v31 = vpop.permute.xlu2 %4455  ;;  %v4290_v55 = vmul.f32 %v12022_v3, %v11927_v53  ;;  %v4287_v39 = vmul.f32 %v12022_v3, %v11954_v45 }
 0x605   :  { %5307 = vperm.xlu0 %8740, %v11635_v25   ;;  %4142 = vrot.lane.b32.xlu2 %v4121_v15, %s8812_s29 }
 0x606   :  { %8374 = vmatmul.msk.f32.gmra.mxu1 %vm15931_vm2, %v11813_v47  ;;  %8392 = vmatmul.msk.f32.gmra.mxu0 %vm15931_vm2, %v11882_v20  ;;  %v11995_v47 = vpop.f32.mrf.mxu3 }
 0x609   :  { %v12008_v50 = vpop.permute.xlu0 %4227 }
 0x60a   :  { %8400 = vmatmul.msk.f32.vlgmr.msrb.gmra.mxu3 %vm15931_vm2, %v11907_v61  ;;  %v4233_v56 = vmul.f32 %v12008_v50, %v11927_v53  ;;  %v4234_v36 = vmul.f32 %v12008_v50, %v11924_v44  ;;  %v4232_v19 = vmul.f32 %v12008_v50, %v11930_v43  ;;  %v4230_v1 = vmul.f32 %v12008_v50, %v11954_v45 }
 0x60b   :  { %v12035_v40 = vpop.permute.xlu1 %4398  ;;  %v4235_v13 = vmul.f32 %v12008_v50, %v11958_v29  ;;  %v4231_v60 = vmul.f32 %v12008_v50, %v11977_v21 }
 0x60c   :  { %4193 = vrot.lane.b32.xlu1 %v4175_v14, %s8813_s30  ;;  %v12031_v62 = vpop.permute.xlu2 %4626  ;;  %v4403_v59 = vmul.f32 %v12035_v40, %v11930_v43  ;;  %v4406_v7 = vmul.f32 %v12035_v40, %v11958_v29  ;;  %v4404_v4 = vmul.f32 %v12035_v40, %v11927_v53  ;;  %v4345_v14 = vmul.f32 %v11993_v46, %v11977_v21 }
 0x60d   :  { %4134 = vrot.lane.b32.xlu2 %v4117_v32, %s8812_s29  ;;  %4197 = vrot.lane.b32.xlu0 %v4177_v49, %s8813_s30  ;;  %v4179_v32 = vmul.f32 %v11970_v54, %v12101_v42 }
 0x60e   :  { %8385 = vmatmul.msk.f32.vlgmr.msrb.gmra.mxu1 %vm15931_vm2, %v3539_v38  ;;  %8403 = vmatmul.msk.f32.vlgmr.msra.gmra.mxu0 %vm15931_vm2, %v3742_v2  ;;  %v4347_v38 = vmul.f32 %v11993_v46, %v11927_v53 }
 0x60f   :  { %8742 = vset.pattern.permute.xlu0 %v16255_v26  ;;  %v4405_v26 = vmul.f32 %v12035_v40, %v11924_v44 }
 0x612   :  { %8401 = vmatmul.msk.f32.gmra.mxu3 %vm15931_vm2, %v3676_v28  ;;  %v12105_v9 = vpop.permute.xlu0 %4512 }
 0x614   :  { %4199 = vrot.lane.b32.xlu1 %v4178_v33, %s8813_s30  ;;  %v12047_v52 = vpop.permute.xlu2 %4740  ;;  %v12051_v16 = vpop.permute.xlu1 %4569  ;;  %v4461_v33 = vmul.f32 %v12015_v31, %v11927_v53 }
 0x615   :  { %4195 = vrot.lane.b32.xlu2 %v4176_v24, %s8813_s30  ;;  %4189 = vrot.lane.b32.xlu0 %v4173_v5, %s8813_s30 }
 0x616   :  { %8386 = vmatmul.msk.f32.gmra.mxu1 %vm15931_vm2, %v3540_v34  ;;  %8404 = vmatmul.msk.f32.gmra.mxu0 %vm15931_vm2, %v3744_v6  ;;  %v4122_v34 = vmul.f32 %v12101_v42, %v11935_v18  ;;  %v4401_v6 = vmul.f32 %v12035_v40, %v11954_v45 }
 0x61b   :  { %v12126_v18 = vpop.permute.xlu0 %4797 }
 0x61c   :  { %4191 = vrot.lane.b32.xlu1 %v4174_v41, %s8813_s30  ;;  %v12060_v20 = vpop.permute.xlu2 %4911  ;;  %v4402_v41 = vmul.f32 %v12035_v40, %v11977_v21 }
 0x61d   :  { %5364 = vperm.xlu2 %8741, %v11635_v25   ;;  %4252 = vrot.lane.b32.xlu0 %v4233_v56, %s8816_s14  ;;  %v12069_v63 = vpop.permute.xlu1 %4683 }
 0x61e   :  { %8397 = vmatmul.msk.f32.vlgmr.msra.gmra.mxu1 %vm15931_vm2, %v11907_v61  ;;  %v4349_v61 = vmul.f32 %v11993_v46, %v11958_v29 }
 0x624   :  { %4254 = vrot.lane.b32.xlu1 %v4234_v36, %s8816_s14  ;;  %v12082_v2 = vpop.permute.xlu2 %5025  ;;  %v12144_v5 = vpop.permute.xlu0 %5082  ;;  %v4180_v36 = vmul.f32 %v11970_v54, %v12074_v0  ;;  %v4460_v54 = vmul.f32 %v12015_v31, %v11930_v43 }
 0x625   :  { %4250 = vrot.lane.b32.xlu2 %v4232_v19, %s8816_s14  ;;  %5421 = vperm.xlu0 %8742, %v11635_v25   ;;  %v16256_v25 = vmov 20   ;;  %v4236_v19 = vmul.f32 %v12008_v50, %v12101_v42 }
 0x626   :  { %8398 = vmatmul.msk.f32.gmra.mxu1 %vm15931_vm2, %v3676_v28  ;;  %8766 = vset.pattern.permute.xlu2 %v16251_v10  ;;  %v4344_v28 = vmul.f32 %v11993_v46, %v11954_v45  ;;  %vm16481_vm2 = vmmov %vm16477_vm9 }
 0x627   :  { %v12087_v27 = vpop.permute.xlu1 %4854 }
 0x62c   :  { %4246 = vrot.lane.b32.xlu1 %v4230_v1, %s8816_s14  ;;  %v12098_v23 = vpop.permute.xlu2 %4062 }
 0x62d   :  { %4256 = vrot.lane.b32.xlu2 %v4235_v13, %s8816_s14  ;;  %4311 = vrot.lane.b32.xlu0 %v4291_v12, %s8820_s15  ;;  %16258 = vst [vmem:[#allocation22_spill] sm:$0xff] %v12098_v23 }
 0x62e   :  { %8743 = vset.pattern.permute.xlu0 %v16256_v25  ;;  %v4462_v25 = vmul.f32 %v12015_v31, %v11924_v44 }
 0x632   :  { %v12103_v51 = vpop.permute.xlu1 %4968 }
 0x634   :  { %4307 = vrot.lane.b32.xlu1 %v4289_v37, %s8820_s15  ;;  %v4459_v37 = vmul.f32 %v12015_v31, %v11977_v21 }
 0x635   :  { %4248 = vrot.lane.b32.xlu2 %v4231_v60, %s8816_s14  ;;  %4305 = vrot.lane.b32.xlu0 %v4288_v30, %s8820_s15 }
 0x63b   :  { %v12120_v15 = vpop.permute.xlu1 %5139 }
 0x63c   :  { %4313 = vrot.lane.b32.xlu1 %v4292_v35, %s8820_s15 }
 0x63d   :  { %4309 = vrot.lane.b32.xlu2 %v4290_v55, %s8820_s15  ;;  %4368 = vrot.lane.b32.xlu0 %v4348_v8, %s16232_s19  ;;  %v4237_v55 = vmul.f32 %v12008_v50, %v12074_v0  ;;  %v4463_v8 = vmul.f32 %v12015_v31, %v11958_v29  ;;  %v4517_v50 = vmul.f32 %v12105_v9, %v11930_v43 }
 0x644   :  { %4364 = vrot.lane.b32.xlu1 %v4346_v22, %s16232_s19  ;;  %v12140_v24 = vpop.permute.xlu1 %5233  ;;  %v4519_v22 = vmul.f32 %v12105_v9, %v11924_v44 }
 0x645   :  { %4303 = vrot.lane.b32.xlu2 %v4287_v39, %s8820_s15  ;;  %4146 = vrot.lane.b32.xlu0 %v4123_v57, %s8812_s29 }
 0x64c   :  { %4370 = vrot.lane.b32.xlu1 %v4349_v61, %s16232_s19 }
 0x64d   :  { %4421 = vrot.lane.b32.xlu0 %v4403_v59, %s16257_s21  ;;  %4366 = vrot.lane.b32.xlu2 %v4347_v38, %s16232_s19  ;;  %v4294_v59 = vmul.f32 %v12022_v3, %v12074_v0  ;;  %v4458_v38 = vmul.f32 %v12015_v31, %v11954_v45 }
 0x654   :  { %4360 = vrot.lane.b32.xlu1 %v4344_v28, %s16232_s19 }
 0x655   :  { %4427 = vrot.lane.b32.xlu0 %v4406_v7, %s16257_s21  ;;  %4144 = vrot.lane.b32.xlu2 %v4122_v34, %s8812_s29 }
 0x657   :  { %v12116_v48 = vpop.permute.xlu2 %4136 }
 0x658   :  { %16259 = vst [vmem:[#allocation50_spill] sm:$0xff] %v12116_v48 }
 0x65c   :  { %4423 = vrot.lane.b32.xlu1 %v4404_v4, %s16257_s21  ;;  %v4520_v4 = vmul.f32 %v12105_v9, %v11958_v29 }
 0x65d   :  { %4417 = vrot.lane.b32.xlu0 %v4401_v6, %s16257_s21  ;;  %4362 = vrot.lane.b32.xlu2 %v4345_v14, %s16232_s19  ;;  %v4574_v6 = vmul.f32 %v12051_v16, %v11930_v43  ;;  %v4518_v14 = vmul.f32 %v12105_v9, %v11927_v53 }
 0x65f   :  { %v12131_v49 = vpop.permute.xlu2 %4142 }
 0x660   :  { %16260 = vst [vmem:[#allocation12_spill] sm:$0xff] %v12131_v49  ;;  %v4977_v49 = vmul.f32 %v12103_v51, %v12101_v42 }
 0x664   :  { %4201 = vrot.lane.b32.xlu1 %v4179_v32, %s8813_s30 }
 0x665   :  { %4425 = vrot.lane.b32.xlu2 %v4405_v26, %s16257_s21  ;;  %4480 = vrot.lane.b32.xlu0 %v4461_v33, %s16261_s27 }
 0x667   :  { %v12146_v56 = vpop.permute.xlu2 %4134 }
 0x668   :  { %16262 = vst [vmem:[#allocation20_spill] sm:$0xff] %v12146_v56 }
 0x66c   :  { %4419 = vrot.lane.b32.xlu1 %v4402_v41, %s16257_s21  ;;  %v4515_v41 = vmul.f32 %v12105_v9, %v11954_v45 }
 0x66d   :  { %4203 = vrot.lane.b32.xlu2 %v4180_v36, %s8813_s30  ;;  %4258 = vrot.lane.b32.xlu0 %v4236_v19, %s8816_s14  ;;  %v4577_v36 = vmul.f32 %v12051_v16, %v11958_v29  ;;  %v4293_v19 = vmul.f32 %v12022_v3, %v12101_v42  ;;  %v4516_v3 = vmul.f32 %v12105_v9, %v11977_v21 }
 0x66e   :  { %v12157_v1 = vpop.permute.xlu1 %4140 }
 0x66f   :  { %16263 = vst [vmem:[#allocation31_spill] sm:$0xff] %v12157_v1  ;;  %v12159_v13 = vpop.permute.xlu0 %4138  ;;  %v12161_v12 = vpop.permute.xlu2 %4195 }
 0x670   :  { %16264 = vst [vmem:[#allocation14_spill] sm:$0xff] %v12159_v13 }
 0x671   :  { %16265 = vst [vmem:[#allocation41_spill] sm:$0xff] %v12161_v12 }
 0x674   :  { %4482 = vrot.lane.b32.xlu1 %v4462_v25, %s16261_s27 }
 0x675   :  { %4478 = vrot.lane.b32.xlu2 %v4460_v54, %s16261_s27  ;;  %4476 = vrot.lane.b32.xlu0 %v4459_v37, %s16261_s27 }
 0x676   :  { %v12172_v60 = vpop.permute.xlu1 %4132 }
 0x677   :  { %16266 = vst [vmem:[#allocation33_spill] sm:$0xff] %v12172_v60  ;;  %v12174_v30 = vpop.permute.xlu0 %5307  ;;  %v12176_v35 = vpop.permute.xlu2 %5364 }
 0x67c   :  { %4260 = vrot.lane.b32.xlu1 %v4237_v55, %s8816_s14  ;;  %v4575_v55 = vmul.f32 %v12051_v16, %v11927_v53 }
 0x67d   :  { %4484 = vrot.lane.b32.xlu2 %v4463_v8, %s16261_s27  ;;  %4539 = vrot.lane.b32.xlu0 %v4519_v22, %s16267_s18  ;;  %v4572_v8 = vmul.f32 %v12051_v16, %v11954_v45 }
 0x67e   :  { %v12187_v39 = vpop.permute.xlu1 %4193 }
 0x67f   :  { %16268 = vst [vmem:[#allocation43_spill] sm:$0xff] %v12187_v39  ;;  %v12189_v57 = vpop.permute.xlu0 %4197  ;;  %v12191_v61 = vpop.permute.xlu2 %4250 }
 0x680   :  { %16269 = vst [vmem:[#allocation23_spill] sm:$0xff] %v12189_v57  ;;  %v4863_v57 = vmul.f32 %v12087_v27, %v12101_v42 }
 0x681   :  { %16270 = vst [vmem:[#allocation25_spill] sm:$0xff] %v12191_v61 }
 0x684   :  { %4535 = vrot.lane.b32.xlu1 %v4517_v50, %s16267_s18 }
 0x685   :  { %4317 = vrot.lane.b32.xlu0 %v4294_v59, %s8820_s15  ;;  %4474 = vrot.lane.b32.xlu2 %v4458_v38, %s16261_s27  ;;  %v4350_v38 = vmul.f32 %v11993_v46, %v12101_v42 }
 0x686   :  { %v12202_v28 = vpop.permute.xlu1 %4199 }
 0x687   :  { %16271 = vst [vmem:[#allocation39_spill] sm:$0xff] %v12202_v28  ;;  %v12204_v7 = vpop.permute.xlu0 %4189  ;;  %v12206_v34 = vpop.permute.xlu2 %4256 }
 0x688   :  { %16272 = vst [vmem:[#allocation34_spill] sm:$0xff] %v12204_v7 }
 0x689   :  { %16273 = vst [vmem:[#allocation13_spill] sm:$0xff] %v12206_v34 }
 0x68c   :  { %4541 = vrot.lane.b32.xlu1 %v4520_v4, %s16267_s18  ;;  %v4576_v4 = vmul.f32 %v12051_v16, %v11924_v44 }
 0x68d   :  { %4592 = vrot.lane.b32.xlu0 %v4574_v6, %s8829_s20  ;;  %4537 = vrot.lane.b32.xlu2 %v4518_v14, %s16267_s18  ;;  %v4632_v6 = vmul.f32 %v12031_v62, %v11927_v53 }
 0x68e   :  { %v12217_v32 = vpop.permute.xlu1 %4191 }
 0x68f   :  { %16274 = vst [vmem:[#allocation26_spill] sm:$0xff] %v12217_v32  ;;  %v12219_v26 = vpop.permute.xlu0 %4252  ;;  %v12221_v33 = vpop.permute.xlu2 %4248 }
 0x690   :  { %16275 = vst [vmem:[#allocation48_spill] sm:$0xff] %v12219_v26 }
 0x691   :  { %16276 = vst [vmem:[#allocation44_spill] sm:$0xff] %v12221_v33 }
 0x694   :  { %4531 = vrot.lane.b32.xlu1 %v4515_v41, %s16267_s18 }
 0x695   :  { %4598 = vrot.lane.b32.xlu0 %v4577_v36, %s8829_s20  ;;  %4315 = vrot.lane.b32.xlu2 %v4293_v19, %s8820_s15  ;;  %v4573_v19 = vmul.f32 %v12051_v16, %v11977_v21 }
 0x696   :  { %v12232_v25 = vpop.permute.xlu1 %4254 }
 0x697   :  { %16277 = vst [vmem:[#allocation71_spill] sm:$0xff] %v12232_v25  ;;  %v12234_v54 = vpop.permute.xlu0 %5421  ;;  %v12236_v37 = vpop.permute.xlu2 %4309  ;;  %v5028_v25 = vmul.f32 %v12082_v2, %v11954_v45 }
 0x698   :  { %16278 = vst [vmem:[#allocation10_spill] sm:$0xff] %v12236_v37 }
 0x69c   :  { %4594 = vrot.lane.b32.xlu1 %v4575_v55, %s8829_s20  ;;  %v4351_v55 = vmul.f32 %v11993_v46, %v12074_v0  ;;  %v4631_v46 = vmul.f32 %v12031_v62, %v11930_v43 }
 0x69d   :  { %4588 = vrot.lane.b32.xlu0 %v4572_v8, %s8829_s20  ;;  %4533 = vrot.lane.b32.xlu2 %v4516_v3, %s16267_s18  ;;  %v4407_v8 = vmul.f32 %v12035_v40, %v12101_v42 }
 0x69e   :  { %v12247_v22 = vpop.permute.xlu1 %4246 }
 0x69f   :  { %16279 = vst [vmem:[#allocation16_spill] sm:$0xff] %v12247_v22  ;;  %v12249_v50 = vpop.permute.xlu0 %4311  ;;  %v12251_v59 = vpop.permute.xlu2 %4303  ;;  %v5033_v22 = vmul.f32 %v12082_v2, %v11958_v29 }
 0x6a0   :  { %16280 = vst [vmem:[#allocation21_spill] sm:$0xff] %v12249_v50 }
 0x6a1   :  { %16281 = vst [vmem:[#allocation32_spill] sm:$0xff] %v12251_v59  ;;  %v4750_v59 = vmul.f32 %v12047_v52, %v12074_v0 }
 0x6a4   :  { %4372 = vrot.lane.b32.xlu1 %v4350_v38, %s16232_s19 }
 0x6a5   :  { %4596 = vrot.lane.b32.xlu2 %v4576_v4, %s8829_s20  ;;  %4651 = vrot.lane.b32.xlu0 %v4632_v6, %s16282_s16  ;;  %v4633_v6 = vmul.f32 %v12031_v62, %v11924_v44 }
 0x6a6   :  { %v12262_v14 = vpop.permute.xlu1 %4307 }
 0x6a7   :  { %16283 = vst [vmem:[#allocation29_spill] sm:$0xff] %v12262_v14  ;;  %v12264_v41 = vpop.permute.xlu0 %4305  ;;  %v12266_v36 = vpop.permute.xlu2 %4366  ;;  %v5030_v14 = vmul.f32 %v12082_v2, %v11930_v43 }
 0x6a8   :  { %16284 = vst [vmem:[#allocation38_spill] sm:$0xff] %v12264_v41 }
 0x6a9   :  { %16285 = vst [vmem:[#allocation52_spill] sm:$0xff] %v12266_v36  ;;  %v4630_v36 = vmul.f32 %v12031_v62, %v11977_v21 }
 0x6ac   :  { %4590 = vrot.lane.b32.xlu1 %v4573_v19, %s8829_s20 }
 0x6ad   :  { %4374 = vrot.lane.b32.xlu2 %v4351_v55, %s16232_s19  ;;  %4429 = vrot.lane.b32.xlu0 %v4407_v8, %s16257_s21 }
 0x6ae   :  { %v12277_v3 = vpop.permute.xlu1 %4313 }
 0x6af   :  { %16286 = vst [vmem:[#allocation62_spill] sm:$0xff] %v12277_v3  ;;  %v12279_v38 = vpop.permute.xlu0 %4368  ;;  %v12281_v4 = vpop.permute.xlu2 %4144  ;;  %v4690_v3 = vmul.f32 %v12069_v63, %v11924_v44 }
 0x6b0   :  { %16287 = vst [vmem:[#allocation30_spill] sm:$0xff] %v12279_v38  ;;  %v4634_v38 = vmul.f32 %v12031_v62, %v11958_v29 }
 0x6b1   :  { %16288 = vst [vmem:[#allocation37_spill] sm:$0xff] %v12281_v4  ;;  %v4408_v4 = vmul.f32 %v12035_v40, %v12074_v0  ;;  %v4688_v40 = vmul.f32 %v12069_v63, %v11930_v43 }
 0x6b4   :  { %4653 = vrot.lane.b32.xlu1 %v4633_v6, %s16282_s16 }
 0x6b5   :  { %4649 = vrot.lane.b32.xlu2 %v4631_v46, %s16282_s16  ;;  %4647 = vrot.lane.b32.xlu0 %v4630_v36, %s16282_s16 }
 0x6b6   :  { %v12292_v19 = vpop.permute.xlu1 %4364 }
 0x6b7   :  { %16289 = vst [vmem:[#allocation64_spill] sm:$0xff] %v12292_v19  ;;  %v12294_v55 = vpop.permute.xlu0 %4146  ;;  %v12296_v8 = vpop.permute.xlu2 %4362 }
 0x6b8   :  { %16290 = vst [vmem:[#allocation56_spill] sm:$0xff] %v12294_v55  ;;  %v4629_v55 = vmul.f32 %v12031_v62, %v11954_v45 }
 0x6b9   :  { %16291 = vst [vmem:[#allocation55_spill] sm:$0xff] %v12296_v8  ;;  %v4465_v8 = vmul.f32 %v12015_v31, %v12074_v0 }
 0x6bc   :  { %4431 = vrot.lane.b32.xlu1 %v4408_v4, %s16257_s21  ;;  %s16308_s21 = smov 61  }
 0x6bd   :  { %4655 = vrot.lane.b32.xlu2 %v4634_v38, %s16282_s16  ;;  %4710 = vrot.lane.b32.xlu0 %v4690_v3, %s16292_s26 }
 0x6be   :  { %v12307_v36 = vpop.permute.xlu1 %4370 }
 0x6bf   :  { %16293 = vst [vmem:[#allocation42_spill] sm:$0xff] %v12307_v36  ;;  %v12309_v6 = vpop.permute.xlu0 %4421  ;;  %v12311_v46 = vpop.permute.xlu2 %4425  ;;  %v4745_v36 = vmul.f32 %v12047_v52, %v11930_v43 }
 0x6c0   :  { %16294 = vst [vmem:[#allocation69_spill] sm:$0xff] %v12309_v6  ;;  %v4691_v6 = vmul.f32 %v12069_v63, %v11958_v29 }
 0x6c1   :  { %16295 = vst [vmem:[#allocation65_spill] sm:$0xff] %v12311_v46  ;;  %v4689_v46 = vmul.f32 %v12069_v63, %v11927_v53 }
 0x6c4   :  { %4706 = vrot.lane.b32.xlu1 %v4688_v40, %s16292_s26 }
 0x6c5   :  { %4488 = vrot.lane.b32.xlu0 %v4465_v8, %s16261_s27  ;;  %4645 = vrot.lane.b32.xlu2 %v4629_v55, %s16282_s16 }
 0x6c6   :  { %v12322_v3 = vpop.permute.xlu1 %4360 }
 0x6c7   :  { %16296 = vst [vmem:[#allocation94_spill] sm:$0xff] %v12322_v3  ;;  %v12324_v38 = vpop.permute.xlu0 %4427  ;;  %v12326_v4 = vpop.permute.xlu2 %4203  ;;  %v4748_v3 = vmul.f32 %v12047_v52, %v11958_v29 }
 0x6c8   :  { %16297 = vst [vmem:[#allocation54_spill] sm:$0xff] %v12324_v38  ;;  %v4464_v38 = vmul.f32 %v12015_v31, %v12101_v42  ;;  %v4687_v31 = vmul.f32 %v12069_v63, %v11977_v21 }
 0x6c9   :  { %16298 = vst [vmem:[#allocation51_spill] sm:$0xff] %v12326_v4  ;;  %v4686_v4 = vmul.f32 %v12069_v63, %v11954_v45 }
 0x6cc   :  { %4712 = vrot.lane.b32.xlu1 %v4691_v6, %s16292_s26 }
 0x6cd   :  { %4708 = vrot.lane.b32.xlu2 %v4689_v46, %s16292_s26  ;;  %4763 = vrot.lane.b32.xlu0 %v4745_v36, %s15891_s23 }
 0x6ce   :  { %v12337_v55 = vpop.permute.xlu1 %4423 }
 0x6cf   :  { %16299 = vst [vmem:[#allocation60_spill] sm:$0xff] %v12337_v55  ;;  %v12339_v8 = vpop.permute.xlu0 %4417  ;;  %v12341_v40 = vpop.permute.xlu2 %4478 }
 0x6d0   :  { %16300 = vst [vmem:[#allocation57_spill] sm:$0xff] %v12339_v8  ;;  %v4743_v8 = vmul.f32 %v12047_v52, %v11954_v45 }
 0x6d1   :  { %16301 = vst [vmem:[#allocation74_spill] sm:$0xff] %v12341_v40  ;;  %v4746_v40 = vmul.f32 %v12047_v52, %v11927_v53 }
 0x6d4   :  { %4702 = vrot.lane.b32.xlu1 %v4686_v4, %s16292_s26 }
 0x6d5   :  { %4486 = vrot.lane.b32.xlu2 %v4464_v38, %s16261_s27  ;;  %4769 = vrot.lane.b32.xlu0 %v4748_v3, %s15891_s23 }
 0x6d6   :  { %v12352_v36 = vpop.permute.xlu1 %4201 }
 0x6d7   :  { %16302 = vst [vmem:[#allocation85_spill] sm:$0xff] %v12352_v36  ;;  %v12354_v6 = vpop.permute.xlu0 %4480  ;;  %v12356_v46 = vpop.permute.xlu2 %4484  ;;  %v4803_v36 = vmul.f32 %v12126_v18, %v11927_v53 }
 0x6d8   :  { %16303 = vst [vmem:[#allocation49_spill] sm:$0xff] %v12354_v6  ;;  %v4747_v6 = vmul.f32 %v12047_v52, %v11924_v44 }
 0x6d9   :  { %16304 = vst [vmem:[#allocation53_spill] sm:$0xff] %v12356_v46  ;;  %v4521_v46 = vmul.f32 %v12105_v9, %v12101_v42 }
 0x6dc   :  { %4765 = vrot.lane.b32.xlu1 %v4746_v40, %s15891_s23 }
 0x6dd   :  { %4704 = vrot.lane.b32.xlu2 %v4687_v31, %s16292_s26  ;;  %4759 = vrot.lane.b32.xlu0 %v4743_v8, %s15891_s23 }
 0x6de   :  { %v12367_v3 = vpop.permute.xlu1 %4419 }
 0x6df   :  { %16305 = vst [vmem:[#allocation82_spill] sm:$0xff] %v12367_v3  ;;  %v12369_v38 = vpop.permute.xlu0 %4258  ;;  %v12371_v4 = vpop.permute.xlu2 %4474  ;;  %v4578_v3 = vmul.f32 %v12051_v16, %v12101_v42 }
 0x6e0   :  { %16306 = vst [vmem:[#allocation67_spill] sm:$0xff] %v12369_v38  ;;  %v4522_v38 = vmul.f32 %v12105_v9, %v12074_v0  ;;  %v4802_v9 = vmul.f32 %v12126_v18, %v11930_v43 }
 0x6e1   :  { %16307 = vst [vmem:[#allocation79_spill] sm:$0xff] %v12371_v4  ;;  %v4744_v4 = vmul.f32 %v12047_v52, %v11977_v21 }
 0x6e4   :  { %4543 = vrot.lane.b32.xlu1 %v4521_v46, %s16267_s18 }
 0x6e5   :  { %4767 = vrot.lane.b32.xlu2 %v4747_v6, %s15891_s23  ;;  %4822 = vrot.lane.b32.xlu0 %v4803_v36, %s16308_s21 }
 0x6e6   :  { %v12382_v8 = vpop.permute.xlu1 %4482 }
 0x6e7   :  { %16309 = vst [vmem:[#allocation77_spill] sm:$0xff] %v12382_v8  ;;  %v12384_v40 = vpop.permute.xlu0 %4476  ;;  %v12386_v31 = vpop.permute.xlu2 %4537  ;;  %v4975_v8 = vmul.f32 %v12103_v51, %v11924_v44 }
 0x6e8   :  { %16310 = vst [vmem:[#allocation58_spill] sm:$0xff] %v12384_v40  ;;  %v4801_v40 = vmul.f32 %v12126_v18, %v11977_v21 }
 0x6e9   :  { %16311 = vst [vmem:[#allocation87_spill] sm:$0xff] %v12386_v31  ;;  %v4804_v31 = vmul.f32 %v12126_v18, %v11924_v44 }
 0x6ec   :  { %4761 = vrot.lane.b32.xlu1 %v4744_v4, %s15891_s23 }
 0x6ed   :  { %4545 = vrot.lane.b32.xlu2 %v4522_v38, %s16267_s18  ;;  %4600 = vrot.lane.b32.xlu0 %v4578_v3, %s8829_s20  ;;  %s16318_s18 = smov 60  }
 0x6ee   :  { %v12397_v36 = vpop.permute.xlu1 %4260 }
 0x6ef   :  { %16312 = vst [vmem:[#allocation76_spill] sm:$0xff] %v12397_v36  ;;  %v12399_v6 = vpop.permute.xlu0 %4539  ;;  %v12401_v46 = vpop.permute.xlu2 %4315  ;;  %v4861_v36 = vmul.f32 %v12087_v27, %v11924_v44 }
 0x6f0   :  { %16313 = vst [vmem:[#allocation72_spill] sm:$0xff] %v12399_v6  ;;  %v4805_v6 = vmul.f32 %v12126_v18, %v11958_v29 }
 0x6f1   :  { %16314 = vst [vmem:[#allocation83_spill] sm:$0xff] %v12401_v46  ;;  %v4579_v46 = vmul.f32 %v12051_v16, %v12074_v0  ;;  %v4859_v16 = vmul.f32 %v12087_v27, %v11930_v43 }
 0x6f4   :  { %4824 = vrot.lane.b32.xlu1 %v4804_v31, %s16308_s21 }
 0x6f5   :  { %4820 = vrot.lane.b32.xlu2 %v4802_v9, %s16308_s21  ;;  %4818 = vrot.lane.b32.xlu0 %v4801_v40, %s16308_s21 }
 0x6f6   :  { %v12412_v3 = vpop.permute.xlu1 %4535 }
 0x6f7   :  { %16315 = vst [vmem:[#allocation63_spill] sm:$0xff] %v12412_v3  ;;  %v12414_v38 = vpop.permute.xlu0 %4317  ;;  %v12416_v4 = vpop.permute.xlu2 %4533 }
 0x6f8   :  { %16316 = vst [vmem:[#allocation92_spill] sm:$0xff] %v12414_v38  ;;  %v4636_v38 = vmul.f32 %v12031_v62, %v12074_v0  ;;  %v12533_v3 = vpop.f32.mrf.mxu1 }
 0x6f9   :  { %16317 = vst [vmem:[#allocation80_spill] sm:$0xff] %v12416_v4  ;;  %v4800_v4 = vmul.f32 %v12126_v18, %v11954_v45 }
 0x6fc   :  { %4602 = vrot.lane.b32.xlu1 %v4579_v46, %s8829_s20 }
 0x6fd   :  { %4826 = vrot.lane.b32.xlu2 %v4805_v6, %s16308_s21  ;;  %4881 = vrot.lane.b32.xlu0 %v4861_v36, %s16318_s18 }
 0x6fe   :  { %v12427_v40 = vpop.permute.xlu1 %4541 }
 0x6ff   :  { %16319 = vst [vmem:[#allocation98_spill] sm:$0xff] %v12427_v40  ;;  %v12429_v31 = vpop.permute.xlu0 %4592  ;;  %v12431_v9 = vpop.permute.xlu2 %4596  ;;  %v4916_v40 = vmul.f32 %v12060_v20, %v11930_v43 }
 0x700   :  { %16320 = vst [vmem:[#allocation109_spill] sm:$0xff] %v12429_v31  ;;  %v4862_v31 = vmul.f32 %v12087_v27, %v11958_v29 }
 0x701   :  { %16321 = vst [vmem:[#allocation88_spill] sm:$0xff] %v12431_v9  ;;  %v4860_v9 = vmul.f32 %v12087_v27, %v11927_v53 }
 0x704   :  { %4877 = vrot.lane.b32.xlu1 %v4859_v16, %s16318_s18 }
 0x705   :  { %4816 = vrot.lane.b32.xlu2 %v4800_v4, %s16308_s21  ;;  %4659 = vrot.lane.b32.xlu0 %v4636_v38, %s16282_s16 }
 0x706   :  { %v12442_v36 = vpop.permute.xlu1 %4531 }
 0x707   :  { %16322 = vst [vmem:[#allocation70_spill] sm:$0xff] %v12442_v36  ;;  %v12444_v6 = vpop.permute.xlu0 %4598  ;;  %v12446_v46 = vpop.permute.xlu2 %4374  ;;  %v4919_v36 = vmul.f32 %v12060_v20, %v11958_v29 }
 0x708   :  { %16323 = vst [vmem:[#allocation75_spill] sm:$0xff] %v12444_v6  ;;  %v4635_v6 = vmul.f32 %v12031_v62, %v12101_v42  ;;  %v4858_v62 = vmul.f32 %v12087_v27, %v11977_v21 }
 0x709   :  { %16324 = vst [vmem:[#allocation106_spill] sm:$0xff] %v12446_v46  ;;  %v4857_v46 = vmul.f32 %v12087_v27, %v11954_v45 }
 0x70c   :  { %4883 = vrot.lane.b32.xlu1 %v4862_v31, %s16318_s18 }
 0x70d   :  { %4879 = vrot.lane.b32.xlu2 %v4860_v9, %s16318_s18  ;;  %4934 = vrot.lane.b32.xlu0 %v4916_v40, %s16233_s28 }
 0x70e   :  { %v12457_v38 = vpop.permute.xlu1 %4594 }
 0x70f   :  { %16325 = vst [vmem:[#allocation90_spill] sm:$0xff] %v12457_v38  ;;  %v12459_v4 = vpop.permute.xlu0 %4588  ;;  %v12461_v16 = vpop.permute.xlu2 %4649  ;;  %v4974_v38 = vmul.f32 %v12103_v51, %v11927_v53 }
 0x710   :  { %16326 = vst [vmem:[#allocation102_spill] sm:$0xff] %v12459_v4  ;;  %v4914_v4 = vmul.f32 %v12060_v20, %v11954_v45 }
 0x711   :  { %16327 = vst [vmem:[#allocation101_spill] sm:$0xff] %v12461_v16  ;;  %v4917_v16 = vmul.f32 %v12060_v20, %v11927_v53 }
 0x714   :  { %4873 = vrot.lane.b32.xlu1 %v4857_v46, %s16318_s18  ;;  %v12484_v46 = vpop.f32.mrf.mxu3 }
 0x715   :  { %4657 = vrot.lane.b32.xlu2 %v4635_v6, %s16282_s16  ;;  %4940 = vrot.lane.b32.xlu0 %v4919_v36, %s16233_s28  ;;  %s16334_s16 = smov 31  }
 0x716   :  { %v12472_v40 = vpop.permute.xlu1 %4372 }
 0x717   :  { %16328 = vst [vmem:[#allocation73_spill] sm:$0xff] %v12472_v40  ;;  %v12474_v31 = vpop.permute.xlu0 %4651  ;;  %v12476_v9 = vpop.permute.xlu2 %4655  ;;  %v4918_v40 = vmul.f32 %v12060_v20, %v11924_v44 }
 0x718   :  { %16329 = vst [vmem:[#allocation36_spill] sm:$0xff] %v12474_v31 }
 0x719   :  { %16330 = vst [vmem:[#allocation24_spill] sm:$0xff] %v12476_v9  ;;  %v4692_v9 = vmul.f32 %v12069_v63, %v12101_v42 }
 0x71c   :  { %4936 = vrot.lane.b32.xlu1 %v4917_v16, %s16233_s28 }
 0x71d   :  { %4875 = vrot.lane.b32.xlu2 %v4858_v62, %s16318_s18  ;;  %4930 = vrot.lane.b32.xlu0 %v4914_v4, %s16233_s28  ;;  %v12504_v4 = vpop.f32.mrf.mxu3 }
 0x71e   :  { %v12489_v36 = vpop.permute.xlu1 %4590 }
 0x71f   :  { %16331 = vst [vmem:[#allocation81_spill] sm:$0xff] %v12489_v36  ;;  %v12491_v6 = vpop.permute.xlu0 %4429  ;;  %v12493_v31 = vpop.permute.xlu2 %4645  ;;  %v4693_v36 = vmul.f32 %v12069_v63, %v12074_v0 }
 0x720   :  { %16332 = vst [vmem:[#allocation111_spill] sm:$0xff] %v12491_v6  ;;  %v4915_v6 = vmul.f32 %v12060_v20, %v11977_v21 }
 0x721   :  { %16333 = vst [vmem:[#allocation86_spill] sm:$0xff] %v12493_v31 }
 0x724   :  { %4714 = vrot.lane.b32.xlu1 %v4692_v9, %s16292_s26  ;;  %v4749_v9 = vmul.f32 %v12047_v52, %v12101_v42 }
 0x725   :  { %4938 = vrot.lane.b32.xlu2 %v4918_v40, %s16233_s28  ;;  %4993 = vrot.lane.b32.xlu0 %v4974_v38, %s16334_s16  ;;  %v12518_v40 = vpop.f32.mrf.mxu2  ;;  %v12521_v38 = vpop.f32.mrf.mxu0 }
 0x726   :  { %v12506_v16 = vpop.permute.xlu1 %4653 }
 0x727   :  { %16335 = vst [vmem:[#allocation99_spill] sm:$0xff] %v12506_v16  ;;  %v12508_v62 = vpop.permute.xlu0 %4647  ;;  %v12510_v31 = vpop.permute.xlu2 %4708 }
 0x728   :  { %16336 = vst [vmem:[#allocation95_spill] sm:$0xff] %v12508_v62  ;;  %v12529_v16 = vpop.f32.mrf.mxu3 }
 0x729   :  { %16337 = vst [vmem:[#allocation107_spill] sm:$0xff] %v12510_v31 }
 0x72c   :  { %4932 = vrot.lane.b32.xlu1 %v4915_v6, %s16233_s28  ;;  %v4973_v6 = vmul.f32 %v12103_v51, %v11930_v43 }
 0x72d   :  { %4716 = vrot.lane.b32.xlu2 %v4693_v36, %s16292_s26  ;;  %4771 = vrot.lane.b32.xlu0 %v4749_v9, %s15891_s23  ;;  %v4972_v36 = vmul.f32 %v12103_v51, %v11977_v21  ;;  %v12544_v9 = vpop.f32.mrf.mxu2  ;;  %s16344_s26 = smov 30  }
 0x72e   :  { %v12525_v31 = vpop.permute.xlu1 %4431 }
 0x72f   :  { %16338 = vst [vmem:[#allocation103_spill] sm:$0xff] %v12525_v31  ;;  %v12527_v62 = vpop.permute.xlu0 %4710  ;;  %v12531_v63 = vpop.permute.xlu2 %4486 }
 0x730   :  { %16339 = vst [vmem:[#allocation120_spill] sm:$0xff] %v12527_v62  ;;  %v12548_v31 = vpop.f32.mrf.mxu0  ;;  %v12554_v19 = vpop.f32.mrf.mxu3 }
 0x731   :  { %16340 = vst [vmem:[#allocation128_spill] sm:$0xff] %v12531_v63 }
 0x734   :  { %4995 = vrot.lane.b32.xlu1 %v4975_v8, %s16334_s16  ;;  %v12558_v8 = vpop.f32.mrf.mxu1 }
 0x735   :  { %4991 = vrot.lane.b32.xlu2 %v4973_v6, %s16334_s16  ;;  %4989 = vrot.lane.b32.xlu0 %v4972_v36, %s16334_s16  ;;  %v4976_v6 = vmul.f32 %v12103_v51, %v11958_v29  ;;  %v5032_v36 = vmul.f32 %v12082_v2, %v11924_v44 }
 0x736   :  { %v12546_v63 = vpop.permute.xlu1 %4706 }
 0x737   :  { %16341 = vst [vmem:[#allocation116_spill] sm:$0xff] %v12546_v63  ;;  %v12550_v62 = vpop.permute.xlu0 %4488  ;;  %v12552_v55 = vpop.permute.xlu2 %4704 }
 0x738   :  { %16342 = vst [vmem:[#allocation93_spill] sm:$0xff] %v12550_v62  ;;  %v12571_v63 = vpop.f32.mrf.mxu2  ;;  %v12575_v41 = vpop.f32.mrf.mxu0 }
 0x739   :  { %16343 = vst [vmem:[#allocation78_spill] sm:$0xff] %v12552_v55 }
 0x73c   :  { %4773 = vrot.lane.b32.xlu1 %v4750_v59, %s15891_s23  ;;  %v4971_v59 = vmul.f32 %v12103_v51, %v11954_v45  ;;  %s16709_s23 = smov 74  }
 0x73d   :  { %4997 = vrot.lane.b32.xlu2 %v4976_v6, %s16334_s16  ;;  %5052 = vrot.lane.b32.xlu0 %v5032_v36, %s16344_s26  ;;  %v4807_v6 = vmul.f32 %v12126_v18, %v12074_v0  ;;  %v12583_v36 = vpop.f32.mrf.mxu3 }
 0x73e   :  { %v12567_v62 = vpop.permute.xlu1 %4712 }
 0x73f   :  { %16345 = vst [vmem:[#allocation130_spill] sm:$0xff] %v12567_v62  ;;  %v12569_v55 = vpop.permute.xlu0 %4763  ;;  %v12573_v52 = vpop.permute.xlu2 %4767 }
 0x740   :  { %16346 = vst [vmem:[#allocation114_spill] sm:$0xff] %v12569_v55  ;;  %v12586_v55 = vpop.f32.mrf.mxu1  ;;  %v12596_v50 = vpop.f32.mrf.mxu2 }
 0x741   :  { %16347 = vst [vmem:[#allocation121_spill] sm:$0xff] %v12573_v52  ;;  %v12600_v33 = vpop.f32.mrf.mxu0 }
 0x744   :  { %5048 = vrot.lane.b32.xlu1 %v5030_v14, %s16344_s26  ;;  %v5087_v14 = vmul.f32 %v12144_v5, %v11930_v43 }
 0x745   :  { %4987 = vrot.lane.b32.xlu2 %v4971_v59, %s16334_s16  ;;  %4830 = vrot.lane.b32.xlu0 %v4807_v6, %s16308_s21  ;;  %v5031_v59 = vmul.f32 %v12082_v2, %v11927_v53  ;;  %v12609_v6 = vpop.f32.mrf.mxu3 }
 0x746   :  { %v12590_v52 = vpop.permute.xlu1 %4702 }
 0x747   :  { %16348 = vst [vmem:[#allocation97_spill] sm:$0xff] %v12590_v52  ;;  %v12592_v62 = vpop.permute.xlu0 %4769  ;;  %v12594_v37 = vpop.permute.xlu2 %4545 }
 0x748   :  { %16349 = vst [vmem:[#allocation104_spill] sm:$0xff] %v12592_v62  ;;  %v12613_v52 = vpop.f32.mrf.mxu1 }
 0x749   :  { %16350 = vst [vmem:[#allocation112_spill] sm:$0xff] %v12594_v37 }
 0x74c   :  { %5054 = vrot.lane.b32.xlu1 %v5033_v22, %s16344_s26  ;;  %v5090_v22 = vmul.f32 %v12144_v5, %v11958_v29 }
 0x74d   :  { %5105 = vrot.lane.b32.xlu0 %v5087_v14, %s16351_s25  ;;  %5050 = vrot.lane.b32.xlu2 %v5031_v59, %s16344_s26  ;;  %v4806_v14 = vmul.f32 %v12126_v18, %v12101_v42  ;;  %v12625_v59 = vpop.f32.mrf.mxu2  ;;  %v12636_v61 = vpop.f32.mrf.mxu3  ;;  %v5088_v18 = vmul.f32 %v12144_v5, %v11927_v53 }
 0x74e   :  { %v12611_v37 = vpop.permute.xlu1 %4765 }
 0x74f   :  { %16352 = vst [vmem:[#allocation117_spill] sm:$0xff] %v12611_v37  ;;  %v12615_v62 = vpop.permute.xlu0 %4759  ;;  %v12617_v34 = vpop.permute.xlu2 %4820 }
 0x750   :  { %16353 = vst [vmem:[#allocation47_spill] sm:$0xff] %v12615_v62  ;;  %v12628_v37 = vpop.f32.mrf.mxu0  ;;  %v12640_v7 = vpop.f32.mrf.mxu1 }
 0x751   :  { %16354 = vst [vmem:[#allocation129_spill] sm:$0xff] %v12617_v34 }
 0x754   :  { %5044 = vrot.lane.b32.xlu1 %v5028_v25, %s16344_s26  ;;  %v5085_v25 = vmul.f32 %v12144_v5, %v11954_v45 }
 0x755   :  { %5111 = vrot.lane.b32.xlu0 %v5090_v22, %s16351_s25  ;;  %4828 = vrot.lane.b32.xlu2 %v4806_v14, %s16308_s21  ;;  %v5029_v22 = vmul.f32 %v12082_v2, %v11977_v21  ;;  %v12651_v14 = vpop.f32.mrf.mxu2  ;;  %v12661_v32 = vpop.f32.mrf.mxu3  ;;  %s16361_s21 = smov 28  }
 0x756   :  { %v12632_v62 = vpop.permute.xlu1 %4543 }
 0x757   :  { %16355 = vst [vmem:[#allocation105_spill] sm:$0xff] %v12632_v62  ;;  %v12634_v34 = vpop.permute.xlu0 %4822  ;;  %v12638_v26 = vpop.permute.xlu2 %4826 }
 0x758   :  { %16356 = vst [vmem:[#allocation123_spill] sm:$0xff] %v12634_v34  ;;  %v12655_v34 = vpop.f32.mrf.mxu0 }
 0x759   :  { %16357 = vst [vmem:[#allocation96_spill] sm:$0xff] %v12638_v26 }
 0x75c   :  { %5107 = vrot.lane.b32.xlu1 %v5088_v18, %s16351_s25  ;;  %v12665_v18 = vpop.f32.mrf.mxu1 }
 0x75d   :  { %5101 = vrot.lane.b32.xlu0 %v5085_v25, %s16351_s25  ;;  %5046 = vrot.lane.b32.xlu2 %v5029_v22, %s16344_s26  ;;  %v5145_v25 = vmul.f32 %v12120_v15, %v11927_v53  ;;  %v5089_v22 = vmul.f32 %v12144_v5, %v11924_v44  ;;  %v5086_v53 = vmul.f32 %v12144_v5, %v11977_v21  ;;  %v12688_v60 = vpop.f32.mrf.mxu3 }
 0x75e   :  { %v12653_v62 = vpop.permute.xlu1 %4761 }
 0x75f   :  { %16358 = vst [vmem:[#allocation110_spill] sm:$0xff] %v12653_v62  ;;  %v12657_v26 = vpop.permute.xlu0 %4600  ;;  %v12659_v28 = vpop.permute.xlu2 %4816 }
 0x760   :  { %16359 = vst [vmem:[#allocation46_spill] sm:$0xff] %v12657_v26  ;;  %v12678_v62 = vpop.f32.mrf.mxu2  ;;  %v12682_v12 = vpop.f32.mrf.mxu0 }
 0x761   :  { %16360 = vst [vmem:[#allocation17_spill] sm:$0xff] %v12659_v28 }
 0x764   :  { %4885 = vrot.lane.b32.xlu1 %v4863_v57, %s16318_s18  ;;  %v4864_v57 = vmul.f32 %v12087_v27, %v12074_v0 }
 0x765   :  { %5164 = vrot.lane.b32.xlu0 %v5145_v25, %s16361_s21  ;;  %5109 = vrot.lane.b32.xlu2 %v5089_v22, %s16351_s25  ;;  %v12691_v25 = vpop.f32.mrf.mxu1  ;;  %v8770_v22 = vld [vmem:[%s15574_s1] sm:$0x3f]  ;;  %s16692_s1 = smov 122  }
 0x766   :  { %v12674_v26 = vpop.permute.xlu1 %4824  ;;  %16365 = vst [vmem:[#allocation40_spill] sm:$0xff] %v12691_v25 }
 0x767   :  { %16362 = vst [vmem:[#allocation100_spill] sm:$0xff] %v12674_v26  ;;  %v12676_v28 = vpop.permute.xlu0 %4818  ;;  %v12680_v39 = vpop.permute.xlu2 %4879 }
 0x768   :  { %16363 = vst [vmem:[#allocation125_spill] sm:$0xff] %v12676_v28  ;;  %v12703_v27 = vpop.f32.mrf.mxu2  ;;  %v12707_v1 = vpop.f32.mrf.mxu0 }
 0x769   :  { %16364 = vst [vmem:[#allocation124_spill] sm:$0xff] %v12680_v39 }
 0x76a   :  { %16369 = vst [vmem:[#allocation27_spill] sm:$0xff] %v12707_v1 }
 0x76c   :  { %5103 = vrot.lane.b32.xlu1 %v5086_v53, %s16351_s25  ;;  %v5146_v53 = vmul.f32 %v12120_v15, %v11924_v44  ;;  %v12721_v44 = vpop.f32.mrf.mxu3 }
 0x76d   :  { %5198 = vperm.xlu0 %8743, %v8770_v22   ;;  %4887 = vrot.lane.b32.xlu2 %v4864_v57, %s16318_s18  ;;  %v5144_v22 = vmul.f32 %v12120_v15, %v11930_v43  ;;  %v12717_v57 = vld [vmem:[%s15573_s0 + $0x3] ss:$2 sm:$0xff]  ;;  %s16696_s18 = smov 98  }
 0x76e   :  { %v12697_v39 = vpop.permute.xlu1 %4602 }
 0x76f   :  { %16366 = vst [vmem:[#allocation35_spill] sm:$0xff] %v12697_v39  ;;  %v12699_v28 = vpop.permute.xlu0 %4881  ;;  %v12701_v26 = vpop.permute.xlu2 %4657 }
 0x770   :  { %16367 = vst [vmem:[#allocation45_spill] sm:$0xff] %v12699_v28  ;;  %v12741_v13 = vpop.f32.mrf.mxu2 }
 0x771   :  { %16368 = vst [vmem:[#allocation59_spill] sm:$0xff] %v12701_v26  ;;  %v12726_v26 = vpop.f32.mrf.mxu1 }
 0x774   :  { %5166 = vrot.lane.b32.xlu1 %v5146_v53, %s16361_s21  ;;  %v12731_v53 = vperm.slane %v12717_v57, 3  ;;  %v12752_v56 = vpop.f32.mrf.mxu3 }
 0x775   :  { %4999 = vrot.lane.b32.xlu0 %v4977_v49, %s16334_s16  ;;  %5162 = vrot.lane.b32.xlu2 %v5144_v22, %s16361_s21  ;;  %v4920_v49 = vmul.f32 %v12060_v20, %v12101_v42 }
 0x776   :  { %v12723_v39 = vpop.permute.xlu1 %4877  ;;  %8745 = vset.pattern.permute.xlu0 %v16251_v10  ;;  %v5256_v22 = vmul.f32 %v12731_v53, %v12140_v24  ;;  %v12744_v10 = vpop.f32.mrf.mxu0 }
 0x777   :  { %16370 = vst [vmem:[#allocation68_spill] sm:$0xff] %v12723_v39  ;;  %v12728_v43 = vpop.permute.xlu0 %4659  ;;  %v12733_v28 = vpop.permute.xlu2 %4875  ;;  %v5147_v39 = vmul.f32 %v12120_v15, %v11958_v29  ;;  %v5142_v29 = vmul.f32 %v12120_v15, %v11954_v45  ;;  %v12776_v45 = vperm.slane %v12717_v57, 1 }
 0x778   :  { %16371 = vst [vmem:[#allocation119_spill] sm:$0xff] %v12728_v43 }
 0x779   :  { %16372 = vst [vmem:[#allocation126_spill] sm:$0xff] %v12733_v28  ;;  %v12756_v23 = vpop.f32.mrf.mxu1 }
 0x77a   :  { %16376 = vst [vmem:[#allocation66_spill] sm:$0xff] %v12756_v23 }
 0x77c   :  { %4942 = vrot.lane.b32.xlu1 %v4920_v49, %s16233_s28  ;;  %v5034_v49 = vmul.f32 %v12082_v2, %v12101_v42 }
 0x77d   :  { %5275 = vrot.lane.b32.xlu0 %v5256_v22, %s8812_s29  ;;  %5168 = vrot.lane.b32.xlu2 %v5147_v39, %s16361_s21  ;;  %v4921_v22 = vmul.f32 %v12060_v20, %v12074_v0  ;;  %v12767_v39 = vpop.f32.mrf.mxu2  ;;  %v12780_v20 = vpop.f32.mrf.mxu3 }
 0x77e   :  { %v12748_v43 = vpop.permute.xlu1 %4883  ;;  %16377 = vst [vmem:[#allocation122_spill] sm:$0xff] %v12767_v39 }
 0x77f   :  { %16373 = vst [vmem:[#allocation127_spill] sm:$0xff] %v12748_v43  ;;  %v12750_v28 = vpop.permute.xlu0 %4934  ;;  %v12754_v48 = vpop.permute.xlu2 %4938 }
 0x780   :  { %16374 = vst [vmem:[#allocation118_spill] sm:$0xff] %v12750_v28 }
 0x781   :  { %16375 = vst [vmem:[#allocation61_spill] sm:$0xff] %v12754_v48  ;;  %v12771_v48 = vpop.f32.mrf.mxu0 }
 0x782   :  { %16379 = vst [vmem:[#allocation131_spill] sm:$0xff] %v12771_v48  ;;  %v12801_v48 = vperm.slane %v12717_v57, 2 }
 0x783   :  { %16382 = vst [vmem:[#allocation115_spill] sm:$0xff] %v12780_v20 }
 0x784   :  { %5158 = vrot.lane.b32.xlu1 %v5142_v29, %s16361_s21  ;;  %v4978_v29 = vmul.f32 %v12103_v51, %v12074_v0 }
 0x785   :  { %5056 = vrot.lane.b32.xlu0 %v5034_v49, %s16344_s26  ;;  %4944 = vrot.lane.b32.xlu2 %v4921_v22, %s16233_s28  ;;  %v12784_v49 = vpop.f32.mrf.mxu1  ;;  %v5254_v22 = vmul.f32 %v12776_v45, %v12140_v24  ;;  %v12803_v1 = vpop.f32.mrf.mxu2 }
 0x786   :  { %v12769_v28 = vpop.permute.xlu1 %4873  ;;  %16383 = vst [vmem:[#allocation108_spill] sm:$0xff] %v12784_v49 }
 0x787   :  { %16378 = vst [vmem:[#allocation91_spill] sm:$0xff] %v12769_v28  ;;  %v12773_v43 = vpop.permute.xlu0 %4940  ;;  %v12778_v23 = vpop.permute.xlu2 %4716  ;;  %v5143_v28 = vmul.f32 %v12120_v15, %v11977_v21 }
 0x788   :  { %16380 = vst [vmem:[#allocation84_spill] sm:$0xff] %v12773_v43  ;;  %v12796_v43 = vperm.slane %v12717_v57, 4 }
 0x789   :  { %16381 = vst [vmem:[#allocation89_spill] sm:$0xff] %v12778_v23  ;;  %v12807_v21 = vpop.f32.mrf.mxu0 }
 0x78a   :  { %16386 = vst [vmem:[#allocation15_spill] sm:$0xff] %v12803_v1  ;;  %v12827_v1 = vperm.slane %v12717_v57, 5 }
 0x78b   :  { %16388 = vst [vmem:[#allocation11_spill] sm:$0xff] %v12807_v21 }
 0x78c   :  { %5001 = vrot.lane.b32.xlu1 %v4978_v29, %s16334_s16  ;;  %v5257_v29 = vmul.f32 %v12796_v43, %v12140_v24  ;;  %s16700_s16 = smov 86  }
 0x78d   :  { %5271 = vrot.lane.b32.xlu0 %v5254_v22, %s8812_s29  ;;  %5160 = vrot.lane.b32.xlu2 %v5143_v28, %s16361_s21  ;;  %v5314_v28 = vmul.f32 %v12174_v30, %v12796_v43  ;;  %v5255_v22 = vmul.f32 %v12801_v48, %v12140_v24  ;;  %v12831_v20 = vpop.f32.mrf.mxu2 }
 0x78e   :  { %v12793_v23 = vpop.permute.xlu1 %4936  ;;  %16394 = vst [vmem:[#allocation136_spill] sm:$0xff] %v12831_v20 }
 0x78f   :  { %16384 = vst [vmem:[#allocation113_spill] sm:$0xff] %v12793_v23  ;;  %v12798_v51 = vpop.permute.xlu0 %4930  ;;  %v12805_v39 = vpop.permute.xlu2 %4991 }
 0x790   :  { %16385 = vst [vmem:[#allocation28_spill] sm:$0xff] %v12798_v51  ;;  %v12815_v23 = vpop.f32.mrf.mxu3  ;;  %v12818_v51 = vpop.f32.mrf.mxu1 }
 0x791   :  { %16387 = vst [vmem:[#allocation19_spill] sm:$0xff] %v12805_v39 }
 0x792   :  { %16389 = vst [vmem:[#allocation18_spill] sm:$0xff] %v12815_v23  ;;  %v12835_v23 = vpop.f32.mrf.mxu0 }
 0x793   :  { %16390 = vst [vmem:[#allocation132_spill] sm:$0xff] %v12818_v51 }
 0x794   :  { %5277 = vrot.lane.b32.xlu1 %v5257_v29, %s8812_s29  ;;  %v5035_v29 = vmul.f32 %v12082_v2, %v12074_v0  ;;  %16395 = vst [vmem:[#allocation137_spill] sm:$0xff] %v12835_v23  ;;  %v12853_v23 = vperm.slane %v12717_v57, 0 }
 0x795   :  { %5334 = vrot.lane.b32.xlu0 %v5314_v28, %s8813_s30  ;;  %5273 = vrot.lane.b32.xlu2 %v5255_v22, %s8812_s29  ;;  %v5092_v28 = vmul.f32 %v12144_v5, %v12074_v0  ;;  %v5258_v22 = vmul.f32 %v12827_v1, %v12140_v24  ;;  %v12863_v20 = vpop.f32.mrf.mxu2 }
 0x796   :  { %v12822_v39 = vpop.permute.xlu1 %4714  ;;  %16401 = vst [vmem:[#allocation143_spill] sm:$0xff] %v12863_v20  ;;  %v5315_v20 = vmul.f32 %v12174_v30, %v12827_v1 }
 0x797   :  { %16391 = vst [vmem:[#allocation133_spill] sm:$0xff] %v12822_v39  ;;  %v12824_v21 = vpop.permute.xlu0 %4993  ;;  %v12829_v49 = vpop.permute.xlu2 %4997 }
 0x798   :  { %16392 = vst [vmem:[#allocation134_spill] sm:$0xff] %v12824_v21  ;;  %v12844_v39 = vpop.f32.mrf.mxu3 }
 0x799   :  { %16393 = vst [vmem:[#allocation135_spill] sm:$0xff] %v12829_v49  ;;  %v12848_v49 = vpop.f32.mrf.mxu1 }
 0x79a   :  { %16396 = vst [vmem:[#allocation138_spill] sm:$0xff] %v12844_v39 }
 0x79b   :  { %16398 = vst [vmem:[#allocation140_spill] sm:$0xff] %v12848_v49 }
 0x79c   :  { %5058 = vrot.lane.b32.xlu1 %v5035_v29, %s16344_s26  ;;  %v5312_v29 = vmul.f32 %v12174_v30, %v12801_v48  ;;  %s16705_s26 = smov 113  }
 0x79d   :  { %5115 = vrot.lane.b32.xlu0 %v5092_v28, %s16351_s25  ;;  %5279 = vrot.lane.b32.xlu2 %v5258_v22, %s8812_s29  ;;  %v5369_v28 = vmul.f32 %v12176_v35, %v12801_v48  ;;  %v5253_v22 = vmul.f32 %v12853_v23, %v12140_v24 }
 0x79e   :  { %v12846_v21 = vpop.permute.xlu1 %4932 }
 0x79f   :  { %16397 = vst [vmem:[#allocation139_spill] sm:$0xff] %v12846_v21  ;;  %v12850_v2 = vpop.permute.xlu0 %4771  ;;  %v12855_v51 = vpop.permute.xlu2 %4987 }
 0x7a0   :  { %16399 = vst [vmem:[#allocation141_spill] sm:$0xff] %v12850_v2  ;;  %v12866_v21 = vpop.f32.mrf.mxu0  ;;  %v12874_v49 = vpop.f32.mrf.mxu3 }
 0x7a1   :  { %16400 = vst [vmem:[#allocation142_spill] sm:$0xff] %v12855_v51  ;;  %v12878_v25 = vpop.f32.mrf.mxu1 }
 0x7a2   :  { %16402 = vst [vmem:[#allocation144_spill] sm:$0xff] %v12866_v21 }
 0x7a3   :  { %16405 = vst [vmem:[#allocation147_spill] sm:$0xff] %v12874_v49  ;;  %v5310_v49 = vmul.f32 %v12174_v30, %v12853_v23 }
 0x7a4   :  { %5330 = vrot.lane.b32.xlu1 %v5312_v29, %s8813_s30  ;;  %16407 = vst [vmem:[#allocation149_spill] sm:$0xff] %v12878_v25  ;;  %v5372_v29 = vmul.f32 %v12176_v35, %v12827_v1 }
 0x7a5   :  { %5387 = vrot.lane.b32.xlu0 %v5369_v28, %s8816_s14  ;;  %5269 = vrot.lane.b32.xlu2 %v5253_v22, %s8812_s29  ;;  %v5313_v28 = vmul.f32 %v12174_v30, %v12731_v53  ;;  %v12889_v22 = vpop.f32.mrf.mxu2 }
 0x7a6   :  { %v12870_v2 = vpop.permute.xlu1 %4995  ;;  %16408 = vst [vmem:[#allocation150_spill] sm:$0xff] %v12889_v22 }
 0x7a7   :  { %16403 = vst [vmem:[#allocation145_spill] sm:$0xff] %v12870_v2  ;;  %v12872_v51 = vpop.permute.xlu0 %4989  ;;  %v12876_v39 = vpop.permute.xlu2 %5050 }
 0x7a8   :  { %16404 = vst [vmem:[#allocation146_spill] sm:$0xff] %v12872_v51  ;;  %v12893_v51 = vpop.f32.mrf.mxu0  ;;  %v12899_v21 = vpop.f32.mrf.mxu3 }
 0x7a9   :  { %16406 = vst [vmem:[#allocation148_spill] sm:$0xff] %v12876_v39 }
 0x7aa   :  { %16410 = vst [vmem:[#allocation152_spill] sm:$0xff] %v12893_v51 }
 0x7ac   :  { %5336 = vrot.lane.b32.xlu1 %v5315_v20, %s8813_s30  ;;  %v12903_v20 = vpop.f32.mrf.mxu1 }
 0x7ad   :  { %5393 = vrot.lane.b32.xlu0 %v5372_v29, %s8816_s14  ;;  %5332 = vrot.lane.b32.xlu2 %v5313_v28, %s8813_s30  ;;  %v5149_v29 = vmul.f32 %v12120_v15, %v12074_v0  ;;  %v5091_v28 = vmul.f32 %v12144_v5, %v12101_v42  ;;  %v5370_v0 = vmul.f32 %v12176_v35, %v12731_v53 }
 0x7ae   :  { %v12891_v39 = vpop.permute.xlu1 %4773  ;;  %v5426_v5 = vmul.f32 %v12234_v54, %v12801_v48  ;;  %v2229_v48 = vadd.f32 %v12484_v46, %v11884_v11 }
 0x7af   :  { %16409 = vst [vmem:[#allocation151_spill] sm:$0xff] %v12891_v39  ;;  %v12895_v2 = vpop.permute.xlu0 %5052  ;;  %v12897_v25 = vpop.permute.xlu2 %4828 }
 0x7b0   :  { %16411 = vst [vmem:[#allocation153_spill] sm:$0xff] %v12895_v2  ;;  %v12916_v2 = vpop.f32.mrf.mxu2  ;;  %v12920_v22 = vpop.f32.mrf.mxu0  ;;  %v2298_v11 = vadd.f32 %v12548_v31, %v2229_v48 }
 0x7b1   :  { %16412 = vst [vmem:[#allocation154_spill] sm:$0xff] %v12897_v25 }
 0x7b2   :  { %16416 = vst [vmem:[#allocation158_spill] sm:$0xff] %v12920_v22  ;;  %v3809_v22 = vld [vmem:[%s15578_s5] sm:$0xff] }
 0x7b4   :  { %5326 = vrot.lane.b32.xlu1 %v5310_v49, %s8813_s30  ;;  %v5311_v49 = vmul.f32 %v12174_v30, %v12776_v45 }
 0x7b5   :  { %5172 = vrot.lane.b32.xlu0 %v5149_v29, %s16361_s21  ;;  %5113 = vrot.lane.b32.xlu2 %v5091_v28, %s16351_s25  ;;  %v12928_v29 = vpop.f32.mrf.mxu3  ;;  %v12931_v28 = vpop.f32.mrf.mxu1  ;;  %s16694_s25 = smov 110  }
 0x7b6   :  { %v12912_v39 = vpop.permute.xlu1 %5048  ;;  %16417 = vst [vmem:[#allocation159_spill] sm:$0xff] %v12931_v28 }
 0x7b7   :  { %16413 = vst [vmem:[#allocation155_spill] sm:$0xff] %v12912_v39  ;;  %v12914_v25 = vpop.permute.xlu0 %4830  ;;  %v12918_v51 = vpop.permute.xlu2 %5046 }
 0x7b8   :  { %16414 = vst [vmem:[#allocation156_spill] sm:$0xff] %v12914_v25  ;;  %v12948_v28 = vpop.f32.mrf.mxu0 }
 0x7b9   :  { %16415 = vst [vmem:[#allocation157_spill] sm:$0xff] %v12918_v51 }
 0x7ba   :  { %16422 = vst [vmem:[#allocation164_spill] sm:$0xff] %v12948_v28 }
 0x7bc   :  { %5389 = vrot.lane.b32.xlu1 %v5370_v0, %s8816_s14  ;;  %v12946_v0 = vpop.f32.mrf.mxu2 }
 0x7bd   :  { %5444 = vrot.lane.b32.xlu0 %v5426_v5, %s8820_s15  ;;  %5328 = vrot.lane.b32.xlu2 %v5311_v49, %s8813_s30  ;;  %16421 = vst [vmem:[#allocation163_spill] sm:$0xff] %v12946_v0  ;;  %v5429_v5 = vmul.f32 %v12234_v54, %v12827_v1  ;;  %v5371_v49 = vmul.f32 %v12176_v35, %v12796_v43  ;;  %v12959_v46 = vpop.f32.mrf.mxu3  ;;  %v12964_v1 = vpop.f32.mrf.mxu1 }
 0x7be   :  { %v12935_v25 = vpop.permute.xlu1 %5054 }
 0x7bf   :  { %16418 = vst [vmem:[#allocation160_spill] sm:$0xff] %v12935_v25  ;;  %v12937_v51 = vpop.permute.xlu0 %5105  ;;  %v12939_v39 = vpop.permute.xlu2 %5109  ;;  %v2365_v25 = vadd.f32 %v12529_v16, %v2298_v11  ;;  %v5367_v16 = vmul.f32 %v12176_v35, %v12853_v23 }
 0x7c0   :  { %16419 = vst [vmem:[#allocation161_spill] sm:$0xff] %v12937_v51  ;;  %v2232_v51 = vadd.f32 %v12504_v4, %v11995_v47  ;;  %v2364_v4 = vadd.f32 %v12558_v8, %v11905_v58 }
 0x7c1   :  { %16420 = vst [vmem:[#allocation162_spill] sm:$0xff] %v12939_v39  ;;  %v2432_v48 = vadd.f32 %v12544_v9, %v2365_v25 }
 0x7c2   :  { %v2300_v0 = vadd.f32 %v12518_v40, %v2232_v51  ;;  %v12986_v51 = vpop.f32.mrf.mxu0  ;;  %v2431_v8 = vadd.f32 %v12575_v41, %v2364_v4  ;;  %v3810_v41 = vld [vmem:[%s15578_s5 + $0x8] sm:$0xff] }
 0x7c4   :  { %3813 = vperm.xlu1 %8744, %v3809_v22   ;;  %v2367_v31 = vadd.f32 %v12554_v19, %v2300_v0  ;;  %v5477_v22 = vld [vmem:[%s15575_s2] sm:$0x3f]  ;;  %v12982_v40 = vpop.f32.mrf.mxu2  ;;  %v2500_v19 = vadd.f32 %v12583_v36, %v2432_v48  ;;  %v2499_v36 = vadd.f32 %v12613_v52, %v2431_v8  ;;  %v5368_v52 = vmul.f32 %v12176_v35, %v12776_v45  ;;  %s16701_s2 = smov 111  }
 0x7c5   :  { %5450 = vrot.lane.b32.xlu0 %v5429_v5, %s8820_s15  ;;  %5391 = vrot.lane.b32.xlu2 %v5371_v49, %s8816_s14  ;;  %v5148_v5 = vmul.f32 %v12120_v15, %v12101_v42  ;;  %v2209_v42 = vadd.f32 %v12533_v3, %v11865_v17  ;;  %v12999_v25 = vpop.f32.mrf.mxu3  ;;  %v5427_v17 = vmul.f32 %v12234_v54, %v12731_v53 }
 0x7c6   :  { %v12961_v39 = vpop.permute.xlu1 %5044  ;;  %v2434_v58 = vadd.f32 %v12571_v63, %v2367_v31  ;;  %v2568_v11 = vadd.f32 %v12596_v50, %v2500_v19  ;;  %v13004_v63 = vpop.f32.mrf.mxu1  ;;  %v2567_v50 = vadd.f32 %v12628_v37, %v2499_v36 }
 0x7c7   :  { %v12966_v28 = vpop.permute.xlu0 %5111  ;;  %v12969_v47 = vpop.permute.xlu2 %4887  ;;  %v2299_v3 = vadd.f32 %v12521_v38, %v2209_v42 }
 0x7c8   :  { %16423 = vst [vmem:[#allocation165_spill] sm:$0xff] %v12966_v28  ;;  %v2502_v9 = vadd.f32 %v12609_v6, %v2434_v58  ;;  %v2636_v6 = vadd.f32 %v12636_v61, %v2568_v11  ;;  %v2635_v38 = vadd.f32 %v12665_v18, %v2567_v50  ;;  %v16431_v50 = vld [vmem:[#allocation122_spill] sm:$0xff] }
 0x7c9   :  { %16424 = vst [vmem:[#allocation166_spill] sm:$0xff] %v12969_v47  ;;  %v2366_v4 = vadd.f32 %v12586_v55, %v2299_v3 }
 0x7ca   :  { %v2570_v31 = vadd.f32 %v12625_v59, %v2502_v9  ;;  %v13027_v59 = vpop.f32.mrf.mxu0  ;;  %v2703_v19 = vadd.f32 %v12682_v12, %v2635_v38 }
 0x7cb   :  { %v2433_v55 = vadd.f32 %v12600_v33, %v2366_v4 }
 0x7cc   :  { %5383 = vrot.lane.b32.xlu1 %v5367_v16, %s8816_s14  ;;  %v2638_v53 = vadd.f32 %v12661_v32, %v2570_v31  ;;  %v2704_v16 = vadd.f32 %v12651_v14, %v2636_v6  ;;  %v13036_v32 = vperm.slane %v12717_v57, 6  ;;  %v5424_v14 = vmul.f32 %v12234_v54, %v12853_v23  ;;  %v16429_v6 = vld [vmem:[#allocation115_spill] sm:$0xff]  ;;  %v16430_v31 = vld [vmem:[#allocation108_spill] sm:$0xff] }
 0x7cd   :  { %5480 = vperm.xlu0 %8745, %v5477_v22   ;;  %5170 = vrot.lane.b32.xlu2 %v5148_v5, %s16361_s21  ;;  %v13022_v22 = vpop.f32.mrf.mxu2  ;;  %v13040_v58 = vpop.f32.mrf.mxu3  ;;  %v2501_v8 = vadd.f32 %v12640_v7, %v2433_v55  ;;  %s16707_s21 = smov 68  }
 0x7ce   :  { %v12991_v0 = vpop.permute.xlu1 %5107  ;;  %v2772_v5 = vadd.f32 %v12688_v60, %v2704_v16  ;;  %v2706_v18 = vadd.f32 %v12678_v62, %v2638_v53  ;;  %v13045_v42 = vpop.f32.mrf.mxu1  ;;  %v5430_v33 = vmul.f32 %v12234_v54, %v13036_v32  ;;  %v5428_v60 = vmul.f32 %v12234_v54, %v12796_v43  ;;  %v16432_v53 = vld [vmem:[#allocation27_spill] sm:$0xff]  ;;  %v16433_v16 = vld [vmem:[#allocation18_spill] sm:$0xff] }
 0x7cf   :  { %v12995_v15 = vpop.permute.xlu0 %5101  ;;  %v13001_v49 = vpop.permute.xlu2 %5162  ;;  %v2771_v62 = vadd.f32 %v12726_v26, %v2703_v19  ;;  %v2569_v7 = vadd.f32 %v12655_v34, %v2501_v8 }
 0x7d0   :  { %v2774_v9 = vadd.f32 %v12721_v44, %v2706_v18  ;;  %v2840_v12 = vadd.f32 %v12703_v27, %v2772_v5  ;;  %v16428_v27 = vld [vmem:[#allocation40_spill] sm:$0xff]  ;;  %v16434_v18 = vld [vmem:[#allocation15_spill] sm:$0xff] }
 0x7d1   :  { %v2839_v26 = vadd.f32 %v12744_v10, %v2771_v62  ;;  %v5244_v62 = vperm.slane %v12717_v57, 7 }
 0x7d2   :  { %v2908_v36 = vadd.f32 %v12752_v56, %v2840_v12  ;;  %v2842_v44 = vadd.f32 %v12741_v13, %v2774_v9  ;;  %v13070_v3 = vpop.f32.mrf.mxu0  ;;  %v5259_v56 = vmul.f32 %v13036_v32, %v12140_v24  ;;  %v5425_v13 = vmul.f32 %v12234_v54, %v12776_v45  ;;  %v16438_v12 = vld [vmem:[#allocation138_spill] sm:$0xff] }
 0x7d3   :  { %v2907_v34 = vadd.f32 %v16430_v31, %v2839_v26  ;;  %v16441_v31 = vld [vmem:[#allocation131_spill] sm:$0xff]  ;;  %v5260_v57 = vmul.f32 %v5244_v62, %v12140_v24 }
 0x7d4   :  { %5446 = vrot.lane.b32.xlu1 %v5427_v17, %s8820_s15  ;;  %v2637_v17 = vadd.f32 %v16428_v27, %v2569_v7  ;;  %v2976_v4 = vadd.f32 %v16431_v50, %v2908_v36  ;;  %v16439_v36 = vld [vmem:[#allocation140_spill] sm:$0xff] }
 0x7d5   :  { %3818 = vperm.xlu0 %8745, %v3810_v41   ;;  %5385 = vrot.lane.b32.xlu2 %v5368_v52, %s8816_s14  ;;  %v13065_v43 = vpop.f32.mrf.mxu2  ;;  %v2910_v52 = vadd.f32 %v16429_v6, %v2842_v44  ;;  %v13079_v10 = vpop.f32.mrf.mxu3  ;;  %v16440_v27 = vld [vmem:[#allocation136_spill] sm:$0xff] }
 0x7d6   :  { %v13024_v61 = vpop.permute.xlu1 %4885  ;;  %v2705_v38 = vadd.f32 %v16432_v53, %v2637_v17  ;;  %v3044_v55 = vadd.f32 %v16433_v16, %v2976_v4  ;;  %v13084_v5 = vpop.f32.mrf.mxu1 }
 0x7d7   :  { %16425 = vst [vmem:[#allocation167_spill] sm:$0xff] %v13024_v61  ;;  %v13029_v37 = vpop.permute.xlu0 %5164  ;;  %v13031_v48 = vpop.permute.xlu2 %5168  ;;  %v2978_v19 = vadd.f32 %v16434_v18, %v2910_v52  ;;  %v5316_v52 = vmul.f32 %v12174_v30, %v13036_v32 }
 0x7d8   :  { %16426 = vst [vmem:[#allocation168_spill] sm:$0xff] %v13031_v48  ;;  %v3111_v17 = vadd.f32 %v16440_v27, %v3044_v55  ;;  %v16446_v55 = vld [vmem:[#allocation132_spill] sm:$0xff] }
 0x7d9   :  { %v3046_v7 = vadd.f32 %v16438_v12, %v2978_v19 }
 0x7da   :  { %v13106_v4 = vpop.f32.mrf.mxu0 }
 0x7db   :  { %16443 = vst [vmem:[#allocation115_spill] sm:$0xff] %v13106_v4 }
 0x7dc   :  { %5440 = vrot.lane.b32.xlu1 %v5424_v14, %s8820_s15  ;;  %v16435_v14 = vld [vmem:[#allocation11_spill] sm:$0xff] }
 0x7dd   :  { %5452 = vrot.lane.b32.xlu0 %v5430_v33, %s8820_s15  ;;  %5448 = vrot.lane.b32.xlu2 %v5428_v60, %s8820_s15  ;;  %v2975_v8 = vadd.f32 %v16435_v14, %v2907_v34  ;;  %v16436_v60 = vld [vmem:[#allocation66_spill] sm:$0xff]  ;;  %v13100_v6 = vpop.f32.mrf.mxu2 }
 0x7de   :  { %v13057_v23 = vpop.permute.xlu1 %5103  ;;  %v2773_v45 = vadd.f32 %v16436_v60, %v2705_v38  ;;  %v16445_v38 = vld [vmem:[#allocation144_spill] sm:$0xff]  ;;  %v13121_v12 = vpop.f32.mrf.mxu1 }
 0x7df   :  { %v13061_v11 = vpop.permute.xlu0 %5198  ;;  %v13067_v41 = vpop.permute.xlu2 %4944  ;;  %v3043_v44 = vadd.f32 %v16439_v36, %v2975_v8 }
 0x7e0   :  { %16427 = vst [vmem:[#allocation169_spill] sm:$0xff] %v13067_v41  ;;  %v2841_v34 = vadd.f32 %v16441_v31, %v2773_v45  ;;  %v13116_v8 = vpop.f32.mrf.mxu3  ;;  %v16448_v45 = vld [vmem:[#allocation150_spill] sm:$0xff]  ;;  %v5373_v31 = vmul.f32 %v12176_v35, %v13036_v32 }
 0x7e1   :  { %v3110_v16 = vadd.f32 %v16445_v38, %v3043_v44  ;;  %v16449_v44 = vld [vmem:[#allocation137_spill] sm:$0xff] }
 0x7e2   :  { %v2909_v18 = vadd.f32 %v16446_v55, %v2841_v34  ;;  %v16451_v34 = vld [vmem:[#allocation149_spill] sm:$0xff] }
 0x7e3   :  { %v3178_v14 = vadd.f32 %v12903_v20, %v3110_v16  ;;  %v13144_v16 = vpop.f32.mrf.mxu0 }
 0x7e4   :  { %5281 = vrot.lane.b32.xlu1 %v5259_v56, %s8812_s29  ;;  %v16442_v56 = vld [vmem:[#allocation147_spill] sm:$0xff]  ;;  %v2977_v27 = vadd.f32 %v16449_v44, %v2909_v18 }
 0x7e5   :  { %5442 = vrot.lane.b32.xlu2 %v5425_v13, %s8820_s15  ;;  %v3179_v50 = vadd.f32 %v16442_v56, %v3111_v17  ;;  %v16444_v13 = vld [vmem:[#allocation143_spill] sm:$0xff] }
 0x7e6   :  { %v13089_v33 = vpop.permute.xlu1 %5166  ;;  %v3113_v53 = vadd.f32 %v16444_v13, %v3046_v7  ;;  %v3045_v56 = vadd.f32 %v16451_v34, %v2977_v27  ;;  %v8411_v13 = vld [vmem:[%s15573_s0 + $0x1] ss:$2 sm:$0xff]  ;;  %v16455_v27 = vld [vmem:[#allocation159_spill] sm:$0xff] }
 0x7e7   :  { %v13092_v9 = vpop.permute.xlu0 %4999  ;;  %v13097_v26 = vpop.permute.xlu2 %5160  ;;  %v3247_v24 = vadd.f32 %v16448_v45, %v3179_v50  ;;  %v5317_v50 = vmul.f32 %v12174_v30, %v5244_v62  ;;  %v16453_v30 = vld [vmem:[#allocation152_spill] sm:$0xff]  ;;  %v4067_v55 = vperm.slane %v8411_v13, 1 }
 0x7e8   :  { %16437 = vst [vmem:[#allocation40_spill] sm:$0xff] %v13092_v9  ;;  %v3181_v19 = vadd.f32 %v12899_v21, %v3113_v53  ;;  %v16471_v9 = vld [vmem:[#allocation26_spill] sm:$0xff] }
 0x7e9   :  { %v3315_v17 = vadd.f32 %v12928_v29, %v3247_v24  ;;  %v13140_v29 = vpop.f32.mrf.mxu2 }
 0x7ea   :  { %v3249_v21 = vadd.f32 %v12916_v2, %v3181_v19  ;;  %v16452_v2 = vld [vmem:[#allocation163_spill] sm:$0xff] }
 0x7eb   :  { %v3383_v38 = vadd.f32 %v16452_v2, %v3315_v17 }
 0x7ec   :  { %5338 = vrot.lane.b32.xlu1 %v5316_v52, %s8813_s30  ;;  %v16450_v52 = vld [vmem:[#allocation158_spill] sm:$0xff] }
 0x7ed   :  { %5283 = vrot.lane.b32.xlu2 %v5260_v57, %s8812_s29  ;;  %v3246_v20 = vadd.f32 %v16450_v52, %v3178_v14  ;;  %v3317_v57 = vadd.f32 %v12959_v46, %v3249_v21  ;;  %v3112_v46 = vadd.f32 %v16453_v30, %v3045_v56  ;;  %v3451_v18 = vadd.f32 %v12999_v25, %v3383_v38 }
 0x7ee   :  { %v13118_v60 = vpop.permute.xlu1 %4942  ;;  %v4068_v14 = vperm.slane %v8411_v13, 2  ;;  %v4069_v21 = vperm.slane %v8411_v13, 3  ;;  %v4066_v52 = vperm.slane %v8411_v13, 0  ;;  %v5431_v56 = vmul.f32 %v12234_v54, %v5244_v62 }
 0x7ef   :  { %16447 = vst [vmem:[#allocation108_spill] sm:$0xff] %v13118_v60  ;;  %v13123_v7 = vpop.permute.xlu0 %5275  ;;  %v13125_v36 = vpop.permute.xlu2 %5273  ;;  %v3314_v53 = vadd.f32 %v12964_v1, %v3246_v20  ;;  %v4070_v1 = vperm.slane %v8411_v13, 4  ;;  %v3385_v45 = vadd.f32 %v12982_v40, %v3317_v57  ;;  %v3180_v17 = vadd.f32 %v16455_v27, %v3112_v46  ;;  %v16457_v57 = vld [vmem:[#allocation22_spill] sm:$0xff]  ;;  %v16458_v46 = vld [vmem:[#allocation164_spill] sm:$0xff]  ;;  %v16543_v60 = vld [vmem:[#allocation99_spill] sm:$0xff] }
 0x7f0   :  { %v3731_v20 = vpop.f32.mrf.mxu3  ;;  %v4071_v40 = vperm.slane %v8411_v13, 5  ;;  %v4082_v38 = vmul.f32 %v4068_v14, %v16457_v57  ;;  %v4072_v30 = vperm.slane %v8411_v13, 6  ;;  %v4080_v54 = vmul.f32 %v4066_v52, %v16457_v57  ;;  %v16463_v27 = vld [vmem:[#allocation12_spill] sm:$0xff] }
 0x7f1   :  { %v3382_v24 = vadd.f32 %v12986_v51, %v3314_v53  ;;  %v3453_v34 = vadd.f32 %v13040_v58, %v3385_v45  ;;  %v5374_v51 = vmul.f32 %v12176_v35, %v5244_v62  ;;  %v4081_v53 = vmul.f32 %v4067_v55, %v16457_v57  ;;  %v16459_v35 = vld [vmem:[#allocation50_spill] sm:$0xff]  ;;  %v16460_v62 = vld [vmem:[#allocation20_spill] sm:$0xff] }
 0x7f2   :  { %v4084_v2 = vmul.f32 %v4070_v1, %v16457_v57  ;;  %v4083_v58 = vmul.f32 %v4069_v21, %v16457_v57  ;;  %v4149_v55 = vsel %vm135_vm0, %v16460_v62, %v16459_v35  ;;  %v3799_v1 = vpop.f32.mrf.mxu2 }
 0x7f3   :  { %v3450_v25 = vadd.f32 %v13045_v42, %v3382_v24  ;;  %v3248_v42 = vadd.f32 %v16458_v46, %v3180_v17  ;;  %v3521_v14 = vadd.f32 %v13065_v43, %v3453_v34  ;;  %v16464_v17 = vld [vmem:[#allocation31_spill] sm:$0xff] }
 0x7f4   :  { %5395 = vrot.lane.b32.xlu1 %v5373_v31, %s8816_s14  ;;  %v13158_v31 = vpop.f32.mrf.mxu1 }
 0x7f5   :  { %5340 = vrot.lane.b32.xlu2 %v5317_v50, %s8813_s30  ;;  %16456 = vst [vmem:[#allocation27_spill] sm:$0xff] %v13158_v31  ;;  %v3519_v50 = vadd.f32 %v13022_v22, %v3451_v18  ;;  %v16461_v18 = vld [vmem:[#allocation14_spill] sm:$0xff]  ;;  %v3518_v45 = vadd.f32 %v13070_v3, %v3450_v25  ;;  %v3316_v52 = vadd.f32 %v13004_v63, %v3248_v42  ;;  %v16466_v3 = vld [vmem:[#allocation33_spill] sm:$0xff] }
 0x7f6   :  { %v13147_v32 = vpop.permute.xlu1 %5158  ;;  %v4150_v13 = vsel %vm135_vm0, %v16459_v35, %v16461_v18  ;;  %v4151_v21 = vsel %vm135_vm0, %v16461_v18, %v16464_v17  ;;  %v4148_v34 = vsel %vm135_vm0, %v16466_v3, %v16460_v62  ;;  %v16467_v25 = vld [vmem:[#allocation41_spill] sm:$0xff]  ;;  %v3604_v35 = vadd.f32 %v13116_v8, %v3521_v14  ;;  %v16470_v62 = vld [vmem:[#allocation23_spill] sm:$0xff] }
 0x7f7   :  { %v13151_v19 = vpop.permute.xlu0 %5056  ;;  %v13155_v44 = vpop.permute.xlu2 %5279  ;;  %v3602_v22 = vadd.f32 %v13079_v10, %v3519_v50  ;;  %v4152_v10 = vsel %vm135_vm0, %v16464_v17, %v16463_v27  ;;  %v13194_v50 = vmul.f32 %v4071_v40, %v16457_v57  ;;  %v3601_v18 = vadd.f32 %v13121_v12, %v3518_v45 }
 0x7f8   :  { %16454 = vst [vmem:[#allocation122_spill] sm:$0xff] %v13151_v19  ;;  %v4163_v42 = vadd.f32 %v4149_v55, %v4081_v53  ;;  %v4164_v17 = vadd.f32 %v4150_v13, %v4082_v38  ;;  %v4166_v19 = vadd.f32 %v4152_v10, %v4084_v2  ;;  %v4165_v41 = vadd.f32 %v4151_v21, %v4083_v58  ;;  %v3734_v55 = vpop.f32.mrf.mxu3  ;;  %v16473_v2 = vld [vmem:[#allocation34_spill] sm:$0xff]  ;;  %v16476_v10 = vld [vmem:[#allocation25_spill] sm:$0xff] }
 0x7f9   :  { %v3670_v40 = vadd.f32 %v13100_v6, %v3602_v22  ;;  %v4208_v3 = vsel %vm193_vm1, %v16467_v25, %v16470_v62  ;;  %v4162_v12 = vadd.f32 %v4148_v34, %v4080_v54  ;;  %v3384_v53 = vadd.f32 %v13027_v59, %v3316_v52  ;;  %v16472_v22 = vld [vmem:[#allocation39_spill] sm:$0xff] }
 0x7fa   :  { %v3672_v58 = vadd.f32 %v13140_v29, %v3604_v35  ;;  %v3669_v13 = vadd.f32 %v13144_v16, %v3601_v18  ;;  %v4222_v45 = vadd.f32 %v4208_v3, %v4165_v41  ;;  %v16478_v34 = vld [vmem:[#allocation71_spill] sm:$0xff]  ;;  %v3802_v35 = vpop.f32.mrf.mxu2  ;;  %v16482_v18 = vld [vmem:[#allocation44_spill] sm:$0xff] }
 0x7fb   :  { %v3738_v38 = vadd.f32 %v3731_v20, %v3670_v40  ;;  %v13228_v54 = vadd.f32 %v13084_v5, %v3384_v53  ;;  %v16475_v20 = vld [vmem:[#allocation48_spill] sm:$0xff]  ;;  %v16487_v53 = vld [vmem:[#allocation10_spill] sm:$0xff] }
 0x7fc   :  { %5454 = vrot.lane.b32.xlu1 %v5431_v56, %s8820_s15  ;;  %v13191_v56 = vpop.f32.mrf.mxu0  ;;  %v3708_v6 = vpop.f32.mrf.mxu1  ;;  %v4264_v21 = vsel %vm16477_vm9, %v16476_v10, %v16475_v20  ;;  %v3740_v52 = vadd.f32 %v3734_v55, %v3672_v58  ;;  %vm16484_vm9 = vmmov %vm16481_vm2 }
 0x7fd   :  { %5397 = vrot.lane.b32.xlu2 %v5374_v51, %s8816_s14  ;;  %16465 = vst [vmem:[#allocation15_spill] sm:$0xff] %v13191_v56  ;;  %v16468_v51 = vld [vmem:[#allocation43_spill] sm:$0xff]  ;;  %v3737_v29 = vadd.f32 %v3708_v6, %v3669_v13  ;;  %v13241_v5 = vadd.f32 %v3799_v1, %v3738_v38 }
 0x7fe   :  { %v13182_v24 = vpop.permute.xlu1 %5001  ;;  %v4207_v46 = vsel %vm193_vm1, %v16468_v51, %v16467_v25  ;;  %v4206_v8 = vsel %vm193_vm1, %v16471_v9, %v16468_v51  ;;  %16474 = vst [vmem:[#allocation66_spill] sm:$0xff] %v13228_v54  ;;  %v4265_v25 = vsel %vm16479_vm10, %v16475_v20, %v16478_v34  ;;  %v16480_v51 = vld [vmem:[#allocation13_spill] sm:$0xff]  ;;  %vm16485_vm10 = vmmov %vm16481_vm2  ;;  %v13262_v13 = vadd.f32 %v3802_v35, %v3740_v52  ;;  %v16564_v54 = vld [vmem:[#allocation100_spill] sm:$0xff] }
 0x7ff   :  { %16462 = vst [vmem:[#allocation18_spill] sm:$0xff] %v13182_v24  ;;  %v13196_v43 = vpop.permute.xlu0 %5271  ;;  %v13206_v63 = vpop.permute.xlu2 %5269  ;;  %v13210_v24 = vmul.f32 %v4072_v30, %v16457_v57  ;;  %v4221_v14 = vadd.f32 %v4207_v46, %v4164_v17  ;;  %v4209_v57 = vsel %vm193_vm1, %v16470_v62, %v16472_v22  ;;  %v4205_v30 = vsel %vm193_vm1, %v16473_v2, %v16471_v9  ;;  %v16500_v52 = vld [vmem:[#allocation37_spill] sm:$0xff] }
 0x800   :  { %16469 = vst [vmem:[#allocation11_spill] sm:$0xff] %v13206_v63  ;;  %v4220_v59 = vadd.f32 %v4206_v8, %v4163_v42  ;;  %v4266_v9 = vsel %vm16481_vm2, %v16478_v34, %v16480_v51  ;;  %v4223_v41 = vadd.f32 %v4209_v57, %v4166_v19  ;;  %v4219_v46 = vadd.f32 %v4205_v30, %v4162_v12  ;;  %v16483_v42 = vld [vmem:[#allocation16_spill] sm:$0xff]  ;;  %v16486_v8 = vld [vmem:[#allocation21_spill] sm:$0xff]  ;;  %v16491_v30 = vld [vmem:[#allocation38_spill] sm:$0xff] }
 0x801   :  { %v4262_v17 = vsel %vm16484_vm9, %v16483_v42, %v16482_v18  ;;  %v4278_v62 = vadd.f32 %v4264_v21, %v4221_v14  ;;  %v4263_v3 = vsel %vm16485_vm10, %v16482_v18, %v16476_v10  ;;  %vm16488_vm2 = vcmask 1014784   ;;  %v16489_v19 = vld [vmem:[#allocation29_spill] sm:$0xff]  ;;  %v16492_v14 = vld [vmem:[#allocation32_spill] sm:$0xff]  ;;  %16494 = vst [vmem:[#allocation138_spill] sm:$0xff] %v13262_v13  ;;  %v16495_v21 = vld [vmem:[#allocation62_spill] sm:$0xff] }
 0x802   :  { %v4322_v55 = vsel %vm16488_vm2, %v16487_v53, %v16486_v8  ;;  %vm16490_vm3 = vmmov %vm16488_vm2  ;;  %v4277_v6 = vadd.f32 %v4263_v3, %v4220_v59  ;;  %v4279_v57 = vadd.f32 %v4265_v25, %v4222_v45  ;;  %v4280_v2 = vadd.f32 %v4266_v9, %v4223_v41  ;;  %v16498_v59 = vld [vmem:[#allocation30_spill] sm:$0xff]  ;;  %v16499_v25 = vld [vmem:[#allocation52_spill] sm:$0xff] }
 0x803   :  { %v4321_v1 = vsel %vm16490_vm3, %v16489_v19, %v16487_v53  ;;  %vm16493_vm9 = vmmov %vm16488_vm2  ;;  %v4276_v10 = vadd.f32 %v4262_v17, %v4219_v46  ;;  %v4379_v9 = vsel %vm367_vm4, %v16499_v25, %v16498_v59  ;;  %v16501_v46 = vld [vmem:[#allocation64_spill] sm:$0xff]  ;;  %v16502_v17 = vld [vmem:[#allocation42_spill] sm:$0xff] }
 0x804   :  { %v3776_v38 = vpop.f32.mrf.mxu0  ;;  %v4319_v58 = vsel %vm16493_vm9, %v16492_v14, %v16491_v30  ;;  %vm16496_vm10 = vmmov %vm16488_vm2  ;;  %v4336_v18 = vadd.f32 %v4322_v55, %v4279_v57  ;;  %v4335_v42 = vadd.f32 %v4321_v1, %v4278_v62  ;;  %v4378_v35 = vsel %vm367_vm4, %v16501_v46, %v16499_v25  ;;  %v16504_v55 = vld [vmem:[#allocation55_spill] sm:$0xff]  ;;  %v16505_v1 = vld [vmem:[#allocation94_spill] sm:$0xff] }
 0x805   :  { %v13264_v20 = vadd.f32 %v3776_v38, %v3737_v29  ;;  %v4323_v34 = vsel %vm16496_vm10, %v16486_v8, %v16495_v21  ;;  %vm16497_vm3 = vmmov %vm16488_vm2  ;;  %v4333_v41 = vadd.f32 %v4319_v58, %v4276_v10  ;;  %v4153_v29 = vsel %vm135_vm0, %v16463_v27, %v16500_v52  ;;  %v16503_v8 = vld [vmem:[#allocation56_spill] sm:$0xff]  ;;  %v16507_v14 = vld [vmem:[#allocation65_spill] sm:$0xff] }
 0x806   :  { %v13239_v16 = vpop.permute.xlu1 %5277  ;;  %v4320_v45 = vsel %vm16497_vm3, %v16491_v30, %v16489_v19  ;;  %v4380_v62 = vsel %vm367_vm4, %v16498_v59, %v16502_v17  ;;  %v4337_v3 = vadd.f32 %v4323_v34, %v4280_v2  ;;  %v4154_v53 = vsel %vm135_vm0, %v16500_v52, %v16503_v8  ;;  %v16506_v30 = vld [vmem:[#allocation54_spill] sm:$0xff]  ;;  %v16508_v10 = vld [vmem:[#allocation60_spill] sm:$0xff]  ;;  %v16509_v2 = vld [vmem:[#allocation69_spill] sm:$0xff] }
 0x807   :  { %v13246_v40 = vpop.permute.xlu0 %5334  ;;  %v13257_v12 = vpop.permute.xlu2 %5332  ;;  %v4377_v19 = vsel %vm367_vm4, %v16504_v55, %v16501_v46  ;;  %v4376_v27 = vsel %vm367_vm4, %v16505_v1, %v16504_v55  ;;  %v4334_v38 = vadd.f32 %v4320_v45, %v4277_v6  ;;  %v4393_v57 = vadd.f32 %v4379_v9, %v4336_v18  ;;  %v16512_v55 = vld [vmem:[#allocation85_spill] sm:$0xff]  ;;  %vm16530_vm10 = vmmov %vm16497_vm3 }
 0x808   :  { %v4437_v58 = vsel %vm425_vm5, %v16507_v14, %v16506_v30  ;;  %v4435_v34 = vsel %vm425_vm5, %v16509_v2, %v16508_v10  ;;  %v4167_v25 = vadd.f32 %v4153_v29, %v13194_v50  ;;  %v4392_v52 = vadd.f32 %v4378_v35, %v4335_v42  ;;  %v16514_v42 = vld [vmem:[#allocation51_spill] sm:$0xff]  ;;  %v16515_v35 = vld [vmem:[#allocation82_spill] sm:$0xff] }
 0x809   :  { %v4394_v46 = vadd.f32 %v4380_v62, %v4337_v3  ;;  %v4436_v8 = vsel %vm425_vm5, %v16508_v10, %v16507_v14  ;;  %v4168_v18 = vadd.f32 %v4154_v53, %v13210_v24  ;;  %v4391_v45 = vadd.f32 %v4377_v19, %v4334_v38  ;;  %v16516_v62 = vld [vmem:[#allocation57_spill] sm:$0xff]  ;;  %v16518_v53 = vld [vmem:[#allocation74_spill] sm:$0xff]  ;;  %v16519_v19 = vld [vmem:[#allocation67_spill] sm:$0xff] }
 0x80a   :  { %v4390_v9 = vadd.f32 %v4376_v27, %v4333_v41  ;;  %v4210_v1 = vsel %vm193_vm1, %v16472_v22, %v16512_v55  ;;  %v4449_v50 = vadd.f32 %v4435_v34, %v4392_v52  ;;  %v4211_v29 = vsel %vm193_vm1, %v16512_v55, %v16514_v42  ;;  %v16517_v24 = vld [vmem:[#allocation49_spill] sm:$0xff]  ;;  %v16523_v52 = vld [vmem:[#allocation58_spill] sm:$0xff] }
 0x80b   :  { %v4433_v3 = vsel %vm425_vm5, %v16516_v62, %v16515_v35  ;;  %v4450_v14 = vadd.f32 %v4436_v8, %v4393_v57  ;;  %v4492_v41 = vsel %vm483_vm6, %v16518_v53, %v16517_v24  ;;  %v4434_v22 = vsel %vm425_vm5, %v16515_v35, %v16509_v2  ;;  %v16522_v34 = vld [vmem:[#allocation53_spill] sm:$0xff] }
 0x80c   :  { %vm16520_vm2 = vcmask 1022976   ;;  %v4224_v38 = vadd.f32 %v4210_v1, %v4167_v25  ;;  %v4225_v55 = vadd.f32 %v4211_v29, %v4168_v18  ;;  %v4447_v42 = vadd.f32 %v4433_v3, %v4390_v9  ;;  %v16529_v18 = vld [vmem:[#allocation83_spill] sm:$0xff] }
 0x80d   :  { %v4267_v27 = vsel %vm16520_vm2, %v16480_v51, %v16519_v19  ;;  %v4491_v2 = vsel %vm483_vm6, %v16523_v52, %v16518_v53  ;;  %v16525_v51 = vld [vmem:[#allocation76_spill] sm:$0xff]  ;;  %vm16526_vm9 = vmmov %vm16520_vm2  ;;  %v4506_v1 = vadd.f32 %v4492_v41, %v4449_v50  ;;  %v4448_v35 = vadd.f32 %v4434_v22, %v4391_v45  ;;  %v16532_v50 = vld [vmem:[#allocation98_spill] sm:$0xff] }
 0x80e   :  { %v13299_v59 = vpop.permute.xlu1 %5058  ;;  %v4268_v25 = vsel %vm16526_vm9, %v16519_v19, %v16525_v51  ;;  %v4281_v62 = vadd.f32 %v4267_v27, %v4224_v38  ;;  %v4324_v9 = vsel %vm16530_vm10, %v16495_v21, %v16529_v18  ;;  %v16531_v19 = vld [vmem:[#allocation63_spill] sm:$0xff]  ;;  %v16534_v21 = vld [vmem:[#allocation80_spill] sm:$0xff]  ;;  %vm16544_vm2 = vcmask 523264  }
 0x80f   :  { %16510 = vst [vmem:[#allocation140_spill] sm:$0xff] %v13299_v59  ;;  %v13305_v6 = vpop.permute.xlu0 %5115  ;;  %v13311_v47 = vpop.permute.xlu2 %5113  ;;  %v4451_v59 = vadd.f32 %v4437_v58, %v4394_v46  ;;  %v16521_v58 = vld [vmem:[#allocation77_spill] sm:$0xff]  ;;  %v16524_v46 = vld [vmem:[#allocation79_spill] sm:$0xff]  ;;  %v4505_v3 = vadd.f32 %v4491_v2, %v4448_v35  ;;  %v4282_v53 = vadd.f32 %v4268_v25, %v4225_v55  ;;  %v4548_v38 = vsel %vm541_vm7, %v16534_v21, %v16531_v19  ;;  %v16537_v55 = vld [vmem:[#allocation88_spill] sm:$0xff] }
 0x810   :  { %16511 = vst [vmem:[#allocation136_spill] sm:$0xff] %v13305_v6  ;;  %v4493_v10 = vsel %vm483_vm6, %v16517_v24, %v16521_v58  ;;  %v4494_v57 = vsel %vm483_vm6, %v16521_v58, %v16522_v34  ;;  %v4490_v8 = vsel %vm483_vm6, %v16524_v46, %v16523_v52  ;;  %v16527_v24 = vld [vmem:[#allocation72_spill] sm:$0xff]  ;;  %v16528_v6 = vld [vmem:[#allocation87_spill] sm:$0xff]  ;;  %v4338_v52 = vadd.f32 %v4324_v9, %v4281_v62  ;;  %v16539_v2 = vld [vmem:[#allocation109_spill] sm:$0xff] }
 0x811   :  { %16513 = vst [vmem:[#allocation131_spill] sm:$0xff] %v13311_v47  ;;  %v4550_v58 = vsel %vm541_vm7, %v16528_v6, %v16527_v24  ;;  %v4507_v47 = vadd.f32 %v4493_v10, %v4450_v14  ;;  %v4508_v56 = vadd.f32 %v4494_v57, %v4451_v59  ;;  %v4504_v46 = vadd.f32 %v4490_v8, %v4447_v42  ;;  %v16533_v14 = vld [vmem:[#allocation92_spill] sm:$0xff]  ;;  %v16535_v10 = vld [vmem:[#allocation70_spill] sm:$0xff]  ;;  %v16536_v8 = vld [vmem:[#allocation75_spill] sm:$0xff] }
 0x812   :  { %v4549_v45 = vsel %vm541_vm7, %v16531_v19, %v16528_v6  ;;  %v4551_v41 = vsel %vm541_vm7, %v16527_v24, %v16532_v50  ;;  %v4325_v27 = vsel %vm16497_vm3, %v16529_v18, %v16533_v14  ;;  %v4547_v57 = vsel %vm541_vm7, %v16535_v10, %v16534_v21  ;;  %v16541_v19 = vld [vmem:[#allocation106_spill] sm:$0xff]  ;;  %v16542_v10 = vld [vmem:[#allocation24_spill] sm:$0xff]  ;;  %vm16552_vm10 = vmmov %vm16544_vm2 }
 0x813   :  { %v4564_v59 = vadd.f32 %v4550_v58, %v4507_v47  ;;  %v4608_v42 = vsel %vm599_vm8, %v16537_v55, %v16536_v8  ;;  %v16538_v47 = vld [vmem:[#allocation90_spill] sm:$0xff]  ;;  %v4563_v35 = vadd.f32 %v4549_v45, %v4506_v1  ;;  %v4565_v24 = vadd.f32 %v4551_v41, %v4508_v56  ;;  %v16540_v58 = vld [vmem:[#allocation73_spill] sm:$0xff]  ;;  %vm16554_vm3 = vmmov %vm16544_vm2 }
 0x814   :  { %v4606_v51 = vsel %vm599_vm8, %v16539_v2, %v16538_v47  ;;  %v4607_v25 = vsel %vm599_vm8, %v16538_v47, %v16537_v55  ;;  %v4381_v18 = vsel %vm367_vm4, %v16502_v17, %v16540_v58  ;;  %v4382_v62 = vsel %vm367_vm4, %v16540_v58, %v16541_v19  ;;  %v16545_v1 = vld [vmem:[#allocation81_spill] sm:$0xff]  ;;  %v16546_v56 = vld [vmem:[#allocation102_spill] sm:$0xff]  ;;  %v16558_v19 = vld [vmem:[#allocation104_spill] sm:$0xff] }
 0x815   :  { %v4339_v9 = vadd.f32 %v4325_v27, %v4282_v53  ;;  %v4562_v14 = vadd.f32 %v4548_v38, %v4505_v3  ;;  %v4561_v21 = vadd.f32 %v4547_v57, %v4504_v46  ;;  %v4665_v61 = vsel %vm16544_vm2, %v16543_v60, %v16542_v10  ;;  %v16547_v53 = vld [vmem:[#allocation130_spill] sm:$0xff]  ;;  %v16548_v3 = vld [vmem:[#allocation120_spill] sm:$0xff]  ;;  %v16551_v38 = vld [vmem:[#allocation101_spill] sm:$0xff] }
 0x816   :  { %v13349_v29 = vpop.permute.xlu1 %5330  ;;  %v4622_v31 = vadd.f32 %v4608_v42, %v4565_v24  ;;  %v4620_v4 = vadd.f32 %v4606_v51, %v4563_v35  ;;  %v4621_v55 = vadd.f32 %v4607_v25, %v4564_v59  ;;  %v4604_v45 = vsel %vm599_vm8, %v16546_v56, %v16545_v1  ;;  %v16550_v27 = vld [vmem:[#allocation36_spill] sm:$0xff]  ;;  %v16553_v42 = vld [vmem:[#allocation111_spill] sm:$0xff]  ;;  %v16556_v24 = vld [vmem:[#allocation86_spill] sm:$0xff] }
 0x817   :  { %v13357_v22 = vpop.permute.xlu0 %5387  ;;  %v13368_v6 = vpop.permute.xlu2 %5328  ;;  %v4395_v41 = vadd.f32 %v4381_v18, %v4338_v52  ;;  %v4396_v17 = vadd.f32 %v4382_v62, %v4339_v9  ;;  %v4605_v47 = vsel %vm599_vm8, %v16545_v1, %v16539_v2  ;;  %vm16549_vm9 = vcmask 515072   ;;  %v16555_v35 = vld [vmem:[#allocation95_spill] sm:$0xff]  ;;  %v16559_v62 = vld [vmem:[#allocation121_spill] sm:$0xff] }
 0x818   :  { %v4722_v46 = vsel %vm16549_vm9, %v16548_v3, %v16547_v53  ;;  %v4663_v57 = vsel %vm16552_vm10, %v16551_v38, %v16550_v27  ;;  %v4438_v59 = vsel %vm425_vm5, %v16506_v30, %v16553_v42  ;;  %v4664_v52 = vsel %vm16554_vm3, %v16550_v27, %v16543_v60  ;;  %vm16557_vm9 = vmmov %vm16544_vm2  ;;  %v16560_v60 = vld [vmem:[#allocation103_spill] sm:$0xff]  ;;  %v16565_v53 = vld [vmem:[#allocation116_spill] sm:$0xff] }
 0x819   :  { %v4679_v51 = vadd.f32 %v4665_v61, %v4622_v31  ;;  %v4618_v2 = vadd.f32 %v4604_v45, %v4561_v21  ;;  %v4661_v58 = vsel %vm16544_vm2, %v16556_v24, %v16555_v35  ;;  %v4662_v18 = vsel %vm16557_vm9, %v16555_v35, %v16551_v38  ;;  %v16561_v31 = vld [vmem:[#allocation107_spill] sm:$0xff]  ;;  %v16563_v24 = vld [vmem:[#allocation96_spill] sm:$0xff] }
 0x81a   :  { %v4779_v30 = vsel %vm773_vm11, %v16559_v62, %v16558_v19  ;;  %v4619_v1 = vadd.f32 %v4605_v47, %v4562_v14  ;;  %v4439_v61 = vsel %vm425_vm5, %v16553_v42, %v16560_v60  ;;  %vm16562_vm10 = vcmask 515072  }
 0x81b   :  { %v4721_v21 = vsel %vm16562_vm10, %v16561_v31, %v16548_v3  ;;  %v4736_v56 = vadd.f32 %v4722_v46, %v4679_v51  ;;  %v4677_v27 = vadd.f32 %v4663_v57, %v4620_v4  ;;  %v13427_v38 = vadd.f32 %v4438_v59, %v4395_v41  ;;  %vm16566_vm3 = vmmov %vm16562_vm10  ;;  %v16568_v46 = vld [vmem:[#allocation78_spill] sm:$0xff]  ;;  %v16570_v41 = vld [vmem:[#allocation127_spill] sm:$0xff] }
 0x81c   :  { %v4678_v35 = vadd.f32 %v4664_v52, %v4621_v55  ;;  %v4836_v19 = vsel %vm831_vm12, %v16564_v54, %v16563_v24  ;;  %v4675_v14 = vadd.f32 %v4661_v58, %v4618_v2  ;;  %v4676_v47 = vadd.f32 %v4662_v18, %v4619_v1  ;;  %vm16569_vm2 = vmmov %vm16566_vm3  ;;  %v16571_v55 = vld [vmem:[#allocation45_spill] sm:$0xff]  ;;  %v16573_v59 = vld [vmem:[#allocation128_spill] sm:$0xff] }
 0x81d   :  { %v4720_v42 = vsel %vm16566_vm3, %v16565_v53, %v16561_v31  ;;  %v4793_v60 = vadd.f32 %v4779_v30, %v4736_v56  ;;  %v13435_v13 = vadd.f32 %v4439_v61, %v4396_v17  ;;  %v4719_v4 = vsel %vm16569_vm2, %v16568_v46, %v16565_v53  ;;  %v16574_v51 = vld [vmem:[#allocation97_spill] sm:$0xff]  ;;  %vm16575_vm10 = vmmov %vm16569_vm2  ;;  %v16577_v58 = vld [vmem:[#allocation114_spill] sm:$0xff] }
 0x81e   :  { %v13406_v25 = vpop.permute.xlu1 %5336  ;;  %v4735_v3 = vadd.f32 %v4721_v21, %v4678_v35  ;;  %vm16572_vm9 = vcmask 490496   ;;  %v13446_v52 = vsel %vm483_vm6, %v16522_v34, %v16573_v59  ;;  %v4718_v2 = vsel %vm16575_vm10, %v16574_v51, %v16568_v46  ;;  %v16576_v17 = vld [vmem:[#allocation117_spill] sm:$0xff]  ;;  %v16578_v61 = vld [vmem:[#allocation110_spill] sm:$0xff]  ;;  %v16579_v34 = vld [vmem:[#allocation84_spill] sm:$0xff] }
 0x81f   :  { %v13417_v9 = vpop.permute.xlu0 %5393  ;;  %v13425_v45 = vpop.permute.xlu2 %5391  ;;  %16567 = vst [vmem:[#allocation147_spill] sm:$0xff] %v13435_v13  ;;  %v4893_v57 = vsel %vm16572_vm9, %v16571_v55, %v16570_v41  ;;  %v4777_v18 = vsel %vm773_vm11, %v16577_v58, %v16576_v17  ;;  %v4850_v30 = vadd.f32 %v4836_v19, %v4793_v60  ;;  %v4734_v1 = vadd.f32 %v4720_v42, %v4677_v27  ;;  %v16580_v21 = vld [vmem:[#allocation61_spill] sm:$0xff]  ;;  %v16581_v46 = vld [vmem:[#allocation123_spill] sm:$0xff]  ;;  %vm16593_vm2 = vmmov %vm16572_vm9 }
 0x820   :  { %v4778_v53 = vsel %vm773_vm11, %v16576_v17, %v16559_v62  ;;  %v4776_v31 = vsel %vm773_vm11, %v16578_v61, %v16577_v58  ;;  %v4950_v56 = vsel %vm947_vm14, %v16580_v21, %v16579_v34  ;;  %v4733_v35 = vadd.f32 %v4719_v4, %v4676_v47  ;;  %v16582_v51 = vld [vmem:[#allocation129_spill] sm:$0xff]  ;;  %v16583_v19 = vld [vmem:[#allocation47_spill] sm:$0xff]  ;;  %vm16599_vm10 = vmmov %vm16593_vm2 }
 0x821   :  { %v4834_v41 = vsel %vm831_vm12, %v16582_v51, %v16581_v46  ;;  %v4775_v27 = vsel %vm773_vm11, %v16583_v19, %v16578_v61  ;;  %v4907_v42 = vadd.f32 %v4893_v57, %v4850_v30  ;;  %v4732_v62 = vadd.f32 %v4718_v2, %v4675_v14  ;;  %v16585_v58 = vld [vmem:[#allocation125_spill] sm:$0xff]  ;;  %v16586_v13 = vld [vmem:[#allocation135_spill] sm:$0xff]  ;;  %v16594_v19 = vld [vmem:[#allocation160_spill] sm:$0xff] }
 0x822   :  { %v4791_v17 = vadd.f32 %v4777_v18, %v4734_v1  ;;  %v4833_v24 = vsel %vm831_vm12, %v16585_v58, %v16582_v51  ;;  %v16587_v34 = vld [vmem:[#allocation145_spill] sm:$0xff]  ;;  %vm16588_vm3 = vcmask 252928   ;;  %v4792_v63 = vadd.f32 %v4778_v53, %v4735_v3  ;;  %v16591_v18 = vld [vmem:[#allocation68_spill] sm:$0xff]  ;;  %v16592_v1 = vld [vmem:[#allocation126_spill] sm:$0xff] }
 0x823   :  { %v5007_v47 = vsel %vm16588_vm3, %v16587_v34, %v16586_v13  ;;  %v4790_v10 = vadd.f32 %v4776_v31, %v4733_v35  ;;  %v4835_v57 = vsel %vm831_vm12, %v16581_v46, %v16564_v54  ;;  %v4964_v30 = vadd.f32 %v4950_v56, %v4907_v42  ;;  %v16597_v3 = vld [vmem:[#allocation17_spill] sm:$0xff]  ;;  %v16598_v54 = vld [vmem:[#allocation124_spill] sm:$0xff]  ;;  %vm16600_vm3 = vmmov %vm16593_vm2 }
 0x824   :  { %v4848_v14 = vadd.f32 %v4834_v41, %v4791_v17  ;;  %v4789_v2 = vadd.f32 %v4775_v27, %v4732_v62  ;;  %v4890_v51 = vsel %vm16593_vm2, %v16592_v1, %v16591_v18  ;;  %vm16596_vm9 = vcmask 244736   ;;  %v16601_v27 = vld [vmem:[#allocation118_spill] sm:$0xff]  ;;  %v16602_v42 = vld [vmem:[#allocation139_spill] sm:$0xff] }
 0x825   :  { %v4832_v53 = vsel %vm831_vm12, %v16597_v3, %v16585_v58  ;;  %v4847_v31 = vadd.f32 %v4833_v24, %v4790_v10  ;;  %v4892_v56 = vsel %vm16599_vm10, %v16598_v54, %v16571_v55  ;;  %v5021_v35 = vadd.f32 %v5007_v47, %v4964_v30  ;;  %v16603_v17 = vld [vmem:[#allocation162_spill] sm:$0xff] }
 0x826   :  { %v13469_v60 = vpop.permute.xlu1 %5326  ;;  %v4849_v41 = vadd.f32 %v4835_v57, %v4792_v63  ;;  %v4891_v46 = vsel %vm16600_vm3, %v16591_v18, %v16598_v54  ;;  %v4947_v62 = vsel %vm947_vm14, %v16602_v42, %v16601_v27  ;;  %v13508_v10 = vld [vmem:[%s15573_s0 + $0x3] ss:$2 sm:$0xff]  ;;  %v16604_v63 = vld [vmem:[#allocation91_spill] sm:$0xff]  ;;  %v4846_v57 = vadd.f32 %v4832_v53, %v4789_v2  ;;  %s16687_s0 = smov 114  }
 0x827   :  { %16584 = vst [vmem:[#allocation143_spill] sm:$0xff] %v13469_v60  ;;  %v13477_v4 = vpop.permute.xlu0 %5172  ;;  %v13482_v61 = vpop.permute.xlu2 %5170  ;;  %v16595_v60 = vld [vmem:[#allocation153_spill] sm:$0xff]  ;;  %v4904_v24 = vadd.f32 %v4890_v51, %v4847_v31  ;;  %v4889_v55 = vsel %vm16593_vm2, %v16604_v63, %v16592_v1  ;;  %v5206_v47 = vperm.slane %v13508_v10, 4  ;;  %v16605_v18 = vld [vmem:[#allocation19_spill] sm:$0xff]  ;;  %v16606_v3 = vld [vmem:[#allocation146_spill] sm:$0xff]  ;;  %v4905_v53 = vadd.f32 %v4891_v46, %v4848_v14 }
 0x828   :  { %16589 = vst [vmem:[#allocation144_spill] sm:$0xff] %v13477_v4  ;;  %v5064_v13 = vsel %vm16596_vm9, %v16595_v60, %v16594_v19  ;;  %v5121_v4 = vsel %vm1121_vm13, %v16603_v17, %v12966_v28  ;;  %v4906_v30 = vadd.f32 %v4892_v56, %v4849_v41  ;;  %vm16607_vm9 = vcmask 252928   ;;  %v16608_v28 = vld [vmem:[#allocation113_spill] sm:$0xff]  ;;  %v16611_v63 = vld [vmem:[#allocation155_spill] sm:$0xff] }
 0x829   :  { %16590 = vst [vmem:[#allocation132_spill] sm:$0xff] %v13482_v61  ;;  %v5078_v58 = vadd.f32 %v5064_v13, %v5021_v35  ;;  %v5004_v54 = vsel %vm16607_vm9, %v16606_v3, %v16605_v18  ;;  %v5178_v61 = vsel %vm1179_vm15, %v13089_v33, %v13031_v48  ;;  %v4948_v51 = vsel %vm947_vm14, %v16601_v27, %v16608_v28  ;;  %v16609_v35 = vld [vmem:[#allocation134_spill] sm:$0xff]  ;;  %vm16610_vm10 = vmmov %vm16607_vm9  ;;  %v16612_v48 = vld [vmem:[#allocation157_spill] sm:$0xff] }
 0x82a   :  { %v4949_v13 = vsel %vm947_vm14, %v16608_v28, %v16580_v21  ;;  %v4961_v1 = vadd.f32 %v4947_v62, %v4904_v24  ;;  %v4903_v56 = vadd.f32 %v4889_v55, %v4846_v57  ;;  %v5005_v41 = vsel %vm16610_vm10, %v16605_v18, %v16609_v35  ;;  %vm16614_vm2 = vmmov %vm16607_vm9  ;;  %v16615_v24 = vld [vmem:[#allocation28_spill] sm:$0xff] }
 0x82b   :  { %v5135_v31 = vadd.f32 %v5121_v4, %v5078_v58  ;;  %vm16613_vm3 = vcmask 244736   ;;  %v5006_v28 = vsel %vm16614_vm2, %v16609_v35, %v16587_v34  ;;  %v5220_v27 = vmul.f32 %v5206_v47, %v13061_v11  ;;  %v16616_v58 = vld [vmem:[#allocation161_spill] sm:$0xff]  ;;  %v16617_v18 = vld [vmem:[#allocation148_spill] sm:$0xff] }
 0x82c   :  { %v5061_v19 = vsel %vm16613_vm3, %v16612_v48, %v16611_v63  ;;  %v5018_v21 = vadd.f32 %v5004_v54, %v4961_v1  ;;  %v4962_v46 = vadd.f32 %v4948_v51, %v4905_v53  ;;  %v4963_v62 = vadd.f32 %v4949_v13, %v4906_v30  ;;  %vm16618_vm9 = vmmov %vm16613_vm3 }
 0x82d   :  { %v5192_v4 = vadd.f32 %v5178_v61, %v5135_v31  ;;  %v4946_v55 = vsel %vm947_vm14, %v16615_v24, %v16602_v42  ;;  %v5118_v57 = vsel %vm1121_vm13, %v13057_v23, %v16616_v58  ;;  %v5063_v34 = vsel %vm16618_vm9, %v16617_v18, %v16595_v60  ;;  %vm16619_vm10 = vmmov %vm16613_vm3  ;;  %v16620_v60 = vld [vmem:[#allocation142_spill] sm:$0xff] }
 0x82e   :  { %v13526_v2 = vpop.permute.xlu1 %5389  ;;  %v5062_v61 = vsel %vm16619_vm10, %v16611_v63, %v16617_v18  ;;  %v5075_v47 = vadd.f32 %v5061_v19, %v5018_v21  ;;  %v5203_v54 = vperm.slane %v13508_v10, 1  ;;  %v5019_v30 = vadd.f32 %v5005_v41, %v4962_v46  ;;  %vm16621_vm3 = vmmov %vm16614_vm2 }
 0x82f   :  { %v13534_v59 = vpop.permute.xlu0 %5444  ;;  %v13540_v14 = vpop.permute.xlu2 %5385  ;;  %v5020_v51 = vadd.f32 %v5006_v28, %v4963_v62  ;;  %v5175_v42 = vsel %vm1179_vm15, %v13097_v26, %v13001_v49  ;;  %v5289_v13 = vsel %vm135_vm0, %v13239_v16, %v13155_v44  ;;  %v4960_v1 = vadd.f32 %v4946_v55, %v4903_v56  ;;  %vm16622_vm2 = vmmov %vm16618_vm9 }
 0x830   :  { %v5003_v31 = vsel %vm16621_vm3, %v16620_v60, %v16606_v3  ;;  %v5132_v53 = vadd.f32 %v5118_v57, %v5075_v47  ;;  %v5227_v35 = vadd.f32 %v5220_v27, %v5192_v4  ;;  %v5076_v63 = vadd.f32 %v5062_v61, %v5019_v30 }
 0x831   :  { %v5077_v19 = vadd.f32 %v5063_v34, %v5020_v51  ;;  %v5120_v41 = vsel %vm1121_vm13, %v12991_v0, %v16603_v17  ;;  %v5346_v28 = vsel %vm193_vm1, %v13246_v40, %v13406_v25  ;;  %v5217_v46 = vmul.f32 %v5203_v54, %v13061_v11 }
 0x832   :  { %v5189_v21 = vadd.f32 %v5175_v42, %v5132_v53  ;;  %v5205_v56 = vperm.slane %v13508_v10, 3  ;;  %v5303_v62 = vadd.f32 %v5289_v13, %v5227_v35  ;;  %v5177_v3 = vsel %vm1179_vm15, %v13029_v37, %v13089_v33 }
 0x833   :  { %v5204_v4 = vperm.slane %v13508_v10, 2  ;;  %v5060_v57 = vsel %vm16622_vm2, %v12961_v39, %v16612_v48  ;;  %v5134_v18 = vadd.f32 %v5120_v41, %v5077_v19  ;;  %vm3830_vm9 = vcmask 97280  }
 0x834   :  { %v5360_v34 = vadd.f32 %v5346_v28, %v5303_v62  ;;  %v5119_v33 = vsel %vm1121_vm13, %v16616_v58, %v12991_v0  ;;  %v5176_v39 = vsel %vm1179_vm15, %v13001_v49, %v13029_v37  ;;  %v5224_v54 = vadd.f32 %v5217_v46, %v5189_v21 }
 0x835   :  { %v5191_v48 = vadd.f32 %v5177_v3, %v5134_v18  ;;  %v5219_v30 = vmul.f32 %v5205_v56, %v13061_v11  ;;  %v5343_v51 = vsel %vm193_vm1, %v13368_v6, %v13349_v29  ;;  %vm16623_vm10 = vcmask 1022976   ;;  %v16626_v56 = vld [vmem:[#allocation105_spill] sm:$0xff] }
 0x836   :  { %v3814_v24 = vpop.permute.xlu1 %3813  ;;  %v5403_v0 = vsel %vm16623_vm10, %v13425_v45, %v13417_v9  ;;  %vm16624_vm3 = vcmask 1014784   ;;  %v5133_v49 = vadd.f32 %v5119_v33, %v5076_v63  ;;  %v5218_v37 = vmul.f32 %v5204_v4, %v13061_v11  ;;  %vm16625_vm2 = vmmov %vm16623_vm10  ;;  %v16628_v33 = vld [vmem:[#allocation46_spill] sm:$0xff] }
 0x837   :  { %v3821_v27 = vadd.f32 %v3814_v24, %v13264_v20  ;;  %v3822_v17 = vadd.f32 %v3814_v24, %v13241_v5  ;;  %v13578_v55 = vpop.permute.xlu0 %5450  ;;  %v13583_v61 = vpop.permute.xlu2 %5448  ;;  %v5286_v20 = vsel %vm135_vm0, %v13196_v43, %v13125_v36  ;;  %v5417_v13 = vadd.f32 %v5403_v0, %v5360_v34  ;;  %vm16627_vm10 = vmmov %vm16624_vm3  ;;  %v16633_v0 = vld [vmem:[#allocation59_spill] sm:$0xff] }
 0x838   :  { %v5460_v58 = vsel %vm16624_vm3, %v13583_v61, %v13578_v55  ;;  %v5300_v42 = vadd.f32 %v5286_v20, %v5224_v54  ;;  %v4509_v60 = vadd.f32 %v13446_v52, %v13427_v38  ;;  %v5017_v53 = vadd.f32 %v5003_v31, %v4960_v1  ;;  %vm16629_vm3 = vmmov %vm16625_vm2  ;;  %v16630_v54 = vld [vmem:[#allocation93_spill] sm:$0xff] }
 0x839   :  { %v13591_v5 = vmax.f32 %v3821_v27, 0.0  ;;  %v3826_v47 = vmax.f32 %v3822_v17, 0.0  ;;  %v5288_v35 = vsel %vm135_vm0, %v13123_v7, %v13239_v16  ;;  %v5400_v19 = vsel %vm16625_vm2, %v13540_v14, %v13357_v22 }
 0x83a   :  { %v5190_v41 = vadd.f32 %v5176_v39, %v5133_v49  ;;  %v5226_v28 = vadd.f32 %v5219_v30, %v5191_v48  ;;  %v5357_v21 = vadd.f32 %v5343_v51, %v5300_v42  ;;  %v5474_v63 = vadd.f32 %v5460_v58, %v5417_v13  ;;  %v16631_v30 = vld [vmem:[#allocation128_spill] sm:$0xff] }
 0x83b   :  { %3831 = vst.msk [vmem:[#allocation4 + $0x8] sm:$0xff] %vm3830_vm9, %v3826_v47  ;;  %3838 = vrot.lane.b32.xlu2 %v13591_v5, %s8812_s29  ;;  %v4552_v62 = vsel %vm541_vm7, %v16532_v50, %v16626_v56  ;;  %v5074_v24 = vadd.f32 %v5060_v57, %v5017_v53  ;;  %v5117_v38 = vsel %vm1121_vm13, %v12995_v15, %v13057_v23  ;;  %v5202_v17 = vperm.slane %v13508_v10, 0 }
 0x83c   :  { %v5287_v16 = vsel %vm135_vm0, %v13125_v36, %v13123_v7  ;;  %v5225_v1 = vadd.f32 %v5218_v37, %v5190_v41  ;;  %v5302_v31 = vadd.f32 %v5288_v35, %v5226_v28  ;;  %v5414_v3 = vadd.f32 %v5400_v19, %v5357_v21  ;;  %v16636_v35 = vld [vmem:[#allocation11_spill] sm:$0xff] }
 0x83d   :  { %v5174_v50 = vsel %vm1179_vm15, %v13147_v32, %v13097_v26  ;;  %v5344_v15 = vsel %vm193_vm1, %v13349_v29, %v13257_v12  ;;  %v5131_v7 = vadd.f32 %v5117_v38, %v5074_v24  ;;  %v4609_v26 = vsel %vm599_vm8, %v16536_v8, %v16628_v33  ;;  %v16640_v38 = vld [vmem:[#allocation147_spill] sm:$0xff] }
 0x83e   :  { %v5384_v46 = vpop.permute.xlu1 %5383  ;;  %v5301_v36 = vadd.f32 %v5287_v16, %v5225_v1  ;;  %v5345_v32 = vsel %vm193_vm1, %v13257_v12, %v13246_v40  ;;  %v5401_v29 = vsel %vm16629_vm3, %v13357_v22, %v13526_v2  ;;  %v5402_v20 = vsel %vm16625_vm2, %v13526_v2, %v13425_v45  ;;  %v16632_v12 = vld [vmem:[#allocation112_spill] sm:$0xff] }
 0x83f   :  { %v13627_v52 = vpop.permute.xlu0 %5480  ;;  %v13630_v27 = vpop.permute.xlu2 %5442  ;;  %v5188_v47 = vadd.f32 %v5174_v50, %v5131_v7  ;;  %v5359_v39 = vadd.f32 %v5345_v32, %v5302_v31  ;;  %v4496_v40 = vsel %vm483_vm6, %v16631_v30, %v16630_v54  ;;  %v4553_v22 = vsel %vm541_vm7, %v16626_v56, %v16632_v12  ;;  %v16634_v45 = vld [vmem:[#allocation24_spill] sm:$0xff]  ;;  %v16641_v31 = vld [vmem:[#allocation133_spill] sm:$0xff]  ;;  %v16645_v7 = vld [vmem:[#allocation35_spill] sm:$0xff] }
 0x840   :  { %v5487_v4 = vadd.f32 %v13627_v52, %v5474_v63  ;;  %v5457_v23 = vsel %vm16627_vm10, %v13630_v27, %v13534_v59  ;;  %v5358_v48 = vadd.f32 %v5344_v15, %v5301_v36  ;;  %v4566_v51 = vadd.f32 %v4552_v62, %v4509_v60  ;;  %v16639_v63 = vld [vmem:[#allocation138_spill] sm:$0xff]  ;;  %v16650_v54 = vld [vmem:[#allocation119_spill] sm:$0xff] }
 0x841   :  { %v5471_v18 = vadd.f32 %v5457_v23, %v5414_v3  ;;  %vm16635_vm10 = vcmask 523264   ;;  %v5216_v58 = vmul.f32 %v5202_v17, %v13061_v11  ;;  %v5416_v37 = vadd.f32 %v5402_v20, %v5359_v39  ;;  %v16648_v39 = vld [vmem:[#allocation66_spill] sm:$0xff] }
 0x842   :  { %v5494_v57 = vmax.f32 %v5487_v4, 0.0  ;;  %v13642_v34 = vld [vmem:[#allocation4 + $0x8] sm:$0xff]  ;;  %v4666_v2 = vsel %vm16635_vm10, %v16634_v45, %v16633_v0  ;;  %v5415_v49 = vadd.f32 %v5401_v29, %v5358_v48  ;;  %v4623_v53 = vadd.f32 %v4609_v26, %v4566_v51  ;;  %v16651_v30 = vld [vmem:[#allocation154_spill] sm:$0xff] }
 0x843   :  { %3850 = vrot.lane.b32.xlu0 %v13642_v34, %s8812_s29  ;;  %v5484_v8 = vadd.f32 %v13627_v52, %v5471_v18  ;;  %v5285_v19 = vsel %vm135_vm0, %v16636_v35, %v13196_v43  ;;  %vm16637_vm6 = vcmask 1014784   ;;  %v5223_v21 = vadd.f32 %v5216_v58, %v5188_v47  ;;  %v16642_v43 = vld [vmem:[#allocation130_spill] sm:$0xff]  ;;  %v16644_v4 = vld [vmem:[#allocation143_spill] sm:$0xff]  ;;  %v16647_v18 = vld [vmem:[#allocation104_spill] sm:$0xff] }
 0x844   :  { %5501 = vst [vmem:[#allocation2 + $0x8] sm:$0x3f] %v5494_v57  ;;  %vm16638_vm7 = vmmov %vm16637_vm6  ;;  %v4510_v16 = vadd.f32 %v4496_v40, %v16640_v38  ;;  %v4680_v1 = vadd.f32 %v4666_v2, %v4623_v53  ;;  %vm16643_vm3 = vcmask 515072   ;;  %v4610_v36 = vsel %vm599_vm8, %v16628_v33, %v16645_v7  ;;  %v16646_v57 = vld [vmem:[#allocation141_spill] sm:$0xff]  ;;  %v16649_v48 = vld [vmem:[#allocation115_spill] sm:$0xff] }
 0x845   :  { %v5491_v42 = vmax.f32 %v5484_v8, 0.0  ;;  %v4723_v3 = vsel %vm16643_vm3, %v16642_v43, %v16641_v31  ;;  %v5299_v50 = vadd.f32 %v5285_v19, %v5223_v21  ;;  %v4780_v26 = vsel %vm773_vm11, %v16647_v18, %v16646_v57  ;;  %v16652_v40 = vld [vmem:[#allocation96_spill] sm:$0xff]  ;;  %v16653_v45 = vld [vmem:[#allocation27_spill] sm:$0xff]  ;;  %v16654_v58 = vld [vmem:[#allocation89_spill] sm:$0xff] }
 0x846   :  { %v5447_v13 = vpop.permute.xlu1 %5446  ;;  %v4567_v23 = vadd.f32 %v4553_v22, %v4510_v16  ;;  %v5399_v32 = vsel %vm16625_vm2, %v5384_v46, %v13540_v14  ;;  %v4737_v29 = vadd.f32 %v4723_v3, %v4680_v1  ;;  %v3520_v8 = vadd.f32 %v16649_v48, %v16648_v39  ;;  %vm16655_vm8 = vmmov %vm16643_vm3  ;;  %v16662_v1 = vld [vmem:[#allocation15_spill] sm:$0xff]  ;;  %v16663_v43 = vld [vmem:[#allocation156_spill] sm:$0xff] }
 0x847   :  { %v13672_v41 = vpop.permute.xlu0 %3818  ;;  %v5458_v60 = vsel %vm16637_vm6, %v13534_v59, %v5447_v13  ;;  %v5459_v28 = vsel %vm16638_vm7, %v5447_v13, %v13583_v61  ;;  %5498 = vst [vmem:[#allocation2] sm:$0x3f] %v5491_v42  ;;  %v5342_v59 = vsel %vm193_vm1, %v16644_v4, %v13368_v6  ;;  %v4667_v33 = vsel %vm16635_vm10, %v16633_v0, %v16650_v54  ;;  %v16657_v42 = vld [vmem:[#allocation127_spill] sm:$0xff]  ;;  %v16671_v39 = vld [vmem:[#allocation160_spill] sm:$0xff]  ;;  %v3779_v54 = vpop.f32.mrf.mxu0 }
 0x848   :  { %v3824_v56 = vadd.f32 %v13672_v41, %v16639_v63  ;;  %v5472_v62 = vadd.f32 %v5458_v60, %v5415_v49  ;;  %v5473_v24 = vadd.f32 %v5459_v28, %v5416_v37  ;;  %v5356_v6 = vadd.f32 %v5342_v59, %v5299_v50  ;;  %v16656_v37 = vld [vmem:[#allocation167_spill] sm:$0xff]  ;;  %v16660_v63 = vld [vmem:[#allocation108_spill] sm:$0xff] }
 0x849   :  { %v4837_v12 = vsel %vm831_vm12, %v16652_v40, %v16651_v30  ;;  %v4624_v22 = vadd.f32 %v4610_v36, %v4567_v23  ;;  %v4794_v51 = vadd.f32 %v4780_v26, %v4737_v29  ;;  %v3603_v2 = vadd.f32 %v16653_v45, %v3520_v8  ;;  %v16659_v28 = vld [vmem:[#allocation151_spill] sm:$0xff]  ;;  %v5284_v36 = vpop.permute.xlu2 %5283  ;;  %v16666_v26 = vld [vmem:[#allocation40_spill] sm:$0xff] }
 0x84a   :  { %v3828_v61 = vmax.f32 %v3824_v56, 0.0  ;;  %v5485_v17 = vadd.f32 %v13627_v52, %v5472_v62  ;;  %v5486_v15 = vadd.f32 %v13627_v52, %v5473_v24  ;;  %v5413_v14 = vadd.f32 %v5399_v32, %v5356_v6  ;;  %v16661_v56 = vld [vmem:[#allocation84_spill] sm:$0xff]  ;;  %v3711_v24 = vpop.f32.mrf.mxu1  ;;  %v16667_v32 = vld [vmem:[#allocation135_spill] sm:$0xff]  ;;  %v16669_v6 = vld [vmem:[#allocation169_spill] sm:$0xff] }
 0x84b   :  { %v4724_v49 = vsel %vm16655_vm8, %v16641_v31, %v16654_v58  ;;  %vm16658_vm6 = vcmask 490496   ;;  %v4681_v35 = vadd.f32 %v4667_v33, %v4624_v22  ;;  %v4851_v19 = vadd.f32 %v4837_v12, %v4794_v51  ;;  %v16673_v12 = vld [vmem:[#allocation18_spill] sm:$0xff]  ;;  %v16675_v51 = vld [vmem:[#allocation131_spill] sm:$0xff]  ;;  %v16677_v58 = vld [vmem:[#allocation140_spill] sm:$0xff] }
 0x84c   :  { %3833 = vst.msk [vmem:[#allocation4 + $0x18] sm:$0xff] %vm3830_vm9, %v3828_v61  ;;  %v5492_v20 = vmax.f32 %v5485_v17, 0.0  ;;  %v5493_v47 = vmax.f32 %v5486_v15, 0.0  ;;  %v4894_v13 = vsel %vm16658_vm6, %v16657_v42, %v16656_v37  ;;  %v4781_v21 = vsel %vm773_vm11, %v16646_v57, %v16659_v28  ;;  %v16664_v17 = vld [vmem:[#allocation166_spill] sm:$0xff]  ;;  %vm16665_vm11 = vmmov %vm16658_vm6  ;;  %v16680_v42 = vld [vmem:[#allocation168_spill] sm:$0xff] }
 0x84d   :  { %v4951_v62 = vsel %vm947_vm14, %v16661_v56, %v16660_v63  ;;  %v4738_v38 = vadd.f32 %v4724_v49, %v4681_v35  ;;  %v4908_v16 = vadd.f32 %v4894_v13, %v4851_v19  ;;  %v3671_v31 = vadd.f32 %v16662_v1, %v3603_v2  ;;  %vm16686_vm8 = vmmov %vm16638_vm7 }
 0x84e   :  { %5499 = vst [vmem:[#allocation2 + $0x18] sm:$0x3f] %v5492_v20  ;;  %v5441_v46 = vpop.permute.xlu1 %5440  ;;  %v13715_v53 = vld [vmem:[#allocation2] sm:$0x3f]  ;;  %v4838_v3 = vsel %vm831_vm12, %v16651_v30, %v16663_v43  ;;  %v4895_v15 = vsel %vm16665_vm11, %v16656_v37, %v16664_v17  ;;  %vm16668_vm3 = vcmask 252928   ;;  %v4952_v20 = vsel %vm947_vm14, %v16660_v63, %v16669_v6  ;;  %v16679_v37 = vld [vmem:[#allocation132_spill] sm:$0xff] }
 0x84f   :  { %5500 = vst [vmem:[#allocation2 + $0x10] sm:$0x3f] %v5493_v47  ;;  %v5456_v0 = vsel %vm16638_vm7, %v5441_v46, %v13630_v27  ;;  %5520 = vrot.lane.b32.xlu0 %v13715_v53, %s8812_s29  ;;  %v4795_v4 = vadd.f32 %v4781_v21, %v4738_v38  ;;  %v4965_v59 = vadd.f32 %v4951_v62, %v4908_v16  ;;  %v16670_v47 = vld [vmem:[#allocation122_spill] sm:$0xff]  ;;  %vm16672_vm12 = vcmask 244736   ;;  %vm16674_vm2 = vmmov %vm16668_vm3 }
 0x850   :  { %v5470_v60 = vadd.f32 %v5456_v0, %v5413_v14  ;;  %v3739_v61 = vadd.f32 %v3711_v24, %v3671_v31  ;;  %v5008_v29 = vsel %vm16668_vm3, %v16667_v32, %v16666_v26  ;;  %v5065_v48 = vsel %vm16672_vm12, %v16671_v39, %v16670_v47  ;;  %v16676_v14 = vld [vmem:[#allocation165_spill] sm:$0xff]  ;;  %vm16678_vm14 = vmmov %vm16672_vm12  ;;  %v13765_v21 = vld [vmem:[#allocation2 + $0x8] sm:$0x3f] }
 0x851   :  { %v4852_v7 = vadd.f32 %v4838_v3, %v4795_v4  ;;  %v5022_v30 = vadd.f32 %v5008_v29, %v4965_v59  ;;  %v5009_v22 = vsel %vm16674_vm2, %v16666_v26, %v16673_v12  ;;  %v5122_v46 = vsel %vm1121_vm13, %v16676_v14, %v16675_v51  ;;  %v5341_v16 = vpop.permute.xlu2 %5340  ;;  %v16682_v31 = vld [vmem:[#allocation144_spill] sm:$0xff] }
 0x852   :  { %v5483_v27 = vadd.f32 %v13627_v52, %v5470_v60  ;;  %v3807_v40 = vadd.f32 %v3779_v54, %v3739_v61  ;;  %v5066_v49 = vsel %vm16678_vm14, %v16670_v47, %v16677_v58  ;;  %v5179_v13 = vsel %vm1179_vm15, %v16680_v42, %v16679_v37 }
 0x853   :  { %v4909_v33 = vadd.f32 %v4895_v15, %v4852_v7  ;;  %v5079_v2 = vadd.f32 %v5065_v48, %v5022_v30  ;;  %v5207_v60 = vperm.slane %v13508_v10, 5  ;;  %v5180_v43 = vsel %vm1179_vm15, %v16679_v37, %v16682_v31  ;;  %v5453_v7 = vpop.permute.xlu0 %5452  ;;  %vm16684_vm15 = vmmov %vm16638_vm7 }
 0x854   :  { %v5490_v50 = vmax.f32 %v5483_v27, 0.0  ;;  %v3823_v0 = vadd.f32 %v13672_v41, %v3807_v40  ;;  %v16681_v41 = vld [vmem:[#allocation136_spill] sm:$0xff]  ;;  %v5208_v59 = vperm.slane %v13508_v10, 6  ;;  %vm3905_vm6 = vcmask 1040384  }
 0x855   :  { %v13733_v23 = vld [vmem:[#allocation2 + $0x18] sm:$0x3f]  ;;  %v4966_v45 = vadd.f32 %v4952_v20, %v4909_v33  ;;  %v5136_v19 = vadd.f32 %v5122_v46, %v5079_v2  ;;  %v5221_v27 = vmul.f32 %v5207_v60, %v13061_v11  ;;  %v5123_v1 = vsel %vm1121_vm13, %v16675_v51, %v16681_v41  ;;  %v13790_v20 = vld [vmem:[#allocation4 + $0x18] sm:$0xff] }
 0x856   :  { %5497 = vst [vmem:[#allocation2 + $0x30] sm:$0x3f] %v5490_v50  ;;  %v5282_v57 = vpop.permute.xlu1 %5281  ;;  %v13735_v18 = vld [vmem:[#allocation2 + $0x10] sm:$0x3f]  ;;  %v13769_v38 = vmax.f32 %v3823_v0, 0.0  ;;  %v5222_v26 = vmul.f32 %v5208_v59, %v13061_v11  ;;  %vm16683_vm13 = vcmask 1022976  }
 0x857   :  { %v8746_v8 = vpack.i.bf16 %v13735_v18, %v13733_v23  ;;  %v5023_v35 = vadd.f32 %v5009_v22, %v4966_v45  ;;  %v5193_v56 = vadd.f32 %v5179_v13, %v5136_v19  ;;  %v5290_v3 = vsel %vm135_vm0, %v13155_v44, %v5282_v57  ;;  %vm16685_vm10 = vmmov %vm16683_vm13  ;;  %v5621_v59 = vld [vmem:[%s15576_s3 + $0xe0] sm:$0xff] }
 0x858   :  { %v5291_v6 = vsel %vm135_vm0, %v5282_v57, %v5284_v36  ;;  %vm16688_vm7 = vcmask 1046528   ;;  %vm16689_vm11 = vcmask 932864   ;;  %vm3898_vm3 = vcmask 990208  }
 0x859   :  { %8747 = vrot.lane.b32.xlu1 %v8746_v8, %s8812_s29  ;;  %v5080_v63 = vadd.f32 %v5066_v49, %v5023_v35  ;;  %v5228_v50 = vadd.f32 %v5221_v27, %v5193_v56  ;;  %v5398_v48 = vpop.permute.xlu2 %5397  ;;  %vm16690_vm12 = vmmov %vm16689_vm11  ;;  %vm3932_vm14 = vcmask 203776  }
 0x85a   :  { %vm16691_vm2 = vmmov %vm16688_vm7 }
 0x85b   :  { %v5137_v4 = vadd.f32 %v5123_v1, %v5080_v63  ;;  %v5304_v15 = vadd.f32 %v5290_v3, %v5228_v50  ;;  %v5623_v3 = vld [vmem:[%s15576_s3 + $0xf0] sm:$0xff] }
 0x85c   :  { %5818 = vmatpush.msra.mxu3 %v5623_v3  ;;  %v5619_v50 = vld [vmem:[%s15576_s3 + $0xd0] sm:$0xff]  ;;  %v5637_v3 = vld [vmem:[%s15576_s3 + $0x160] sm:$0xff] }
 0x85d   :  { %v13763_v28 = vld [vmem:[#allocation2 + $0x30] sm:$0x3f]  ;;  %v5194_v17 = vadd.f32 %v5180_v43, %v5137_v4  ;;  %v3895_v4 = vld [vmem:[%s15579_s6 + $0x68] sm:$0xff] }
 0x85e   :  { %v5339_v62 = vpop.permute.xlu1 %5338  ;;  %v8751_v24 = vpack.i.bf16 %v13763_v28, %v13765_v21  ;;  %5819 = vmatpush.msra.mxu3 %v5621_v59  ;;  %v5717_v59 = vld [vmem:[%s15576_s3 + $0x3e0] sm:$0xff] }
 0x85f   :  { %v5347_v61 = vsel %vm193_vm1, %v13406_v25, %v5339_v62  ;;  %v5229_v47 = vadd.f32 %v5222_v26, %v5194_v17  ;;  %v5461_v25 = vsel %vm16684_vm15, %v13578_v55, %v5453_v7  ;;  %v5348_v39 = vsel %vm193_vm1, %v5339_v62, %v5341_v16  ;;  %v3892_v26 = vld [vmem:[%s15579_s6 + $0x50] sm:$0xff] }
 0x860   :  { %8752 = vrot.lane.b32.xlu2 %v8751_v24, %s8812_s29  ;;  %v5361_v32 = vadd.f32 %v5347_v61, %v5304_v15  ;;  %v3894_v61 = vld [vmem:[%s15579_s6 + $0x60] sm:$0xff]  ;;  %5820 = vmatpush.msra.mxu3 %v5619_v50  ;;  %v5595_v50 = vld [vmem:[%s15576_s3 + $0x10] sm:$0xff]  ;;  %vm16698_vm15 = vcmask 48128  }
 0x861   :  { %3840 = vrot.lane.b32.xlu1 %v13769_v38, %s8812_s29  ;;  %v5305_v11 = vadd.f32 %v5291_v6, %v5229_v47  ;;  %v5617_v15 = vld [vmem:[%s15576_s3 + $0xc0] sm:$0xff] }
 0x862   :  { %5821 = vmatpush.msra.mxu3 %v5617_v15  ;;  %v5715_v15 = vld [vmem:[%s15576_s3 + $0x3d0] sm:$0xff] }
 0x863   :  { %v5362_v57 = vadd.f32 %v5348_v39, %v5305_v11  ;;  %v3890_v39 = vld [vmem:[%s15579_s6 + $0x40] sm:$0xff]  ;;  %v5615_v11 = vld [vmem:[%s15576_s3 + $0xb0] sm:$0xff] }
 0x864   :  { %5822 = vmatpush.msra.mxu3 %v5615_v11  ;;  %v5629_v11 = vld [vmem:[%s15576_s3 + $0x120] sm:$0xff] }
 0x866   :  { %v5396_v29 = vpop.permute.xlu1 %5395 }
 0x867   :  { %v5404_v44 = vsel %vm16683_vm13, %v13417_v9, %v5396_v29  ;;  %v5405_v36 = vsel %vm16685_vm10, %v5396_v29, %v5398_v48  ;;  %v5655_v48 = vld [vmem:[%s15576_s3 + $0x1f0] sm:$0xff]  ;;  %vm16697_vm13 = vcmask 1045504   ;;  %vm16699_vm10 = vmmov %vm16698_vm15 }
 0x868   :  { %v5418_v10 = vadd.f32 %v5404_v44, %v5361_v32  ;;  %3852 = vrot.lane.b32.xlu2 %v13790_v20, %s8812_s29  ;;  %v5419_v54 = vadd.f32 %v5405_v36, %v5362_v57  ;;  %v3891_v32 = vld [vmem:[%s15579_s6 + $0x48] sm:$0xff]  ;;  %v3889_v36 = vld [vmem:[%s15579_s6 + $0x38] sm:$0xff]  ;;  %v5613_v57 = vld [vmem:[%s15576_s3 + $0xa0] sm:$0xff]  ;;  %5838 = vmatpush.msrb.mxu0 %v5655_v48 }
 0x869   :  { %5823 = vmatpush.msra.mxu3 %v5613_v57  ;;  %v5659_v48 = vld [vmem:[%s15576_s3 + $0x210] sm:$0xff] }
 0x86a   :  { %v5475_v8 = vadd.f32 %v5461_v25, %v5418_v10  ;;  %v5627_v57 = vld [vmem:[%s15576_s3 + $0x110] sm:$0xff] }
 0x86c   :  { %v5488_v9 = vadd.f32 %v13627_v52, %v5475_v8  ;;  %v5685_v8 = vld [vmem:[%s15576_s3 + $0x2e0] sm:$0xff] }
 0x86e   :  { %v5495_v33 = vmax.f32 %v5488_v9, 0.0  ;;  %v5455_v30 = vpop.permute.xlu1 %5454  ;;  %v5653_v9 = vld [vmem:[%s15576_s3 + $0x1e0] sm:$0xff] }
 0x86f   :  { %v5462_v40 = vsel %vm16686_vm8, %v5453_v7, %v5455_v30  ;;  %v3893_v7 = vld [vmem:[%s15579_s6 + $0x58] sm:$0xff]  ;;  %v5611_v30 = vld [vmem:[%s15576_s3 + $0x90] sm:$0xff]  ;;  %5839 = vmatpush.msrb.mxu0 %v5653_v9  ;;  %v5657_v9 = vld [vmem:[%s15576_s3 + $0x200] sm:$0xff] }
 0x870   :  { %5502 = vst [vmem:[#allocation2 + $0x20] sm:$0x3f] %v5495_v33  ;;  %v5476_v12 = vadd.f32 %v5462_v40, %v5419_v54  ;;  %v5683_v54 = vld [vmem:[%s15576_s3 + $0x2d0] sm:$0xff]  ;;  %5824 = vmatpush.msra.mxu3 %v5611_v30  ;;  %v5625_v30 = vld [vmem:[%s15576_s3 + $0x100] sm:$0xff]  ;;  %vm16702_vm8 = vmmov %vm16697_vm13 }
 0x871   :  { %v3888_v33 = vld [vmem:[%s15579_s6 + $0x30] sm:$0xff] }
 0x872   :  { %v5489_v22 = vadd.f32 %v13627_v52, %v5476_v12  ;;  %v5651_v40 = vld [vmem:[%s15576_s3 + $0x1d0] sm:$0xff]  ;;  %v5681_v12 = vld [vmem:[%s15576_s3 + $0x2c0] sm:$0xff] }
 0x873   :  { %5840 = vmatpush.msrb.mxu0 %v5651_v40  ;;  %v5807_v40 = vld [vmem:[%s15576_s3 + $0x6b0] sm:$0x7f] }
 0x874   :  { %v5496_v55 = vmax.f32 %v5489_v22, 0.0  ;;  %v3887_v22 = vld [vmem:[%s15579_s6 + $0x28] sm:$0xff] }
 0x876   :  { %5503 = vst [vmem:[#allocation2 + $0x28] sm:$0x3f] %v5496_v55  ;;  %v5609_v55 = vld [vmem:[%s15576_s3 + $0x80] sm:$0xff] }
 0x877   :  { %v13801_v51 = vld [vmem:[#allocation2 + $0x20] sm:$0x3f]  ;;  %5825 = vmatpush.msra.mxu3 %v5609_v55  ;;  %v5783_v55 = vld [vmem:[%s15576_s3 + $0x5f0] sm:$0xff] }
 0x878   :  { %5528 = vrot.lane.b32.xlu1 %v13801_v51, %s8812_s29 }
 0x87d   :  { %v13805_v14 = vld [vmem:[#allocation2 + $0x28] sm:$0x3f] }
 0x87e   :  { %5530 = vrot.lane.b32.xlu0 %v13805_v14, %s8812_s29 }
 0x895   :  { %v13809_v46 = vpop.permute.xlu2 %3838 }
 0x8b5   :  { %v3851_v45 = vpop.permute.xlu0 %3850 }
 0x8b6   :  { %v3854_v2 = vsel %vm135_vm0, %v13809_v46, %v3851_v45  ;;  %v3861_v52 = vmax.f32 %v13642_v34, %v3851_v45  ;;  %v3886_v45 = vld [vmem:[%s15579_s6 + $0x20] sm:$0xff] }
 0x8b7   :  { %v3860_v58 = vmax.f32 %v13591_v5, %v3854_v2  ;;  %v5607_v2 = vld [vmem:[%s15576_s3 + $0x70] sm:$0xff] }
 0x8b8   :  { %3870 = vrot.lane.b32.xlu0 %v3861_v52, %s16687_s0  ;;  %v5647_v52 = vld [vmem:[%s15576_s3 + $0x1b0] sm:$0xff]  ;;  %5826 = vmatpush.msra.mxu3 %v5607_v2  ;;  %v5781_v2 = vld [vmem:[%s15576_s3 + $0x5e0] sm:$0xff] }
 0x8b9   :  { %3868 = vrot.lane.b32.xlu2 %v3860_v58, %s16687_s0  ;;  %v5677_v58 = vld [vmem:[%s15576_s3 + $0x2a0] sm:$0xff] }
 0x8ba   :  { %v8753_v49 = vpop.permute.xlu2 %8752 }
 0x8bb   :  { %v8755_v42 = vunpack.i.h.bf16 %v8753_v49  ;;  %v8754_v0 = vunpack.i.l.bf16 %v8753_v49  ;;  %v3885_v49 = vld [vmem:[%s15579_s6 + $0x18] sm:$0xff] }
 0x8c1   :  { %v5521_v37 = vpop.permute.xlu0 %5520 }
 0x8c2   :  { %v5532_v35 = vsel %vm135_vm0, %v8755_v42, %v5521_v37  ;;  %v3853_v31 = vpop.permute.xlu2 %3852  ;;  %v5645_v42 = vld [vmem:[%s15576_s3 + $0x1a0] sm:$0xff] }
 0x8c3   :  { %v13822_v62 = vmax.f32 %v13763_v28, %v5532_v35  ;;  %v3863_v17 = vmax.f32 %v13790_v20, %v3853_v31  ;;  %v5603_v35 = vld [vmem:[%s15576_s3 + $0x50] sm:$0xff] }
 0x8cb   :  { %v8748_v13 = vpop.permute.xlu1 %8747 }
 0x8cc   :  { %v8750_v19 = vunpack.i.h.bf16 %v8748_v13  ;;  %v8749_v60 = vunpack.i.l.bf16 %v8748_v13  ;;  %v5675_v13 = vld [vmem:[%s15576_s3 + $0x290] sm:$0xff] }
 0x8ce   :  { %v5533_v63 = vsel %vm135_vm0, %v5521_v37, %v8749_v60  ;;  %v5534_v56 = vsel %vm135_vm0, %v8749_v60, %v8750_v19  ;;  %v5535_v34 = vsel %vm135_vm0, %v8750_v19, %v8754_v0  ;;  %v5605_v37 = vld [vmem:[%s15576_s3 + $0x60] sm:$0xff]  ;;  %v5643_v19 = vld [vmem:[%s15576_s3 + $0x190] sm:$0xff] }
 0x8cf   :  { %v13825_v24 = vmax.f32 %v13715_v53, %v5533_v63  ;;  %v13828_v16 = vmax.f32 %v13733_v23, %v5534_v56  ;;  %v13831_v27 = vmax.f32 %v13735_v18, %v5535_v34  ;;  %v3897_v23 = vld [vmem:[%s15579_s6 + $0x78] sm:$0x1]  ;;  %v3896_v18 = vld [vmem:[%s15579_s6 + $0x70] sm:$0xff]  ;;  %5827 = vmatpush.msra.mxu3 %v5605_v37  ;;  %v5673_v60 = vld [vmem:[%s15576_s3 + $0x280] sm:$0xff] }
 0x8d0   :  { %8408 = vmatpush.msk.msrb.mxu1 %vm3905_vm6, %v3897_v23  ;;  %v3883_v63 = vld [vmem:[%s15579_s6 + $0x8] sm:$0xff]  ;;  %v5601_v56 = vld [vmem:[%s15576_s3 + $0x40] sm:$0xff]  ;;  %v5779_v37 = vld [vmem:[%s15576_s3 + $0x5d0] sm:$0xff] }
 0x8d1   :  { %v8761_v41 = vpack.i.bf16 %v13825_v24, %v13822_v62  ;;  %v8756_v1 = vpack.i.bf16 %v13831_v27, %v13828_v16  ;;  %5828 = vmatpush.msra.mxu3 %v5603_v35  ;;  %v5641_v34 = vld [vmem:[%s15576_s3 + $0x180] sm:$0xff] }
 0x8d2   :  { %3910 = vmatpush.msrb.mxu1 %v3896_v18  ;;  %v5669_v23 = vld [vmem:[%s15576_s3 + $0x260] sm:$0xff]  ;;  %v5719_v18 = vld [vmem:[%s15576_s3 + $0x3f0] sm:$0xff] }
 0x8d3   :  { %v13837_v43 = vpop.permute.xlu1 %3840  ;;  %8762 = vrot.lane.b32.xlu2 %v8761_v41, %s16232_s19  ;;  %8757 = vrot.lane.b32.xlu1 %v8756_v1, %s16232_s19  ;;  %v5671_v41 = vld [vmem:[%s15576_s3 + $0x270] sm:$0xff]  ;;  %v3882_v1 = vld [vmem:[%s15579_s6] sm:$0xff] }
 0x8d4   :  { %v3855_v53 = vsel %vm135_vm0, %v13837_v43, %v3853_v31  ;;  %3911 = vmatpush.msrb.mxu1 %v3895_v4  ;;  %v5599_v31 = vld [vmem:[%s15576_s3 + $0x30] sm:$0xff]  ;;  %5829 = vmatpush.msra.mxu3 %v5601_v56  ;;  %v5777_v35 = vld [vmem:[%s15576_s3 + $0x5c0] sm:$0xff] }
 0x8d5   :  { %v3862_v28 = vmax.f32 %v13769_v38, %v3855_v53  ;;  %v5639_v53 = vld [vmem:[%s15576_s3 + $0x170] sm:$0xff] }
 0x8d6   :  { %3912 = vmatpush.msrb.mxu1 %v3894_v61  ;;  %5830 = vmatpush.msra.mxu3 %v5599_v31  ;;  %v5667_v4 = vld [vmem:[%s15576_s3 + $0x250] sm:$0xff]  ;;  %v5773_v31 = vld [vmem:[%s15576_s3 + $0x5a0] sm:$0xff] }
 0x8d7   :  { %3872 = vrot.lane.b32.xlu0 %v3862_v28, %s16687_s0  ;;  %v5597_v28 = vld [vmem:[%s15576_s3 + $0x20] sm:$0xff]  ;;  %v5635_v61 = vld [vmem:[%s15576_s3 + $0x150] sm:$0xff] }
 0x8d8   :  { %3913 = vmatpush.msrb.mxu1 %v3893_v7  ;;  %5831 = vmatpush.msra.mxu3 %v5597_v28  ;;  %v5593_v7 = vld [vmem:[%s15576_s3] sm:$0xff]  ;;  %v5775_v56 = vld [vmem:[%s15576_s3 + $0x5b0] sm:$0xff] }
 0x8d9   :  { %v5771_v28 = vld [vmem:[%s15576_s3 + $0x590] sm:$0xff] }
 0x8da   :  { %3914 = vmatpush.msrb.mxu1 %v3892_v26  ;;  %5832 = vmatpush.msra.mxu3 %v5595_v50  ;;  %v5633_v26 = vld [vmem:[%s15576_s3 + $0x140] sm:$0xff] }
 0x8db   :  { %3874 = vrot.lane.b32.xlu1 %v3863_v17, %s16687_s0  ;;  %v5665_v17 = vld [vmem:[%s15576_s3 + $0x240] sm:$0xff] }
 0x8dc   :  { %3915 = vmatpush.msrb.mxu1 %v3891_v32  ;;  %v5663_v32 = vld [vmem:[%s15576_s3 + $0x230] sm:$0xff]  ;;  %5833 = vmatpush.msra.mxu3 %v5593_v7  ;;  %v5769_v50 = vld [vmem:[%s15576_s3 + $0x580] sm:$0xff] }
 0x8dd   :  { %v5727_v7 = vld [vmem:[%s15576_s3 + $0x430] sm:$0xff] }
 0x8de   :  { %3916 = vmatpush.msrb.mxu1 %v3890_v39  ;;  %v5749_v39 = vld [vmem:[%s15576_s3 + $0x4e0] sm:$0xff] }
 0x8e0   :  { %3917 = vmatpush.msrb.mxu1 %v3889_v36  ;;  %v5747_v36 = vld [vmem:[%s15576_s3 + $0x4d0] sm:$0xff] }
 0x8e2   :  { %3918 = vmatpush.msrb.mxu1 %v3888_v33  ;;  %v5745_v33 = vld [vmem:[%s15576_s3 + $0x4c0] sm:$0xff] }
 0x8e4   :  { %3919 = vmatpush.msrb.mxu1 %v3887_v22  ;;  %v5743_v22 = vld [vmem:[%s15576_s3 + $0x4b0] sm:$0xff] }
 0x8e6   :  { %3920 = vmatpush.msrb.mxu1 %v3886_v45  ;;  %v5741_v45 = vld [vmem:[%s15576_s3 + $0x4a0] sm:$0xff] }
 0x8e8   :  { %3921 = vmatpush.msrb.mxu1 %v3885_v49  ;;  %v5739_v49 = vld [vmem:[%s15576_s3 + $0x490] sm:$0xff] }
 0x8ea   :  { %v5529_v29 = vpop.permute.xlu1 %5528 }
 0x8eb   :  { %v5536_v6 = vsel %vm135_vm0, %v8754_v0, %v5529_v29  ;;  %v3884_v0 = vld [vmem:[%s15579_s6 + $0x10] sm:$0xff] }
 0x8ec   :  { %v13883_v44 = vmax.f32 %v13765_v21, %v5536_v6  ;;  %v5687_v21 = vld [vmem:[%s15576_s3 + $0x2f0] sm:$0xff]  ;;  %3922 = vmatpush.msrb.mxu1 %v3884_v0  ;;  %v5737_v0 = vld [vmem:[%s15576_s3 + $0x480] sm:$0xff] }
 0x8ed   :  { %5858 = vmatpush.msra.mxu2 %v5687_v21  ;;  %v5751_v6 = vld [vmem:[%s15576_s3 + $0x4f0] sm:$0xff] }
 0x8ee   :  { %5567 = vrot.lane.b32.xlu0 %v13883_v44, %s16232_s19  ;;  %3923 = vmatpush.msrb.mxu1 %v3883_v63  ;;  %v5711_v21 = vld [vmem:[%s15576_s3 + $0x3b0] sm:$0xff] }
 0x8ef   :  { %5859 = vmatpush.msra.mxu2 %v5685_v8  ;;  %5898 = vmatpush.msrb.mxu3 %v5751_v6  ;;  %v5709_v8 = vld [vmem:[%s15576_s3 + $0x3a0] sm:$0xff]  ;;  %v5735_v63 = vld [vmem:[%s15576_s3 + $0x470] sm:$0xff] }
 0x8f0   :  { %v5531_v20 = vpop.permute.xlu0 %5530  ;;  %3924 = vmatpush.msrb.mxu1 %v3882_v1  ;;  %v5733_v1 = vld [vmem:[%s15576_s3 + $0x460] sm:$0xff] }
 0x8f1   :  { %v5537_v47 = vsel %vm135_vm0, %v5529_v29, %v5531_v20  ;;  %v13889_v10 = vmax.f32 %v13805_v14, %v5531_v20  ;;  %5860 = vmatpush.msra.mxu2 %v5683_v54  ;;  %v5679_v14 = vld [vmem:[%s15576_s3 + $0x2b0] sm:$0xff]  ;;  %v5713_v29 = vld [vmem:[%s15576_s3 + $0x3c0] sm:$0xff]  ;;  %5899 = vmatpush.msrb.mxu3 %v5749_v39 }
 0x8f2   :  { %v13892_v25 = vmax.f32 %v13801_v51, %v5537_v47  ;;  %v5649_v51 = vld [vmem:[%s15576_s3 + $0x1c0] sm:$0xff]  ;;  %5878 = vmatpush.msra.mxu1 %v5719_v18  ;;  %v5631_v20 = vld [vmem:[%s15576_s3 + $0x130] sm:$0xff] }
 0x8f3   :  { %5571 = vrot.lane.b32.xlu2 %v13889_v10, %s16232_s19  ;;  %5861 = vmatpush.msra.mxu2 %v5681_v12  ;;  %v5661_v47 = vld [vmem:[%s15576_s3 + $0x220] sm:$0xff]  ;;  %v5707_v54 = vld [vmem:[%s15576_s3 + $0x390] sm:$0xff] }
 0x8f4   :  { %5569 = vrot.lane.b32.xlu1 %v13892_v25, %s16232_s19  ;;  %5841 = vmatpush.msrb.mxu0 %v5649_v51  ;;  %v5705_v12 = vld [vmem:[%s15576_s3 + $0x380] sm:$0xff]  ;;  %v5731_v18 = vld [vmem:[%s15576_s3 + $0x450] sm:$0xff] }
 0x8f5   :  { %5862 = vmatpush.msra.mxu2 %v5679_v14  ;;  %5879 = vmatpush.msra.mxu1 %v5717_v59  ;;  %v5805_v51 = vld [vmem:[%s15576_s3 + $0x6a0] sm:$0xff]  ;;  %v5703_v14 = vld [vmem:[%s15576_s3 + $0x370] sm:$0xff] }
 0x8f6   :  { %5842 = vmatpush.msrb.mxu0 %v5647_v52  ;;  %5900 = vmatpush.msrb.mxu3 %v5747_v36  ;;  %v5803_v52 = vld [vmem:[%s15576_s3 + $0x690] sm:$0xff]  ;;  %v5729_v59 = vld [vmem:[%s15576_s3 + $0x440] sm:$0xff] }
 0x8f7   :  { %5863 = vmatpush.msra.mxu2 %v5677_v58  ;;  %5880 = vmatpush.msra.mxu1 %v5715_v15  ;;  %v5701_v58 = vld [vmem:[%s15576_s3 + $0x360] sm:$0xff] }
 0x8f8   :  { %5843 = vmatpush.msrb.mxu0 %v5645_v42  ;;  %5901 = vmatpush.msrb.mxu3 %v5745_v33  ;;  %v5801_v42 = vld [vmem:[%s15576_s3 + $0x680] sm:$0xff] }
 0x8f9   :  { %5864 = vmatpush.msra.mxu2 %v5675_v13  ;;  %5881 = vmatpush.msra.mxu1 %v5713_v29  ;;  %v5699_v13 = vld [vmem:[%s15576_s3 + $0x350] sm:$0xff]  ;;  %v5725_v29 = vld [vmem:[%s15576_s3 + $0x420] sm:$0xff] }
 0x8fa   :  { %5844 = vmatpush.msrb.mxu0 %v5643_v19  ;;  %5902 = vmatpush.msrb.mxu3 %v5743_v22  ;;  %v5799_v19 = vld [vmem:[%s15576_s3 + $0x670] sm:$0xff]  ;;  %v5765_v6 = vld [vmem:[%s15576_s3 + $0x560] sm:$0xff]  ;;  %v5620_v22 = vld [vmem:[%s15576_s3 + $0xd8] sm:$0xff] }
 0x8fb   :  { %5865 = vmatpush.msra.mxu2 %v5673_v60  ;;  %5882 = vmatpush.msra.mxu1 %v5711_v21  ;;  %v5697_v60 = vld [vmem:[%s15576_s3 + $0x340] sm:$0xff]  ;;  %v3844_v21 = vmax.f32 %v13591_v5, %v13809_v46  ;;  %v5624_v46 = vld [vmem:[%s15576_s3 + $0xf8] sm:$0xff] }
 0x8fc   :  { %5845 = vmatpush.msrb.mxu0 %v5641_v34  ;;  %5903 = vmatpush.msrb.mxu3 %v5741_v45  ;;  %v5797_v34 = vld [vmem:[%s15576_s3 + $0x660] sm:$0xff]  ;;  %v5618_v45 = vld [vmem:[%s15576_s3 + $0xc8] sm:$0xff] }
 0x8fd   :  { %5866 = vmatpush.msra.mxu2 %v5671_v41  ;;  %5883 = vmatpush.msra.mxu1 %v5709_v8  ;;  %v5695_v41 = vld [vmem:[%s15576_s3 + $0x330] sm:$0xff]  ;;  %v5721_v36 = vld [vmem:[%s15576_s3 + $0x400] sm:$0xff] }
 0x8fe   :  { %5846 = vmatpush.msrb.mxu0 %v5639_v53  ;;  %5904 = vmatpush.msrb.mxu3 %v5739_v49  ;;  %v5795_v53 = vld [vmem:[%s15576_s3 + $0x650] sm:$0xff]  ;;  %v5753_v49 = vld [vmem:[%s15576_s3 + $0x500] sm:$0xff] }
 0x8ff   :  { %5867 = vmatpush.msra.mxu2 %v5669_v23  ;;  %5884 = vmatpush.msra.mxu1 %v5707_v54  ;;  %v5693_v23 = vld [vmem:[%s15576_s3 + $0x320] sm:$0xff] }
 0x900   :  { %5847 = vmatpush.msrb.mxu0 %v5637_v3  ;;  %5905 = vmatpush.msrb.mxu3 %v5737_v0  ;;  %v5793_v3 = vld [vmem:[%s15576_s3 + $0x640] sm:$0xff]  ;;  %v5680_v0 = vld [vmem:[%s15576_s3 + $0x2b8] sm:$0xff] }
 0x901   :  { %5868 = vmatpush.msra.mxu2 %v5667_v4  ;;  %5885 = vmatpush.msra.mxu1 %v5705_v12  ;;  %v5691_v4 = vld [vmem:[%s15576_s3 + $0x310] sm:$0xff] }
 0x902   :  { %5848 = vmatpush.msrb.mxu0 %v5635_v61  ;;  %5906 = vmatpush.msrb.mxu3 %v5735_v63  ;;  %v5791_v61 = vld [vmem:[%s15576_s3 + $0x630] sm:$0xff]  ;;  %v5676_v63 = vld [vmem:[%s15576_s3 + $0x298] sm:$0xff] }
 0x903   :  { %5869 = vmatpush.msra.mxu2 %v5665_v17  ;;  %5886 = vmatpush.msra.mxu1 %v5703_v14  ;;  %v5689_v17 = vld [vmem:[%s15576_s3 + $0x300] sm:$0xff] }
 0x904   :  { %5849 = vmatpush.msrb.mxu0 %v5633_v26  ;;  %5907 = vmatpush.msrb.mxu3 %v5733_v1  ;;  %v5767_v26 = vld [vmem:[%s15576_s3 + $0x570] sm:$0xff]  ;;  %v5757_v14 = vld [vmem:[%s15576_s3 + $0x520] sm:$0xff]  ;;  %v5672_v1 = vld [vmem:[%s15576_s3 + $0x278] sm:$0xff] }
 0x905   :  { %5870 = vmatpush.msra.mxu2 %v5663_v32  ;;  %5887 = vmatpush.msra.mxu1 %v5701_v58  ;;  %v5789_v32 = vld [vmem:[%s15576_s3 + $0x620] sm:$0xff]  ;;  %v5684_v58 = vld [vmem:[%s15576_s3 + $0x2d8] sm:$0xff] }
 0x906   :  { %5850 = vmatpush.msrb.mxu0 %v5631_v20  ;;  %5908 = vmatpush.msrb.mxu3 %v5731_v18  ;;  %v5787_v20 = vld [vmem:[%s15576_s3 + $0x610] sm:$0xff] }
 0x907   :  { %5871 = vmatpush.msra.mxu2 %v5661_v47  ;;  %5888 = vmatpush.msra.mxu1 %v5699_v13  ;;  %v5723_v47 = vld [vmem:[%s15576_s3 + $0x410] sm:$0xff]  ;;  %v5612_v13 = vld [vmem:[%s15576_s3 + $0x98] sm:$0xff] }
 0x908   :  { %5851 = vmatpush.msrb.mxu0 %v5629_v11  ;;  %5909 = vmatpush.msrb.mxu3 %v5729_v59  ;;  %v5763_v11 = vld [vmem:[%s15576_s3 + $0x550] sm:$0xff]  ;;  %v5598_v59 = vld [vmem:[%s15576_s3 + $0x28] sm:$0xff] }
 0x909   :  { %5872 = vmatpush.msra.mxu2 %v5659_v48  ;;  %5889 = vmatpush.msra.mxu1 %v5697_v60  ;;  %v5785_v48 = vld [vmem:[%s15576_s3 + $0x600] sm:$0xff]  ;;  %v5608_v60 = vld [vmem:[%s15576_s3 + $0x78] sm:$0xff] }
 0x90a   :  { %5852 = vmatpush.msrb.mxu0 %v5627_v57  ;;  %5910 = vmatpush.msrb.mxu3 %v5727_v7  ;;  %v5761_v57 = vld [vmem:[%s15576_s3 + $0x540] sm:$0xff] }
 0x90b   :  { %5873 = vmatpush.msra.mxu2 %v5657_v9  ;;  %5890 = vmatpush.msra.mxu1 %v5695_v41  ;;  %v5604_v41 = vld [vmem:[%s15576_s3 + $0x58] sm:$0xff] }
 0x90c   :  { %5853 = vmatpush.msrb.mxu0 %v5625_v30  ;;  %5911 = vmatpush.msrb.mxu3 %v5725_v29  ;;  %v5622_v30 = vld [vmem:[%s15576_s3 + $0xe8] sm:$0xff]  ;;  %v5596_v29 = vld [vmem:[%s15576_s3 + $0x18] sm:$0xff] }
 0x90d   :  { %8415 = vmatpush.msk.msrb.mxu2 %vm16688_vm7, %v5807_v40  ;;  %5891 = vmatpush.msra.mxu1 %v5693_v23  ;;  %v5759_v40 = vld [vmem:[%s15576_s3 + $0x530] sm:$0xff]  ;;  %v5600_v23 = vld [vmem:[%s15576_s3 + $0x38] sm:$0xff]  ;;  %vm16704_vm7 = vmmov %vm16699_vm10 }
 0x90e   :  { %5918 = vmatpush.msra.mxu0 %v5783_v55  ;;  %5912 = vmatpush.msrb.mxu3 %v5723_v47  ;;  %v5662_v47 = vld [vmem:[%s15576_s3 + $0x228] sm:$0xff] }
 0x90f   :  { %5943 = vmatpush.msrb.mxu2 %v5805_v51  ;;  %5892 = vmatpush.msra.mxu1 %v5691_v4  ;;  %v5688_v51 = vld [vmem:[%s15576_s3 + $0x2f8] sm:$0xff] }
 0x910   :  { %5919 = vmatpush.msra.mxu0 %v5781_v2  ;;  %5913 = vmatpush.msrb.mxu3 %v5721_v36  ;;  %v5755_v2 = vld [vmem:[%s15576_s3 + $0x510] sm:$0xff] }
 0x911   :  { %5944 = vmatpush.msrb.mxu2 %v5803_v52  ;;  %5893 = vmatpush.msra.mxu1 %v5689_v17  ;;  %v5616_v52 = vld [vmem:[%s15576_s3 + $0xb8] sm:$0xff] }
 0x912   :  { %5920 = vmatpush.msra.mxu0 %v5779_v37  ;;  %v5614_v37 = vld [vmem:[%s15576_s3 + $0xa8] sm:$0xff] }
 0x913   :  { %5945 = vmatpush.msrb.mxu2 %v5801_v42  ;;  %v3869_v15 = vpop.permute.xlu2 %3868  ;;  %v5682_v42 = vld [vmem:[%s15576_s3 + $0x2c8] sm:$0xff] }
 0x914   :  { %5921 = vmatpush.msra.mxu0 %v5777_v35  ;;  %v5610_v35 = vld [vmem:[%s15576_s3 + $0x88] sm:$0xff] }
 0x915   :  { %5946 = vmatpush.msrb.mxu2 %v5799_v19  ;;  %v5678_v19 = vld [vmem:[%s15576_s3 + $0x2a8] sm:$0xff] }
 0x916   :  { %5922 = vmatpush.msra.mxu0 %v5775_v56  ;;  %v5606_v56 = vld [vmem:[%s15576_s3 + $0x68] sm:$0xff] }
 0x917   :  { %5947 = vmatpush.msrb.mxu2 %v5797_v34  ;;  %v5674_v34 = vld [vmem:[%s15576_s3 + $0x288] sm:$0xff] }
 0x918   :  { %5923 = vmatpush.msra.mxu0 %v5773_v31  ;;  %v5602_v31 = vld [vmem:[%s15576_s3 + $0x48] sm:$0xff] }
 0x919   :  { %5948 = vmatpush.msrb.mxu2 %v5795_v53  ;;  %v5670_v53 = vld [vmem:[%s15576_s3 + $0x268] sm:$0xff] }
 0x91a   :  { %5924 = vmatpush.msra.mxu0 %v5771_v28  ;;  %v5668_v28 = vld [vmem:[%s15576_s3 + $0x258] sm:$0xff] }
 0x91b   :  { %5949 = vmatpush.msrb.mxu2 %v5793_v3 }
 0x91c   :  { %5925 = vmatpush.msra.mxu0 %v5769_v50  ;;  %v5666_v50 = vld [vmem:[%s15576_s3 + $0x248] sm:$0xff] }
 0x91d   :  { %5950 = vmatpush.msrb.mxu2 %v5791_v61 }
 0x91e   :  { %5926 = vmatpush.msra.mxu0 %v5767_v26  ;;  %v5656_v26 = vld [vmem:[%s15576_s3 + $0x1f8] sm:$0xff] }
 0x91f   :  { %5951 = vmatpush.msrb.mxu2 %v5789_v32  ;;  %v5720_v32 = vld [vmem:[%s15576_s3 + $0x3f8] sm:$0xff] }
 0x920   :  { %5927 = vmatpush.msra.mxu0 %v5765_v6  ;;  %v5718_v6 = vld [vmem:[%s15576_s3 + $0x3e8] sm:$0xff] }
 0x921   :  { %5952 = vmatpush.msrb.mxu2 %v5787_v20  ;;  %v5594_v20 = vld [vmem:[%s15576_s3 + $0x8] sm:$0xff] }
 0x922   :  { %5928 = vmatpush.msra.mxu0 %v5763_v11 }
 0x923   :  { %5953 = vmatpush.msrb.mxu2 %v5785_v48  ;;  %v5652_v48 = vld [vmem:[%s15576_s3 + $0x1d8] sm:$0xff] }
 0x924   :  { %5929 = vmatpush.msra.mxu0 %v5761_v57  ;;  %v5714_v57 = vld [vmem:[%s15576_s3 + $0x3c8] sm:$0xff] }
 0x926   :  { %5930 = vmatpush.msra.mxu0 %v5759_v40  ;;  %v5710_v40 = vld [vmem:[%s15576_s3 + $0x3a8] sm:$0xff] }
 0x928   :  { %5931 = vmatpush.msra.mxu0 %v5757_v14  ;;  %v5706_v14 = vld [vmem:[%s15576_s3 + $0x388] sm:$0xff] }
 0x92a   :  { %v3871_v39 = vpop.permute.xlu0 %3870  ;;  %5932 = vmatpush.msra.mxu0 %v5755_v2  ;;  %v5638_v2 = vld [vmem:[%s15576_s3 + $0x168] sm:$0xff] }
 0x92b   :  { %v3876_v8 = vsel %vm16689_vm11, %v3869_v15, %v3871_v39  ;;  %vm16706_vm11 = vmmov %vm16704_vm7 }
 0x92c   :  { %v3880_v5 = vmax.f32 %v3844_v21, %v3876_v8  ;;  %5933 = vmatpush.msra.mxu0 %v5753_v49  ;;  %v3845_v21 = vmax.f32 %v13769_v38, %v13837_v43  ;;  %v5716_v8 = vld [vmem:[%s15576_s3 + $0x3d8] sm:$0xff] }
 0x92d   :  { %v14232_v9 = vpop.permute.xlu2 %8762  ;;  %v5660_v38 = vld [vmem:[%s15576_s3 + $0x218] sm:$0xff] }
 0x92e   :  { %v8765_v54 = vunpack.i.h.bf16 %v14232_v9  ;;  %v8764_v33 = vunpack.i.l.bf16 %v14232_v9  ;;  %8409 = vmatmul.msk.f32.vlgmr.msrb.gmra.mxu1 %vm3898_vm3, %v3880_v5  ;;  %v5658_v9 = vld [vmem:[%s15576_s3 + $0x208] sm:$0xff]  ;;  %v5700_v49 = vld [vmem:[%s15576_s3 + $0x358] sm:$0xff] }
 0x92f   :  { %5958 = vmatpush.msrb.mxu1 %v5624_v46  ;;  %v5650_v46 = vld [vmem:[%s15576_s3 + $0x1c8] sm:$0xff] }
 0x930   :  { %v5573_v12 = vsel %vm367_vm4, %v8764_v33, %v8765_v54  ;;  %v5648_v33 = vld [vmem:[%s15576_s3 + $0x1b8] sm:$0xff] }
 0x931   :  { %v14250_v55 = vmax.f32 %v13822_v62, %v5573_v12  ;;  %5959 = vmatpush.msrb.mxu1 %v5622_v30  ;;  %v5686_v62 = vld [vmem:[%s15576_s3 + $0x2e8] sm:$0xff]  ;;  %v5712_v30 = vld [vmem:[%s15576_s3 + $0x3b8] sm:$0xff] }
 0x932   :  { %v5644_v12 = vld [vmem:[%s15576_s3 + $0x198] sm:$0xff] }
 0x933   :  { %5834 = vmatmul.f32.vlgmr.msra.gmra.mxu3 %v14250_v55  ;;  %5960 = vmatpush.msrb.mxu1 %v5620_v22  ;;  %v5708_v22 = vld [vmem:[%s15576_s3 + $0x398] sm:$0xff] }
 0x934   :  { %5998 = vmatpush.msra.mxu3 %v5688_v51  ;;  %v5642_v51 = vld [vmem:[%s15576_s3 + $0x188] sm:$0xff] }
 0x935   :  { %5961 = vmatpush.msrb.mxu1 %v5618_v45  ;;  %v5640_v45 = vld [vmem:[%s15576_s3 + $0x178] sm:$0xff] }
 0x936   :  { %5999 = vmatpush.msra.mxu3 %v5686_v62  ;;  %v5704_v62 = vld [vmem:[%s15576_s3 + $0x378] sm:$0xff] }
 0x937   :  { %5962 = vmatpush.msrb.mxu1 %v5616_v52  ;;  %v5702_v52 = vld [vmem:[%s15576_s3 + $0x368] sm:$0xff] }
 0x938   :  { %6000 = vmatpush.msra.mxu3 %v5684_v58  ;;  %v5636_v58 = vld [vmem:[%s15576_s3 + $0x158] sm:$0xff] }
 0x939   :  { %5963 = vmatpush.msrb.mxu1 %v5614_v37  ;;  %v5634_v37 = vld [vmem:[%s15576_s3 + $0x148] sm:$0xff] }
 0x93a   :  { %6001 = vmatpush.msra.mxu3 %v5682_v42  ;;  %v5698_v42 = vld [vmem:[%s15576_s3 + $0x348] sm:$0xff] }
 0x93b   :  { %5964 = vmatpush.msrb.mxu1 %v5612_v13 }
 0x93c   :  { %6002 = vmatpush.msra.mxu3 %v5680_v0 }
 0x93d   :  { %5965 = vmatpush.msrb.mxu1 %v5610_v35  ;;  %v5632_v35 = vld [vmem:[%s15576_s3 + $0x138] sm:$0xff] }
 0x93e   :  { %6003 = vmatpush.msra.mxu3 %v5678_v19 }
 0x93f   :  { %5966 = vmatpush.msrb.mxu1 %v5608_v60  ;;  %v5752_v60 = vld [vmem:[%s15576_s3 + $0x4f8] sm:$0xff] }
 0x940   :  { %6004 = vmatpush.msra.mxu3 %v5676_v63  ;;  %v5696_v63 = vld [vmem:[%s15576_s3 + $0x338] sm:$0xff] }
 0x941   :  { %5967 = vmatpush.msrb.mxu1 %v5606_v56  ;;  %v5630_v56 = vld [vmem:[%s15576_s3 + $0x128] sm:$0xff] }
 0x942   :  { %6005 = vmatpush.msra.mxu3 %v5674_v34  ;;  %v5694_v34 = vld [vmem:[%s15576_s3 + $0x328] sm:$0xff] }
 0x943   :  { %5968 = vmatpush.msrb.mxu1 %v5604_v41  ;;  %v5628_v41 = vld [vmem:[%s15576_s3 + $0x118] sm:$0xff] }
 0x944   :  { %6006 = vmatpush.msra.mxu3 %v5672_v1 }
 0x945   :  { %v14322_v18 = vpop.permute.xlu1 %8757  ;;  %5969 = vmatpush.msrb.mxu1 %v5602_v31  ;;  %v5748_v31 = vld [vmem:[%s15576_s3 + $0x4d8] sm:$0xff] }
 0x946   :  { %v8760_v3 = vunpack.i.h.bf16 %v14322_v18  ;;  %v8759_v4 = vunpack.i.l.bf16 %v14322_v18  ;;  %6007 = vmatpush.msra.mxu3 %v5670_v53  ;;  %v5692_v53 = vld [vmem:[%s15576_s3 + $0x318] sm:$0xff] }
 0x947   :  { %5970 = vmatpush.msrb.mxu1 %v5600_v23 }
 0x948   :  { %v5574_v61 = vsel %vm367_vm4, %v8765_v54, %v8759_v4  ;;  %v5575_v17 = vsel %vm367_vm4, %v8759_v4, %v8760_v3  ;;  %6008 = vmatpush.msra.mxu3 %v5668_v28  ;;  %v5626_v28 = vld [vmem:[%s15576_s3 + $0x108] sm:$0xff] }
 0x949   :  { %v14342_v15 = vmax.f32 %v13825_v24, %v5574_v61  ;;  %v14345_v7 = vmax.f32 %v13828_v16, %v5575_v17  ;;  %5971 = vmatpush.msrb.mxu1 %v5598_v59  ;;  %v5664_v24 = vld [vmem:[%s15576_s3 + $0x238] sm:$0xff]  ;;  %v5654_v16 = vld [vmem:[%s15576_s3 + $0x1e8] sm:$0xff]  ;;  %v3873_v39 = vpop.permute.xlu0 %3872 }
 0x94a   :  { %6009 = vmatpush.msra.mxu3 %v5666_v50  ;;  %v5784_v59 = vld [vmem:[%s15576_s3 + $0x5f8] sm:$0xff]  ;;  %v5746_v50 = vld [vmem:[%s15576_s3 + $0x4c8] sm:$0xff] }
 0x94b   :  { %5854 = vmatmul.f32.vlgmr.msrb.gmra.mxu0 %v14342_v15  ;;  %5874 = vmatmul.f32.vlgmr.msra.gmra.mxu2 %v14345_v7  ;;  %v5744_v61 = vld [vmem:[%s15576_s3 + $0x4b8] sm:$0xff]  ;;  %v5806_v17 = vld [vmem:[%s15576_s3 + $0x6a8] sm:$0xff] }
 0x94c   :  { %5978 = vmatpush.msra.mxu2 %v5656_v26  ;;  %6018 = vmatpush.msrb.mxu0 %v5720_v32  ;;  %v5780_v26 = vld [vmem:[%s15576_s3 + $0x5d8] sm:$0xff]  ;;  %v5742_v32 = vld [vmem:[%s15576_s3 + $0x4a8] sm:$0xff] }
 0x94d   :  { %v3875_v11 = vpop.permute.xlu1 %3874  ;;  %5972 = vmatpush.msrb.mxu1 %v5596_v29  ;;  %6010 = vmatpush.msra.mxu3 %v5664_v24  ;;  %v14382_v5 = vpop.permute.xlu2 %5571  ;;  %v5804_v29 = vld [vmem:[%s15576_s3 + $0x698] sm:$0xff]  ;;  %v5778_v24 = vld [vmem:[%s15576_s3 + $0x5c8] sm:$0xff] }
 0x94e   :  { %v3877_v36 = vsel %vm16690_vm12, %v3873_v39, %v3875_v11  ;;  %5979 = vmatpush.msra.mxu2 %v5654_v16  ;;  %6019 = vmatpush.msrb.mxu0 %v5718_v6  ;;  %v14398_v54 = vmax.f32 %v13889_v10, %v14382_v5  ;;  %v5646_v10 = vld [vmem:[%s15576_s3 + $0x1a8] sm:$0xff]  ;;  %v5776_v6 = vld [vmem:[%s15576_s3 + $0x5b8] sm:$0xff]  ;;  %vm16717_vm12 = vcmask 1022976  }
 0x94f   :  { %v3881_v43 = vmax.f32 %v3845_v21, %v3877_v36  ;;  %5973 = vmatpush.msrb.mxu1 %v5594_v20  ;;  %6011 = vmatpush.msra.mxu3 %v5662_v47  ;;  %v5802_v16 = vld [vmem:[%s15576_s3 + $0x688] sm:$0xff]  ;;  %v5800_v47 = vld [vmem:[%s15576_s3 + $0x678] sm:$0xff] }
 0x950   :  { %5980 = vmatpush.msra.mxu2 %v5652_v48  ;;  %6020 = vmatpush.msrb.mxu0 %v5716_v8  ;;  %v5738_v20 = vld [vmem:[%s15576_s3 + $0x488] sm:$0xff]  ;;  %v5736_v39 = vld [vmem:[%s15576_s3 + $0x478] sm:$0xff] }
 0x951   :  { %8410 = vmatmul.msk.f32.gmra.mxu1 %vm3898_vm3, %v3881_v43  ;;  %6012 = vmatpush.msra.mxu3 %v5660_v38  ;;  %v5774_v21 = vld [vmem:[%s15576_s3 + $0x5a8] sm:$0xff]  ;;  %v5772_v48 = vld [vmem:[%s15576_s3 + $0x598] sm:$0xff] }
 0x952   :  { %5981 = vmatpush.msra.mxu2 %v5650_v46  ;;  %6021 = vmatpush.msrb.mxu0 %v5714_v57  ;;  %v5798_v11 = vld [vmem:[%s15576_s3 + $0x668] sm:$0xff]  ;;  %v5768_v43 = vld [vmem:[%s15576_s3 + $0x578] sm:$0xff] }
 0x953   :  { %8416 = vmatmul.msk.f32.vlgmr.msrb.gmra.mxu2 %vm425_vm5, %v14398_v54  ;;  %6013 = vmatpush.msra.mxu3 %v5658_v9  ;;  %v5734_v8 = vld [vmem:[%s15576_s3 + $0x468] sm:$0xff]  ;;  %v5792_v57 = vld [vmem:[%s15576_s3 + $0x638] sm:$0xff] }
 0x954   :  { %5982 = vmatpush.msra.mxu2 %v5648_v33  ;;  %6022 = vmatpush.msrb.mxu0 %v5712_v30  ;;  %v5770_v36 = vld [vmem:[%s15576_s3 + $0x588] sm:$0xff]  ;;  %v5728_v33 = vld [vmem:[%s15576_s3 + $0x438] sm:$0xff] }
 0x955   :  { %v5794_v38 = vld [vmem:[%s15576_s3 + $0x648] sm:$0xff] }
 0x956   :  { %5983 = vmatpush.msra.mxu2 %v5646_v10  ;;  %6023 = vmatpush.msrb.mxu0 %v5710_v40  ;;  %v5730_v46 = vld [vmem:[%s15576_s3 + $0x448] sm:$0xff]  ;;  %v5764_v10 = vld [vmem:[%s15576_s3 + $0x558] sm:$0xff] }
 0x957   :  { %v5766_v9 = vld [vmem:[%s15576_s3 + $0x568] sm:$0xff] }
 0x958   :  { %5984 = vmatpush.msra.mxu2 %v5644_v12  ;;  %6024 = vmatpush.msrb.mxu0 %v5708_v22  ;;  %v5790_v30 = vld [vmem:[%s15576_s3 + $0x628] sm:$0xff]  ;;  %v5788_v12 = vld [vmem:[%s15576_s3 + $0x618] sm:$0xff] }
 0x959   :  { %v5726_v40 = vld [vmem:[%s15576_s3 + $0x428] sm:$0xff] }
 0x95a   :  { %5985 = vmatpush.msra.mxu2 %v5642_v51  ;;  %6025 = vmatpush.msrb.mxu0 %v5706_v14  ;;  %v5762_v22 = vld [vmem:[%s15576_s3 + $0x548] sm:$0xff]  ;;  %v5724_v51 = vld [vmem:[%s15576_s3 + $0x418] sm:$0xff] }
 0x95b   :  { %v5786_v14 = vld [vmem:[%s15576_s3 + $0x608] sm:$0xff] }
 0x95c   :  { %5986 = vmatpush.msra.mxu2 %v5640_v45  ;;  %6026 = vmatpush.msrb.mxu0 %v5704_v62  ;;  %v5760_v45 = vld [vmem:[%s15576_s3 + $0x538] sm:$0xff]  ;;  %v5722_v62 = vld [vmem:[%s15576_s3 + $0x408] sm:$0xff] }
 0x95e   :  { %5987 = vmatpush.msra.mxu2 %v5638_v2  ;;  %6027 = vmatpush.msrb.mxu0 %v5702_v52  ;;  %v5758_v2 = vld [vmem:[%s15576_s3 + $0x528] sm:$0xff]  ;;  %v5756_v52 = vld [vmem:[%s15576_s3 + $0x518] sm:$0xff] }
 0x960   :  { %5988 = vmatpush.msra.mxu2 %v5636_v58  ;;  %v5568_v13 = vpop.permute.xlu0 %5567  ;;  %6028 = vmatpush.msrb.mxu0 %v5700_v49  ;;  %v5754_v58 = vld [vmem:[%s15576_s3 + $0x508] sm:$0xff] }
 0x961   :  { %v5576_v0 = vsel %vm367_vm4, %v8760_v3, %v5568_v13 }
 0x962   :  { %v5589_v19 = vmax.f32 %v13831_v27, %v5576_v0  ;;  %5989 = vmatpush.msra.mxu2 %v5634_v37  ;;  %6029 = vmatpush.msrb.mxu0 %v5698_v42  ;;  %v5750_v27 = vld [vmem:[%s15576_s3 + $0x4e8] sm:$0xff]  ;;  %v14634_v37 = vld [vmem:[%s15577_s4 + $0x10] sm:$0xff]  ;;  %v14644_v42 = vld [vmem:[%s15577_s4] sm:$0xff] }
 0x963   :  { %6108 = vrot.lane.b32.xlu2 %v14634_v37, %s16692_s1  ;;  %6106 = vrot.lane.b32.xlu1 %v14644_v42, %s16692_s1 }
 0x964   :  { %5990 = vmatpush.msra.mxu2 %v5632_v35  ;;  %5894 = vmatmul.f32.vlgmr.msra.gmra.mxu1 %v5589_v19 }
 0x965   :  { %6038 = vmatpush.msra.mxu1 %v5752_v60  ;;  %6030 = vmatpush.msrb.mxu0 %v5696_v63 }
 0x966   :  { %5991 = vmatpush.msra.mxu2 %v5630_v56  ;;  %v5570_v1 = vpop.permute.xlu1 %5569 }
 0x967   :  { %v5577_v23 = vsel %vm367_vm4, %v5568_v13, %v5570_v1  ;;  %v5578_v18 = vsel %vm367_vm4, %v5570_v1, %v14382_v5  ;;  %6039 = vmatpush.msra.mxu1 %v5750_v27  ;;  %6031 = vmatpush.msrb.mxu0 %v5694_v34  ;;  %v5732_v5 = vld [vmem:[%s15576_s3 + $0x458] sm:$0xff] }
 0x968   :  { %v14489_v3 = vmax.f32 %v13883_v44, %v5577_v23  ;;  %v14492_v4 = vmax.f32 %v13892_v25, %v5578_v18  ;;  %5992 = vmatpush.msra.mxu2 %v5628_v41  ;;  %v5808_v44 = vld [vmem:[%s15576_s3 + $0x6b8] sm:$0x7f]  ;;  %v5782_v25 = vld [vmem:[%s15576_s3 + $0x5e8] sm:$0xff] }
 0x969   :  { %6040 = vmatpush.msra.mxu1 %v5748_v31  ;;  %6032 = vmatpush.msrb.mxu0 %v5692_v53 }
 0x96a   :  { %5993 = vmatpush.msra.mxu2 %v5626_v28  ;;  %5914 = vmatmul.f32.vlgmr.msrb.gmra.mxu3 %v14489_v3 }
 0x96b   :  { %5994 = vmatmul.f32.vlgmr.msra.gmra.mxu2 %v14342_v15  ;;  %5934 = vmatmul.f32.vlgmr.msra.gmra.mxu0 %v14492_v4  ;;  %v5690_v15 = vld [vmem:[%s15576_s3 + $0x308] sm:$0xff] }
 0x96c   :  { %6058 = vmatpush.msrb.mxu2 %v5784_v59  ;;  %6041 = vmatpush.msra.mxu1 %v5746_v50 }
 0x96d   :  { %8417 = vmatpush.msk.msrb.mxu3 %vm16691_vm2, %v5808_v44  ;;  %5974 = vmatmul.f32.vlgmr.msrb.gmra.mxu1 %v14250_v55  ;;  %v5740_v55 = vld [vmem:[%s15576_s3 + $0x498] sm:$0xff]  ;;  %vm16718_vm2 = vmmov %vm16702_vm8 }
 0x96e   :  { %6059 = vmatpush.msrb.mxu2 %v5782_v25  ;;  %6042 = vmatpush.msra.mxu1 %v5744_v61 }
 0x96f   :  { %6083 = vmatpush.msrb.mxu3 %v5806_v17  ;;  %6033 = vmatpush.msrb.mxu0 %v5690_v15 }
 0x970   :  { %6060 = vmatpush.msrb.mxu2 %v5780_v26  ;;  %6043 = vmatpush.msra.mxu1 %v5742_v32 }
 0x971   :  { %6084 = vmatpush.msrb.mxu3 %v5804_v29  ;;  %6294 = vrot.lane.b32.xlu1 %v14634_v37, %s16694_s25 }
 0x972   :  { %6061 = vmatpush.msrb.mxu2 %v5778_v24  ;;  %6044 = vmatpush.msra.mxu1 %v5740_v55 }
 0x973   :  { %6085 = vmatpush.msrb.mxu3 %v5802_v16  ;;  %6034 = vmatmul.f32.vlgmr.msrb.gmra.mxu0 %v5589_v19 }
 0x974   :  { %6062 = vmatpush.msrb.mxu2 %v5776_v6  ;;  %6014 = vmatmul.f32.vlgmr.msra.gmra.mxu3 %v14345_v7  ;;  %v5796_v7 = vld [vmem:[%s15576_s3 + $0x658] sm:$0xff]  ;;  %s16693_s3 = smov 116  }
 0x975   :  { %6045 = vmatpush.msra.mxu1 %v5738_v20  ;;  %6086 = vmatpush.msrb.mxu3 %v5800_v47 }
 0x976   :  { %6063 = vmatpush.msrb.mxu2 %v5774_v21  ;;  %6227 = vrot.lane.b32.xlu0 %v14634_v37, %s16693_s3 }
 0x977   :  { %6046 = vmatpush.msra.mxu1 %v5736_v39  ;;  %6087 = vmatpush.msrb.mxu3 %v5798_v11 }
 0x978   :  { %6064 = vmatpush.msrb.mxu2 %v5772_v48  ;;  %6225 = vrot.lane.b32.xlu2 %v14644_v42, %s16693_s3  ;;  %s16708_s3 = smov 100  }
 0x979   :  { %6047 = vmatpush.msra.mxu1 %v5734_v8  ;;  %6088 = vmatpush.msrb.mxu3 %v5796_v7 }
 0x97a   :  { %6065 = vmatpush.msrb.mxu2 %v5770_v36 }
 0x97b   :  { %6048 = vmatpush.msra.mxu1 %v5732_v5  ;;  %6089 = vmatpush.msrb.mxu3 %v5794_v38 }
 0x97c   :  { %6066 = vmatpush.msrb.mxu2 %v5768_v43 }
 0x97d   :  { %6049 = vmatpush.msra.mxu1 %v5730_v46  ;;  %6090 = vmatpush.msrb.mxu3 %v5792_v57 }
 0x97e   :  { %6067 = vmatpush.msrb.mxu2 %v5766_v9  ;;  %6292 = vrot.lane.b32.xlu0 %v14644_v42, %s16694_s25 }
 0x97f   :  { %6050 = vmatpush.msra.mxu1 %v5728_v33  ;;  %6091 = vmatpush.msrb.mxu3 %v5790_v30 }
 0x980   :  { %6068 = vmatpush.msrb.mxu2 %v5764_v10  ;;  %6361 = vrot.lane.b32.xlu2 %v14634_v37, %s16695_s22 }
 0x981   :  { %6051 = vmatpush.msra.mxu1 %v5726_v40  ;;  %6092 = vmatpush.msrb.mxu3 %v5788_v12 }
 0x982   :  { %6069 = vmatpush.msrb.mxu2 %v5762_v22 }
 0x983   :  { %6052 = vmatpush.msra.mxu1 %v5724_v51  ;;  %6093 = vmatpush.msrb.mxu3 %v5786_v14 }
 0x984   :  { %6070 = vmatpush.msrb.mxu2 %v5760_v45  ;;  %8418 = vmatmul.msk.f32.vlgmr.msrb.gmra.mxu3 %vm425_vm5, %v14398_v54  ;;  %vm15941_vm5 = vcmask 196608  }
 0x985   :  { %6053 = vmatpush.msra.mxu1 %v5722_v62 }
 0x986   :  { %6054 = vmatmul.f32.vlgmr.msra.gmra.mxu1 %v14489_v3  ;;  %6071 = vmatpush.msrb.mxu2 %v5758_v2 }
 0x987   :  { %6359 = vrot.lane.b32.xlu0 %v14644_v42, %s16695_s22  ;;  %s16713_s22 = smov 97  }
 0x988   :  { %6072 = vmatpush.msrb.mxu2 %v5756_v52  ;;  %6426 = vrot.lane.b32.xlu2 %v14644_v42, %s16696_s18 }
 0x98a   :  { %6073 = vmatpush.msrb.mxu2 %v5754_v58 }
 0x98b   :  { %6074 = vmatmul.f32.vlgmr.msrb.gmra.mxu2 %v14492_v4 }
 0x9ab   :  { %v3926_v49 = vpop.f32.mrf.mxu1 }
 0x9ac   :  { %3933 = vst.msk [vmem:[#allocation5] sm:$0xff] %vm3932_vm14, %v3926_v49 }
 0x9b3   :  { %v3935_v54 = vld [vmem:[#allocation5] sm:$0x1] }
 0x9b4   :  { %3937 = vst.msk [vmem:[#allocation6] sm:$0x1] %vm15941_vm5, %v3935_v54 }
 0x9b6   :  { %v5835_v0 = vpop.f32.mrf.mxu3 }
 0x9bd   :  { %v14715_v55 = vpop.permute.xlu2 %6108 }
 0x9c8   :  { %v5855_v35 = vpop.f32.mrf.mxu0 }
 0x9c9   :  { %v5856_v60 = vadd.f32 %v5855_v35, %v5835_v0 }
 0x9ce   :  { %v3929_v13 = vpop.f32.mrf.mxu1  ;;  %v5875_v19 = vpop.f32.mrf.mxu2 }
 0x9cf   :  { %3934 = vst.msk [vmem:[#allocation5 + $0x8] sm:$0xff] %vm3932_vm14, %v3929_v13  ;;  %v5876_v56 = vadd.f32 %v5875_v19, %v5856_v60 }
 0x9d2   :  { %v14723_v16 = vpop.permute.xlu2 %6225 }
 0x9d5   :  { %v14753_v21 = vpop.permute.xlu1 %6106 }
 0x9d6   :  { %v5955_v53 = vpop.f32.mrf.mxu2 }
 0x9da   :  { %v14733_v6 = vpop.permute.xlu2 %6361 }
 0x9e1   :  { %v5895_v63 = vpop.f32.mrf.mxu1 }
 0x9e2   :  { %v5896_v27 = vadd.f32 %v5895_v63, %v5876_v56  ;;  %v14745_v20 = vpop.permute.xlu2 %6426 }
 0x9e3   :  { %v6295_v48 = vpop.permute.xlu1 %6294 }
 0x9e8   :  { %v5935_v1 = vpop.f32.mrf.mxu0  ;;  %v14759_v39 = vpop.permute.xlu0 %6227 }
 0x9ea   :  { %v5975_v28 = vpop.f32.mrf.mxu1 }
 0x9ed   :  { %v5915_v34 = vpop.f32.mrf.mxu3 }
 0x9ee   :  { %v5916_v41 = vadd.f32 %v5915_v34, %v5896_v27  ;;  %v5995_v3 = vpop.f32.mrf.mxu2 }
 0x9ef   :  { %v5996_v59 = vadd.f32 %v5995_v3, %v5975_v28 }
 0x9f0   :  { %v5936_v31 = vadd.f32 %v5935_v1, %v5916_v41  ;;  %v6035_v44 = vpop.f32.mrf.mxu0  ;;  %v6293_v8 = vpop.permute.xlu0 %6292 }
 0x9f2   :  { %v5956_v23 = vadd.f32 %v5955_v53, %v5936_v31 }
 0x9f4   :  { %6098 = vst [vmem:[#allocation3] sm:$0x3f] %v5956_v23 }
 0x9f7   :  { %v6015_v4 = vpop.f32.mrf.mxu3 }
 0x9f8   :  { %v6016_v50 = vadd.f32 %v6015_v4, %v5996_v59  ;;  %v7499_v59 = vld [vmem:[%s15577_s4 + $0x8] sm:$0xff] }
 0x9f9   :  { %v14781_v38 = vpop.permute.xlu0 %6359 }
 0x9fa   :  { %v6036_v61 = vadd.f32 %v6035_v44, %v6016_v50 }
 0x9fb   :  { %v14661_v18 = vld [vmem:[#allocation3] sm:$0x3f] }
 0x9fc   :  { %6296 = vrot.lane.b32.xlu1 %v14661_v18, %s8816_s14  ;;  %6229 = vrot.lane.b32.xlu0 %v14661_v18, %s8813_s30 }
 0x9fd   :  { %6112 = vrot.lane.b32.xlu2 %v14661_v18, %s8812_s29  ;;  %8425 = vmatpush.msk.msra.mxu3 %vm16697_vm13, %v14661_v18  ;;  %vm16719_vm13 = vmmov %vm16718_vm2 }
 0x9fe   :  { %8426 = vmatmul.msk.f32.vlgmr.msra.gmra.mxu3 %vm16698_vm15, %v14644_v42  ;;  %vm16720_vm15 = vmmov %vm16704_vm7 }
 0xa03   :  { %v6055_v25 = vpop.f32.mrf.mxu1 }
 0xa04   :  { %6363 = vrot.lane.b32.xlu1 %v14661_v18, %s8820_s15  ;;  %6430 = vrot.lane.b32.xlu0 %v14661_v18, %s16687_s0  ;;  %v6056_v17 = vadd.f32 %v6055_v25, %v6036_v61 }
 0xa05   :  { %6493 = vrot.lane.b32.xlu2 %v14644_v42, %s8829_s20 }
 0xa06   :  { %8427 = vmatmul.msk.f32.gmra.mxu3 %vm16699_vm10, %v14634_v37  ;;  %vm16721_vm10 = vmmov %vm16704_vm7 }
 0xa07   :  { %v6095_v32 = vpop.f32.mrf.mxu3 }
 0xa0c   :  { %6495 = vrot.lane.b32.xlu1 %v14634_v37, %s8829_s20  ;;  %s16703_s20 = smov 80  }
 0xa0d   :  { %6564 = vrot.lane.b32.xlu2 %v14661_v18, %s8854_s17 }
 0xa0e   :  { %v6075_v15 = vpop.f32.mrf.mxu2 }
 0xa0f   :  { %v6076_v26 = vadd.f32 %v6075_v15, %v6056_v17 }
 0xa11   :  { %v6096_v29 = vadd.f32 %v6095_v32, %v6076_v26 }
 0xa13   :  { %6099 = vst [vmem:[#allocation3 + $0x8] sm:$0x3f] %v6096_v29 }
 0xa14   :  { %6560 = vrot.lane.b32.xlu1 %v14644_v42, %s16700_s16 }
 0xa15   :  { %6631 = vrot.lane.b32.xlu2 %v14661_v18, %s16701_s2 }
 0xa1a   :  { %v14689_v24 = vld [vmem:[#allocation3 + $0x8] sm:$0x3f] }
 0xa1b   :  { %8428 = vmatpush.msk.msrb.mxu1 %vm16702_vm8, %v14689_v24  ;;  %6114 = vrot.lane.b32.xlu0 %v14689_v24, %s8812_s29  ;;  %vm16724_vm8 = vmmov %vm16718_vm2 }
 0xa1c   :  { %6627 = vrot.lane.b32.xlu1 %v14644_v42, %s16703_s20  ;;  %8429 = vmatmul.msk.f32.vlgmr.msrb.gmra.mxu1 %vm16704_vm7, %v14644_v42 }
 0xa1d   :  { %6562 = vrot.lane.b32.xlu2 %v14634_v37, %s16700_s16 }
 0xa23   :  { %6497 = vrot.lane.b32.xlu0 %v14661_v18, %s16705_s26 }
 0xa24   :  { %6698 = vrot.lane.b32.xlu1 %v14661_v18, %s16694_s25  ;;  %8430 = vmatmul.msk.f32.gmra.mxu1 %vm16706_vm11, %v14634_v37  ;;  %vm16725_vm11 = vmmov %vm16718_vm2 }
 0xa25   :  { %6763 = vrot.lane.b32.xlu2 %v14634_v37, %s16707_s21 }
 0xa2b   :  { %6428 = vrot.lane.b32.xlu0 %v14634_v37, %s16696_s18 }
 0xa2c   :  { %6231 = vrot.lane.b32.xlu1 %v14689_v24, %s8813_s30  ;;  %s16710_s30 = smov 62  }
 0xa2d   :  { %6298 = vrot.lane.b32.xlu2 %v14689_v24, %s8816_s14 }
 0xa33   :  { %6629 = vrot.lane.b32.xlu0 %v14634_v37, %s16703_s20  ;;  %s16716_s20 = smov 85  }
 0xa34   :  { %6765 = vrot.lane.b32.xlu1 %v14661_v18, %s16708_s3 }
 0xa35   :  { %6365 = vrot.lane.b32.xlu2 %v14689_v24, %s8820_s15 }
 0xa3b   :  { %6694 = vrot.lane.b32.xlu0 %v14644_v42, %s16709_s23 }
 0xa3c   :  { %6696 = vrot.lane.b32.xlu1 %v14634_v37, %s16709_s23  ;;  %s16729_s23 = smov 20  }
 0xa3d   :  { %6700 = vrot.lane.b32.xlu2 %v14689_v24, %s16694_s25  ;;  %s16712_s25 = smov 56  }
 0xa43   :  { %6761 = vrot.lane.b32.xlu0 %v14644_v42, %s16707_s21 }
 0xa44   :  { %6432 = vrot.lane.b32.xlu1 %v14689_v24, %s16687_s0 }
 0xa45   :  { %6767 = vrot.lane.b32.xlu2 %v14689_v24, %s16708_s3 }
 0xa4b   :  { %6566 = vrot.lane.b32.xlu0 %v14689_v24, %s8854_s17 }
 0xa4c   :  { %6499 = vrot.lane.b32.xlu1 %v14689_v24, %s16705_s26  ;;  %s16728_s26 = smov 84  }
 0xa4d   :  { %6828 = vrot.lane.b32.xlu2 %v14644_v42, %s16710_s30 }
 0xa53   :  { %6633 = vrot.lane.b32.xlu0 %v14689_v24, %s16701_s2  ;;  %s16714_s2 = smov 50  }
 0xa54   :  { %6834 = vrot.lane.b32.xlu1 %v14689_v24, %s16711_s24 }
 0xa55   :  { %6895 = vrot.lane.b32.xlu2 %v14644_v42, %s16712_s25 }
 0xa57   :  { %v6113_v47 = vpop.permute.xlu2 %6112 }
 0xa5b   :  { %6832 = vrot.lane.b32.xlu0 %v14661_v18, %s16711_s24  ;;  %s16739_s24 = smov 72  }
 0xa5c   :  { %6901 = vrot.lane.b32.xlu1 %v14689_v24, %s16696_s18 }
 0xa5d   :  { %6966 = vrot.lane.b32.xlu2 %v14661_v18, %s16713_s22 }
 0xa5f   :  { %v14763_v11 = vpop.permute.xlu2 %6493 }
 0xa63   :  { %6899 = vrot.lane.b32.xlu0 %v14661_v18, %s16696_s18  ;;  %s16715_s18 = smov 44  }
 0xa64   :  { %6897 = vrot.lane.b32.xlu1 %v14634_v37, %s16712_s25  ;;  %s16742_s25 = smov 14  }
 0xa65   :  { %7033 = vrot.lane.b32.xlu2 %v14661_v18, %s16232_s19 }
 0xa67   :  { %v14771_v7 = vpop.permute.xlu2 %6564 }
 0xa6b   :  { %6830 = vrot.lane.b32.xlu0 %v14634_v37, %s16710_s30  ;;  %s16731_s30 = smov 83  }
 0xa6c   :  { %6962 = vrot.lane.b32.xlu1 %v14644_v42, %s16714_s2 }
 0xa6d   :  { %6964 = vrot.lane.b32.xlu2 %v14634_v37, %s16714_s2 }
 0xa6e   :  { %v6297_v36 = vpop.permute.xlu1 %6296  ;;  %v6230_v57 = vpop.permute.xlu0 %6229 }
 0xa6f   :  { %v14779_v5 = vpop.permute.xlu2 %6631 }
 0xa73   :  { %6968 = vrot.lane.b32.xlu0 %v14689_v24, %s16713_s22 }
 0xa74   :  { %7029 = vrot.lane.b32.xlu1 %v14644_v42, %s16715_s18 }
 0xa75   :  { %7102 = vrot.lane.b32.xlu2 %v14689_v24, %s16700_s16 }
 0xa76   :  { %v6364_v43 = vpop.permute.xlu1 %6363  ;;  %v14805_v30 = vpop.permute.xlu0 %6430 }
 0xa77   :  { %v14789_v46 = vpop.permute.xlu2 %6562 }
 0xa7b   :  { %7035 = vrot.lane.b32.xlu0 %v14689_v24, %s16232_s19  ;;  %s16722_s19 = smov 38  }
 0xa7c   :  { %7100 = vrot.lane.b32.xlu1 %v14661_v18, %s16700_s16  ;;  %s16723_s16 = smov 26  }
 0xa7d   :  { %7169 = vrot.lane.b32.xlu2 %v14689_v24, %s16716_s20 }
 0xa7e   :  { %v14797_v9 = vpop.permute.xlu1 %6495 }
 0xa7f   :  { %v14799_v33 = vpop.permute.xlu2 %6763 }
 0xa83   :  { %7031 = vrot.lane.b32.xlu0 %v14634_v37, %s16715_s18 }
 0xa84   :  { %7167 = vrot.lane.b32.xlu1 %v14661_v18, %s16716_s20  ;;  %s16745_s20 = smov 8  }
 0xa85   :  { %7165 = vrot.lane.b32.xlu2 %v14634_v37, %s16233_s28 }
 0xa86   :  { %v14809_v10 = vpop.permute.xlu1 %6560 }
 0xa87   :  { %v6299_v40 = vpop.permute.xlu2 %6298 }
 0xa88   :  { %v6300_v12 = vsel %vm16717_vm12, %v6297_v36, %v6299_v40  ;;  %8440 = vmatpush.msk.msra.mxu1 %vm16718_vm2, %v6299_v40  ;;  %vm16726_vm12 = vmmov %vm16704_vm7 }
 0xa89   :  { %8437 = vmatpush.msk.msrb.mxu3 %vm16719_vm13, %v6300_v12  ;;  %8441 = vmatmul.msk.f32.vlgmr.msra.gmra.mxu1 %vm16720_vm15, %v6293_v8  ;;  %vm16727_vm2 = vmmov %vm16704_vm7 }
 0xa8a   :  { %8438 = vmatmul.msk.f32.vlgmr.msrb.gmra.mxu3 %vm16721_vm10, %v6293_v8  ;;  %vm16730_vm13 = vmmov %vm16727_vm2 }
 0xa8b   :  { %7096 = vrot.lane.b32.xlu0 %v14644_v42, %s16722_s19  ;;  %vm16733_vm15 = vmmov %vm16724_vm8 }
 0xa8c   :  { %7098 = vrot.lane.b32.xlu1 %v14634_v37, %s16722_s19  ;;  %vm16734_vm10 = vmmov %vm16727_vm2  ;;  %s16746_s19 = smov 71  }
 0xa8d   :  { %v6115_v22 = vpop.permute.xlu0 %6114  ;;  %7230 = vrot.lane.b32.xlu2 %v14644_v42, %s16723_s16 }
 0xa8e   :  { %v6116_v51 = vsel %vm135_vm0, %v6113_v47, %v6115_v22  ;;  %v14823_v14 = vpop.permute.xlu1 %6627 }
 0xa8f   :  { %8419 = vmatpush.msk.msra.mxu0 %vm16724_vm8, %v6116_v51  ;;  %v6366_v45 = vpop.permute.xlu2 %6365 }
 0xa90   :  { %8420 = vmatmul.msk.f32.vlgmr.msra.gmra.mxu0 %vm16704_vm7, %v14753_v21  ;;  %vm16735_vm7 = vcmask 1014784  }
 0xa91   :  { %8422 = vmatpush.msk.msrb.mxu0 %vm16725_vm11, %v6115_v22  ;;  %8442 = vmatmul.msk.f32.gmra.mxu1 %vm16726_vm12, %v6295_v48  ;;  %v6367_v0 = vsel %vm16735_vm7, %v6364_v43, %v6366_v45  ;;  %vm16736_vm11 = vmmov %vm16724_vm8 }
 0xa92   :  { %8439 = vmatmul.msk.f32.gmra.mxu3 %vm16727_vm2, %v6295_v48  ;;  %vm16737_vm12 = vmmov %vm16727_vm2  ;;  %v7780_v48 = vld [vmem:[%s15578_s5] sm:$0xff] }
 0xa93   :  { %7163 = vrot.lane.b32.xlu0 %v14644_v42, %s16233_s28  ;;  %s16732_s28 = smov 82   ;;  %vm16738_vm2 = vmmov %vm16724_vm8 }
 0xa94   :  { %7236 = vrot.lane.b32.xlu1 %v14689_v24, %s16728_s26  ;;  %vm16748_vm7 = vmmov %vm16738_vm2 }
 0xa95   :  { %v6498_v62 = vpop.permute.xlu0 %6497  ;;  %7297 = vrot.lane.b32.xlu2 %v14644_v42, %s16729_s23 }
 0xa96   :  { %v6699_v2 = vpop.permute.xlu1 %6698 }
 0xa97   :  { %v6701_v52 = vpop.permute.xlu2 %6700 }
 0xa98   :  { %8421 = vmatmul.msk.f32.gmra.mxu0 %vm16730_vm13, %v14715_v55 }
 0xa9b   :  { %7234 = vrot.lane.b32.xlu0 %v14661_v18, %s16728_s26  ;;  %s8879_s26 = smov 19  }
 0xa9c   :  { %7303 = vrot.lane.b32.xlu1 %v14689_v24, %s16731_s30 }
 0xa9d   :  { %v6429_v58 = vpop.permute.xlu0 %6428  ;;  %7368 = vrot.lane.b32.xlu2 %v14661_v18, %s16732_s28 }
 0xa9e   :  { %v6232_v49 = vpop.permute.xlu1 %6231 }
 0xa9f   :  { %v6233_v54 = vsel %vm193_vm1, %v6230_v57, %v6232_v49  ;;  %v14846_v13 = vpop.permute.xlu2 %6767  ;;  %8434 = vmatpush.msk.msra.mxu0 %vm16733_vm15, %v6232_v49  ;;  %vm16740_vm1 = vmmov %vm16734_vm10  ;;  %v6196_v49 = vpop.f32.mrf.mxu3 }
 0xaa0   :  { %8423 = vmatmul.msk.f32.vlgmr.msrb.gmra.mxu0 %vm16734_vm10, %v14753_v21  ;;  %8431 = vmatpush.msk.msra.mxu2 %vm16724_vm8, %v6233_v54  ;;  %vm16741_vm13 = vmmov %vm16740_vm1  ;;  %vm16747_vm8 = vcmask 932864  }
 0xaa1   :  { %8446 = vmatpush.msk.msrb.mxu0 %vm16736_vm11, %v6366_v45  ;;  %8432 = vmatmul.msk.f32.vlgmr.msra.gmra.mxu2 %vm16737_vm12, %v14723_v16  ;;  %vm16743_vm15 = vmmov %vm16740_vm1 }
 0xaa2   :  { %8443 = vmatpush.msk.msrb.mxu2 %vm16738_vm2, %v6367_v0  ;;  %vm16744_vm10 = vmmov %vm16740_vm1 }
 0xaa3   :  { %7301 = vrot.lane.b32.xlu0 %v14661_v18, %s16731_s30  ;;  %vm16749_vm11 = vmmov %vm16740_vm1  ;;  %s16766_s30 = smov 2  }
 0xaa4   :  { %7299 = vrot.lane.b32.xlu1 %v14634_v37, %s16729_s23  ;;  %vm16750_vm12 = vmmov %vm16738_vm2  ;;  %s15942_s23 = smov 119  }
 0xaa5   :  { %v14861_v35 = vpop.permute.xlu0 %6629  ;;  %7435 = vrot.lane.b32.xlu2 %v14661_v18, %s16739_s24  ;;  %vm16751_vm2 = vmmov %vm16740_vm1 }
 0xaa6   :  { %v6766_v19 = vpop.permute.xlu1 %6765 }
 0xaa7   :  { %v14865_v60 = vpop.permute.xlu2 %6828 }
 0xaa8   :  { %8424 = vmatmul.msk.f32.gmra.mxu0 %vm16740_vm1, %v14715_v55 }
 0xaa9   :  { %8433 = vmatmul.msk.f32.gmra.mxu2 %vm16741_vm13, %v14759_v39  ;;  %vm16752_vm13 = vmmov %vm16740_vm1 }
 0xaab   :  { %7232 = vrot.lane.b32.xlu0 %v14634_v37, %s16723_s16  ;;  %s16753_s16 = smov 70  }
 0xaac   :  { %7364 = vrot.lane.b32.xlu1 %v14644_v42, %s16742_s25 }
 0xaad   :  { %v14875_v63 = vpop.permute.xlu0 %6694  ;;  %7366 = vrot.lane.b32.xlu2 %v14634_v37, %s16742_s25 }
 0xaae   :  { %v14879_v56 = vpop.permute.xlu1 %6696 }
 0xaaf   :  { %v14881_v27 = vpop.permute.xlu2 %6895 }
 0xab0   :  { %8435 = vmatmul.msk.f32.vlgmr.msra.gmra.mxu0 %vm16743_vm15, %v14723_v16  ;;  %vm16754_vm15 = vcmask 916480  }
 0xab1   :  { %8444 = vmatmul.msk.f32.vlgmr.msrb.gmra.mxu2 %vm16744_vm10, %v14781_v38  ;;  %vm16755_vm10 = vmmov %vm16748_vm7 }
 0xab3   :  { %7370 = vrot.lane.b32.xlu0 %v14689_v24, %s16732_s28  ;;  %s16775_s28 = smov 69  }
 0xab4   :  { %7431 = vrot.lane.b32.xlu1 %v14644_v42, %s16745_s20 }
 0xab5   :  { %v14891_v34 = vpop.permute.xlu0 %6761  ;;  %7518 = vrot.lane.b32.xlu2 %v14689_v24, %s16746_s19 }
 0xab6   :  { %v6433_v41 = vpop.permute.xlu1 %6432 }
 0xab7   :  { %v6434_v1 = vsel %vm16747_vm8, %v14805_v30, %v6433_v41  ;;  %8452 = vmatpush.msk.msrb.mxu1 %vm16748_vm7, %v6433_v41  ;;  %v14900_v31 = vpop.permute.xlu2 %6966  ;;  %vm16756_vm8 = vcmask 900096  }
 0xab8   :  { %8436 = vmatmul.msk.f32.gmra.mxu0 %vm16749_vm11, %v14759_v39  ;;  %8449 = vmatpush.msk.msra.mxu3 %vm16750_vm12, %v6434_v1  ;;  %v6702_v3 = vsel %vm16756_vm8, %v6699_v2, %v6701_v52  ;;  %vm16757_vm11 = vmmov %vm16748_vm7  ;;  %vm16758_vm12 = vcmask 924672  }
 0xab9   :  { %8453 = vmatmul.msk.f32.vlgmr.msrb.gmra.mxu1 %vm16751_vm2, %v14745_v20  ;;  %8445 = vmatmul.msk.f32.gmra.mxu2 %vm16740_vm1, %v14733_v6  ;;  %vm16759_vm2 = vmmov %vm16740_vm1 }
 0xaba   :  { %8450 = vmatmul.msk.f32.vlgmr.msra.gmra.mxu3 %vm16752_vm13, %v14745_v20  ;;  %vm16760_vm1 = vmmov %vm16748_vm7 }
 0xabb   :  { %7437 = vrot.lane.b32.xlu0 %v14689_v24, %s16739_s24  ;;  %vm16761_vm13 = vmmov %vm16760_vm1 }
 0xabc   :  { %7516 = vrot.lane.b32.xlu1 %v14661_v18, %s16746_s19  ;;  %vm16762_vm5 = vmmov %vm16759_vm2 }
 0xabd   :  { %v6567_v53 = vpop.permute.xlu0 %6566  ;;  %7583 = vrot.lane.b32.xlu2 %v14661_v18, %s16753_s16  ;;  %vm16765_vm8 = vmmov %vm16759_vm2 }
 0xabe   :  { %v6568_v23 = vsel %vm16754_vm15, %v14771_v7, %v6567_v53  ;;  %8464 = vmatpush.msk.msra.mxu1 %vm16755_vm10, %v6567_v53  ;;  %v6500_v28 = vpop.permute.xlu1 %6499  ;;  %vm16763_vm15 = vmmov %vm16760_vm1 }
 0xabf   :  { %8461 = vmatpush.msk.msrb.mxu3 %vm16748_vm7, %v6568_v23  ;;  %v6501_v4 = vsel %vm16758_vm12, %v6498_v62, %v6500_v28  ;;  %8458 = vmatpush.msk.msra.mxu0 %vm16761_vm13, %v6500_v28  ;;  %v14930_v50 = vpop.permute.xlu2 %7033  ;;  %vm16764_vm10 = vmmov %vm16759_vm2  ;;  %v15072_v62 = vpop.f32.mrf.mxu1 }
 0xac0   :  { %8476 = vmatpush.msk.msrb.mxu1 %vm16757_vm11, %v6701_v52  ;;  %8447 = vmatmul.msk.f32.vlgmr.msrb.gmra.mxu0 %vm16759_vm2, %v14781_v38  ;;  %vm16768_vm7 = vmmov %vm16760_vm1  ;;  %vm16769_vm11 = vcmask 818176  }
 0xac1   :  { %8473 = vmatpush.msk.msra.mxu3 %vm16760_vm1, %v6702_v3  ;;  %8454 = vmatmul.msk.f32.gmra.mxu1 %vm16762_vm5, %v6429_v58  ;;  %vm16767_vm5 = vcmask 908288   ;;  %v6769_v17 = vsel %vm16769_vm11, %v6766_v19, %v14846_v13  ;;  %vm16770_vm12 = vmmov %vm16760_vm1 }
 0xac2   :  { %8455 = vmatpush.msk.msra.mxu2 %vm16763_vm15, %v6501_v4  ;;  %8451 = vmatmul.msk.f32.gmra.mxu3 %vm16764_vm10, %v6429_v58  ;;  %vm16771_vm13 = vmmov %vm16759_vm2 }
 0xac3   :  { %7433 = vrot.lane.b32.xlu0 %v14634_v37, %s16745_s20  ;;  %8456 = vmatmul.msk.f32.vlgmr.msra.gmra.mxu2 %vm16765_vm8, %v14763_v11  ;;  %vm16772_vm15 = vmmov %vm16760_vm1 }
 0xac4   :  { %7508 = vrot.lane.b32.xlu1 %v7499_v59, %s16766_s30  ;;  %vm16773_vm10 = vmmov %vm16759_vm2 }
 0xac5   :  { %v6634_v44 = vpop.permute.xlu0 %6633  ;;  %7510 = vrot.lane.b32.xlu2 %v14634_v37, %s16766_s30  ;;  %vm16774_vm8 = vmmov %vm16759_vm2 }
 0xac6   :  { %v6635_v25 = vsel %vm16767_vm5, %v14779_v5, %v6634_v44  ;;  %8470 = vmatpush.msk.msrb.mxu0 %vm16768_vm7, %v6634_v44  ;;  %v6835_v61 = vpop.permute.xlu1 %6834  ;;  %vm16776_vm5 = vcmask 809984   ;;  %vm16777_vm7 = vmmov %vm16760_vm1 }
 0xac7   :  { %8467 = vmatpush.msk.msrb.mxu2 %vm16770_vm12, %v6635_v25  ;;  %v14959_v37 = vpop.permute.xlu2 %6964  ;;  %vm16778_vm11 = vmmov %vm16759_vm2  ;;  %v6222_v0 = vpop.f32.mrf.mxu1 }
 0xac8   :  { %8448 = vmatmul.msk.f32.gmra.mxu0 %vm16759_vm2, %v14733_v6  ;;  %vm16779_vm12 = vmmov %vm16760_vm1 }
 0xac9   :  { %8479 = vmatpush.msk.msra.mxu2 %vm16760_vm1, %v6769_v17  ;;  %8465 = vmatmul.msk.f32.vlgmr.msra.gmra.mxu1 %vm16771_vm13, %v14809_v10  ;;  %vm16780_vm1 = vmmov %vm16759_vm2 }
 0xaca   :  { %8488 = vmatpush.msk.msra.mxu1 %vm16772_vm15, %v6835_v61  ;;  %8462 = vmatmul.msk.f32.vlgmr.msrb.gmra.mxu3 %vm16773_vm10, %v14809_v10  ;;  %vm16781_vm13 = vmmov %vm16780_vm1  ;;  %vm16782_vm15 = vcmask 801792  }
 0xacb   :  { %7506 = vrot.lane.b32.xlu0 %v14644_v42, %s16766_s30  ;;  %8457 = vmatmul.msk.f32.gmra.mxu2 %vm16774_vm8, %v14797_v9  ;;  %v7501_v42 = vld [vmem:[%s15577_s4 + $0x18] sm:$0xff]  ;;  %vm16783_vm10 = vmmov %vm16777_vm7  ;;  %s16788_s4 = smov 118  }
 0xacc   :  { %7579 = vrot.lane.b32.xlu1 %v7499_v59, %s8820_s15  ;;  %vm16784_vm8 = vmmov %vm16780_vm1 }
 0xacd   :  { %v6833_v15 = vpop.permute.xlu0 %6832  ;;  %7650 = vrot.lane.b32.xlu2 %v14661_v18, %s16775_s28 }
 0xace   :  { %v6836_v26 = vsel %vm16776_vm5, %v6833_v15, %v6835_v61  ;;  %v6902_v32 = vpop.permute.xlu1 %6901  ;;  %vm16785_vm5 = vmmov %vm16780_vm1 }
 0xacf   :  { %8485 = vmatpush.msk.msrb.mxu3 %vm16777_vm7, %v6836_v26  ;;  %v7103_v55 = vpop.permute.xlu2 %7102  ;;  %vm16786_vm7 = vmmov %vm16780_vm1 }
 0xad0   :  { %8459 = vmatmul.msk.f32.vlgmr.msra.gmra.mxu0 %vm16778_vm11, %v14763_v11  ;;  %vm16787_vm11 = vmmov %vm16780_vm1 }
 0xad1   :  { %8482 = vmatpush.msk.msra.mxu0 %vm16779_vm12, %v14846_v13  ;;  %8466 = vmatmul.msk.f32.gmra.mxu1 %vm16759_vm2, %v14789_v46  ;;  %vm16789_vm12 = vmmov %vm16780_vm1 }
 0xad2   :  { %8463 = vmatmul.msk.f32.gmra.mxu3 %vm16780_vm1, %v14789_v46  ;;  %vm16790_vm2 = vmmov %vm16783_vm10 }
 0xad3   :  { %7585 = vrot.lane.b32.xlu0 %v14689_v24, %s16753_s16  ;;  %8468 = vmatmul.msk.f32.vlgmr.msrb.gmra.mxu2 %vm16781_vm13, %v14823_v14  ;;  %vm16791_vm13 = vmmov %vm16780_vm1  ;;  %s15943_s16 = smov 75  }
 0xad4   :  { %7581 = vrot.lane.b32.xlu1 %v7501_v42, %s8820_s15 }
 0xad5   :  { %v6900_v29 = vpop.permute.xlu0 %6899  ;;  %7717 = vrot.lane.b32.xlu2 %v14661_v18, %s16707_s21 }
 0xad6   :  { %v6903_v16 = vsel %vm16782_vm15, %v6900_v29, %v6902_v32  ;;  %v14985_v6 = vpop.permute.xlu1 %6897  ;;  %vm16792_vm15 = vmmov %vm16780_vm1 }
 0xad7   :  { %8491 = vmatpush.msk.msrb.mxu2 %vm16783_vm10, %v6903_v16  ;;  %v7170_v47 = vpop.permute.xlu2 %7169  ;;  %vm16793_vm10 = vcmask 793600  }
 0xad8   :  { %8460 = vmatmul.msk.f32.gmra.mxu0 %vm16784_vm8, %v14797_v9  ;;  %vm16794_vm8 = vmmov %vm16790_vm2 }
 0xad9   :  { %8477 = vmatmul.msk.f32.vlgmr.msrb.gmra.mxu1 %vm16785_vm5, %v14875_v63  ;;  %vm16795_vm5 = vmmov %vm16790_vm2 }
 0xada   :  { %8474 = vmatmul.msk.f32.vlgmr.msra.gmra.mxu3 %vm16786_vm7, %v14875_v63  ;;  %vm16796_vm7 = vmmov %vm16780_vm1 }
 0xadb   :  { %7512 = vrot.lane.b32.xlu0 %v7501_v42, %s16766_s30  ;;  %8469 = vmatmul.msk.f32.gmra.mxu2 %vm16787_vm11, %v14861_v35  ;;  %vm16797_vm11 = vmmov %vm16780_vm1 }
 0xadc   :  { %7646 = vrot.lane.b32.xlu1 %v7499_v59, %s16788_s4 }
 0xadd   :  { %v6831_v18 = vpop.permute.xlu0 %6830  ;;  %7648 = vrot.lane.b32.xlu2 %v7501_v42, %s16788_s4 }
 0xade   :  { %v6963_v20 = vpop.permute.xlu1 %6962 }
 0xadf   :  { %v15022_v8 = vpop.permute.xlu2 %7165 }
 0xae0   :  { %8471 = vmatmul.msk.f32.vlgmr.msrb.gmra.mxu0 %vm16789_vm12, %v14823_v14  ;;  %vm16798_vm12 = vmmov %vm16790_vm2 }
 0xae1   :  { %8494 = vmatpush.msk.msrb.mxu0 %vm16790_vm2, %v6902_v32  ;;  %8478 = vmatmul.msk.f32.gmra.mxu1 %vm16780_vm1, %v14879_v56  ;;  %vm16799_vm2 = vmmov %vm16780_vm1 }
 0xae2   :  { %8475 = vmatmul.msk.f32.gmra.mxu3 %vm16791_vm13, %v14879_v56  ;;  %vm16800_vm13 = vmmov %vm16795_vm5  ;;  %v6199_v56 = vpop.f32.mrf.mxu3 }
 0xae3   :  { %7652 = vrot.lane.b32.xlu0 %v14689_v24, %s16775_s28  ;;  %8480 = vmatmul.msk.f32.vlgmr.msra.gmra.mxu2 %vm16792_vm15, %v14891_v34  ;;  %vm16801_vm15 = vcmask 703488  }
 0xae4   :  { %7713 = vrot.lane.b32.xlu1 %v7499_v59, %s8854_s17 }
 0xae5   :  { %v6969_v21 = vpop.permute.xlu0 %6968 }
 0xae6   :  { %v6970_v39 = vsel %vm16793_vm10, %v14900_v31, %v6969_v21  ;;  %8500 = vmatpush.msk.msrb.mxu1 %vm16794_vm8, %v6969_v21  ;;  %v7030_v11 = vpop.permute.xlu1 %7029  ;;  %vm16802_vm10 = vmmov %vm16780_vm1 }
 0xae7   :  { %8497 = vmatpush.msk.msra.mxu3 %vm16795_vm5, %v6970_v39  ;;  %vm16803_vm8 = vmmov %vm16795_vm5 }
 0xae8   :  { %8472 = vmatmul.msk.f32.gmra.mxu0 %vm16796_vm7, %v14861_v35  ;;  %vm16804_vm7 = vmmov %vm16780_vm1 }
 0xae9   :  { %8489 = vmatmul.msk.f32.vlgmr.msra.gmra.mxu1 %vm16797_vm11, %v14865_v60  ;;  %vm16805_vm11 = vmmov %vm16780_vm1 }
 0xaea   :  { %8512 = vmatpush.msk.msra.mxu1 %vm16798_vm12, %v7103_v55  ;;  %8486 = vmatmul.msk.f32.vlgmr.msrb.gmra.mxu3 %vm16799_vm2, %v14865_v60  ;;  %vm16806_vm12 = vmmov %vm16780_vm1 }
 0xaeb   :  { %7719 = vrot.lane.b32.xlu0 %v14689_v24, %s16707_s21  ;;  %8481 = vmatmul.msk.f32.gmra.mxu2 %vm16780_vm1, %v14799_v33  ;;  %v7231_v24 = vpop.permute.xlu2 %7230  ;;  %vm16808_vm2 = vmmov %vm16780_vm1 }
 0xaec   :  { %7784 = vperm.xlu1 %8744, %v7780_v48   ;;  %vm16809_vm1 = vmmov %vm16795_vm5 }
 0xaed   :  { %v7036_v7 = vpop.permute.xlu0 %7035 }
 0xaee   :  { %v7037_v36 = vsel %vm367_vm4, %v14930_v50, %v7036_v7  ;;  %v7101_v5 = vpop.permute.xlu1 %7100  ;;  %vm16807_vm4 = vcmask 695296  }
 0xaef   :  { %8503 = vmatpush.msk.msra.mxu2 %vm16800_vm13, %v7037_v36  ;;  %v7104_v38 = vsel %vm16801_vm15, %v7101_v5, %v7103_v55  ;;  %vm16810_vm13 = vmmov %vm16808_vm2 }
 0xaf0   :  { %8483 = vmatmul.msk.f32.vlgmr.msra.gmra.mxu0 %vm16802_vm10, %v14891_v34  ;;  %8509 = vmatpush.msk.msrb.mxu3 %vm16803_vm8, %v7104_v38  ;;  %vm16811_vm15 = vmmov %vm16808_vm2 }
 0xaf1   :  { %8506 = vmatpush.msk.msra.mxu0 %vm16795_vm5, %v7036_v7  ;;  %8490 = vmatmul.msk.f32.gmra.mxu1 %vm16804_vm7, %v6831_v18  ;;  %vm16812_vm10 = vmmov %vm16808_vm2 }
 0xaf2   :  { %8487 = vmatmul.msk.f32.gmra.mxu3 %vm16805_vm11, %v6831_v18  ;;  %vm16813_vm8 = vmmov %vm16808_vm2 }
 0xaf3   :  { %8492 = vmatmul.msk.f32.vlgmr.msrb.gmra.mxu2 %vm16806_vm12, %v14881_v27  ;;  %7715 = vrot.lane.b32.xlu0 %v7501_v42, %s8854_s17  ;;  %v15052_v30 = vpop.permute.xlu2 %7297  ;;  %vm16814_vm5 = vmmov %vm16809_vm1 }
 0xaf4   :  { %vm16815_vm7 = vmmov %vm16808_vm2 }
 0xaf5   :  { %v7032_v43 = vpop.permute.xlu0 %7031  ;;  %vm16816_vm11 = vmmov %vm16808_vm2 }
 0xaf6   :  { %v7168_v46 = vpop.permute.xlu1 %7167  ;;  %vm16817_vm12 = vmmov %vm16808_vm2 }
 0xaf7   :  { %v7171_v57 = vsel %vm16807_vm4, %v7168_v46, %v7170_v47  ;;  %vm16818_vm4 = vmmov %vm16809_vm1 }
 0xaf8   :  { %8484 = vmatmul.msk.f32.gmra.mxu0 %vm16808_vm2, %v14799_v33  ;;  %8515 = vmatpush.msk.msrb.mxu2 %vm16809_vm1, %v7171_v57  ;;  %vm16819_vm1 = vmmov %vm16808_vm2 }
 0xaf9   :  { %8501 = vmatmul.msk.f32.vlgmr.msrb.gmra.mxu1 %vm16810_vm13, %v6963_v20  ;;  %vm16820_vm13 = vmmov %vm16819_vm1 }
 0xafa   :  { %8498 = vmatmul.msk.f32.vlgmr.msra.gmra.mxu3 %vm16811_vm15, %v6963_v20  ;;  %vm16821_vm15 = vmmov %vm16819_vm1 }
 0xafb   :  { %8493 = vmatmul.msk.f32.gmra.mxu2 %vm16812_vm10, %v14985_v6  ;;  %v7369_v12 = vpop.permute.xlu2 %7368  ;;  %vm16822_vm10 = vcmask 687104  }
 0xafd   :  { %v7097_v9 = vpop.permute.xlu0 %7096 }
 0xafe   :  { %v7099_v10 = vpop.permute.xlu1 %7098 }
 0xb00   :  { %8495 = vmatmul.msk.f32.vlgmr.msrb.gmra.mxu0 %vm16813_vm8, %v14881_v27  ;;  %vm16823_vm8 = vmmov %vm16818_vm4 }
 0xb01   :  { %8518 = vmatpush.msk.msrb.mxu0 %vm16814_vm5, %v7170_v47  ;;  %8502 = vmatmul.msk.f32.gmra.mxu1 %vm16815_vm7, %v14959_v37  ;;  %vm16824_vm5 = vmmov %vm16819_vm1 }
 0xb02   :  { %8499 = vmatmul.msk.f32.gmra.mxu3 %vm16816_vm11, %v14959_v37  ;;  %vm16825_vm7 = vmmov %vm16818_vm4 }
 0xb03   :  { %8504 = vmatmul.msk.f32.vlgmr.msra.gmra.mxu2 %vm16817_vm12, %v7030_v11  ;;  %vm16826_vm11 = vmmov %vm16819_vm1  ;;  %v7436_v2 = vpop.permute.xlu2 %7435 }
 0xb04   :  { %vm16827_vm12 = vmmov %vm16819_vm1 }
 0xb05   :  { %v7164_v33 = vpop.permute.xlu0 %7163 }
 0xb06   :  { %v7237_v40 = vpop.permute.xlu1 %7236  ;;  %v6349_v27 = vpop.f32.mrf.mxu1 }
 0xb07   :  { %8524 = vmatpush.msk.msrb.mxu1 %vm16818_vm4, %v7237_v40  ;;  %vm16828_vm4 = vmmov %vm16819_vm1 }
 0xb08   :  { %8496 = vmatmul.msk.f32.gmra.mxu0 %vm16808_vm2, %v14985_v6  ;;  %vm16829_vm2 = vcmask 678912  }
 0xb09   :  { %8513 = vmatmul.msk.f32.vlgmr.msra.gmra.mxu1 %vm16819_vm1, %v7097_v9  ;;  %vm16830_vm1 = vmmov %vm16825_vm7 }
 0xb0a   :  { %8510 = vmatmul.msk.f32.vlgmr.msrb.gmra.mxu3 %vm16820_vm13, %v7097_v9  ;;  %vm16831_vm13 = vmmov %vm16828_vm4 }
 0xb0b   :  { %8505 = vmatmul.msk.f32.gmra.mxu2 %vm16821_vm15, %v7032_v43  ;;  %vm16832_vm15 = vmmov %vm16828_vm4  ;;  %v7367_v35 = vpop.permute.xlu2 %7366 }
 0xb0d   :  { %v7235_v22 = vpop.permute.xlu0 %7234  ;;  %v15068_v51 = vpop.f32.mrf.mxu0 }
 0xb0e   :  { %v7238_v14 = vsel %vm16822_vm10, %v7235_v22, %v7237_v40  ;;  %v7304_v45 = vpop.permute.xlu1 %7303  ;;  %vm16833_vm10 = vmmov %vm16828_vm4  ;;  %v6326_v28 = vpop.f32.mrf.mxu3  ;;  %v6197_v26 = vadd.f32 %v6196_v49, %v15068_v51 }
 0xb0f   :  { %8521 = vmatpush.msk.msra.mxu3 %vm16823_vm8, %v7238_v14  ;;  %vm16834_vm8 = vmmov %vm16828_vm4  ;;  %v6352_v50 = vpop.f32.mrf.mxu1 }
 0xb10   :  { %8507 = vmatmul.msk.f32.vlgmr.msra.gmra.mxu0 %vm16824_vm5, %v7030_v11  ;;  %vm16835_vm5 = vmmov %vm16828_vm4 }
 0xb11   :  { %8530 = vmatpush.msk.msra.mxu0 %vm16825_vm7, %v7304_v45  ;;  %8514 = vmatmul.msk.f32.gmra.mxu1 %vm16826_vm11, %v7099_v10  ;;  %vm16836_vm7 = vmmov %vm16828_vm4 }
 0xb12   :  { %8511 = vmatmul.msk.f32.gmra.mxu3 %vm16827_vm12, %v7099_v10  ;;  %vm16837_vm11 = vmmov %vm16828_vm4 }
 0xb13   :  { %8516 = vmatmul.msk.f32.vlgmr.msrb.gmra.mxu2 %vm16828_vm4, %v7164_v33  ;;  %vm16838_vm12 = vmmov %vm16828_vm4  ;;  %v7519_v31 = vpop.permute.xlu2 %7518  ;;  %vm16839_vm4 = vcmask 670720  }
 0xb15   :  { %v7302_v52 = vpop.permute.xlu0 %7301  ;;  %v6145_v58 = vpop.f32.mrf.mxu0 }
 0xb16   :  { %v7305_v54 = vsel %vm16829_vm2, %v7302_v52, %v7304_v45  ;;  %v7300_v13 = vpop.permute.xlu1 %7299  ;;  %vm16840_vm2 = vmmov %vm16830_vm1  ;;  %v6329_v17 = vpop.f32.mrf.mxu3  ;;  %v6200_v32 = vadd.f32 %v6199_v56, %v6145_v58 }
 0xb17   :  { %8527 = vmatpush.msk.msra.mxu2 %vm16830_vm1, %v7305_v54 }
 0xb18   :  { %8508 = vmatmul.msk.f32.gmra.mxu0 %vm16831_vm13, %v7032_v43  ;;  %vm16841_vm13 = vmmov %vm16830_vm1 }
 0xb19   :  { %8525 = vmatmul.msk.f32.vlgmr.msrb.gmra.mxu1 %vm16832_vm15, %v7231_v24  ;;  %vm16842_vm15 = vmmov %vm16835_vm5 }
 0xb1a   :  { %8522 = vmatmul.msk.f32.vlgmr.msra.gmra.mxu3 %vm16833_vm10, %v7231_v24  ;;  %vm16843_vm10 = vmmov %vm16835_vm5 }
 0xb1b   :  { %8517 = vmatmul.msk.f32.gmra.mxu2 %vm16834_vm8, %v15022_v8  ;;  %vm16844_vm8 = vmmov %vm16835_vm5  ;;  %v7584_v55 = vpop.permute.xlu2 %7583 }
 0xb1d   :  { %v7233_v19 = vpop.permute.xlu0 %7232  ;;  %v6165_v60 = vpop.f32.mrf.mxu0 }
 0xb1e   :  { %v7365_v63 = vpop.permute.xlu1 %7364  ;;  %v6220_v16 = vadd.f32 %v15072_v62, %v6165_v60 }
 0xb20   :  { %8519 = vmatmul.msk.f32.vlgmr.msrb.gmra.mxu0 %vm16835_vm5, %v7164_v33 }
 0xb21   :  { %8526 = vmatmul.msk.f32.gmra.mxu1 %vm16836_vm7, %v7233_v19  ;;  %vm16845_vm7 = vcmask 588800  }
 0xb22   :  { %8523 = vmatmul.msk.f32.gmra.mxu3 %vm16837_vm11, %v7233_v19  ;;  %vm16846_vm11 = vmmov %vm16830_vm1 }
 0xb23   :  { %8528 = vmatmul.msk.f32.vlgmr.msra.gmra.mxu2 %vm16838_vm12, %v15052_v30  ;;  %vm16847_vm12 = vmmov %vm16830_vm1  ;;  %v7511_v33 = vpop.permute.xlu2 %7510 }
 0xb24   :  { %v6259_v34 = vpop.f32.mrf.mxu2 }
 0xb25   :  { %v7371_v41 = vpop.permute.xlu0 %7370  ;;  %v6168_v1 = vpop.f32.mrf.mxu0  ;;  %v6288_v20 = vadd.f32 %v6259_v34, %v6197_v26 }
 0xb26   :  { %v7372_v53 = vsel %vm16839_vm4, %v7369_v12, %v7371_v41  ;;  %8536 = vmatpush.msk.msra.mxu1 %vm16840_vm2, %v7371_v41  ;;  %v7432_v23 = vpop.permute.xlu1 %7431  ;;  %vm16848_vm4 = vmmov %vm16835_vm5  ;;  %vm16849_vm2 = vcmask 580608   ;;  %v6223_v37 = vadd.f32 %v6222_v0, %v6168_v1 }
 0xb27   :  { %8533 = vmatpush.msk.msrb.mxu3 %vm16830_vm1, %v7372_v53  ;;  %v6355_v48 = vadd.f32 %v6326_v28, %v6288_v20 }
 0xb28   :  { %8548 = vmatpush.msk.msrb.mxu1 %vm16841_vm13, %v7519_v31  ;;  %8520 = vmatmul.msk.f32.gmra.mxu0 %vm16842_vm15, %v15022_v8  ;;  %vm16850_vm13 = vmmov %vm16848_vm4 }
 0xb29   :  { %8537 = vmatmul.msk.f32.vlgmr.msra.gmra.mxu1 %vm16843_vm10, %v7365_v63  ;;  %vm16851_vm15 = vmmov %vm16848_vm4 }
 0xb2a   :  { %8534 = vmatmul.msk.f32.vlgmr.msrb.gmra.mxu3 %vm16844_vm8, %v7365_v63  ;;  %vm16852_vm10 = vmmov %vm16848_vm4 }
 0xb2b   :  { %8529 = vmatmul.msk.f32.gmra.mxu2 %vm16835_vm5, %v7300_v13  ;;  %vm16853_vm8 = vmmov %vm16848_vm4 }
 0xb2c   :  { %v6262_v3 = vpop.f32.mrf.mxu2  ;;  %vm16854_vm5 = vmmov %vm16848_vm4 }
 0xb2d   :  { %v7438_v4 = vpop.permute.xlu0 %7437  ;;  %v6282_v59 = vpop.f32.mrf.mxu0  ;;  %v6290_v47 = vadd.f32 %v6262_v3, %v6200_v32 }
 0xb2e   :  { %v7439_v44 = vsel %vm16845_vm7, %v7436_v2, %v7438_v4  ;;  %8542 = vmatpush.msk.msrb.mxu0 %vm16846_vm11, %v7438_v4  ;;  %v7517_v25 = vpop.permute.xlu1 %7516  ;;  %v6289_v39 = vadd.f32 %v6282_v59, %v6220_v16  ;;  %vm16855_vm7 = vcmask 15360   ;;  %vm16856_vm11 = vmmov %vm16848_vm4 }
 0xb2f   :  { %8539 = vmatpush.msk.msrb.mxu2 %vm16847_vm12, %v7439_v44  ;;  %v7520_v61 = vsel %vm16849_vm2, %v7517_v25, %v7519_v31  ;;  %v6357_v8 = vadd.f32 %v6329_v17, %v6290_v47  ;;  %vm16857_vm12 = vmmov %vm16848_vm4  ;;  %vm16858_vm2 = vcmask 572416  }
 0xb30   :  { %8531 = vmatmul.msk.f32.vlgmr.msra.gmra.mxu0 %vm16848_vm4, %v15052_v30  ;;  %8545 = vmatpush.msk.msra.mxu3 %vm16830_vm1, %v7520_v61  ;;  %v6356_v7 = vadd.f32 %v6349_v27, %v6289_v39 }
 0xb31   :  { %8538 = vmatmul.msk.f32.gmra.mxu1 %vm16850_vm13, %v7367_v35  ;;  %vm16859_vm13 = vmmov %vm16830_vm1 }
 0xb32   :  { %8535 = vmatmul.msk.f32.gmra.mxu3 %vm16851_vm15, %v7367_v35  ;;  %vm16860_vm15 = vmmov %vm16848_vm4 }
 0xb33   :  { %8540 = vmatmul.msk.f32.vlgmr.msrb.gmra.mxu2 %vm16852_vm10, %v7432_v23  ;;  %vm16861_vm10 = vmmov %vm16848_vm4 }
 0xb34   :  { %v6393_v15 = vpop.f32.mrf.mxu2 }
 0xb35   :  { %v7434_v42 = vpop.permute.xlu0 %7433  ;;  %v6285_v29 = vpop.f32.mrf.mxu0  ;;  %v6422_v5 = vadd.f32 %v6393_v15, %v6355_v48 }
 0xb36   :  { %v6291_v6 = vadd.f32 %v6285_v29, %v6223_v37  ;;  %v6483_v18 = vpop.f32.mrf.mxu1  ;;  %v7509_v21 = vpop.permute.xlu1 %7508 }
 0xb38   :  { %8532 = vmatmul.msk.f32.gmra.mxu0 %vm16853_vm8, %v7300_v13  ;;  %v6358_v11 = vadd.f32 %v6352_v50, %v6291_v6  ;;  %v7651_v13 = vpop.permute.xlu2 %7650  ;;  %vm16862_vm8 = vmmov %vm16855_vm7 }
 0xb3b   :  { %8541 = vmatmul.msk.f32.gmra.mxu2 %vm16854_vm5, %v7434_v42  ;;  %vm16863_vm5 = vmmov %vm16848_vm4 }
 0xb3c   :  { %v6396_v36 = vpop.f32.mrf.mxu2 }
 0xb3d   :  { %v7507_v38 = vpop.permute.xlu0 %7506  ;;  %v6416_v24 = vpop.f32.mrf.mxu0  ;;  %v6424_v43 = vadd.f32 %v6396_v36, %v6357_v8 }
 0xb3e   :  { %v7514_v46 = vsel %vm16855_vm7, %v7507_v38, %v7509_v21  ;;  %v6423_v57 = vadd.f32 %v6416_v24, %v6356_v7  ;;  %v6460_v9 = vpop.f32.mrf.mxu3  ;;  %v6486_v30 = vpop.f32.mrf.mxu1  ;;  %vm16864_vm7 = vmmov %vm16848_vm4  ;;  %v7781_v24 = vld [vmem:[%s15578_s5 + $0x8] sm:$0xff]  ;;  %s8875_s5 = smov 25  }
 0xb3f   :  { %v6489_v10 = vadd.f32 %v6460_v9, %v6422_v5  ;;  %8546 = vmatmul.msk.f32.vlgmr.msra.gmra.mxu3 %vm16856_vm11, %v7514_v46  ;;  %8549 = vmatmul.msk.f32.vlgmr.msrb.gmra.mxu1 %vm16857_vm12, %v7514_v46  ;;  %v7580_v40 = vpop.permute.xlu1 %7579  ;;  %vm16865_vm11 = vmmov %vm16848_vm4 }
 0xb40   :  { %8543 = vmatmul.msk.f32.vlgmr.msrb.gmra.mxu0 %vm16848_vm4, %v7432_v23  ;;  %v6490_v12 = vadd.f32 %v6483_v18, %v6423_v57  ;;  %vm16866_vm12 = vmmov %vm16848_vm4  ;;  %v7718_v53 = vpop.permute.xlu2 %7717  ;;  %vm16867_vm4 = vcmask 564224   ;;  %7789 = vperm.xlu2 %8766, %v7781_v24  }
 0xb45   :  { %v7586_v22 = vpop.permute.xlu0 %7585  ;;  %v6419_v51 = vpop.f32.mrf.mxu0 }
 0xb46   :  { %v7587_v14 = vsel %vm16858_vm2, %v7584_v55, %v7586_v22  ;;  %v6425_v45 = vadd.f32 %v6419_v51, %v6358_v11  ;;  %8554 = vmatpush.msk.msra.mxu0 %vm16830_vm1, %v7586_v22  ;;  %v6463_v62 = vpop.f32.mrf.mxu3  ;;  %v6527_v2 = vpop.f32.mrf.mxu2  ;;  %vm16868_vm2 = vmmov %vm16830_vm1 }
 0xb47   :  { %v6491_v52 = vadd.f32 %v6463_v62, %v6424_v43  ;;  %v6556_v58 = vadd.f32 %v6527_v2, %v6489_v10  ;;  %8551 = vmatpush.msk.msra.mxu2 %vm16859_vm13, %v7587_v14  ;;  %v6617_v49 = vpop.f32.mrf.mxu1  ;;  %v7582_v0 = vpop.permute.xlu1 %7581  ;;  %vm16869_vm13 = vmmov %vm16863_vm5 }
 0xb48   :  { %8544 = vmatmul.msk.f32.gmra.mxu0 %vm16860_vm15, %v7434_v42  ;;  %8552 = vmatmul.msk.f32.vlgmr.msra.gmra.mxu2 %vm16861_vm10, %v7580_v40  ;;  %v6492_v54 = vadd.f32 %v6486_v30, %v6425_v45  ;;  %vm16870_vm15 = vmmov %vm16863_vm5  ;;  %v7649_v15 = vpop.permute.xlu2 %7648 }
 0xb49   :  { %vm16871_vm10 = vmmov %vm16863_vm5 }
 0xb4d   :  { %v7513_v35 = vpop.permute.xlu0 %7512  ;;  %v6550_v19 = vpop.f32.mrf.mxu0 }
 0xb4e   :  { %v7515_v60 = vsel %vm16862_vm8, %v7511_v33, %v7513_v35  ;;  %v6557_v63 = vadd.f32 %v6550_v19, %v6490_v12  ;;  %v6530_v56 = vpop.f32.mrf.mxu2  ;;  %v6594_v27 = vpop.f32.mrf.mxu3  ;;  %vm16872_vm8 = vcmask 556032  }
 0xb4f   :  { %v6558_v34 = vadd.f32 %v6530_v56, %v6491_v52  ;;  %v6623_v41 = vadd.f32 %v6594_v27, %v6556_v58  ;;  %8547 = vmatmul.msk.f32.gmra.mxu3 %vm16863_vm5, %v7515_v60  ;;  %8550 = vmatmul.msk.f32.gmra.mxu1 %vm16864_vm7, %v7515_v60  ;;  %v6620_v1 = vpop.f32.mrf.mxu1  ;;  %v7647_v23 = vpop.permute.xlu1 %7646  ;;  %vm16873_vm5 = vmmov %vm16830_vm1 }
 0xb50   :  { %8555 = vmatmul.msk.f32.vlgmr.msra.gmra.mxu0 %vm16865_vm11, %v7580_v40  ;;  %8553 = vmatmul.msk.f32.gmra.mxu2 %vm16866_vm12, %v7582_v0  ;;  %v6624_v31 = vadd.f32 %v6617_v49, %v6557_v63  ;;  %vm16874_vm11 = vmmov %vm16830_vm1 }
 0xb51   :  { %vm16875_vm12 = vmmov %vm16864_vm7 }
 0xb55   :  { %v7653_v28 = vpop.permute.xlu0 %7652  ;;  %v6553_v3 = vpop.f32.mrf.mxu0 }
 0xb56   :  { %v7654_v4 = vsel %vm16867_vm4, %v7651_v13, %v7653_v28  ;;  %v6559_v59 = vadd.f32 %v6553_v3, %v6492_v54  ;;  %8560 = vmatpush.msk.msra.mxu1 %vm16868_vm2, %v7653_v28  ;;  %v6597_v50 = vpop.f32.mrf.mxu3  ;;  %v6661_v44 = vpop.f32.mrf.mxu2  ;;  %vm16876_vm4 = vmmov %vm16864_vm7 }
 0xb57   :  { %v6625_v25 = vadd.f32 %v6597_v50, %v6558_v34  ;;  %v6690_v61 = vadd.f32 %v6661_v44, %v6623_v41  ;;  %8557 = vmatpush.msk.msrb.mxu3 %vm16830_vm1, %v7654_v4  ;;  %8561 = vmatmul.msk.f32.vlgmr.msra.gmra.mxu1 %vm16869_vm13, %v7647_v23  ;;  %v6751_v17 = vpop.f32.mrf.mxu1  ;;  %v7714_v6 = vpop.permute.xlu1 %7713  ;;  %vm16877_vm2 = vmmov %vm16876_vm4 }
 0xb58   :  { %8556 = vmatmul.msk.f32.gmra.mxu0 %vm16870_vm15, %v7582_v0  ;;  %8558 = vmatmul.msk.f32.vlgmr.msrb.gmra.mxu3 %vm16871_vm10, %v7647_v23  ;;  %v6626_v37 = vadd.f32 %v6620_v1, %v6559_v59  ;;  %vm16878_vm1 = vmmov %vm16877_vm2  ;;  %vm3950_vm15 = vcmask 606608   ;;  %vm3957_vm10 = vcmask 811608  }
 0xb59   :  { %vm16879_vm13 = vmmov %vm16878_vm1 }
 0xb5d   :  { %v7720_v26 = vpop.permute.xlu0 %7719  ;;  %v6684_v32 = vpop.f32.mrf.mxu0 }
 0xb5e   :  { %v7721_v42 = vsel %vm16872_vm8, %v7718_v53, %v7720_v26  ;;  %v6691_v29 = vadd.f32 %v6684_v32, %v6624_v31  ;;  %8566 = vmatpush.msk.msrb.mxu0 %vm16873_vm5, %v7720_v26  ;;  %v6664_v55 = vpop.f32.mrf.mxu2  ;;  %v6728_v16 = vpop.f32.mrf.mxu3  ;;  %vm3973_vm8 = vcmask 1041384   ;;  %vm3974_vm5 = vcmask 174082  }
 0xb5f   :  { %v6692_v18 = vadd.f32 %v6664_v55, %v6625_v25  ;;  %v6757_v20 = vadd.f32 %v6728_v16, %v6690_v61  ;;  %8562 = vmatmul.msk.f32.gmra.mxu1 %vm16864_vm7, %v7649_v15  ;;  %8563 = vmatpush.msk.msrb.mxu2 %vm16874_vm11, %v7721_v42  ;;  %v6754_v47 = vpop.f32.mrf.mxu1  ;;  %vm3964_vm7 = vcmask 1016608   ;;  %vm15246_vm11 = vmor %vm3974_vm5, %vm3973_vm8  ;;  %vm4022_vm5 = vcmask 352408  }
 0xb60   :  { %8559 = vmatmul.msk.f32.gmra.mxu3 %vm16875_vm12, %v7649_v15  ;;  %8564 = vmatmul.msk.f32.vlgmr.msrb.gmra.mxu2 %vm16876_vm4, %v7714_v6  ;;  %v6758_v21 = vadd.f32 %v6751_v17, %v6691_v29  ;;  %vm16884_vm12 = vcmask 1022976   ;;  %vm3989_vm4 = vcmask 582008  }
 0xb61   :  { %8567 = vmatmul.msk.f32.vlgmr.msrb.gmra.mxu0 %vm16877_vm2, %v7714_v6  ;;  %vm4013_vm2 = vcmask 1041360  }
 0xb65   :  { %v6687_v39 = vpop.f32.mrf.mxu0  ;;  %v7716_v11 = vpop.permute.xlu0 %7715 }
 0xb66   :  { %v6693_v48 = vadd.f32 %v6687_v39, %v6626_v37  ;;  %v6731_v8 = vpop.f32.mrf.mxu3  ;;  %v6795_v7 = vpop.f32.mrf.mxu2 }
 0xb67   :  { %v6759_v36 = vadd.f32 %v6731_v8, %v6692_v18  ;;  %v6824_v5 = vadd.f32 %v6795_v7, %v6757_v20  ;;  %v6885_v38 = vpop.f32.mrf.mxu1 }
 0xb68   :  { %8565 = vmatmul.msk.f32.gmra.mxu2 %vm16878_vm1, %v7716_v11  ;;  %v6760_v43 = vadd.f32 %v6754_v47, %v6693_v48  ;;  %vm4014_vm1 = vcmask 149506  }
 0xb69   :  { %8568 = vmatmul.msk.f32.gmra.mxu0 %vm16879_vm13, %v7716_v11  ;;  %vm3996_vm13 = vcmask 787008   ;;  %vm15256_vm8 = vmor %vm4014_vm1, %vm4013_vm2  ;;  %vm4036_vm2 = vcmask 762408   ;;  %vm16887_vm1 = vcmask 196608  }
 0xb6d   :  { %v6818_v46 = vpop.f32.mrf.mxu0 }
 0xb6e   :  { %v6825_v57 = vadd.f32 %v6818_v46, %v6758_v21  ;;  %v6798_v9 = vpop.f32.mrf.mxu2  ;;  %v6862_v30 = vpop.f32.mrf.mxu3 }
 0xb6f   :  { %v6826_v10 = vadd.f32 %v6798_v9, %v6759_v36  ;;  %v6891_v33 = vadd.f32 %v6862_v30, %v6824_v5  ;;  %v6888_v40 = vpop.f32.mrf.mxu1 }
 0xb70   :  { %v6892_v12 = vadd.f32 %v6885_v38, %v6825_v57 }
 0xb75   :  { %v6821_v22 = vpop.f32.mrf.mxu0 }
 0xb76   :  { %v6827_v51 = vadd.f32 %v6821_v22, %v6760_v43  ;;  %v6865_v14 = vpop.f32.mrf.mxu3  ;;  %v6929_v45 = vpop.f32.mrf.mxu2 }
 0xb77   :  { %v6893_v62 = vadd.f32 %v6865_v14, %v6826_v10  ;;  %v6958_v2 = vadd.f32 %v6929_v45, %v6891_v33  ;;  %v7019_v52 = vpop.f32.mrf.mxu1 }
 0xb78   :  { %v6894_v58 = vadd.f32 %v6888_v40, %v6827_v51 }
 0xb7d   :  { %v6952_v49 = vpop.f32.mrf.mxu0 }
 0xb7e   :  { %v6959_v54 = vadd.f32 %v6952_v49, %v6892_v12  ;;  %v6932_v13 = vpop.f32.mrf.mxu2  ;;  %v6996_v0 = vpop.f32.mrf.mxu3 }
 0xb7f   :  { %v6960_v35 = vadd.f32 %v6932_v13, %v6893_v62  ;;  %v7022_v19 = vpop.f32.mrf.mxu1  ;;  %v7025_v43 = vadd.f32 %v6996_v0, %v6958_v2 }
 0xb80   :  { %v7026_v18 = vadd.f32 %v7019_v52, %v6959_v54 }
 0xb85   :  { %v6955_v60 = vpop.f32.mrf.mxu0 }
 0xb86   :  { %v6961_v63 = vadd.f32 %v6955_v60, %v6894_v58  ;;  %v7063_v56 = vpop.f32.mrf.mxu2  ;;  %v6999_v27 = vpop.f32.mrf.mxu3 }
 0xb87   :  { %v7153_v34 = vpop.f32.mrf.mxu1  ;;  %v7092_v9 = vadd.f32 %v7063_v56, %v7025_v43  ;;  %v7027_v51 = vadd.f32 %v6999_v27, %v6960_v35 }
 0xb88   :  { %v7028_v7 = vadd.f32 %v7022_v19, %v6961_v63 }
 0xb8d   :  { %v7086_v41 = vpop.f32.mrf.mxu0 }
 0xb8e   :  { %v7066_v1 = vpop.f32.mrf.mxu2  ;;  %v7130_v31 = vpop.f32.mrf.mxu3  ;;  %v7093_v20 = vadd.f32 %v7086_v41, %v7026_v18 }
 0xb8f   :  { %v7156_v23 = vpop.f32.mrf.mxu1  ;;  %v7159_v33 = vadd.f32 %v7130_v31, %v7092_v9  ;;  %v7094_v52 = vadd.f32 %v7066_v1, %v7027_v51 }
 0xb90   :  { %v7160_v11 = vadd.f32 %v7153_v34, %v7093_v20 }
 0xb95   :  { %v7089_v53 = vpop.f32.mrf.mxu0 }
 0xb96   :  { %v7197_v28 = vpop.f32.mrf.mxu2  ;;  %v7133_v3 = vpop.f32.mrf.mxu3  ;;  %v7095_v5 = vadd.f32 %v7089_v53, %v7028_v7 }
 0xb97   :  { %v7287_v59 = vpop.f32.mrf.mxu1  ;;  %v7226_v14 = vadd.f32 %v7197_v28, %v7159_v33  ;;  %v7161_v54 = vadd.f32 %v7133_v3, %v7094_v52  ;;  %v3945_v52 = vld [vmem:[#allocation5 + $0x2] sm:$0x1] }
 0xb98   :  { %v7162_v30 = vadd.f32 %v7156_v23, %v7095_v5 }
 0xb9a   :  { %v7790_v20 = vpop.permute.xlu2 %7789 }
 0xb9d   :  { %v7220_v4 = vpop.f32.mrf.mxu0 }
 0xb9e   :  { %v7200_v50 = vpop.f32.mrf.mxu2  ;;  %v7264_v44 = vpop.f32.mrf.mxu3  ;;  %v7227_v48 = vadd.f32 %v7220_v4, %v7160_v11 }
 0xb9f   :  { %v7290_v61 = vpop.f32.mrf.mxu1  ;;  %v7293_v58 = vadd.f32 %v7264_v44, %v7226_v14  ;;  %v7228_v60 = vadd.f32 %v7200_v50, %v7161_v54  ;;  %v7785_v44 = vpop.permute.xlu1 %7784  ;;  %v3938_v14 = vld [vmem:[#allocation5 + $0x1] sm:$0x1]  ;;  %v3959_v54 = vld [vmem:[#allocation5 + $0x4] sm:$0x1] }
 0xba0   :  { %v7294_v38 = vadd.f32 %v7287_v59, %v7227_v48 }
 0xba5   :  { %v7223_v25 = vpop.f32.mrf.mxu0 }
 0xba6   :  { %v7331_v17 = vpop.f32.mrf.mxu2  ;;  %v7267_v15 = vpop.f32.mrf.mxu3  ;;  %v7229_v40 = vadd.f32 %v7223_v25, %v7162_v30 }
 0xba7   :  { %v7421_v26 = vpop.f32.mrf.mxu1  ;;  %v7360_v13 = vadd.f32 %v7331_v17, %v7293_v58  ;;  %v7295_v41 = vadd.f32 %v7267_v15, %v7228_v60  ;;  %v3977_v58 = vld [vmem:[#allocation5 + $0x6] sm:$0x1]  ;;  %v3998_v60 = vld [vmem:[#allocation5 + $0x9] sm:$0x1] }
 0xba8   :  { %v7296_v49 = vadd.f32 %v7290_v61, %v7229_v40 }
 0xbad   :  { %v7354_v37 = vpop.f32.mrf.mxu0 }
 0xbae   :  { %v7334_v32 = vpop.f32.mrf.mxu2  ;;  %v7398_v29 = vpop.f32.mrf.mxu3  ;;  %v7361_v57 = vadd.f32 %v7354_v37, %v7294_v38 }
 0xbaf   :  { %v7424_v55 = vpop.f32.mrf.mxu1  ;;  %v7427_v63 = vadd.f32 %v7398_v29, %v7360_v13  ;;  %v7362_v27 = vadd.f32 %v7334_v32, %v7295_v41  ;;  %v4005_v13 = vld [vmem:[#allocation5 + $0xa] sm:$0x1]  ;;  %v7867_v41 = vld [vmem:[%s15579_s6 + $0x78] sm:$0x1] }
 0xbb0   :  { %v7428_v12 = vadd.f32 %v7421_v26, %v7361_v57  ;;  %8569 = vmatpush.msk.msra.mxu3 %vm3905_vm6, %v7867_v41 }
 0xbb5   :  { %v7357_v42 = vpop.f32.mrf.mxu0 }
 0xbb6   :  { %v7465_v6 = vpop.f32.mrf.mxu2  ;;  %v7401_v47 = vpop.f32.mrf.mxu3  ;;  %v7363_v2 = vadd.f32 %v7357_v42, %v7296_v49  ;;  %v3952_v49 = vld [vmem:[#allocation5 + $0x3] sm:$0x1] }
 0xbb7   :  { %v7494_v31 = vadd.f32 %v7465_v6, %v7427_v63  ;;  %v7429_v3 = vadd.f32 %v7401_v47, %v7362_v27  ;;  %v4045_v63 = vld [vmem:[#allocation5 + $0xf] sm:$0x1]  ;;  %v7862_v27 = vld [vmem:[%s15579_s6 + $0x50] sm:$0xff] }
 0xbb8   :  { %v7430_v53 = vadd.f32 %v7424_v55, %v7363_v2  ;;  %v4017_v2 = vld [vmem:[#allocation5 + $0xb] sm:$0x1] }
 0xbbc   :  { %v7569_v39 = vpop.f32.mrf.mxu1 }
 0xbbd   :  { %v7488_v16 = vpop.f32.mrf.mxu0 }
 0xbbe   :  { %v7468_v8 = vpop.f32.mrf.mxu2  ;;  %v7495_v45 = vadd.f32 %v7488_v16, %v7428_v12 }
 0xbbf   :  { %v7496_v37 = vadd.f32 %v7468_v8, %v7429_v3  ;;  %v7856_v3 = vld [vmem:[%s15579_s6 + $0x20] sm:$0xff] }
 0xbc0   :  { %v7576_v0 = vadd.f32 %v7569_v39, %v7495_v45 }
 0xbc2   :  { %v7546_v36 = vpop.f32.mrf.mxu3 }
 0xbc3   :  { %v7575_v28 = vadd.f32 %v7546_v36, %v7494_v31  ;;  %v7866_v31 = vld [vmem:[%s15579_s6 + $0x70] sm:$0xff] }
 0xbc4   :  { %7878 = vmatpush.msra.mxu3 %v7866_v31 }
 0xbc5   :  { %v7491_v21 = vpop.f32.mrf.mxu0 }
 0xbc6   :  { %v7497_v1 = vadd.f32 %v7491_v21, %v7430_v53  ;;  %v7865_v53 = vld [vmem:[%s15579_s6 + $0x68] sm:$0xff] }
 0xbc7   :  { %7879 = vmatpush.msra.mxu3 %v7865_v53  ;;  %v8016_v53 = vld [vmem:[%s15580_s7 + $0x78] sm:$0xff] }
 0xbc8   :  { %8067 = vmatpush.msrb.mxu1 %v8016_v53 }
 0xbcb   :  { %v7613_v10 = vpop.f32.mrf.mxu2 }
 0xbcc   :  { %v7572_v46 = vpop.f32.mrf.mxu1  ;;  %v7642_v25 = vadd.f32 %v7613_v10, %v7575_v28  ;;  %v7861_v28 = vld [vmem:[%s15579_s6 + $0x48] sm:$0xff] }
 0xbcd   :  { %v7636_v24 = vpop.f32.mrf.mxu0  ;;  %v7578_v61 = vadd.f32 %v7572_v46, %v7497_v1  ;;  %v7859_v1 = vld [vmem:[%s15579_s6 + $0x38] sm:$0xff] }
 0xbce   :  { %v7643_v56 = vadd.f32 %v7636_v24, %v7576_v0  ;;  %v3991_v0 = vld [vmem:[#allocation5 + $0x8] sm:$0x1] }
 0xbd2   :  { %v7549_v22 = vpop.f32.mrf.mxu3 }
 0xbd3   :  { %v7616_v34 = vpop.f32.mrf.mxu2  ;;  %v7577_v16 = vadd.f32 %v7549_v22, %v7496_v37  ;;  %v7852_v37 = vld [vmem:[%s15579_s6] sm:$0xff] }
 0xbd4   :  { %v7703_v19 = vpop.f32.mrf.mxu1 }
 0xbd5   :  { %v7639_v62 = vpop.f32.mrf.mxu0  ;;  %v7710_v23 = vadd.f32 %v7703_v19, %v7643_v56  ;;  %v7644_v47 = vadd.f32 %v7616_v34, %v7577_v16  ;;  %v3984_v19 = vld [vmem:[#allocation5 + $0x7] sm:$0x1]  ;;  %v4024_v56 = vld [vmem:[#allocation5 + $0xc] sm:$0x1]  ;;  %v4031_v34 = vld [vmem:[#allocation5 + $0xd] sm:$0x1] }
 0xbd6   :  { %v7645_v42 = vadd.f32 %v7639_v62, %v7578_v61  ;;  %v3966_v62 = vld [vmem:[#allocation5 + $0x5] sm:$0x1] }
 0xbd7   :  { %v7854_v61 = vld [vmem:[%s15579_s6 + $0x10] sm:$0xff] }
 0xbdb   :  { %v7680_v35 = vpop.f32.mrf.mxu3 }
 0xbdc   :  { %v7709_v50 = vadd.f32 %v7680_v35, %v7642_v25  ;;  %v7706_v26 = vpop.f32.mrf.mxu1  ;;  %v7863_v35 = vld [vmem:[%s15579_s6 + $0x58] sm:$0xff] }
 0xbdd   :  { %v7712_v6 = vadd.f32 %v7706_v26, %v7645_v42  ;;  %v7855_v25 = vld [vmem:[%s15579_s6 + $0x18] sm:$0xff] }
 0xbde   :  { %v7770_v4 = vpop.f32.mrf.mxu0 }
 0xbdf   :  { %v7777_v59 = vadd.f32 %v7770_v4, %v7710_v23  ;;  %v7864_v23 = vld [vmem:[%s15579_s6 + $0x60] sm:$0xff] }
 0xbe0   :  { %7880 = vmatpush.msra.mxu3 %v7864_v23  ;;  %v7860_v4 = vld [vmem:[%s15579_s6 + $0x40] sm:$0xff]  ;;  %v8032_v23 = vld [vmem:[%s15580_s7 + $0xf8] sm:$0xff] }
 0xbe1   :  { %v7793_v17 = vadd.f32 %v7785_v44, %v7777_v59  ;;  %v7858_v59 = vld [vmem:[%s15579_s6 + $0x30] sm:$0xff]  ;;  %8087 = vmatpush.msra.mxu2 %v8032_v23  ;;  %v8050_v23 = vld [vmem:[%s15580_s7 + $0x188] sm:$0xff] }
 0xbe2   :  { %7881 = vmatpush.msra.mxu3 %v7863_v35  ;;  %v8048_v35 = vld [vmem:[%s15580_s7 + $0x178] sm:$0xff] }
 0xbe3   :  { %v7797_v29 = vmax.f32 %v7793_v17, 0.0  ;;  %v7747_v15 = vpop.f32.mrf.mxu2  ;;  %v7683_v21 = vpop.f32.mrf.mxu3  ;;  %v7853_v17 = vld [vmem:[%s15579_s6 + $0x8] sm:$0xff]  ;;  %8107 = vmatpush.msra.mxu0 %v8048_v35  ;;  %v8049_v35 = vld [vmem:[%s15580_s7 + $0x180] sm:$0xff] }
 0xbe4   :  { %v7776_v55 = vadd.f32 %v7747_v15, %v7709_v50  ;;  %v7711_v8 = vadd.f32 %v7683_v21, %v7644_v47  ;;  %7882 = vmatpush.msra.mxu3 %v7862_v27  ;;  %v8015_v27 = vld [vmem:[%s15580_s7 + $0x70] sm:$0xff] }
 0xbe5   :  { %7801 = vst.msk [vmem:[#allocation4 + $0x8] sm:$0xff] %vm3830_vm9, %v7797_v29  ;;  %8068 = vmatpush.msrb.mxu1 %v8015_v27 }
 0xbe6   :  { %v7792_v32 = vadd.f32 %v7785_v44, %v7776_v55  ;;  %v7773_v18 = vpop.f32.mrf.mxu0  ;;  %7883 = vmatpush.msra.mxu3 %v7861_v28  ;;  %v7857_v44 = vld [vmem:[%s15579_s6 + $0x28] sm:$0xff]  ;;  %s16888_s6 = smov 75   ;;  %v8031_v28 = vld [vmem:[%s15580_s7 + $0xf0] sm:$0xff] }
 0xbe7   :  { %v7779_v39 = vadd.f32 %v7773_v18, %v7712_v6  ;;  %8088 = vmatpush.msra.mxu2 %v8031_v28 }
 0xbe8   :  { %v15147_v11 = vmax.f32 %v7792_v32, 0.0  ;;  %7884 = vmatpush.msra.mxu3 %v7860_v4  ;;  %v8047_v4 = vld [vmem:[%s15580_s7 + $0x170] sm:$0xff] }
 0xbe9   :  { %v7795_v48 = vadd.f32 %v7790_v20, %v7779_v39  ;;  %8108 = vmatpush.msra.mxu0 %v8047_v4 }
 0xbea   :  { %7808 = vrot.lane.b32.xlu0 %v15147_v11, %s8812_s29  ;;  %7885 = vmatpush.msra.mxu3 %v7859_v1 }
 0xbeb   :  { %v7799_v7 = vmax.f32 %v7795_v48, 0.0  ;;  %v7750_v36 = vpop.f32.mrf.mxu2 }
 0xbec   :  { %v7778_v5 = vadd.f32 %v7750_v36, %v7711_v8  ;;  %v7816_v38 = vld [vmem:[#allocation4 + $0x8] sm:$0xff]  ;;  %7886 = vmatpush.msra.mxu3 %v7858_v59  ;;  %v8014_v59 = vld [vmem:[%s15580_s7 + $0x68] sm:$0xff] }
 0xbed   :  { %7803 = vst.msk [vmem:[#allocation4 + $0x18] sm:$0xff] %vm3830_vm9, %v7799_v7  ;;  %7820 = vrot.lane.b32.xlu1 %v7816_v38, %s8812_s29  ;;  %vm16880_vm9 = vcmask 932864   ;;  %8069 = vmatpush.msrb.mxu1 %v8014_v59  ;;  %v8162_v59 = vld [vmem:[%s15582_s9 + $0x70] sm:$0xff] }
 0xbee   :  { %v7794_v24 = vadd.f32 %v7790_v20, %v7778_v5  ;;  %7887 = vmatpush.msra.mxu3 %v7857_v44  ;;  %vm16881_vm6 = vmmov %vm16880_vm9  ;;  %v8030_v44 = vld [vmem:[%s15580_s7 + $0xe8] sm:$0xff] }
 0xbef   :  { %8089 = vmatpush.msra.mxu2 %v8030_v44  ;;  %v8161_v44 = vld [vmem:[%s15582_s9 + $0x68] sm:$0xff] }
 0xbf0   :  { %v15153_v43 = vmax.f32 %v7794_v24, 0.0  ;;  %7888 = vmatpush.msra.mxu3 %v7856_v3  ;;  %v8046_v3 = vld [vmem:[%s15580_s7 + $0x168] sm:$0xff] }
 0xbf1   :  { %8109 = vmatpush.msra.mxu0 %v8046_v3 }
 0xbf2   :  { %7810 = vrot.lane.b32.xlu2 %v15153_v43, %s8812_s29  ;;  %7889 = vmatpush.msra.mxu3 %v7855_v25 }
 0xbf4   :  { %v7817_v46 = vld [vmem:[#allocation4 + $0x18] sm:$0xff]  ;;  %7890 = vmatpush.msra.mxu3 %v7854_v61 }
 0xbf5   :  { %7822 = vrot.lane.b32.xlu0 %v7817_v46, %s8812_s29  ;;  %s8876_s29 = smov 22  }
 0xbf6   :  { %7891 = vmatpush.msra.mxu3 %v7853_v17  ;;  %v8013_v17 = vld [vmem:[%s15580_s7 + $0x60] sm:$0xff] }
 0xbf7   :  { %8070 = vmatpush.msrb.mxu1 %v8013_v17  ;;  %v8159_v17 = vld [vmem:[%s15582_s9 + $0x58] sm:$0xff] }
 0xbf8   :  { %7892 = vmatpush.msra.mxu3 %v7852_v37  ;;  %v8029_v37 = vld [vmem:[%s15580_s7 + $0xe0] sm:$0xff] }
 0xbf9   :  { %8090 = vmatpush.msra.mxu2 %v8029_v37 }
 0xbfa   :  { %8172 = vmatpush.msrb.mxu3 %v8162_v59 }
 0xbfc   :  { %8173 = vmatpush.msrb.mxu3 %v8161_v44 }
 0xc4c   :  { %v15165_v40 = vpop.permute.xlu2 %7810 }
 0xc4d   :  { %v7815_v6 = vmax.f32 %v15153_v43, %v15165_v40 }
 0xc5c   :  { %v15158_v9 = vpop.permute.xlu0 %7808 }
 0xc5d   :  { %v7814_v42 = vmax.f32 %v15147_v11, %v15158_v9 }
 0xc5f   :  { %v7821_v57 = vpop.permute.xlu1 %7820 }
 0xc60   :  { %v7831_v30 = vmax.f32 %v7816_v38, %v7821_v57  ;;  %v7824_v10 = vsel %vm135_vm0, %v15158_v9, %v7821_v57 }
 0xc61   :  { %v7830_v33 = vmax.f32 %v15147_v11, %v7824_v10 }
 0xc62   :  { %7840 = vrot.lane.b32.xlu2 %v7831_v30, %s16687_s0 }
 0xc63   :  { %7838 = vrot.lane.b32.xlu1 %v7830_v33, %s16687_s0 }
 0xc67   :  { %v7823_v12 = vpop.permute.xlu0 %7822 }
 0xc68   :  { %v7825_v22 = vsel %vm135_vm0, %v15165_v40, %v7823_v12  ;;  %v7833_v51 = vmax.f32 %v7817_v46, %v7823_v12  ;;  %vm3943_vm0 = vcmask 401608  }
 0xc69   :  { %v7832_v45 = vmax.f32 %v15153_v43, %v7825_v22  ;;  %v4038_v22 = vld [vmem:[#allocation5 + $0xe] sm:$0x1] }
 0xc6a   :  { %3940 = vrot.lane.b32.xlu2 %v3938_v14, %s8875_s5 }
 0xc6b   :  { %7844 = vrot.lane.b32.xlu1 %v7833_v51, %s16687_s0  ;;  %7842 = vrot.lane.b32.xlu0 %v7832_v45, %s16687_s0  ;;  %s8878_s0 = smov 47  }
 0xc72   :  { %3968 = vrot.lane.b32.xlu2 %v3966_v62, %s8816_s14 }
 0xc73   :  { %3947 = vrot.lane.b32.xlu1 %v3945_v52, %s16714_s2  ;;  %3979 = vrot.lane.b32.xlu0 %v3977_v58, %s8876_s29 }
 0xc7a   :  { %3954 = vrot.lane.b32.xlu2 %v3952_v49, %s15943_s16 }
 0xc7b   :  { %3961 = vrot.lane.b32.xlu1 %v3959_v54, %s16708_s3  ;;  %4007 = vrot.lane.b32.xlu0 %v4005_v13, %s16692_s1 }
 0xc82   :  { %3986 = vrot.lane.b32.xlu2 %v3984_v19, %s8878_s0 }
 0xc83   :  { %4019 = vrot.lane.b32.xlu1 %v4017_v2, %s8879_s26  ;;  %3993 = vrot.lane.b32.xlu0 %v3991_v0, %s16739_s24 }
 0xc8a   :  { %4000 = vrot.lane.b32.xlu2 %v3998_v60, %s16713_s22 }
 0xc8b   :  { %4047 = vrot.lane.b32.xlu1 %v4045_v63, %s15942_s23  ;;  %4026 = vrot.lane.b32.xlu0 %v4024_v56, %s16715_s18 }
 0xc93   :  { %4033 = vrot.lane.b32.xlu1 %v4031_v34, %s16775_s28 }
 0xcbc   :  { %v7841_v50 = vpop.permute.xlu2 %7840 }
 0xcc4   :  { %v3941_v26 = vpop.permute.xlu2 %3940 }
 0xcc5   :  { %3944 = vst.msk [vmem:[#allocation6] sm:$0x1] %vm3943_vm0, %v3941_v26  ;;  %v8012_v26 = vld [vmem:[%s15580_s7 + $0x58] sm:$0xff] }
 0xcc6   :  { %8071 = vmatpush.msrb.mxu1 %v8012_v26 }
 0xccc   :  { %v3969_v55 = vpop.permute.xlu2 %3968 }
 0xccd   :  { %v3970_v48 = vrot.slane %v3969_v55, 6 }
 0xccf   :  { %v3971_v38 = vsel %vm16884_vm12, %v3970_v48, %v3969_v55  ;;  %vm4029_vm12 = vcmask 557408   ;;  %v8043_v55 = vld [vmem:[%s15580_s7 + $0x150] sm:$0xff]  ;;  %v8041_v48 = vld [vmem:[%s15580_s7 + $0x140] sm:$0xff] }
 0xcd4   :  { %v3955_v39 = vpop.permute.xlu2 %3954 }
 0xcd5   :  { %v7839_v29 = vpop.permute.xlu1 %7838 }
 0xcd6   :  { %v7846_v15 = vsel %vm16880_vm9, %v7839_v29, %v7841_v50  ;;  %vm4010_vm9 = vcmask 998400   ;;  %v8045_v50 = vld [vmem:[%s15580_s7 + $0x160] sm:$0xff]  ;;  %v8044_v29 = vld [vmem:[%s15580_s7 + $0x158] sm:$0xff] }
 0xcd7   :  { %v7850_v16 = vmax.f32 %v7814_v42, %v7846_v15  ;;  %8110 = vmatpush.msra.mxu0 %v8045_v50  ;;  %v8028_v42 = vld [vmem:[%s15580_s7 + $0xd8] sm:$0xff]  ;;  %v8011_v15 = vld [vmem:[%s15580_s7 + $0x50] sm:$0xff] }
 0xcd8   :  { %8091 = vmatpush.msra.mxu2 %v8028_v42  ;;  %8072 = vmatpush.msrb.mxu1 %v8011_v15  ;;  %v8158_v50 = vld [vmem:[%s15582_s9 + $0x50] sm:$0xff]  ;;  %v8157_v42 = vld [vmem:[%s15582_s9 + $0x48] sm:$0xff] }
 0xcd9   :  { %8570 = vmatmul.msk.f32.vlgmr.msra.gmra.mxu3 %vm3898_vm3, %v7850_v16  ;;  %v8027_v16 = vld [vmem:[%s15580_s7 + $0xd0] sm:$0xff]  ;;  %8111 = vmatpush.msra.mxu0 %v8044_v29  ;;  %v8156_v29 = vld [vmem:[%s15582_s9 + $0x40] sm:$0xff] }
 0xcda   :  { %8092 = vmatpush.msra.mxu2 %v8027_v16 }
 0xcdb   :  { %8112 = vmatpush.msra.mxu0 %v8043_v55 }
 0xcdc   :  { %v3987_v8 = vpop.permute.xlu2 %3986 }
 0xcdd   :  { %v7845_v32 = vpop.permute.xlu1 %7844  ;;  %v7843_v18 = vpop.permute.xlu0 %7842 }
 0xcde   :  { %v7847_v20 = vsel %vm16881_vm6, %v7843_v18, %v7845_v32  ;;  %vm4003_vm6 = vcmask 992008   ;;  %v8026_v32 = vld [vmem:[%s15580_s7 + $0xc8] sm:$0xff] }
 0xcdf   :  { %v7851_v21 = vmax.f32 %v7815_v6, %v7847_v20  ;;  %v8010_v6 = vld [vmem:[%s15580_s7 + $0x48] sm:$0xff]  ;;  %8093 = vmatpush.msra.mxu2 %v8026_v32  ;;  %v8155_v32 = vld [vmem:[%s15582_s9 + $0x38] sm:$0xff] }
 0xce0   :  { %v8042_v18 = vld [vmem:[%s15580_s7 + $0x148] sm:$0xff]  ;;  %8073 = vmatpush.msrb.mxu1 %v8010_v6 }
 0xce1   :  { %8571 = vmatmul.msk.f32.gmra.mxu3 %vm3898_vm3, %v7851_v21  ;;  %vm3982_vm3 = vcmask 377008   ;;  %8113 = vmatpush.msra.mxu0 %v8042_v18  ;;  %v8154_v18 = vld [vmem:[%s15582_s9 + $0x30] sm:$0xff] }
 0xce3   :  { %8114 = vmatpush.msra.mxu0 %v8041_v48  ;;  %v8148_v48 = vld [vmem:[%s15582_s9] sm:$0xff] }
 0xce4   :  { %v4001_v9 = vpop.permute.xlu2 %4000 }
 0xce5   :  { %v3948_v47 = vpop.permute.xlu1 %3947  ;;  %v3980_v11 = vpop.permute.xlu0 %3979 }
 0xce6   :  { %3951 = vst.msk [vmem:[#allocation6] sm:$0x1] %vm3950_vm15, %v3948_v47  ;;  %v8009_v47 = vld [vmem:[%s15580_s7 + $0x40] sm:$0xff] }
 0xce7   :  { %3958 = vst.msk [vmem:[#allocation6] sm:$0x1] %vm3957_vm10, %v3955_v39  ;;  %8074 = vmatpush.msrb.mxu1 %v8009_v47  ;;  %v8150_v47 = vld [vmem:[%s15582_s9 + $0x10] sm:$0xff] }
 0xced   :  { %v3962_v36 = vpop.permute.xlu1 %3961  ;;  %v4008_v5 = vpop.permute.xlu0 %4007 }
 0xcee   :  { %3965 = vst.msk [vmem:[#allocation6] sm:$0x1] %vm3964_vm7, %v3962_v36  ;;  %v4009_v24 = vrot.slane %v4008_v5, 6  ;;  %v8024_v36 = vld [vmem:[%s15580_s7 + $0xb8] sm:$0xff] }
 0xcef   :  { %3976 = vst.msk [vmem:[#allocation6] sm:$0x5] %vm15246_vm11, %v3971_v38  ;;  %v8007_v38 = vld [vmem:[%s15580_s7 + $0x30] sm:$0xff] }
 0xcf0   :  { %3983 = vst.msk [vmem:[#allocation6 + $0x2] sm:$0x1] %vm3982_vm3, %v3980_v11  ;;  %v4011_v30 = vsel %vm4010_vm9, %v4009_v24, %v4008_v5  ;;  %v8025_v11 = vld [vmem:[%s15580_s7 + $0xc0] sm:$0xff]  ;;  %v8040_v5 = vld [vmem:[%s15580_s7 + $0x138] sm:$0xff]  ;;  %v8023_v24 = vld [vmem:[%s15580_s7 + $0xb0] sm:$0xff] }
 0xcf1   :  { %3990 = vst.msk [vmem:[#allocation6 + $0x2] sm:$0x1] %vm3989_vm4, %v3987_v8  ;;  %8094 = vmatpush.msra.mxu2 %v8025_v11  ;;  %v8008_v8 = vld [vmem:[%s15580_s7 + $0x38] sm:$0xff]  ;;  %8115 = vmatpush.msra.mxu0 %v8040_v5  ;;  %v8149_v11 = vld [vmem:[%s15582_s9 + $0x8] sm:$0xff]  ;;  %v8200_v5 = vld [vmem:[%s15584_s11 + $0x40] sm:$0xff] }
 0xcf2   :  { %8075 = vmatpush.msrb.mxu1 %v8008_v8  ;;  %v8202_v8 = vld [vmem:[%s15584_s11 + $0x50] sm:$0xf] }
 0xcf3   :  { %8095 = vmatpush.msra.mxu2 %v8024_v36  ;;  %v8201_v36 = vld [vmem:[%s15584_s11 + $0x48] sm:$0xff] }
 0xcf4   :  { %8076 = vmatpush.msrb.mxu1 %v8007_v38  ;;  %v8199_v38 = vld [vmem:[%s15584_s11 + $0x38] sm:$0xff] }
 0xcf5   :  { %v4020_v43 = vpop.permute.xlu1 %4019  ;;  %v3994_v46 = vpop.permute.xlu0 %3993  ;;  %8096 = vmatpush.msra.mxu2 %v8023_v24  ;;  %v8198_v24 = vld [vmem:[%s15584_s11 + $0x30] sm:$0xff] }
 0xcf6   :  { %3997 = vst.msk [vmem:[#allocation6 + $0x2] sm:$0x1] %vm3996_vm13, %v3994_v46 }
 0xcf7   :  { %4004 = vst.msk [vmem:[#allocation6 + $0x2] sm:$0x1] %vm4003_vm6, %v4001_v9 }
 0xcf8   :  { %4016 = vst.msk [vmem:[#allocation6 + $0x2] sm:$0x5] %vm15256_vm8, %v4011_v30  ;;  %v8006_v30 = vld [vmem:[%s15580_s7 + $0x28] sm:$0xff] }
 0xcf9   :  { %4023 = vst.msk [vmem:[#allocation6 + $0x4] sm:$0x1] %vm4022_vm5, %v4020_v43  ;;  %v8039_v43 = vld [vmem:[%s15580_s7 + $0x130] sm:$0xff]  ;;  %8077 = vmatpush.msrb.mxu1 %v8006_v30 }
 0xcfa   :  { %8116 = vmatpush.msra.mxu0 %v8039_v43  ;;  %v8197_v43 = vld [vmem:[%s15584_s11 + $0x28] sm:$0xff] }
 0xcfd   :  { %v15266_v10 = vpop.permute.xlu1 %4047  ;;  %v4027_v33 = vpop.permute.xlu0 %4026 }
 0xcfe   :  { %4030 = vst.msk [vmem:[#allocation6 + $0x4] sm:$0x1] %vm4029_vm12, %v4027_v33  ;;  %v8022_v33 = vld [vmem:[%s15580_s7 + $0xa8] sm:$0xff] }
 0xcff   :  { %8097 = vmatpush.msra.mxu2 %v8022_v33  ;;  %v8767_v33 = vld [vmem:[%s15581_s8] ss:$0 sm:$0xff] }
 0xd05   :  { %v4034_v40 = vpop.permute.xlu1 %4033 }
 0xd06   :  { %4037 = vst.msk [vmem:[#allocation6 + $0x4] sm:$0x1] %vm4036_vm2, %v4034_v40  ;;  %v8038_v40 = vld [vmem:[%s15580_s7 + $0x128] sm:$0xff] }
 0xd07   :  { %8117 = vmatpush.msra.mxu0 %v8038_v40 }
 0xd5c   :  { %v7894_v12 = vpop.f32.mrf.mxu3 }
 0xd5d   :  { %7900 = vst.msk [vmem:[#allocation5] sm:$0xff] %vm3932_vm14, %v7894_v12 }
 0xd64   :  { %v7897_v51 = vpop.f32.mrf.mxu3  ;;  %v7922_v14 = vld [vmem:[#allocation5 + $0x4] sm:$0x1]  ;;  %v7928_v45 = vld [vmem:[#allocation5 + $0x5] sm:$0x1]  ;;  %v7904_v62 = vld [vmem:[#allocation5 + $0x1] sm:$0x1] }
 0xd65   :  { %7901 = vst.msk [vmem:[#allocation5 + $0x8] sm:$0xff] %vm3932_vm14, %v7897_v51  ;;  %7924 = vrot.lane.b32.xlu2 %v7922_v14, %s16708_s3  ;;  %7930 = vrot.lane.b32.xlu1 %v7928_v45, %s8816_s14  ;;  %v7902_v52 = vld [vmem:[#allocation5] sm:$0x1]  ;;  %v7936_v58 = vld [vmem:[#allocation5 + $0x6] sm:$0x1]  ;;  %s16889_s14 = smov 119  }
 0xd66   :  { %7906 = vrot.lane.b32.xlu0 %v7904_v62, %s8875_s5  ;;  %7903 = vst.msk [vmem:[#allocation6 + $0x1] sm:$0x1] %vm16887_vm1, %v7902_v52  ;;  %v7910_v54 = vld [vmem:[#allocation5 + $0x2] sm:$0x1]  ;;  %v7942_v13 = vld [vmem:[#allocation5 + $0x7] sm:$0x1] }
 0xd67   :  { %v7916_v2 = vld [vmem:[#allocation5 + $0x3] sm:$0x1]  ;;  %v8021_v51 = vld [vmem:[%s15580_s7 + $0xa0] sm:$0xff]  ;;  %vm16890_vm14 = vcmask 1022976   ;;  %v8004_v52 = vld [vmem:[%s15580_s7 + $0x18] sm:$0xff] }
 0xd68   :  { %v8037_v14 = vld [vmem:[%s15580_s7 + $0x120] sm:$0xff]  ;;  %8098 = vmatpush.msra.mxu2 %v8021_v51 }
 0xd69   :  { %8118 = vmatpush.msra.mxu0 %v8037_v14 }
 0xd6c   :  { %v7960_v49 = vld [vmem:[#allocation5 + $0xa] sm:$0x1]  ;;  %v7968_v19 = vld [vmem:[#allocation5 + $0xb] sm:$0x1]  ;;  %v7974_v0 = vld [vmem:[#allocation5 + $0xc] sm:$0x1] }
 0xd6d   :  { %7938 = vrot.lane.b32.xlu1 %v7936_v58, %s8876_s29  ;;  %7962 = vrot.lane.b32.xlu2 %v7960_v49, %s16692_s1  ;;  %v7948_v60 = vld [vmem:[#allocation5 + $0x8] sm:$0x1]  ;;  %v7954_v63 = vld [vmem:[#allocation5 + $0x9] sm:$0x1]  ;;  %v7980_v56 = vld [vmem:[#allocation5 + $0xd] sm:$0x1] }
 0xd6e   :  { %7912 = vrot.lane.b32.xlu0 %v7910_v54, %s16714_s2  ;;  %v7986_v34 = vld [vmem:[#allocation5 + $0xe] sm:$0x1]  ;;  %v7992_v41 = vld [vmem:[#allocation5 + $0xf] sm:$0x1]  ;;  %v8003_v54 = vld [vmem:[%s15580_s7 + $0x10] sm:$0xff]  ;;  %s8881_s29 = smov [#allocation7]  }
 0xd6f   :  { %v8020_v58 = vld [vmem:[%s15580_s7 + $0x98] sm:$0xff] }
 0xd70   :  { %v8036_v49 = vld [vmem:[%s15580_s7 + $0x118] sm:$0xff]  ;;  %8099 = vmatpush.msra.mxu2 %v8020_v58  ;;  %v8194_v58 = vld [vmem:[%s15584_s11 + $0x10] sm:$0xff] }
 0xd71   :  { %8119 = vmatpush.msra.mxu0 %v8036_v49  ;;  %v8193_v49 = vld [vmem:[%s15584_s11 + $0x8] sm:$0xff] }
 0xd75   :  { %7944 = vrot.lane.b32.xlu1 %v7942_v13, %s8878_s0  ;;  %7970 = vrot.lane.b32.xlu2 %v7968_v19, %s8879_s26  ;;  %v8019_v13 = vld [vmem:[%s15580_s7 + $0x90] sm:$0xff]  ;;  %s8241_s0 = sshll.u32 %s8881_s29, 4  ;;  %s8242_s0 = int_to_ptr.vmem [resolvable:$true] %s8241_s0 }
 0xd76   :  { %7918 = vrot.lane.b32.xlu0 %v7916_v2, %s16888_s6  ;;  %v8035_v19 = vld [vmem:[%s15580_s7 + $0x110] sm:$0xff]  ;;  %v8002_v2 = vld [vmem:[%s15580_s7 + $0x8] sm:$0xff]  ;;  %8100 = vmatpush.msra.mxu2 %v8019_v13  ;;  %v8768_v13 = vld [vmem:[%s15583_s10] ss:$0 sm:$0xff] }
 0xd77   :  { %8120 = vmatpush.msra.mxu0 %v8035_v19 }
 0xd7d   :  { %7976 = vrot.lane.b32.xlu2 %v7974_v0, %s16715_s18  ;;  %7950 = vrot.lane.b32.xlu1 %v7948_v60, %s16739_s24  ;;  %v8018_v0 = vld [vmem:[%s15580_s7 + $0x88] sm:$0xff] }
 0xd7e   :  { %7956 = vrot.lane.b32.xlu0 %v7954_v63, %s16713_s22  ;;  %v8034_v60 = vld [vmem:[%s15580_s7 + $0x108] sm:$0xff]  ;;  %8101 = vmatpush.msra.mxu2 %v8018_v0  ;;  %v8769_v0 = vld [vmem:[%s15585_s12] ss:$0 sm:$0xff] }
 0xd7f   :  { %8121 = vmatpush.msra.mxu0 %v8034_v60 }
 0xd85   :  { %7982 = vrot.lane.b32.xlu2 %v7980_v56, %s16775_s28  ;;  %7988 = vrot.lane.b32.xlu1 %v7986_v34, %s16261_s27  ;;  %v8001_v56 = vld [vmem:[%s15580_s7] sm:$0xff] }
 0xd86   :  { %7994 = vrot.lane.b32.xlu0 %v7992_v41, %s16889_s14  ;;  %v8017_v34 = vld [vmem:[%s15580_s7 + $0x80] sm:$0xff] }
 0xd87   :  { %8102 = vmatpush.msra.mxu2 %v8017_v34 }
 0xd8e   :  { %4040 = vrot.lane.b32.xlu0 %v4038_v22, %s16261_s27  ;;  %v8005_v22 = vld [vmem:[%s15580_s7 + $0x20] sm:$0xff] }
 0xd8f   :  { %8078 = vmatpush.msrb.mxu1 %v8005_v22 }
 0xd91   :  { %8079 = vmatpush.msrb.mxu1 %v8004_v52 }
 0xd93   :  { %8080 = vmatpush.msrb.mxu1 %v8003_v54  ;;  %v8192_v54 = vld [vmem:[%s15584_s11] sm:$0xff] }
 0xd95   :  { %8081 = vmatpush.msrb.mxu1 %v8002_v2 }
 0xd97   :  { %8082 = vmatpush.msrb.mxu1 %v8001_v56 }
 0xd99   :  { %8141 = vmatpush.msra.mxu1 %v8050_v23 }
 0xd9b   :  { %8142 = vmatpush.msra.mxu1 %v8049_v35 }
 0xdbf   :  { %v15289_v31 = vpop.permute.xlu2 %7924 }
 0xdc7   :  { %v15309_v1 = vpop.permute.xlu2 %7962 }
 0xdc8   :  { %v7964_v7 = vrot.slane %v15309_v1, 6 }
 0xdca   :  { %v7965_v53 = vsel %vm4010_vm9, %v7964_v7, %v15309_v1  ;;  %vm16893_vm9 = vcmask 687104  }
 0xdcf   :  { %v15359_v21 = vpop.permute.xlu2 %7970 }
 0xdd7   :  { %v15320_v25 = vpop.permute.xlu1 %7930  ;;  %v7977_v62 = vpop.permute.xlu2 %7976 }
 0xdd8   :  { %v7907_v61 = vpop.permute.xlu0 %7906  ;;  %v7932_v46 = vrot.slane %v15320_v25, 6 }
 0xdd9   :  { %7909 = vst.msk [vmem:[#allocation6 + $0x1] sm:$0x1] %vm3943_vm0, %v7907_v61  ;;  %vm4043_vm0 = vcmask 967408   ;;  %v4049_v61 = vrot.slane %v15266_v10, 6 }
 0xdda   :  { %v7933_v45 = vsel %vm16890_vm14, %v7932_v46, %v15320_v25  ;;  %v8160_v25 = vld [vmem:[%s15582_s9 + $0x60] sm:$0xff] }
 0xddb   :  { %8174 = vmatpush.msrb.mxu3 %v8160_v25  ;;  %v8196_v46 = vld [vmem:[%s15584_s11 + $0x20] sm:$0xff] }
 0xddd   :  { %8175 = vmatpush.msrb.mxu3 %v8159_v17 }
 0xddf   :  { %v7939_v20 = vpop.permute.xlu1 %7938  ;;  %v7983_v27 = vpop.permute.xlu2 %7982  ;;  %8176 = vmatpush.msrb.mxu3 %v8158_v50 }
 0xde0   :  { %v7913_v39 = vpop.permute.xlu0 %7912 }
 0xde1   :  { %7915 = vst.msk [vmem:[#allocation6 + $0x1] sm:$0x1] %vm3950_vm15, %v7913_v39  ;;  %vm4053_vm15 = vcmask 1041336   ;;  %8177 = vmatpush.msrb.mxu3 %v8157_v42  ;;  %v8151_v39 = vld [vmem:[%s15582_s9 + $0x18] sm:$0xff] }
 0xde3   :  { %8178 = vmatpush.msrb.mxu3 %v8156_v29 }
 0xde5   :  { %8179 = vmatpush.msrb.mxu3 %v8155_v32 }
 0xde7   :  { %v7945_v9 = vpop.permute.xlu1 %7944  ;;  %8180 = vmatpush.msrb.mxu3 %v8154_v18 }
 0xde8   :  { %v7919_v12 = vpop.permute.xlu0 %7918 }
 0xde9   :  { %7921 = vst.msk [vmem:[#allocation6 + $0x1] sm:$0x1] %vm3957_vm10, %v7919_v12  ;;  %vm4054_vm10 = vcmask 124930  }
 0xdea   :  { %7927 = vst.msk [vmem:[#allocation6 + $0x1] sm:$0x1] %vm3964_vm7, %v15289_v31  ;;  %v8033_v31 = vld [vmem:[%s15580_s7 + $0x100] sm:$0xff]  ;;  %vm15471_vm7 = vmor %vm4054_vm10, %vm4053_vm15 }
 0xdeb   :  { %7935 = vst.msk [vmem:[#allocation6 + $0x1] sm:$0x5] %vm15246_vm11, %v7933_v45  ;;  %8122 = vmatpush.msra.mxu0 %v8033_v31  ;;  %vm4050_vm11 = vcmask 973824  }
 0xdec   :  { %7941 = vst.msk [vmem:[#allocation6 + $0x3] sm:$0x1] %vm3982_vm3, %v7939_v20  ;;  %v4051_v26 = vsel %vm4050_vm11, %v4049_v61, %v15266_v10  ;;  %vm8064_vm3 = vcmask 130048   ;;  %v8153_v20 = vld [vmem:[%s15582_s9 + $0x28] sm:$0xff] }
 0xded   :  { %7947 = vst.msk [vmem:[#allocation6 + $0x3] sm:$0x1] %vm3989_vm4, %v7945_v9  ;;  %8181 = vmatpush.msrb.mxu3 %v8153_v20  ;;  %vm8210_vm4 = vcmask 1043456   ;;  %v8195_v9 = vld [vmem:[%s15584_s11 + $0x18] sm:$0xff]  ;;  %s8243_s11 = sshll.u32 %s15586_s13, 4  ;;  %s8244_s11 = int_to_ptr.hbm [resolvable:$true] %s8243_s11 }
 0xdee   :  { %8574 = vmatpush.msk.msrb.mxu2 %vm8210_vm4, %v8202_v8 }
 0xdef   :  { %v7951_v63 = vpop.permute.xlu1 %7950 }
 0xdf0   :  { %7953 = vst.msk [vmem:[#allocation6 + $0x3] sm:$0x1] %vm3996_vm13, %v7951_v63  ;;  %v7957_v41 = vpop.permute.xlu0 %7956  ;;  %8220 = vmatpush.msrb.mxu2 %v8201_v36  ;;  %vm8167_vm13 = vcmask 982016  }
 0xdf1   :  { %7959 = vst.msk [vmem:[#allocation6 + $0x3] sm:$0x1] %vm4003_vm6, %v7957_v41  ;;  %vm8234_vm6 = vcmask 74752  }
 0xdf2   :  { %7967 = vst.msk [vmem:[#allocation6 + $0x3] sm:$0x5] %vm15256_vm8, %v7965_v53  ;;  %8221 = vmatpush.msrb.mxu2 %v8200_v5 }
 0xdf3   :  { %7973 = vst.msk [vmem:[#allocation6 + $0x5] sm:$0x1] %vm4022_vm5, %v15359_v21  ;;  %v8152_v21 = vld [vmem:[%s15582_s9 + $0x20] sm:$0xff] }
 0xdf4   :  { %7979 = vst.msk [vmem:[#allocation6 + $0x5] sm:$0x1] %vm4029_vm12, %v7977_v62  ;;  %8182 = vmatpush.msrb.mxu3 %v8152_v21  ;;  %8222 = vmatpush.msrb.mxu2 %v8199_v38 }
 0xdf5   :  { %7985 = vst.msk [vmem:[#allocation6 + $0x5] sm:$0x1] %vm4036_vm2, %v7983_v27 }
 0xdf6   :  { %8183 = vmatpush.msrb.mxu3 %v8151_v39  ;;  %8223 = vmatpush.msrb.mxu2 %v8198_v24 }
 0xdf7   :  { %v7989_v57 = vpop.permute.xlu1 %7988 }
 0xdf8   :  { %7991 = vst.msk [vmem:[#allocation6 + $0x5] sm:$0x1] %vm4043_vm0, %v7989_v57  ;;  %v7995_v28 = vpop.permute.xlu0 %7994  ;;  %8184 = vmatpush.msrb.mxu3 %v8150_v47  ;;  %8224 = vmatpush.msrb.mxu2 %v8197_v43 }
 0xdf9   :  { %v7996_v1 = vrot.slane %v7995_v28, 6 }
 0xdfa   :  { %8185 = vmatpush.msrb.mxu3 %v8149_v11  ;;  %8225 = vmatpush.msrb.mxu2 %v8196_v46 }
 0xdfb   :  { %v7997_v3 = vsel %vm4050_vm11, %v7996_v1, %v7995_v28 }
 0xdfc   :  { %7999 = vst.msk [vmem:[#allocation6 + $0x5] sm:$0x5] %vm15471_vm7, %v7997_v3  ;;  %8186 = vmatpush.msrb.mxu3 %v8148_v48  ;;  %8226 = vmatpush.msrb.mxu2 %v8195_v9 }
 0xdfe   :  { %8227 = vmatpush.msrb.mxu2 %v8194_v58 }
 0xe00   :  { %v4041_v37 = vpop.permute.xlu0 %4040  ;;  %8228 = vmatpush.msrb.mxu2 %v8193_v49 }
 0xe01   :  { %4044 = vst.msk [vmem:[#allocation6 + $0x4] sm:$0x1] %vm4043_vm0, %v4041_v37 }
 0xe02   :  { %4056 = vst.msk [vmem:[#allocation6 + $0x4] sm:$0x5] %vm15471_vm7, %v4051_v26  ;;  %8229 = vmatpush.msrb.mxu2 %v8192_v54 }
 0xe09   :  { %v8000_v15 = vld [vmem:[#allocation6] sm:$0xff] }
 0xe0a   :  { %8056 = vst [vmem:[#allocation1] ss:$4 sm:$0xff] %v8000_v15 }
 0xe11   :  { %v8057_v10 = vld.sshfl [vmem:[#allocation1] sm:$0xff pattern:$0x73625140]  ;;  %v8058_v16 = vld.sshfl [vmem:[#allocation1 + $0x8] sm:$0xff pattern:$0x73625140] }
 0xe12   :  { %8083 = vmatmul.f32.vlgmr.msrb.gmra.mxu1 %v8057_v10  ;;  %8103 = vmatmul.f32.vlgmr.msra.gmra.mxu2 %v8058_v16  ;;  %v8059_v55 = vld.sshfl [vmem:[#allocation1 + $0x10] sm:$0xff pattern:$0x73625140]  ;;  %v8060_v6 = vld.sshfl [vmem:[#allocation1 + $0x18] sm:$0xff pattern:$0x73625140] }
 0xe13   :  { %8123 = vmatmul.f32.vlgmr.msra.gmra.mxu0 %v8059_v55 }
 0xe1a   :  { %8572 = vmatmul.msk.f32.vlgmr.msra.gmra.mxu1 %vm8064_vm3, %v8060_v6 }
 0xe8f   :  { %v8084_v30 = vpop.f32.mrf.mxu1 }
 0xe90   :  { %v8085_v40 = vadd.f32 %v8767_v33, %v8084_v30  ;;  %v8124_v51 = vpop.f32.mrf.mxu0 }
 0xe95   :  { %v8104_v12 = vpop.f32.mrf.mxu2 }
 0xe96   :  { %v8105_v22 = vadd.f32 %v8104_v12, %v8085_v40 }
 0xe97   :  { %v8144_v45 = vpop.f32.mrf.mxu1 }
 0xe98   :  { %v8125_v14 = vadd.f32 %v8124_v51, %v8105_v22 }
 0xe9a   :  { %v8145_v62 = vadd.f32 %v8144_v45, %v8125_v14 }
 0xe9c   :  { %v8147_v52 = vmax.f32 %v8145_v62, 0.0 }
 0xe9e   :  { %8573 = vmatmul.msk.f32.vlgmr.msrb.gmra.mxu3 %vm8167_vm13, %v8147_v52 }
 0xf21   :  { %v8188_v19 = vpop.f32.mrf.mxu3 }
 0xf22   :  { %v8189_v7 = vadd.f32 %v8768_v13, %v8188_v19 }
 0xf24   :  { %v8191_v2 = vmax.f32 %v8189_v7, 0.0 }
 0xf26   :  { %8575 = vmatmul.msk.f32.vlgmr.msrb.gmra.mxu2 %vm16893_vm9, %v8191_v2 }
 0xfa9   :  { %v8231_v60 = vpop.f32.mrf.mxu2 }
 0xfaa   :  { %v8232_v63 = vadd.f32 %v8769_v0, %v8231_v60 }
 0xfac   :  { %8235 = vst.msk [vmem:[#allocation7] sm:$0x3] %vm8234_vm6, %v8232_v63 }
 0xfad   :  { %8246 = dma.vmem_to_hbm [thread:$0]  %s8242_s0, 32, %s8244_s11, [#allocation8]  }
 0xfae   :  { %8795 = dma.done.wait [#allocation8], 32  }
 0xfaf   :  { %8796 = vsyncadd [#allocation8], 4294967264 }
 0xfb0   :  { %8251 = vsyncpa [#allocation8], 1 }

</bundles_post_ra>
